<compile_context>
chip_gen: v7x
topology: tpu7x:2x2x1
jax: 0.10.0
libtpu: 0.0.40
codegen_flags: <defaults>
</compile_context>

<pallas_src>
import functools

import numpy as np
import jax
import jax.numpy as jnp
from jax.experimental import pallas as pl
from jax.experimental.pallas import tpu as pltpu

# ---------------- config (cnn_tiny architecture, small synthetic sizes) ----------------
ARCH = {"kernel_size": [4, 4, 4, 4], "stride": [2, 2, 2, 2], "padding": [1, 1, 1, 1]}
Z_SIZE = 16       # config.model.z_size
C_SIZE = 32       # config.model.c_size
LOOK_AHEAD = 3    # config.model.look_ahead
N = 5             # config.model.N
CHANNELS = 4      # config.dataset.channels
BN_EPS = 1e-5

_VMEM = pl.BlockSpec(memory_space=pltpu.MemorySpace.VMEM)
_SMEM = pl.BlockSpec(memory_space=pltpu.MemorySpace.SMEM)


# ---------------------------------------------------------------------------
# In-kernel helpers
# ---------------------------------------------------------------------------
def _shift_lanes(t, d):
    """out[:, j] = t[:, j + d] if 0 <= j + d < width else 0  (static d, width preserved).

    Cheap lane-shift (slice + zero concat) so the tap combination never touches the MXU.
    """
    if d == 0:
        return t
    rows, width = t.shape
    zpad = jnp.zeros((rows, abs(d)), t.dtype)
    if d > 0:
        return jnp.concatenate([t[:, d:], zpad], axis=1)
    return jnp.concatenate([zpad, t[:, : width + d]], axis=1)


# ---------------------------------------------------------------------------
# The fused CPC kernel: encoder -> GRU -> look-ahead scores, all VMEM resident.
# ---------------------------------------------------------------------------
def _cpc_kernel(tsel_ref, cols_ref, x_ref,
                g0_ref, g1_ref, g2_ref, g3_ref,
                w0_ref, wr_ref, gam_ref, bet_ref,
                wih_ref, whh_ref, bih_ref, bhn_ref, wks_ref,
                o_ref, *, B, Tp, H, Z, LA, NN, ksizes, pads, eps):
    g_refs = (g0_ref, g1_ref, g2_ref, g3_ref)
    cout = gam_ref.shape[1]

    # ---- fused CNN encoder: Conv1d (bias=False) + BatchNorm1d (batch stats) + ReLU ----
    # Per layer:  u = sum_k shift_{k-pad}(W_k @ x_b)   (cheap lane shifts)
    #             y = u @ G_dec                         (single decimation matmul, G[j,l]=1 iff j==l*stride)
    xs = [x_ref[b] for b in range(B)]                      # per-batch (Cin, L) blocks
    for layer in range(len(g_refs)):
        gd = g_refs[layer][...]                            # (Lin, Lout), exact 0/1
        lout = gd.shape[1]
        pad = pads[layer]
        ys = []
        ssum = jnp.zeros((cout, 1), jnp.float32)
        sqsum = jnp.zeros((cout, 1), jnp.float32)
        for b in range(B):
            u = None
            for k in range(ksizes[layer]):                 # unrolled (K=4)
                wt = w0_ref[k] if layer == 0 else wr_ref[layer - 1, k]        # (Cout, Cin)
                t = jnp.dot(wt, xs[b], preferred_element_type=jnp.float32)    # (Cout, Lin)
                t = _shift_lanes(t, k - pad)
                u = t if u is None else u + t
            y = jnp.dot(u, gd, preferred_element_type=jnp.float32)            # (Cout, Lout)
            ssum = ssum + jnp.sum(y, axis=1, keepdims=True)
            sqsum = sqsum + jnp.sum(y * y, axis=1, keepdims=True)
            ys.append(y)
        # BatchNorm1d training-mode stats over (batch, length), one-pass E[x^2]-E[x]^2
        inv_n = 1.0 / float(B * lout)
        mean = ssum * inv_n
        var = sqsum * inv_n - mean * mean
        scale = gam_ref[layer] * jax.lax.rsqrt(var + eps)                      # (Cout, 1)
        shift = bet_ref[layer] - mean * scale
        xs = [jnp.maximum(ys[b] * scale + shift, 0.0) for b in range(B)]       # affine + ReLU

    # xs[b]: (Z, Tp) final encoder features.  z_all columns ordered col = b*Tp + t.
    z_all = jnp.concatenate(xs, axis=1)                                        # (Z, B*Tp)

    # ---- GRU (batch_first, gate order r|z|n), feature-major, per-batch unrolled chains ----
    # Hoisted input projection (one GEMM); r/z hidden biases already folded into bih.
    projT = jnp.dot(wih_ref[...], z_all,
                    preferred_element_type=jnp.float32) + bih_ref[...]         # (3H, B*Tp)
    whh = whh_ref[...]                                                         # (3H, H)
    bhn = bhn_ref[...]                                                         # (H, 1)
    c_cols = []
    for b in range(B):                                                         # independent chains -> ILP
        t_sel = tsel_ref[b]                                                    # SMEM scalar = ts[b] - 1
        h = jnp.zeros((H, 1), jnp.float32)
        c_t = jnp.zeros((H, 1), jnp.float32)
        for t in range(Tp):                                                    # fully unrolled (Tp=8)
            xg = projT[:, b * Tp + t: b * Tp + t + 1]                          # (3H, 1), off the h-chain
            hg = jnp.dot(whh, h, preferred_element_type=jnp.float32)           # (3H, 1)
            r = jax.nn.sigmoid(xg[0:H, :] + hg[0:H, :])
            uz = jax.nn.sigmoid(xg[H:2 * H, :] + hg[H:2 * H, :])
            ng = jnp.tanh(xg[2 * H:3 * H, :] + r * (hg[2 * H:3 * H, :] + bhn))
            h = (1.0 - uz) * ng + uz * h
            m = (t_sel == t).astype(jnp.float32)                               # keep h_{ts-1}
            c_t = c_t + m * (h - c_t)
        c_cols.append(c_t)
    c_all = jnp.concatenate(c_cols, axis=1)                                    # (H, B)

    # ---- look-ahead projections + in-kernel data-dependent sample gather + scores ----
    tc = jnp.dot(wks_ref[...], c_all, preferred_element_type=jnp.float32)      # (LA*Z, B)
    m_tot = B * LA * NN
    row_iota = jax.lax.broadcasted_iota(jnp.int32, (B * Tp, m_tot), 0)
    sel = (row_iota == cols_ref[...]).astype(jnp.float32)                      # one-hot (B*Tp, M)
    zs = jnp.dot(z_all, sel, preferred_element_type=jnp.float32)               # (Z, M) sampled z's

    rows_out = []
    for b in range(B):
        pieces = []
        for k in range(LA):
            tck = tc[k * Z:(k + 1) * Z, b:b + 1]                               # (Z, 1) = W_k c_t[b]
            off = (b * LA + k) * NN
            pieces.append(jnp.sum(tck * zs[:, off:off + NN],
                                  axis=0, keepdims=True))                      # (1, NN)
        rows_out.append(jnp.concatenate(pieces, axis=1))                       # (1, LA*NN)
    o_ref[...] = jnp.concatenate(rows_out, axis=0)                             # single (B, LA*NN) store


# ---------------------------------------------------------------------------
# Host-side helpers (cached static prep + random sampling glue)
# ---------------------------------------------------------------------------
@functools.lru_cache(maxsize=None)
def _decimation_matrix(l_in, l_out, stride):
    """G[j, l] = 1 iff j == l*stride.  Batch-independent, Lin x Lout per layer."""
    g = np.zeros((l_in, l_out), np.float32)
    for l in range(l_out):
        g[l * stride, l] = 1.0
    return g


def _layer_lengths(length):
    lens = [length]
    for i in range(len(ARCH["kernel_size"])):
        lens.append((lens[-1] + 2 * ARCH["padding"][i] - ARCH["kernel_size"][i])
                    // ARCH["stride"][i] + 1)
    return lens


def _sample_indices(batch, key):
    B = batch.shape[0]
    nz = (batch != 0.0).astype(jnp.int32)
    cs = jnp.cumsum(nz, axis=2)
    idx = jnp.argmax(cs, axis=2)
    seq_lens_raw = jnp.max(idx + 1, axis=1)                                    # (B,)
    downsample = 1
    for s in ARCH["stride"]:
        downsample *= s
    seq_lens = jnp.maximum(seq_lens_raw // downsample - LOOK_AHEAD + 1, 2)
    k_ts, k_n0, k_n1 = jax.random.split(key, 3)
    ts = jax.random.randint(k_ts, (B,), 1, seq_lens)                           # ts[i] in [1, seq_lens[i])
    idx0 = jax.random.randint(k_n0, (B, LOOK_AHEAD, N - 1), 0, B)
    # NOTE: bound uses the anchor's seq_lens[i] while idx0 picks another batch element; this
    # mirrors the reference RandomNegativeSampleSelector semantics exactly.
    idx1 = jax.random.randint(k_n1, (B, LOOK_AHEAD, N - 1), 0, seq_lens[:, None, None])
    return ts, idx0, idx1


# ---------------------------------------------------------------------------
# CPC forward: one fused pallas_call, jitted wrapper.
# ---------------------------------------------------------------------------
@jax.jit
def cpc_forward(params, batch, key):
    batch = batch.astype(jnp.float32)
    B, _, L = batch.shape
    lens = _layer_lengths(L)
    Tp = lens[-1]
    H = C_SIZE

    # random sampling glue (tiny)
    ts, idx0, idx1 = _sample_indices(batch, key)
    tsel = (ts - 1).astype(jnp.int32)                                          # (B,) -> SMEM scalars
    pos_cols = (jnp.arange(B)[:, None] * Tp + ts[:, None]
                + jnp.arange(LOOK_AHEAD)[None, :])                             # (B, LA)
    neg_cols = idx0 * Tp + idx1                                                # (B, LA, N-1)
    cols = jnp.concatenate([pos_cols[:, :, None], neg_cols], axis=2)           # (B, LA, N)
    cols = cols.reshape(1, B * LOOK_AHEAD * N).astype(jnp.int32)               # flat sample columns

    # encoder operands (decimation matrices are host-cached constants)
    gds = [_decimation_matrix(lens[i], lens[i + 1], ARCH["stride"][i])
           for i in range(len(ARCH["kernel_size"]))]
    w0 = jnp.transpose(params["conv_w"][0], (2, 0, 1)).astype(jnp.float32)     # (K, Z, Cin0)
    wr = jnp.stack([jnp.transpose(params["conv_w"][i], (2, 0, 1))
                    for i in range(1, len(ARCH["kernel_size"]))]).astype(jnp.float32)
    gam = jnp.stack([g.reshape(Z_SIZE, 1) for g in params["bn_gamma"]]).astype(jnp.float32)
    bet = jnp.stack([b.reshape(Z_SIZE, 1) for b in params["bn_beta"]]).astype(jnp.float32)

    # GRU operands (native torch layouts, gates r|z|n); fold b_hr, b_hz into the input bias
    wih = params["gru_wih"].astype(jnp.float32)                                # (3H, Z)
    whh = params["gru_whh"].astype(jnp.float32)                                # (3H, H)
    bih = params["gru_bih"].astype(jnp.float32)
    bhh = params["gru_bhh"].astype(jnp.float32)
    bih_fold = jnp.concatenate([bih[:2 * H] + bhh[:2 * H], bih[2 * H:]]).reshape(3 * H, 1)
    bhn = bhh[2 * H:].reshape(H, 1)
    wks = params["w_ks"].reshape(LOOK_AHEAD * Z_SIZE, C_SIZE).astype(jnp.float32)

    kernel = functools.partial(
        _cpc_kernel, B=B, Tp=Tp, H=H, Z=Z_SIZE, LA=LOOK_AHEAD, NN=N,
        ksizes=tuple(ARCH["kernel_size"]), pads=tuple(ARCH["padding"]), eps=BN_EPS)

    # Total VMEM footprint ~100 KB, far below the 64 MiB (v7x) / 128 MiB (v5e/v6e) limits;
    # the decimation operands now scale as Lin*Lout per layer (batch independent), so the
    # old (B*L)^2 growth that would hit v7x first is gone.
    scores2d = pl.pallas_call(
        kernel,
        out_shape=jax.ShapeDtypeStruct((B, LOOK_AHEAD * N), jnp.float32),
        in_specs=[_SMEM] + [_VMEM] * 15,
        out_specs=_VMEM,
    )(tsel, cols, batch, gds[0], gds[1], gds[2], gds[3], w0, wr, gam, bet,
      wih, whh, bih_fold, bhn, wks)

    scores = scores2d.reshape(B, LOOK_AHEAD, N)
    return scores[:, :, 0:1], scores[:, :, 1:]


# ---------------------------------------------------------------------------
# Pure-JAX reference (used only for the in-script correctness check)
# ---------------------------------------------------------------------------
def reference_forward(params, batch, key):
    batch = batch.astype(jnp.float32)
    B = batch.shape[0]
    ts, idx0, idx1 = _sample_indices(batch, key)

    x = batch
    for i in range(len(ARCH["kernel_size"])):
        y = jax.lax.conv_general_dilated(
            x, params["conv_w"][i], window_strides=(ARCH["stride"][i],),
            padding=[(ARCH["padding"][i], ARCH["padding"][i])],
            dimension_numbers=("NCH", "OIH", "NCH"))
        mean = jnp.mean(y, axis=(0, 2), keepdims=True)
        var = jnp.mean((y - mean) ** 2, axis=(0, 2), keepdims=True)
        y = (y - mean) * jax.lax.rsqrt(var + BN_EPS)
        y = y * params["bn_gamma"][i][None, :, None] + params["bn_beta"][i][None, :, None]
        x = jnp.maximum(y, 0.0)
    z = x                                                                      # (B, Z, Tp)
    Tp = z.shape[2]

    pos = jax.vmap(lambda zi, ti: jax.lax.dynamic_slice_in_dim(zi, ti, LOOK_AHEAD, axis=1))(z, ts)
    pos = jnp.transpose(pos, (0, 2, 1))
    neg = z[idx0, :, idx1]

    H = C_SIZE
    wih, whh = params["gru_wih"], params["gru_whh"]
    bih, bhh = params["gru_bih"], params["gru_bhh"]
    h = jnp.zeros((B, H), jnp.float32)
    c_t = jnp.zeros((B, H), jnp.float32)
    for t in range(Tp):
        gi = z[:, :, t] @ wih.T + bih
        gh = h @ whh.T + bhh
        r = jax.nn.sigmoid(gi[:, :H] + gh[:, :H])
        u = jax.nn.sigmoid(gi[:, H:2 * H] + gh[:, H:2 * H])
        n = jnp.tanh(gi[:, 2 * H:] + r * gh[:, 2 * H:])
        h = (1.0 - u) * n + u * h
        c_t = jnp.where((ts - 1)[:, None] == t, h, c_t)

    pos_s, neg_s = [], []
    for k in range(LOOK_AHEAD):
        tck = c_t @ params["w_ks"][k].T
        pos_s.append(jnp.sum(tck * pos[:, k, :], axis=-1, keepdims=True))
        neg_s.append(jnp.sum(tck[:, None, :] * neg[:, k, :, :], axis=-1))
    return jnp.stack(pos_s, axis=1), jnp.stack(neg_s, axis=1)


# ---------------------------------------------------------------------------
# Deterministic parameter init (shapes follow the torch module __init__)
# ---------------------------------------------------------------------------
def init_params(key):
    p = {"conv_w": [], "bn_gamma": [], "bn_beta": []}
    for i, k in enumerate(ARCH["kernel_size"]):
        cin = CHANNELS if i == 0 else Z_SIZE
        key, sub = jax.random.split(key)
        p["conv_w"].append(0.1 * jax.random.normal(sub, (Z_SIZE, cin, k), jnp.float32))
        p["bn_gamma"].append(jnp.ones((Z_SIZE,), jnp.float32))
        p["bn_beta"].append(jnp.zeros((Z_SIZE,), jnp.float32))
    key, k1, k2, k3, k4, k5 = jax.random.split(key, 6)
    p["gru_wih"] = 0.1 * jax.random.normal(k1, (3 * C_SIZE, Z_SIZE), jnp.float32)
    p["gru_whh"] = 0.1 * jax.random.normal(k2, (3 * C_SIZE, C_SIZE), jnp.float32)
    p["gru_bih"] = 0.01 * jax.random.normal(k3, (3 * C_SIZE,), jnp.float32)
    p["gru_bhh"] = 0.01 * jax.random.normal(k4, (3 * C_SIZE,), jnp.float32)
    # nn.Linear(c_size, z_size, bias=False) weight shape = (z_size, c_size), stacked over look_ahead
    p["w_ks"] = 0.1 * jax.random.normal(k5, (LOOK_AHEAD, Z_SIZE, C_SIZE), jnp.float32)
    return p


if __name__ == "__main__":
    key = jax.random.PRNGKey(0)
    pkey, xkey, fkey = jax.random.split(key, 3)
    params = init_params(pkey)

    # batch: (batch=2, channels=4, time=128) -> encoder output length 8 (downsample 16)
    batch = jax.random.normal(xkey, (2, CHANNELS, 128), jnp.float32)

    pos_scores, neg_scores = cpc_forward(params, batch, fkey)
    jax.block_until_ready((pos_scores, neg_scores))

    assert pos_scores.shape == (2, LOOK_AHEAD, 1)
    assert neg_scores.shape == (2, LOOK_AHEAD, N - 1)
    assert bool(jnp.all(jnp.isfinite(pos_scores))) and bool(jnp.all(jnp.isfinite(neg_scores)))

    # correctness check against a pure-JAX reference (identical random sampling keys)
    ref_pos, ref_neg = reference_forward(params, batch, fkey)
    assert bool(jnp.allclose(pos_scores, ref_pos, rtol=3e-3, atol=3e-3)), "pos score mismatch"
    assert bool(jnp.allclose(neg_scores, ref_neg, rtol=3e-3, atol=3e-3)), "neg score mismatch"

    print("KERNEL_OK")
</pallas_src>

<mosaic_0001>
module attributes {stable_mosaic.version = 11 : i64} {
  func.func @_cpc_kernel(%arg0: memref<2xi32, #tpu.memory_space<smem>>, %arg1: memref<1x30xi32, #tpu.memory_space<vmem>>, %arg2: memref<2x4x128xf32, #tpu.memory_space<vmem>>, %arg3: memref<128x64xf32, #tpu.memory_space<vmem>>, %arg4: memref<64x32xf32, #tpu.memory_space<vmem>>, %arg5: memref<32x16xf32, #tpu.memory_space<vmem>>, %arg6: memref<16x8xf32, #tpu.memory_space<vmem>>, %arg7: memref<4x16x4xf32, #tpu.memory_space<vmem>>, %arg8: memref<3x4x16x16xf32, #tpu.memory_space<vmem>>, %arg9: memref<4x16x1xf32, #tpu.memory_space<vmem>>, %arg10: memref<4x16x1xf32, #tpu.memory_space<vmem>>, %arg11: memref<96x16xf32, #tpu.memory_space<vmem>>, %arg12: memref<96x32xf32, #tpu.memory_space<vmem>>, %arg13: memref<96x1xf32, #tpu.memory_space<vmem>>, %arg14: memref<32x1xf32, #tpu.memory_space<vmem>>, %arg15: memref<48x32xf32, #tpu.memory_space<vmem>>, %arg16: memref<2x15xf32, #tpu.memory_space<vmem>>) attributes {dimension_semantics = [], scalar_prefetch = 0 : i64, scratch_operands = 0 : i64, tpu.core_type = #tpu.core_type<tc>} {
    %c0 = arith.constant 0 : index
    %c0_0 = arith.constant 0 : index
    %c0_1 = arith.constant 0 : index
    %0 = vector.load %arg2[%c0, %c0_0, %c0_1] : memref<2x4x128xf32, #tpu.memory_space<vmem>>, vector<1x4x128xf32>
    %1 = vector.shape_cast %0 : vector<1x4x128xf32> to vector<4x128xf32>
    %c1 = arith.constant 1 : index
    %c0_2 = arith.constant 0 : index
    %c0_3 = arith.constant 0 : index
    %2 = vector.load %arg2[%c1, %c0_2, %c0_3] : memref<2x4x128xf32, #tpu.memory_space<vmem>>, vector<1x4x128xf32>
    %3 = vector.shape_cast %2 : vector<1x4x128xf32> to vector<4x128xf32>
    %c0_4 = arith.constant 0 : index
    %c0_5 = arith.constant 0 : index
    %4 = vector.load %arg3[%c0_4, %c0_5] : memref<128x64xf32, #tpu.memory_space<vmem>>, vector<128x64xf32>
    %cst = arith.constant 0.000000e+00 : f32
    %5 = vector.broadcast %cst : f32 to vector<16x1xf32>
    %cst_6 = arith.constant 0.000000e+00 : f32
    %6 = vector.broadcast %cst_6 : f32 to vector<16x1xf32>
    %c0_7 = arith.constant 0 : index
    %c0_8 = arith.constant 0 : index
    %c0_9 = arith.constant 0 : index
    %7 = vector.load %arg7[%c0_7, %c0_8, %c0_9] : memref<4x16x4xf32, #tpu.memory_space<vmem>>, vector<1x16x4xf32>
    %8 = vector.shape_cast %7 : vector<1x16x4xf32> to vector<16x4xf32>
    %cst_10 = arith.constant dense<0.000000e+00> : vector<16x128xf32>
    %9 = tpu.matmul %8, %1, %cst_10 {dimension_numbers = #tpu.dot_dimension_numbers<[1], [0], [0], [1], [0, 0, 1, 1], [], []>} : vector<16x4xf32>, vector<4x128xf32>, vector<16x128xf32> -> vector<16x128xf32>
    %cst_11 = arith.constant 0.000000e+00 : f32
    %10 = vector.broadcast %cst_11 : f32 to vector<16x1xf32>
    %11 = vector.extract_strided_slice %9 {offsets = [0, 0], sizes = [16, 127], strides = [1, 1]} : vector<16x128xf32> to vector<16x127xf32>
    %12 = tpu.concatenate %10, %11 in 1 : vector<16x1xf32>, vector<16x127xf32> -> vector<16x128xf32>
    %c1_12 = arith.constant 1 : index
    %c0_13 = arith.constant 0 : index
    %c0_14 = arith.constant 0 : index
    %13 = vector.load %arg7[%c1_12, %c0_13, %c0_14] : memref<4x16x4xf32, #tpu.memory_space<vmem>>, vector<1x16x4xf32>
    %14 = vector.shape_cast %13 : vector<1x16x4xf32> to vector<16x4xf32>
    %cst_15 = arith.constant dense<0.000000e+00> : vector<16x128xf32>
    %15 = tpu.matmul %14, %1, %cst_15 {dimension_numbers = #tpu.dot_dimension_numbers<[1], [0], [0], [1], [0, 0, 1, 1], [], []>} : vector<16x4xf32>, vector<4x128xf32>, vector<16x128xf32> -> vector<16x128xf32>
    %16 = arith.addf %12, %15 : vector<16x128xf32>
    %c2 = arith.constant 2 : index
    %c0_16 = arith.constant 0 : index
    %c0_17 = arith.constant 0 : index
    %17 = vector.load %arg7[%c2, %c0_16, %c0_17] : memref<4x16x4xf32, #tpu.memory_space<vmem>>, vector<1x16x4xf32>
    %18 = vector.shape_cast %17 : vector<1x16x4xf32> to vector<16x4xf32>
    %cst_18 = arith.constant dense<0.000000e+00> : vector<16x128xf32>
    %19 = tpu.matmul %18, %1, %cst_18 {dimension_numbers = #tpu.dot_dimension_numbers<[1], [0], [0], [1], [0, 0, 1, 1], [], []>} : vector<16x4xf32>, vector<4x128xf32>, vector<16x128xf32> -> vector<16x128xf32>
    %cst_19 = arith.constant 0.000000e+00 : f32
    %20 = vector.broadcast %cst_19 : f32 to vector<16x1xf32>
    %21 = vector.extract_strided_slice %19 {offsets = [0, 1], sizes = [16, 127], strides = [1, 1]} : vector<16x128xf32> to vector<16x127xf32>
    %22 = tpu.concatenate %21, %20 in 1 : vector<16x127xf32>, vector<16x1xf32> -> vector<16x128xf32>
    %23 = arith.addf %16, %22 : vector<16x128xf32>
    %c3 = arith.constant 3 : index
    %c0_20 = arith.constant 0 : index
    %c0_21 = arith.constant 0 : index
    %24 = vector.load %arg7[%c3, %c0_20, %c0_21] : memref<4x16x4xf32, #tpu.memory_space<vmem>>, vector<1x16x4xf32>
    %25 = vector.shape_cast %24 : vector<1x16x4xf32> to vector<16x4xf32>
    %cst_22 = arith.constant dense<0.000000e+00> : vector<16x128xf32>
    %26 = tpu.matmul %25, %1, %cst_22 {dimension_numbers = #tpu.dot_dimension_numbers<[1], [0], [0], [1], [0, 0, 1, 1], [], []>} : vector<16x4xf32>, vector<4x128xf32>, vector<16x128xf32> -> vector<16x128xf32>
    %cst_23 = arith.constant 0.000000e+00 : f32
    %27 = vector.broadcast %cst_23 : f32 to vector<16x2xf32>
    %28 = vector.extract_strided_slice %26 {offsets = [0, 2], sizes = [16, 126], strides = [1, 1]} : vector<16x128xf32> to vector<16x126xf32>
    %29 = tpu.concatenate %28, %27 in 1 : vector<16x126xf32>, vector<16x2xf32> -> vector<16x128xf32>
    %30 = arith.addf %23, %29 : vector<16x128xf32>
    %cst_24 = arith.constant dense<0.000000e+00> : vector<16x64xf32>
    %31 = tpu.matmul %30, %4, %cst_24 {dimension_numbers = #tpu.dot_dimension_numbers<[1], [0], [0], [1], [0, 0, 1, 1], [], []>} : vector<16x128xf32>, vector<128x64xf32>, vector<16x64xf32> -> vector<16x64xf32>
    %cst_25 = arith.constant dense<0.000000e+00> : vector<16xf32>
    %32 = vector.multi_reduction <add>, %31, %cst_25 [1] : vector<16x64xf32> to vector<16xf32>
    %33 = vector.shape_cast %32 : vector<16xf32> to vector<16x1xf32>
    %34 = arith.addf %5, %33 : vector<16x1xf32>
    %35 = arith.mulf %31, %31 : vector<16x64xf32>
    %cst_26 = arith.constant dense<0.000000e+00> : vector<16xf32>
    %36 = vector.multi_reduction <add>, %35, %cst_26 [1] : vector<16x64xf32> to vector<16xf32>
    %37 = vector.shape_cast %36 : vector<16xf32> to vector<16x1xf32>
    %38 = arith.addf %6, %37 : vector<16x1xf32>
    %c0_27 = arith.constant 0 : index
    %c0_28 = arith.constant 0 : index
    %c0_29 = arith.constant 0 : index
    %39 = vector.load %arg7[%c0_27, %c0_28, %c0_29] : memref<4x16x4xf32, #tpu.memory_space<vmem>>, vector<1x16x4xf32>
    %40 = vector.shape_cast %39 : vector<1x16x4xf32> to vector<16x4xf32>
    %cst_30 = arith.constant dense<0.000000e+00> : vector<16x128xf32>
    %41 = tpu.matmul %40, %3, %cst_30 {dimension_numbers = #tpu.dot_dimension_numbers<[1], [0], [0], [1], [0, 0, 1, 1], [], []>} : vector<16x4xf32>, vector<4x128xf32>, vector<16x128xf32> -> vector<16x128xf32>
    %cst_31 = arith.constant 0.000000e+00 : f32
    %42 = vector.broadcast %cst_31 : f32 to vector<16x1xf32>
    %43 = vector.extract_strided_slice %41 {offsets = [0, 0], sizes = [16, 127], strides = [1, 1]} : vector<16x128xf32> to vector<16x127xf32>
    %44 = tpu.concatenate %42, %43 in 1 : vector<16x1xf32>, vector<16x127xf32> -> vector<16x128xf32>
    %c1_32 = arith.constant 1 : index
    %c0_33 = arith.constant 0 : index
    %c0_34 = arith.constant 0 : index
    %45 = vector.load %arg7[%c1_32, %c0_33, %c0_34] : memref<4x16x4xf32, #tpu.memory_space<vmem>>, vector<1x16x4xf32>
    %46 = vector.shape_cast %45 : vector<1x16x4xf32> to vector<16x4xf32>
    %cst_35 = arith.constant dense<0.000000e+00> : vector<16x128xf32>
    %47 = tpu.matmul %46, %3, %cst_35 {dimension_numbers = #tpu.dot_dimension_numbers<[1], [0], [0], [1], [0, 0, 1, 1], [], []>} : vector<16x4xf32>, vector<4x128xf32>, vector<16x128xf32> -> vector<16x128xf32>
    %48 = arith.addf %44, %47 : vector<16x128xf32>
    %c2_36 = arith.constant 2 : index
    %c0_37 = arith.constant 0 : index
    %c0_38 = arith.constant 0 : index
    %49 = vector.load %arg7[%c2_36, %c0_37, %c0_38] : memref<4x16x4xf32, #tpu.memory_space<vmem>>, vector<1x16x4xf32>
    %50 = vector.shape_cast %49 : vector<1x16x4xf32> to vector<16x4xf32>
    %cst_39 = arith.constant dense<0.000000e+00> : vector<16x128xf32>
    %51 = tpu.matmul %50, %3, %cst_39 {dimension_numbers = #tpu.dot_dimension_numbers<[1], [0], [0], [1], [0, 0, 1, 1], [], []>} : vector<16x4xf32>, vector<4x128xf32>, vector<16x128xf32> -> vector<16x128xf32>
    %cst_40 = arith.constant 0.000000e+00 : f32
    %52 = vector.broadcast %cst_40 : f32 to vector<16x1xf32>
    %53 = vector.extract_strided_slice %51 {offsets = [0, 1], sizes = [16, 127], strides = [1, 1]} : vector<16x128xf32> to vector<16x127xf32>
    %54 = tpu.concatenate %53, %52 in 1 : vector<16x127xf32>, vector<16x1xf32> -> vector<16x128xf32>
    %55 = arith.addf %48, %54 : vector<16x128xf32>
    %c3_41 = arith.constant 3 : index
    %c0_42 = arith.constant 0 : index
    %c0_43 = arith.constant 0 : index
    %56 = vector.load %arg7[%c3_41, %c0_42, %c0_43] : memref<4x16x4xf32, #tpu.memory_space<vmem>>, vector<1x16x4xf32>
    %57 = vector.shape_cast %56 : vector<1x16x4xf32> to vector<16x4xf32>
    %cst_44 = arith.constant dense<0.000000e+00> : vector<16x128xf32>
    %58 = tpu.matmul %57, %3, %cst_44 {dimension_numbers = #tpu.dot_dimension_numbers<[1], [0], [0], [1], [0, 0, 1, 1], [], []>} : vector<16x4xf32>, vector<4x128xf32>, vector<16x128xf32> -> vector<16x128xf32>
    %cst_45 = arith.constant 0.000000e+00 : f32
    %59 = vector.broadcast %cst_45 : f32 to vector<16x2xf32>
    %60 = vector.extract_strided_slice %58 {offsets = [0, 2], sizes = [16, 126], strides = [1, 1]} : vector<16x128xf32> to vector<16x126xf32>
    %61 = tpu.concatenate %60, %59 in 1 : vector<16x126xf32>, vector<16x2xf32> -> vector<16x128xf32>
    %62 = arith.addf %55, %61 : vector<16x128xf32>
    %cst_46 = arith.constant dense<0.000000e+00> : vector<16x64xf32>
    %63 = tpu.matmul %62, %4, %cst_46 {dimension_numbers = #tpu.dot_dimension_numbers<[1], [0], [0], [1], [0, 0, 1, 1], [], []>} : vector<16x128xf32>, vector<128x64xf32>, vector<16x64xf32> -> vector<16x64xf32>
    %cst_47 = arith.constant dense<0.000000e+00> : vector<16xf32>
    %64 = vector.multi_reduction <add>, %63, %cst_47 [1] : vector<16x64xf32> to vector<16xf32>
    %65 = vector.shape_cast %64 : vector<16xf32> to vector<16x1xf32>
    %66 = arith.addf %34, %65 : vector<16x1xf32>
    %67 = arith.mulf %63, %63 : vector<16x64xf32>
    %cst_48 = arith.constant dense<0.000000e+00> : vector<16xf32>
    %68 = vector.multi_reduction <add>, %67, %cst_48 [1] : vector<16x64xf32> to vector<16xf32>
    %69 = vector.shape_cast %68 : vector<16xf32> to vector<16x1xf32>
    %70 = arith.addf %38, %69 : vector<16x1xf32>
    %cst_49 = arith.constant 7.812500e-03 : f32
    %71 = vector.broadcast %cst_49 : f32 to vector<16x1xf32>
    %72 = arith.mulf %66, %71 : vector<16x1xf32>
    %cst_50 = arith.constant 7.812500e-03 : f32
    %73 = vector.broadcast %cst_50 : f32 to vector<16x1xf32>
    %74 = arith.mulf %70, %73 : vector<16x1xf32>
    %75 = arith.mulf %72, %72 : vector<16x1xf32>
    %76 = arith.subf %74, %75 : vector<16x1xf32>
    %c0_51 = arith.constant 0 : index
    %c0_52 = arith.constant 0 : index
    %c0_53 = arith.constant 0 : index
    %77 = vector.load %arg9[%c0_51, %c0_52, %c0_53] : memref<4x16x1xf32, #tpu.memory_space<vmem>>, vector<1x16x1xf32>
    %78 = vector.shape_cast %77 : vector<1x16x1xf32> to vector<16x1xf32>
    %cst_54 = arith.constant 9.99999974E-6 : f32
    %79 = vector.broadcast %cst_54 : f32 to vector<16x1xf32>
    %80 = arith.addf %76, %79 : vector<16x1xf32>
    %81 = math.rsqrt %80 : vector<16x1xf32>
    %82 = arith.mulf %78, %81 : vector<16x1xf32>
    %c0_55 = arith.constant 0 : index
    %c0_56 = arith.constant 0 : index
    %c0_57 = arith.constant 0 : index
    %83 = vector.load %arg10[%c0_55, %c0_56, %c0_57] : memref<4x16x1xf32, #tpu.memory_space<vmem>>, vector<1x16x1xf32>
    %84 = vector.shape_cast %83 : vector<1x16x1xf32> to vector<16x1xf32>
    %85 = arith.mulf %72, %82 : vector<16x1xf32>
    %86 = arith.subf %84, %85 : vector<16x1xf32>
    %87 = vector.broadcast %82 : vector<16x1xf32> to vector<16x64xf32>
    %88 = arith.mulf %31, %87 : vector<16x64xf32>
    %89 = vector.broadcast %86 : vector<16x1xf32> to vector<16x64xf32>
    %90 = arith.addf %88, %89 : vector<16x64xf32>
    %cst_58 = arith.constant 0.000000e+00 : f32
    %91 = vector.broadcast %cst_58 : f32 to vector<16x64xf32>
    %92 = arith.maximumf %90, %91 : vector<16x64xf32>
    %93 = vector.broadcast %82 : vector<16x1xf32> to vector<16x64xf32>
    %94 = arith.mulf %63, %93 : vector<16x64xf32>
    %95 = vector.broadcast %86 : vector<16x1xf32> to vector<16x64xf32>
    %96 = arith.addf %94, %95 : vector<16x64xf32>
    %cst_59 = arith.constant 0.000000e+00 : f32
    %97 = vector.broadcast %cst_59 : f32 to vector<16x64xf32>
    %98 = arith.maximumf %96, %97 : vector<16x64xf32>
    %c0_60 = arith.constant 0 : index
    %c0_61 = arith.constant 0 : index
    %99 = vector.load %arg4[%c0_60, %c0_61] : memref<64x32xf32, #tpu.memory_space<vmem>>, vector<64x32xf32>
    %cst_62 = arith.constant 0.000000e+00 : f32
    %100 = vector.broadcast %cst_62 : f32 to vector<16x1xf32>
    %cst_63 = arith.constant 0.000000e+00 : f32
    %101 = vector.broadcast %cst_63 : f32 to vector<16x1xf32>
    %c0_64 = arith.constant 0 : index
    %c0_65 = arith.constant 0 : index
    %c0_66 = arith.constant 0 : index
    %c0_67 = arith.constant 0 : index
    %102 = vector.load %arg8[%c0_64, %c0_65, %c0_66, %c0_67] : memref<3x4x16x16xf32, #tpu.memory_space<vmem>>, vector<1x1x16x16xf32>
    %103 = vector.shape_cast %102 : vector<1x1x16x16xf32> to vector<16x16xf32>
    %cst_68 = arith.constant dense<0.000000e+00> : vector<16x64xf32>
    %104 = tpu.matmul %103, %92, %cst_68 {dimension_numbers = #tpu.dot_dimension_numbers<[1], [0], [0], [1], [0, 0, 1, 1], [], []>} : vector<16x16xf32>, vector<16x64xf32>, vector<16x64xf32> -> vector<16x64xf32>
    %cst_69 = arith.constant 0.000000e+00 : f32
    %105 = vector.broadcast %cst_69 : f32 to vector<16x1xf32>
    %106 = vector.extract_strided_slice %104 {offsets = [0, 0], sizes = [16, 63], strides = [1, 1]} : vector<16x64xf32> to vector<16x63xf32>
    %107 = tpu.concatenate %105, %106 in 1 : vector<16x1xf32>, vector<16x63xf32> -> vector<16x64xf32>
    %c0_70 = arith.constant 0 : index
    %c1_71 = arith.constant 1 : index
    %c0_72 = arith.constant 0 : index
    %c0_73 = arith.constant 0 : index
    %108 = vector.load %arg8[%c0_70, %c1_71, %c0_72, %c0_73] : memref<3x4x16x16xf32, #tpu.memory_space<vmem>>, vector<1x1x16x16xf32>
    %109 = vector.shape_cast %108 : vector<1x1x16x16xf32> to vector<16x16xf32>
    %cst_74 = arith.constant dense<0.000000e+00> : vector<16x64xf32>
    %110 = tpu.matmul %109, %92, %cst_74 {dimension_numbers = #tpu.dot_dimension_numbers<[1], [0], [0], [1], [0, 0, 1, 1], [], []>} : vector<16x16xf32>, vector<16x64xf32>, vector<16x64xf32> -> vector<16x64xf32>
    %111 = arith.addf %107, %110 : vector<16x64xf32>
    %c0_75 = arith.constant 0 : index
    %c2_76 = arith.constant 2 : index
    %c0_77 = arith.constant 0 : index
    %c0_78 = arith.constant 0 : index
    %112 = vector.load %arg8[%c0_75, %c2_76, %c0_77, %c0_78] : memref<3x4x16x16xf32, #tpu.memory_space<vmem>>, vector<1x1x16x16xf32>
    %113 = vector.shape_cast %112 : vector<1x1x16x16xf32> to vector<16x16xf32>
    %cst_79 = arith.constant dense<0.000000e+00> : vector<16x64xf32>
    %114 = tpu.matmul %113, %92, %cst_79 {dimension_numbers = #tpu.dot_dimension_numbers<[1], [0], [0], [1], [0, 0, 1, 1], [], []>} : vector<16x16xf32>, vector<16x64xf32>, vector<16x64xf32> -> vector<16x64xf32>
    %cst_80 = arith.constant 0.000000e+00 : f32
    %115 = vector.broadcast %cst_80 : f32 to vector<16x1xf32>
    %116 = vector.extract_strided_slice %114 {offsets = [0, 1], sizes = [16, 63], strides = [1, 1]} : vector<16x64xf32> to vector<16x63xf32>
    %117 = tpu.concatenate %116, %115 in 1 : vector<16x63xf32>, vector<16x1xf32> -> vector<16x64xf32>
    %118 = arith.addf %111, %117 : vector<16x64xf32>
    %c0_81 = arith.constant 0 : index
    %c3_82 = arith.constant 3 : index
    %c0_83 = arith.constant 0 : index
    %c0_84 = arith.constant 0 : index
    %119 = vector.load %arg8[%c0_81, %c3_82, %c0_83, %c0_84] : memref<3x4x16x16xf32, #tpu.memory_space<vmem>>, vector<1x1x16x16xf32>
    %120 = vector.shape_cast %119 : vector<1x1x16x16xf32> to vector<16x16xf32>
    %cst_85 = arith.constant dense<0.000000e+00> : vector<16x64xf32>
    %121 = tpu.matmul %120, %92, %cst_85 {dimension_numbers = #tpu.dot_dimension_numbers<[1], [0], [0], [1], [0, 0, 1, 1], [], []>} : vector<16x16xf32>, vector<16x64xf32>, vector<16x64xf32> -> vector<16x64xf32>
    %cst_86 = arith.constant 0.000000e+00 : f32
    %122 = vector.broadcast %cst_86 : f32 to vector<16x2xf32>
    %123 = vector.extract_strided_slice %121 {offsets = [0, 2], sizes = [16, 62], strides = [1, 1]} : vector<16x64xf32> to vector<16x62xf32>
    %124 = tpu.concatenate %123, %122 in 1 : vector<16x62xf32>, vector<16x2xf32> -> vector<16x64xf32>
    %125 = arith.addf %118, %124 : vector<16x64xf32>
    %cst_87 = arith.constant dense<0.000000e+00> : vector<16x32xf32>
    %126 = tpu.matmul %125, %99, %cst_87 {dimension_numbers = #tpu.dot_dimension_numbers<[1], [0], [0], [1], [0, 0, 1, 1], [], []>} : vector<16x64xf32>, vector<64x32xf32>, vector<16x32xf32> -> vector<16x32xf32>
    %cst_88 = arith.constant dense<0.000000e+00> : vector<16xf32>
    %127 = vector.multi_reduction <add>, %126, %cst_88 [1] : vector<16x32xf32> to vector<16xf32>
    %128 = vector.shape_cast %127 : vector<16xf32> to vector<16x1xf32>
    %129 = arith.addf %100, %128 : vector<16x1xf32>
    %130 = arith.mulf %126, %126 : vector<16x32xf32>
    %cst_89 = arith.constant dense<0.000000e+00> : vector<16xf32>
    %131 = vector.multi_reduction <add>, %130, %cst_89 [1] : vector<16x32xf32> to vector<16xf32>
    %132 = vector.shape_cast %131 : vector<16xf32> to vector<16x1xf32>
    %133 = arith.addf %101, %132 : vector<16x1xf32>
    %c0_90 = arith.constant 0 : index
    %c0_91 = arith.constant 0 : index
    %c0_92 = arith.constant 0 : index
    %c0_93 = arith.constant 0 : index
    %134 = vector.load %arg8[%c0_90, %c0_91, %c0_92, %c0_93] : memref<3x4x16x16xf32, #tpu.memory_space<vmem>>, vector<1x1x16x16xf32>
    %135 = vector.shape_cast %134 : vector<1x1x16x16xf32> to vector<16x16xf32>
    %cst_94 = arith.constant dense<0.000000e+00> : vector<16x64xf32>
    %136 = tpu.matmul %135, %98, %cst_94 {dimension_numbers = #tpu.dot_dimension_numbers<[1], [0], [0], [1], [0, 0, 1, 1], [], []>} : vector<16x16xf32>, vector<16x64xf32>, vector<16x64xf32> -> vector<16x64xf32>
    %cst_95 = arith.constant 0.000000e+00 : f32
    %137 = vector.broadcast %cst_95 : f32 to vector<16x1xf32>
    %138 = vector.extract_strided_slice %136 {offsets = [0, 0], sizes = [16, 63], strides = [1, 1]} : vector<16x64xf32> to vector<16x63xf32>
    %139 = tpu.concatenate %137, %138 in 1 : vector<16x1xf32>, vector<16x63xf32> -> vector<16x64xf32>
    %c0_96 = arith.constant 0 : index
    %c1_97 = arith.constant 1 : index
    %c0_98 = arith.constant 0 : index
    %c0_99 = arith.constant 0 : index
    %140 = vector.load %arg8[%c0_96, %c1_97, %c0_98, %c0_99] : memref<3x4x16x16xf32, #tpu.memory_space<vmem>>, vector<1x1x16x16xf32>
    %141 = vector.shape_cast %140 : vector<1x1x16x16xf32> to vector<16x16xf32>
    %cst_100 = arith.constant dense<0.000000e+00> : vector<16x64xf32>
    %142 = tpu.matmul %141, %98, %cst_100 {dimension_numbers = #tpu.dot_dimension_numbers<[1], [0], [0], [1], [0, 0, 1, 1], [], []>} : vector<16x16xf32>, vector<16x64xf32>, vector<16x64xf32> -> vector<16x64xf32>
    %143 = arith.addf %139, %142 : vector<16x64xf32>
    %c0_101 = arith.constant 0 : index
    %c2_102 = arith.constant 2 : index
    %c0_103 = arith.constant 0 : index
    %c0_104 = arith.constant 0 : index
    %144 = vector.load %arg8[%c0_101, %c2_102, %c0_103, %c0_104] : memref<3x4x16x16xf32, #tpu.memory_space<vmem>>, vector<1x1x16x16xf32>
    %145 = vector.shape_cast %144 : vector<1x1x16x16xf32> to vector<16x16xf32>
    %cst_105 = arith.constant dense<0.000000e+00> : vector<16x64xf32>
    %146 = tpu.matmul %145, %98, %cst_105 {dimension_numbers = #tpu.dot_dimension_numbers<[1], [0], [0], [1], [0, 0, 1, 1], [], []>} : vector<16x16xf32>, vector<16x64xf32>, vector<16x64xf32> -> vector<16x64xf32>
    %cst_106 = arith.constant 0.000000e+00 : f32
    %147 = vector.broadcast %cst_106 : f32 to vector<16x1xf32>
    %148 = vector.extract_strided_slice %146 {offsets = [0, 1], sizes = [16, 63], strides = [1, 1]} : vector<16x64xf32> to vector<16x63xf32>
    %149 = tpu.concatenate %148, %147 in 1 : vector<16x63xf32>, vector<16x1xf32> -> vector<16x64xf32>
    %150 = arith.addf %143, %149 : vector<16x64xf32>
    %c0_107 = arith.constant 0 : index
    %c3_108 = arith.constant 3 : index
    %c0_109 = arith.constant 0 : index
    %c0_110 = arith.constant 0 : index
    %151 = vector.load %arg8[%c0_107, %c3_108, %c0_109, %c0_110] : memref<3x4x16x16xf32, #tpu.memory_space<vmem>>, vector<1x1x16x16xf32>
    %152 = vector.shape_cast %151 : vector<1x1x16x16xf32> to vector<16x16xf32>
    %cst_111 = arith.constant dense<0.000000e+00> : vector<16x64xf32>
    %153 = tpu.matmul %152, %98, %cst_111 {dimension_numbers = #tpu.dot_dimension_numbers<[1], [0], [0], [1], [0, 0, 1, 1], [], []>} : vector<16x16xf32>, vector<16x64xf32>, vector<16x64xf32> -> vector<16x64xf32>
    %cst_112 = arith.constant 0.000000e+00 : f32
    %154 = vector.broadcast %cst_112 : f32 to vector<16x2xf32>
    %155 = vector.extract_strided_slice %153 {offsets = [0, 2], sizes = [16, 62], strides = [1, 1]} : vector<16x64xf32> to vector<16x62xf32>
    %156 = tpu.concatenate %155, %154 in 1 : vector<16x62xf32>, vector<16x2xf32> -> vector<16x64xf32>
    %157 = arith.addf %150, %156 : vector<16x64xf32>
    %cst_113 = arith.constant dense<0.000000e+00> : vector<16x32xf32>
    %158 = tpu.matmul %157, %99, %cst_113 {dimension_numbers = #tpu.dot_dimension_numbers<[1], [0], [0], [1], [0, 0, 1, 1], [], []>} : vector<16x64xf32>, vector<64x32xf32>, vector<16x32xf32> -> vector<16x32xf32>
    %cst_114 = arith.constant dense<0.000000e+00> : vector<16xf32>
    %159 = vector.multi_reduction <add>, %158, %cst_114 [1] : vector<16x32xf32> to vector<16xf32>
    %160 = vector.shape_cast %159 : vector<16xf32> to vector<16x1xf32>
    %161 = arith.addf %129, %160 : vector<16x1xf32>
    %162 = arith.mulf %158, %158 : vector<16x32xf32>
    %cst_115 = arith.constant dense<0.000000e+00> : vector<16xf32>
    %163 = vector.multi_reduction <add>, %162, %cst_115 [1] : vector<16x32xf32> to vector<16xf32>
    %164 = vector.shape_cast %163 : vector<16xf32> to vector<16x1xf32>
    %165 = arith.addf %133, %164 : vector<16x1xf32>
    %cst_116 = arith.constant 1.562500e-02 : f32
    %166 = vector.broadcast %cst_116 : f32 to vector<16x1xf32>
    %167 = arith.mulf %161, %166 : vector<16x1xf32>
    %cst_117 = arith.constant 1.562500e-02 : f32
    %168 = vector.broadcast %cst_117 : f32 to vector<16x1xf32>
    %169 = arith.mulf %165, %168 : vector<16x1xf32>
    %170 = arith.mulf %167, %167 : vector<16x1xf32>
    %171 = arith.subf %169, %170 : vector<16x1xf32>
    %c1_118 = arith.constant 1 : index
    %c0_119 = arith.constant 0 : index
    %c0_120 = arith.constant 0 : index
    %172 = vector.load %arg9[%c1_118, %c0_119, %c0_120] : memref<4x16x1xf32, #tpu.memory_space<vmem>>, vector<1x16x1xf32>
    %173 = vector.shape_cast %172 : vector<1x16x1xf32> to vector<16x1xf32>
    %cst_121 = arith.constant 9.99999974E-6 : f32
    %174 = vector.broadcast %cst_121 : f32 to vector<16x1xf32>
    %175 = arith.addf %171, %174 : vector<16x1xf32>
    %176 = math.rsqrt %175 : vector<16x1xf32>
    %177 = arith.mulf %173, %176 : vector<16x1xf32>
    %c1_122 = arith.constant 1 : index
    %c0_123 = arith.constant 0 : index
    %c0_124 = arith.constant 0 : index
    %178 = vector.load %arg10[%c1_122, %c0_123, %c0_124] : memref<4x16x1xf32, #tpu.memory_space<vmem>>, vector<1x16x1xf32>
    %179 = vector.shape_cast %178 : vector<1x16x1xf32> to vector<16x1xf32>
    %180 = arith.mulf %167, %177 : vector<16x1xf32>
    %181 = arith.subf %179, %180 : vector<16x1xf32>
    %182 = vector.broadcast %177 : vector<16x1xf32> to vector<16x32xf32>
    %183 = arith.mulf %126, %182 : vector<16x32xf32>
    %184 = vector.broadcast %181 : vector<16x1xf32> to vector<16x32xf32>
    %185 = arith.addf %183, %184 : vector<16x32xf32>
    %cst_125 = arith.constant 0.000000e+00 : f32
    %186 = vector.broadcast %cst_125 : f32 to vector<16x32xf32>
    %187 = arith.maximumf %185, %186 : vector<16x32xf32>
    %188 = vector.broadcast %177 : vector<16x1xf32> to vector<16x32xf32>
    %189 = arith.mulf %158, %188 : vector<16x32xf32>
    %190 = vector.broadcast %181 : vector<16x1xf32> to vector<16x32xf32>
    %191 = arith.addf %189, %190 : vector<16x32xf32>
    %cst_126 = arith.constant 0.000000e+00 : f32
    %192 = vector.broadcast %cst_126 : f32 to vector<16x32xf32>
    %193 = arith.maximumf %191, %192 : vector<16x32xf32>
    %c0_127 = arith.constant 0 : index
    %c0_128 = arith.constant 0 : index
    %194 = vector.load %arg5[%c0_127, %c0_128] : memref<32x16xf32, #tpu.memory_space<vmem>>, vector<32x16xf32>
    %cst_129 = arith.constant 0.000000e+00 : f32
    %195 = vector.broadcast %cst_129 : f32 to vector<16x1xf32>
    %cst_130 = arith.constant 0.000000e+00 : f32
    %196 = vector.broadcast %cst_130 : f32 to vector<16x1xf32>
    %c1_131 = arith.constant 1 : index
    %c0_132 = arith.constant 0 : index
    %c0_133 = arith.constant 0 : index
    %c0_134 = arith.constant 0 : index
    %197 = vector.load %arg8[%c1_131, %c0_132, %c0_133, %c0_134] : memref<3x4x16x16xf32, #tpu.memory_space<vmem>>, vector<1x1x16x16xf32>
    %198 = vector.shape_cast %197 : vector<1x1x16x16xf32> to vector<16x16xf32>
    %cst_135 = arith.constant dense<0.000000e+00> : vector<16x32xf32>
    %199 = tpu.matmul %198, %187, %cst_135 {dimension_numbers = #tpu.dot_dimension_numbers<[1], [0], [0], [1], [0, 0, 1, 1], [], []>} : vector<16x16xf32>, vector<16x32xf32>, vector<16x32xf32> -> vector<16x32xf32>
    %cst_136 = arith.constant 0.000000e+00 : f32
    %200 = vector.broadcast %cst_136 : f32 to vector<16x1xf32>
    %201 = vector.extract_strided_slice %199 {offsets = [0, 0], sizes = [16, 31], strides = [1, 1]} : vector<16x32xf32> to vector<16x31xf32>
    %202 = tpu.concatenate %200, %201 in 1 : vector<16x1xf32>, vector<16x31xf32> -> vector<16x32xf32>
    %c1_137 = arith.constant 1 : index
    %c1_138 = arith.constant 1 : index
    %c0_139 = arith.constant 0 : index
    %c0_140 = arith.constant 0 : index
    %203 = vector.load %arg8[%c1_137, %c1_138, %c0_139, %c0_140] : memref<3x4x16x16xf32, #tpu.memory_space<vmem>>, vector<1x1x16x16xf32>
    %204 = vector.shape_cast %203 : vector<1x1x16x16xf32> to vector<16x16xf32>
    %cst_141 = arith.constant dense<0.000000e+00> : vector<16x32xf32>
    %205 = tpu.matmul %204, %187, %cst_141 {dimension_numbers = #tpu.dot_dimension_numbers<[1], [0], [0], [1], [0, 0, 1, 1], [], []>} : vector<16x16xf32>, vector<16x32xf32>, vector<16x32xf32> -> vector<16x32xf32>
    %206 = arith.addf %202, %205 : vector<16x32xf32>
    %c1_142 = arith.constant 1 : index
    %c2_143 = arith.constant 2 : index
    %c0_144 = arith.constant 0 : index
    %c0_145 = arith.constant 0 : index
    %207 = vector.load %arg8[%c1_142, %c2_143, %c0_144, %c0_145] : memref<3x4x16x16xf32, #tpu.memory_space<vmem>>, vector<1x1x16x16xf32>
    %208 = vector.shape_cast %207 : vector<1x1x16x16xf32> to vector<16x16xf32>
    %cst_146 = arith.constant dense<0.000000e+00> : vector<16x32xf32>
    %209 = tpu.matmul %208, %187, %cst_146 {dimension_numbers = #tpu.dot_dimension_numbers<[1], [0], [0], [1], [0, 0, 1, 1], [], []>} : vector<16x16xf32>, vector<16x32xf32>, vector<16x32xf32> -> vector<16x32xf32>
    %cst_147 = arith.constant 0.000000e+00 : f32
    %210 = vector.broadcast %cst_147 : f32 to vector<16x1xf32>
    %211 = vector.extract_strided_slice %209 {offsets = [0, 1], sizes = [16, 31], strides = [1, 1]} : vector<16x32xf32> to vector<16x31xf32>
    %212 = tpu.concatenate %211, %210 in 1 : vector<16x31xf32>, vector<16x1xf32> -> vector<16x32xf32>
    %213 = arith.addf %206, %212 : vector<16x32xf32>
    %c1_148 = arith.constant 1 : index
    %c3_149 = arith.constant 3 : index
    %c0_150 = arith.constant 0 : index
    %c0_151 = arith.constant 0 : index
    %214 = vector.load %arg8[%c1_148, %c3_149, %c0_150, %c0_151] : memref<3x4x16x16xf32, #tpu.memory_space<vmem>>, vector<1x1x16x16xf32>
    %215 = vector.shape_cast %214 : vector<1x1x16x16xf32> to vector<16x16xf32>
    %cst_152 = arith.constant dense<0.000000e+00> : vector<16x32xf32>
    %216 = tpu.matmul %215, %187, %cst_152 {dimension_numbers = #tpu.dot_dimension_numbers<[1], [0], [0], [1], [0, 0, 1, 1], [], []>} : vector<16x16xf32>, vector<16x32xf32>, vector<16x32xf32> -> vector<16x32xf32>
    %cst_153 = arith.constant 0.000000e+00 : f32
    %217 = vector.broadcast %cst_153 : f32 to vector<16x2xf32>
    %218 = vector.extract_strided_slice %216 {offsets = [0, 2], sizes = [16, 30], strides = [1, 1]} : vector<16x32xf32> to vector<16x30xf32>
    %219 = tpu.concatenate %218, %217 in 1 : vector<16x30xf32>, vector<16x2xf32> -> vector<16x32xf32>
    %220 = arith.addf %213, %219 : vector<16x32xf32>
    %cst_154 = arith.constant dense<0.000000e+00> : vector<16x16xf32>
    %221 = tpu.matmul %220, %194, %cst_154 {dimension_numbers = #tpu.dot_dimension_numbers<[1], [0], [0], [1], [0, 0, 1, 1], [], []>} : vector<16x32xf32>, vector<32x16xf32>, vector<16x16xf32> -> vector<16x16xf32>
    %cst_155 = arith.constant dense<0.000000e+00> : vector<16xf32>
    %222 = vector.multi_reduction <add>, %221, %cst_155 [1] : vector<16x16xf32> to vector<16xf32>
    %223 = vector.shape_cast %222 : vector<16xf32> to vector<16x1xf32>
    %224 = arith.addf %195, %223 : vector<16x1xf32>
    %225 = arith.mulf %221, %221 : vector<16x16xf32>
    %cst_156 = arith.constant dense<0.000000e+00> : vector<16xf32>
    %226 = vector.multi_reduction <add>, %225, %cst_156 [1] : vector<16x16xf32> to vector<16xf32>
    %227 = vector.shape_cast %226 : vector<16xf32> to vector<16x1xf32>
    %228 = arith.addf %196, %227 : vector<16x1xf32>
    %c1_157 = arith.constant 1 : index
    %c0_158 = arith.constant 0 : index
    %c0_159 = arith.constant 0 : index
    %c0_160 = arith.constant 0 : index
    %229 = vector.load %arg8[%c1_157, %c0_158, %c0_159, %c0_160] : memref<3x4x16x16xf32, #tpu.memory_space<vmem>>, vector<1x1x16x16xf32>
    %230 = vector.shape_cast %229 : vector<1x1x16x16xf32> to vector<16x16xf32>
    %cst_161 = arith.constant dense<0.000000e+00> : vector<16x32xf32>
    %231 = tpu.matmul %230, %193, %cst_161 {dimension_numbers = #tpu.dot_dimension_numbers<[1], [0], [0], [1], [0, 0, 1, 1], [], []>} : vector<16x16xf32>, vector<16x32xf32>, vector<16x32xf32> -> vector<16x32xf32>
    %cst_162 = arith.constant 0.000000e+00 : f32
    %232 = vector.broadcast %cst_162 : f32 to vector<16x1xf32>
    %233 = vector.extract_strided_slice %231 {offsets = [0, 0], sizes = [16, 31], strides = [1, 1]} : vector<16x32xf32> to vector<16x31xf32>
    %234 = tpu.concatenate %232, %233 in 1 : vector<16x1xf32>, vector<16x31xf32> -> vector<16x32xf32>
    %c1_163 = arith.constant 1 : index
    %c1_164 = arith.constant 1 : index
    %c0_165 = arith.constant 0 : index
    %c0_166 = arith.constant 0 : index
    %235 = vector.load %arg8[%c1_163, %c1_164, %c0_165, %c0_166] : memref<3x4x16x16xf32, #tpu.memory_space<vmem>>, vector<1x1x16x16xf32>
    %236 = vector.shape_cast %235 : vector<1x1x16x16xf32> to vector<16x16xf32>
    %cst_167 = arith.constant dense<0.000000e+00> : vector<16x32xf32>
    %237 = tpu.matmul %236, %193, %cst_167 {dimension_numbers = #tpu.dot_dimension_numbers<[1], [0], [0], [1], [0, 0, 1, 1], [], []>} : vector<16x16xf32>, vector<16x32xf32>, vector<16x32xf32> -> vector<16x32xf32>
    %238 = arith.addf %234, %237 : vector<16x32xf32>
    %c1_168 = arith.constant 1 : index
    %c2_169 = arith.constant 2 : index
    %c0_170 = arith.constant 0 : index
    %c0_171 = arith.constant 0 : index
    %239 = vector.load %arg8[%c1_168, %c2_169, %c0_170, %c0_171] : memref<3x4x16x16xf32, #tpu.memory_space<vmem>>, vector<1x1x16x16xf32>
    %240 = vector.shape_cast %239 : vector<1x1x16x16xf32> to vector<16x16xf32>
    %cst_172 = arith.constant dense<0.000000e+00> : vector<16x32xf32>
    %241 = tpu.matmul %240, %193, %cst_172 {dimension_numbers = #tpu.dot_dimension_numbers<[1], [0], [0], [1], [0, 0, 1, 1], [], []>} : vector<16x16xf32>, vector<16x32xf32>, vector<16x32xf32> -> vector<16x32xf32>
    %cst_173 = arith.constant 0.000000e+00 : f32
    %242 = vector.broadcast %cst_173 : f32 to vector<16x1xf32>
    %243 = vector.extract_strided_slice %241 {offsets = [0, 1], sizes = [16, 31], strides = [1, 1]} : vector<16x32xf32> to vector<16x31xf32>
    %244 = tpu.concatenate %243, %242 in 1 : vector<16x31xf32>, vector<16x1xf32> -> vector<16x32xf32>
    %245 = arith.addf %238, %244 : vector<16x32xf32>
    %c1_174 = arith.constant 1 : index
    %c3_175 = arith.constant 3 : index
    %c0_176 = arith.constant 0 : index
    %c0_177 = arith.constant 0 : index
    %246 = vector.load %arg8[%c1_174, %c3_175, %c0_176, %c0_177] : memref<3x4x16x16xf32, #tpu.memory_space<vmem>>, vector<1x1x16x16xf32>
    %247 = vector.shape_cast %246 : vector<1x1x16x16xf32> to vector<16x16xf32>
    %cst_178 = arith.constant dense<0.000000e+00> : vector<16x32xf32>
    %248 = tpu.matmul %247, %193, %cst_178 {dimension_numbers = #tpu.dot_dimension_numbers<[1], [0], [0], [1], [0, 0, 1, 1], [], []>} : vector<16x16xf32>, vector<16x32xf32>, vector<16x32xf32> -> vector<16x32xf32>
    %cst_179 = arith.constant 0.000000e+00 : f32
    %249 = vector.broadcast %cst_179 : f32 to vector<16x2xf32>
    %250 = vector.extract_strided_slice %248 {offsets = [0, 2], sizes = [16, 30], strides = [1, 1]} : vector<16x32xf32> to vector<16x30xf32>
    %251 = tpu.concatenate %250, %249 in 1 : vector<16x30xf32>, vector<16x2xf32> -> vector<16x32xf32>
    %252 = arith.addf %245, %251 : vector<16x32xf32>
    %cst_180 = arith.constant dense<0.000000e+00> : vector<16x16xf32>
    %253 = tpu.matmul %252, %194, %cst_180 {dimension_numbers = #tpu.dot_dimension_numbers<[1], [0], [0], [1], [0, 0, 1, 1], [], []>} : vector<16x32xf32>, vector<32x16xf32>, vector<16x16xf32> -> vector<16x16xf32>
    %cst_181 = arith.constant dense<0.000000e+00> : vector<16xf32>
    %254 = vector.multi_reduction <add>, %253, %cst_181 [1] : vector<16x16xf32> to vector<16xf32>
    %255 = vector.shape_cast %254 : vector<16xf32> to vector<16x1xf32>
    %256 = arith.addf %224, %255 : vector<16x1xf32>
    %257 = arith.mulf %253, %253 : vector<16x16xf32>
    %cst_182 = arith.constant dense<0.000000e+00> : vector<16xf32>
    %258 = vector.multi_reduction <add>, %257, %cst_182 [1] : vector<16x16xf32> to vector<16xf32>
    %259 = vector.shape_cast %258 : vector<16xf32> to vector<16x1xf32>
    %260 = arith.addf %228, %259 : vector<16x1xf32>
    %cst_183 = arith.constant 3.125000e-02 : f32
    %261 = vector.broadcast %cst_183 : f32 to vector<16x1xf32>
    %262 = arith.mulf %256, %261 : vector<16x1xf32>
    %cst_184 = arith.constant 3.125000e-02 : f32
    %263 = vector.broadcast %cst_184 : f32 to vector<16x1xf32>
    %264 = arith.mulf %260, %263 : vector<16x1xf32>
    %265 = arith.mulf %262, %262 : vector<16x1xf32>
    %266 = arith.subf %264, %265 : vector<16x1xf32>
    %c2_185 = arith.constant 2 : index
    %c0_186 = arith.constant 0 : index
    %c0_187 = arith.constant 0 : index
    %267 = vector.load %arg9[%c2_185, %c0_186, %c0_187] : memref<4x16x1xf32, #tpu.memory_space<vmem>>, vector<1x16x1xf32>
    %268 = vector.shape_cast %267 : vector<1x16x1xf32> to vector<16x1xf32>
    %cst_188 = arith.constant 9.99999974E-6 : f32
    %269 = vector.broadcast %cst_188 : f32 to vector<16x1xf32>
    %270 = arith.addf %266, %269 : vector<16x1xf32>
    %271 = math.rsqrt %270 : vector<16x1xf32>
    %272 = arith.mulf %268, %271 : vector<16x1xf32>
    %c2_189 = arith.constant 2 : index
    %c0_190 = arith.constant 0 : index
    %c0_191 = arith.constant 0 : index
    %273 = vector.load %arg10[%c2_189, %c0_190, %c0_191] : memref<4x16x1xf32, #tpu.memory_space<vmem>>, vector<1x16x1xf32>
    %274 = vector.shape_cast %273 : vector<1x16x1xf32> to vector<16x1xf32>
    %275 = arith.mulf %262, %272 : vector<16x1xf32>
    %276 = arith.subf %274, %275 : vector<16x1xf32>
    %277 = vector.broadcast %272 : vector<16x1xf32> to vector<16x16xf32>
    %278 = arith.mulf %221, %277 : vector<16x16xf32>
    %279 = vector.broadcast %276 : vector<16x1xf32> to vector<16x16xf32>
    %280 = arith.addf %278, %279 : vector<16x16xf32>
    %cst_192 = arith.constant 0.000000e+00 : f32
    %281 = vector.broadcast %cst_192 : f32 to vector<16x16xf32>
    %282 = arith.maximumf %280, %281 : vector<16x16xf32>
    %283 = vector.broadcast %272 : vector<16x1xf32> to vector<16x16xf32>
    %284 = arith.mulf %253, %283 : vector<16x16xf32>
    %285 = vector.broadcast %276 : vector<16x1xf32> to vector<16x16xf32>
    %286 = arith.addf %284, %285 : vector<16x16xf32>
    %cst_193 = arith.constant 0.000000e+00 : f32
    %287 = vector.broadcast %cst_193 : f32 to vector<16x16xf32>
    %288 = arith.maximumf %286, %287 : vector<16x16xf32>
    %c0_194 = arith.constant 0 : index
    %c0_195 = arith.constant 0 : index
    %289 = vector.load %arg6[%c0_194, %c0_195] : memref<16x8xf32, #tpu.memory_space<vmem>>, vector<16x8xf32>
    %cst_196 = arith.constant 0.000000e+00 : f32
    %290 = vector.broadcast %cst_196 : f32 to vector<16x1xf32>
    %cst_197 = arith.constant 0.000000e+00 : f32
    %291 = vector.broadcast %cst_197 : f32 to vector<16x1xf32>
    %c2_198 = arith.constant 2 : index
    %c0_199 = arith.constant 0 : index
    %c0_200 = arith.constant 0 : index
    %c0_201 = arith.constant 0 : index
    %292 = vector.load %arg8[%c2_198, %c0_199, %c0_200, %c0_201] : memref<3x4x16x16xf32, #tpu.memory_space<vmem>>, vector<1x1x16x16xf32>
    %293 = vector.shape_cast %292 : vector<1x1x16x16xf32> to vector<16x16xf32>
    %cst_202 = arith.constant dense<0.000000e+00> : vector<16x16xf32>
    %294 = tpu.matmul %293, %282, %cst_202 {dimension_numbers = #tpu.dot_dimension_numbers<[1], [0], [0], [1], [0, 0, 1, 1], [], []>} : vector<16x16xf32>, vector<16x16xf32>, vector<16x16xf32> -> vector<16x16xf32>
    %cst_203 = arith.constant 0.000000e+00 : f32
    %295 = vector.broadcast %cst_203 : f32 to vector<16x1xf32>
    %296 = vector.extract_strided_slice %294 {offsets = [0, 0], sizes = [16, 15], strides = [1, 1]} : vector<16x16xf32> to vector<16x15xf32>
    %297 = tpu.concatenate %295, %296 in 1 : vector<16x1xf32>, vector<16x15xf32> -> vector<16x16xf32>
    %c2_204 = arith.constant 2 : index
    %c1_205 = arith.constant 1 : index
    %c0_206 = arith.constant 0 : index
    %c0_207 = arith.constant 0 : index
    %298 = vector.load %arg8[%c2_204, %c1_205, %c0_206, %c0_207] : memref<3x4x16x16xf32, #tpu.memory_space<vmem>>, vector<1x1x16x16xf32>
    %299 = vector.shape_cast %298 : vector<1x1x16x16xf32> to vector<16x16xf32>
    %cst_208 = arith.constant dense<0.000000e+00> : vector<16x16xf32>
    %300 = tpu.matmul %299, %282, %cst_208 {dimension_numbers = #tpu.dot_dimension_numbers<[1], [0], [0], [1], [0, 0, 1, 1], [], []>} : vector<16x16xf32>, vector<16x16xf32>, vector<16x16xf32> -> vector<16x16xf32>
    %301 = arith.addf %297, %300 : vector<16x16xf32>
    %c2_209 = arith.constant 2 : index
    %c2_210 = arith.constant 2 : index
    %c0_211 = arith.constant 0 : index
    %c0_212 = arith.constant 0 : index
    %302 = vector.load %arg8[%c2_209, %c2_210, %c0_211, %c0_212] : memref<3x4x16x16xf32, #tpu.memory_space<vmem>>, vector<1x1x16x16xf32>
    %303 = vector.shape_cast %302 : vector<1x1x16x16xf32> to vector<16x16xf32>
    %cst_213 = arith.constant dense<0.000000e+00> : vector<16x16xf32>
    %304 = tpu.matmul %303, %282, %cst_213 {dimension_numbers = #tpu.dot_dimension_numbers<[1], [0], [0], [1], [0, 0, 1, 1], [], []>} : vector<16x16xf32>, vector<16x16xf32>, vector<16x16xf32> -> vector<16x16xf32>
    %cst_214 = arith.constant 0.000000e+00 : f32
    %305 = vector.broadcast %cst_214 : f32 to vector<16x1xf32>
    %306 = vector.extract_strided_slice %304 {offsets = [0, 1], sizes = [16, 15], strides = [1, 1]} : vector<16x16xf32> to vector<16x15xf32>
    %307 = tpu.concatenate %306, %305 in 1 : vector<16x15xf32>, vector<16x1xf32> -> vector<16x16xf32>
    %308 = arith.addf %301, %307 : vector<16x16xf32>
    %c2_215 = arith.constant 2 : index
    %c3_216 = arith.constant 3 : index
    %c0_217 = arith.constant 0 : index
    %c0_218 = arith.constant 0 : index
    %309 = vector.load %arg8[%c2_215, %c3_216, %c0_217, %c0_218] : memref<3x4x16x16xf32, #tpu.memory_space<vmem>>, vector<1x1x16x16xf32>
    %310 = vector.shape_cast %309 : vector<1x1x16x16xf32> to vector<16x16xf32>
    %cst_219 = arith.constant dense<0.000000e+00> : vector<16x16xf32>
    %311 = tpu.matmul %310, %282, %cst_219 {dimension_numbers = #tpu.dot_dimension_numbers<[1], [0], [0], [1], [0, 0, 1, 1], [], []>} : vector<16x16xf32>, vector<16x16xf32>, vector<16x16xf32> -> vector<16x16xf32>
    %cst_220 = arith.constant 0.000000e+00 : f32
    %312 = vector.broadcast %cst_220 : f32 to vector<16x2xf32>
    %313 = vector.extract_strided_slice %311 {offsets = [0, 2], sizes = [16, 14], strides = [1, 1]} : vector<16x16xf32> to vector<16x14xf32>
    %314 = tpu.concatenate %313, %312 in 1 : vector<16x14xf32>, vector<16x2xf32> -> vector<16x16xf32>
    %315 = arith.addf %308, %314 : vector<16x16xf32>
    %cst_221 = arith.constant dense<0.000000e+00> : vector<16x8xf32>
    %316 = tpu.matmul %315, %289, %cst_221 {dimension_numbers = #tpu.dot_dimension_numbers<[1], [0], [0], [1], [0, 0, 1, 1], [], []>} : vector<16x16xf32>, vector<16x8xf32>, vector<16x8xf32> -> vector<16x8xf32>
    %cst_222 = arith.constant dense<0.000000e+00> : vector<16xf32>
    %317 = vector.multi_reduction <add>, %316, %cst_222 [1] : vector<16x8xf32> to vector<16xf32>
    %318 = vector.shape_cast %317 : vector<16xf32> to vector<16x1xf32>
    %319 = arith.addf %290, %318 : vector<16x1xf32>
    %320 = arith.mulf %316, %316 : vector<16x8xf32>
    %cst_223 = arith.constant dense<0.000000e+00> : vector<16xf32>
    %321 = vector.multi_reduction <add>, %320, %cst_223 [1] : vector<16x8xf32> to vector<16xf32>
    %322 = vector.shape_cast %321 : vector<16xf32> to vector<16x1xf32>
    %323 = arith.addf %291, %322 : vector<16x1xf32>
    %c2_224 = arith.constant 2 : index
    %c0_225 = arith.constant 0 : index
    %c0_226 = arith.constant 0 : index
    %c0_227 = arith.constant 0 : index
    %324 = vector.load %arg8[%c2_224, %c0_225, %c0_226, %c0_227] : memref<3x4x16x16xf32, #tpu.memory_space<vmem>>, vector<1x1x16x16xf32>
    %325 = vector.shape_cast %324 : vector<1x1x16x16xf32> to vector<16x16xf32>
    %cst_228 = arith.constant dense<0.000000e+00> : vector<16x16xf32>
    %326 = tpu.matmul %325, %288, %cst_228 {dimension_numbers = #tpu.dot_dimension_numbers<[1], [0], [0], [1], [0, 0, 1, 1], [], []>} : vector<16x16xf32>, vector<16x16xf32>, vector<16x16xf32> -> vector<16x16xf32>
    %cst_229 = arith.constant 0.000000e+00 : f32
    %327 = vector.broadcast %cst_229 : f32 to vector<16x1xf32>
    %328 = vector.extract_strided_slice %326 {offsets = [0, 0], sizes = [16, 15], strides = [1, 1]} : vector<16x16xf32> to vector<16x15xf32>
    %329 = tpu.concatenate %327, %328 in 1 : vector<16x1xf32>, vector<16x15xf32> -> vector<16x16xf32>
    %c2_230 = arith.constant 2 : index
    %c1_231 = arith.constant 1 : index
    %c0_232 = arith.constant 0 : index
    %c0_233 = arith.constant 0 : index
    %330 = vector.load %arg8[%c2_230, %c1_231, %c0_232, %c0_233] : memref<3x4x16x16xf32, #tpu.memory_space<vmem>>, vector<1x1x16x16xf32>
    %331 = vector.shape_cast %330 : vector<1x1x16x16xf32> to vector<16x16xf32>
    %cst_234 = arith.constant dense<0.000000e+00> : vector<16x16xf32>
    %332 = tpu.matmul %331, %288, %cst_234 {dimension_numbers = #tpu.dot_dimension_numbers<[1], [0], [0], [1], [0, 0, 1, 1], [], []>} : vector<16x16xf32>, vector<16x16xf32>, vector<16x16xf32> -> vector<16x16xf32>
    %333 = arith.addf %329, %332 : vector<16x16xf32>
    %c2_235 = arith.constant 2 : index
    %c2_236 = arith.constant 2 : index
    %c0_237 = arith.constant 0 : index
    %c0_238 = arith.constant 0 : index
    %334 = vector.load %arg8[%c2_235, %c2_236, %c0_237, %c0_238] : memref<3x4x16x16xf32, #tpu.memory_space<vmem>>, vector<1x1x16x16xf32>
    %335 = vector.shape_cast %334 : vector<1x1x16x16xf32> to vector<16x16xf32>
    %cst_239 = arith.constant dense<0.000000e+00> : vector<16x16xf32>
    %336 = tpu.matmul %335, %288, %cst_239 {dimension_numbers = #tpu.dot_dimension_numbers<[1], [0], [0], [1], [0, 0, 1, 1], [], []>} : vector<16x16xf32>, vector<16x16xf32>, vector<16x16xf32> -> vector<16x16xf32>
    %cst_240 = arith.constant 0.000000e+00 : f32
    %337 = vector.broadcast %cst_240 : f32 to vector<16x1xf32>
    %338 = vector.extract_strided_slice %336 {offsets = [0, 1], sizes = [16, 15], strides = [1, 1]} : vector<16x16xf32> to vector<16x15xf32>
    %339 = tpu.concatenate %338, %337 in 1 : vector<16x15xf32>, vector<16x1xf32> -> vector<16x16xf32>
    %340 = arith.addf %333, %339 : vector<16x16xf32>
    %c2_241 = arith.constant 2 : index
    %c3_242 = arith.constant 3 : index
    %c0_243 = arith.constant 0 : index
    %c0_244 = arith.constant 0 : index
    %341 = vector.load %arg8[%c2_241, %c3_242, %c0_243, %c0_244] : memref<3x4x16x16xf32, #tpu.memory_space<vmem>>, vector<1x1x16x16xf32>
    %342 = vector.shape_cast %341 : vector<1x1x16x16xf32> to vector<16x16xf32>
    %cst_245 = arith.constant dense<0.000000e+00> : vector<16x16xf32>
    %343 = tpu.matmul %342, %288, %cst_245 {dimension_numbers = #tpu.dot_dimension_numbers<[1], [0], [0], [1], [0, 0, 1, 1], [], []>} : vector<16x16xf32>, vector<16x16xf32>, vector<16x16xf32> -> vector<16x16xf32>
    %cst_246 = arith.constant 0.000000e+00 : f32
    %344 = vector.broadcast %cst_246 : f32 to vector<16x2xf32>
    %345 = vector.extract_strided_slice %343 {offsets = [0, 2], sizes = [16, 14], strides = [1, 1]} : vector<16x16xf32> to vector<16x14xf32>
    %346 = tpu.concatenate %345, %344 in 1 : vector<16x14xf32>, vector<16x2xf32> -> vector<16x16xf32>
    %347 = arith.addf %340, %346 : vector<16x16xf32>
    %cst_247 = arith.constant dense<0.000000e+00> : vector<16x8xf32>
    %348 = tpu.matmul %347, %289, %cst_247 {dimension_numbers = #tpu.dot_dimension_numbers<[1], [0], [0], [1], [0, 0, 1, 1], [], []>} : vector<16x16xf32>, vector<16x8xf32>, vector<16x8xf32> -> vector<16x8xf32>
    %cst_248 = arith.constant dense<0.000000e+00> : vector<16xf32>
    %349 = vector.multi_reduction <add>, %348, %cst_248 [1] : vector<16x8xf32> to vector<16xf32>
    %350 = vector.shape_cast %349 : vector<16xf32> to vector<16x1xf32>
    %351 = arith.addf %319, %350 : vector<16x1xf32>
    %352 = arith.mulf %348, %348 : vector<16x8xf32>
    %cst_249 = arith.constant dense<0.000000e+00> : vector<16xf32>
    %353 = vector.multi_reduction <add>, %352, %cst_249 [1] : vector<16x8xf32> to vector<16xf32>
    %354 = vector.shape_cast %353 : vector<16xf32> to vector<16x1xf32>
    %355 = arith.addf %323, %354 : vector<16x1xf32>
    %cst_250 = arith.constant 6.250000e-02 : f32
    %356 = vector.broadcast %cst_250 : f32 to vector<16x1xf32>
    %357 = arith.mulf %351, %356 : vector<16x1xf32>
    %cst_251 = arith.constant 6.250000e-02 : f32
    %358 = vector.broadcast %cst_251 : f32 to vector<16x1xf32>
    %359 = arith.mulf %355, %358 : vector<16x1xf32>
    %360 = arith.mulf %357, %357 : vector<16x1xf32>
    %361 = arith.subf %359, %360 : vector<16x1xf32>
    %c3_252 = arith.constant 3 : index
    %c0_253 = arith.constant 0 : index
    %c0_254 = arith.constant 0 : index
    %362 = vector.load %arg9[%c3_252, %c0_253, %c0_254] : memref<4x16x1xf32, #tpu.memory_space<vmem>>, vector<1x16x1xf32>
    %363 = vector.shape_cast %362 : vector<1x16x1xf32> to vector<16x1xf32>
    %cst_255 = arith.constant 9.99999974E-6 : f32
    %364 = vector.broadcast %cst_255 : f32 to vector<16x1xf32>
    %365 = arith.addf %361, %364 : vector<16x1xf32>
    %366 = math.rsqrt %365 : vector<16x1xf32>
    %367 = arith.mulf %363, %366 : vector<16x1xf32>
    %c3_256 = arith.constant 3 : index
    %c0_257 = arith.constant 0 : index
    %c0_258 = arith.constant 0 : index
    %368 = vector.load %arg10[%c3_256, %c0_257, %c0_258] : memref<4x16x1xf32, #tpu.memory_space<vmem>>, vector<1x16x1xf32>
    %369 = vector.shape_cast %368 : vector<1x16x1xf32> to vector<16x1xf32>
    %370 = arith.mulf %357, %367 : vector<16x1xf32>
    %371 = arith.subf %369, %370 : vector<16x1xf32>
    %372 = vector.broadcast %367 : vector<16x1xf32> to vector<16x8xf32>
    %373 = arith.mulf %316, %372 : vector<16x8xf32>
    %374 = vector.broadcast %371 : vector<16x1xf32> to vector<16x8xf32>
    %375 = arith.addf %373, %374 : vector<16x8xf32>
    %cst_259 = arith.constant 0.000000e+00 : f32
    %376 = vector.broadcast %cst_259 : f32 to vector<16x8xf32>
    %377 = arith.maximumf %375, %376 : vector<16x8xf32>
    %378 = vector.broadcast %367 : vector<16x1xf32> to vector<16x8xf32>
    %379 = arith.mulf %348, %378 : vector<16x8xf32>
    %380 = vector.broadcast %371 : vector<16x1xf32> to vector<16x8xf32>
    %381 = arith.addf %379, %380 : vector<16x8xf32>
    %cst_260 = arith.constant 0.000000e+00 : f32
    %382 = vector.broadcast %cst_260 : f32 to vector<16x8xf32>
    %383 = arith.maximumf %381, %382 : vector<16x8xf32>
    %384 = tpu.concatenate %377, %383 in 1 : vector<16x8xf32>, vector<16x8xf32> -> vector<16x16xf32>
    %c0_261 = arith.constant 0 : index
    %c0_262 = arith.constant 0 : index
    %385 = vector.load %arg11[%c0_261, %c0_262] : memref<96x16xf32, #tpu.memory_space<vmem>>, vector<96x16xf32>
    %cst_263 = arith.constant dense<0.000000e+00> : vector<96x16xf32>
    %386 = tpu.matmul %385, %384, %cst_263 {dimension_numbers = #tpu.dot_dimension_numbers<[1], [0], [0], [1], [0, 0, 1, 1], [], []>} : vector<96x16xf32>, vector<16x16xf32>, vector<96x16xf32> -> vector<96x16xf32>
    %c0_264 = arith.constant 0 : index
    %c0_265 = arith.constant 0 : index
    %387 = vector.load %arg13[%c0_264, %c0_265] : memref<96x1xf32, #tpu.memory_space<vmem>>, vector<96x1xf32>
    %388 = vector.broadcast %387 : vector<96x1xf32> to vector<96x16xf32>
    %389 = arith.addf %386, %388 : vector<96x16xf32>
    %c0_266 = arith.constant 0 : index
    %c0_267 = arith.constant 0 : index
    %390 = vector.load %arg12[%c0_266, %c0_267] : memref<96x32xf32, #tpu.memory_space<vmem>>, vector<96x32xf32>
    %c0_268 = arith.constant 0 : index
    %c0_269 = arith.constant 0 : index
    %391 = vector.load %arg14[%c0_268, %c0_269] : memref<32x1xf32, #tpu.memory_space<vmem>>, vector<32x1xf32>
    %c0_270 = arith.constant 0 : index
    %392 = memref.load %arg0[%c0_270] : memref<2xi32, #tpu.memory_space<smem>>
    %cst_271 = arith.constant 0.000000e+00 : f32
    %393 = vector.broadcast %cst_271 : f32 to vector<32x1xf32>
    %cst_272 = arith.constant 0.000000e+00 : f32
    %394 = vector.broadcast %cst_272 : f32 to vector<32x1xf32>
    %395 = vector.extract_strided_slice %389 {offsets = [0, 0], sizes = [96, 1], strides = [1, 1]} : vector<96x16xf32> to vector<96x1xf32>
    %cst_273 = arith.constant dense<0.000000e+00> : vector<96x1xf32>
    %396 = tpu.matmul %390, %393, %cst_273 {dimension_numbers = #tpu.dot_dimension_numbers<[1], [0], [0], [1], [0, 0, 1, 1], [], []>} : vector<96x32xf32>, vector<32x1xf32>, vector<96x1xf32> -> vector<96x1xf32>
    %397 = vector.extract_strided_slice %395 {offsets = [0, 0], sizes = [32, 1], strides = [1, 1]} : vector<96x1xf32> to vector<32x1xf32>
    %398 = vector.extract_strided_slice %396 {offsets = [0, 0], sizes = [32, 1], strides = [1, 1]} : vector<96x1xf32> to vector<32x1xf32>
    %399 = arith.addf %397, %398 : vector<32x1xf32>
    %400 = arith.negf %399 : vector<32x1xf32>
    %401 = math.exp %400 : vector<32x1xf32>
    %cst_274 = arith.constant 1.000000e+00 : f32
    %402 = vector.broadcast %cst_274 : f32 to vector<32x1xf32>
    %403 = arith.addf %402, %401 : vector<32x1xf32>
    %404 = arith.divf %402, %403 : vector<32x1xf32>
    %405 = vector.extract_strided_slice %395 {offsets = [32, 0], sizes = [32, 1], strides = [1, 1]} : vector<96x1xf32> to vector<32x1xf32>
    %406 = vector.extract_strided_slice %396 {offsets = [32, 0], sizes = [32, 1], strides = [1, 1]} : vector<96x1xf32> to vector<32x1xf32>
    %407 = arith.addf %405, %406 : vector<32x1xf32>
    %408 = arith.negf %407 : vector<32x1xf32>
    %409 = math.exp %408 : vector<32x1xf32>
    %cst_275 = arith.constant 1.000000e+00 : f32
    %410 = vector.broadcast %cst_275 : f32 to vector<32x1xf32>
    %411 = arith.addf %410, %409 : vector<32x1xf32>
    %412 = arith.divf %410, %411 : vector<32x1xf32>
    %413 = vector.extract_strided_slice %395 {offsets = [64, 0], sizes = [32, 1], strides = [1, 1]} : vector<96x1xf32> to vector<32x1xf32>
    %414 = vector.extract_strided_slice %396 {offsets = [64, 0], sizes = [32, 1], strides = [1, 1]} : vector<96x1xf32> to vector<32x1xf32>
    %415 = arith.addf %414, %391 : vector<32x1xf32>
    %416 = arith.mulf %404, %415 : vector<32x1xf32>
    %417 = arith.addf %413, %416 : vector<32x1xf32>
    %418 = math.tanh %417 : vector<32x1xf32>
    %cst_276 = arith.constant 1.000000e+00 : f32
    %419 = vector.broadcast %cst_276 : f32 to vector<32x1xf32>
    %420 = arith.subf %419, %412 : vector<32x1xf32>
    %421 = arith.mulf %420, %418 : vector<32x1xf32>
    %422 = arith.mulf %412, %393 : vector<32x1xf32>
    %423 = arith.addf %421, %422 : vector<32x1xf32>
    %c0_i32 = arith.constant 0 : i32
    %424 = arith.cmpi eq, %392, %c0_i32 : i32
    %425 = arith.extui %424 : i1 to i32
    %426 = arith.sitofp %425 : i32 to f32
    %427 = arith.subf %423, %394 : vector<32x1xf32>
    %428 = vector.broadcast %426 : f32 to vector<32x1xf32>
    %429 = arith.mulf %428, %427 : vector<32x1xf32>
    %430 = arith.addf %394, %429 : vector<32x1xf32>
    %431 = vector.extract_strided_slice %389 {offsets = [0, 1], sizes = [96, 1], strides = [1, 1]} : vector<96x16xf32> to vector<96x1xf32>
    %cst_277 = arith.constant dense<0.000000e+00> : vector<96x1xf32>
    %432 = tpu.matmul %390, %423, %cst_277 {dimension_numbers = #tpu.dot_dimension_numbers<[1], [0], [0], [1], [0, 0, 1, 1], [], []>} : vector<96x32xf32>, vector<32x1xf32>, vector<96x1xf32> -> vector<96x1xf32>
    %433 = vector.extract_strided_slice %431 {offsets = [0, 0], sizes = [32, 1], strides = [1, 1]} : vector<96x1xf32> to vector<32x1xf32>
    %434 = vector.extract_strided_slice %432 {offsets = [0, 0], sizes = [32, 1], strides = [1, 1]} : vector<96x1xf32> to vector<32x1xf32>
    %435 = arith.addf %433, %434 : vector<32x1xf32>
    %436 = arith.negf %435 : vector<32x1xf32>
    %437 = math.exp %436 : vector<32x1xf32>
    %cst_278 = arith.constant 1.000000e+00 : f32
    %438 = vector.broadcast %cst_278 : f32 to vector<32x1xf32>
    %439 = arith.addf %438, %437 : vector<32x1xf32>
    %440 = arith.divf %438, %439 : vector<32x1xf32>
    %441 = vector.extract_strided_slice %431 {offsets = [32, 0], sizes = [32, 1], strides = [1, 1]} : vector<96x1xf32> to vector<32x1xf32>
    %442 = vector.extract_strided_slice %432 {offsets = [32, 0], sizes = [32, 1], strides = [1, 1]} : vector<96x1xf32> to vector<32x1xf32>
    %443 = arith.addf %441, %442 : vector<32x1xf32>
    %444 = arith.negf %443 : vector<32x1xf32>
    %445 = math.exp %444 : vector<32x1xf32>
    %cst_279 = arith.constant 1.000000e+00 : f32
    %446 = vector.broadcast %cst_279 : f32 to vector<32x1xf32>
    %447 = arith.addf %446, %445 : vector<32x1xf32>
    %448 = arith.divf %446, %447 : vector<32x1xf32>
    %449 = vector.extract_strided_slice %431 {offsets = [64, 0], sizes = [32, 1], strides = [1, 1]} : vector<96x1xf32> to vector<32x1xf32>
    %450 = vector.extract_strided_slice %432 {offsets = [64, 0], sizes = [32, 1], strides = [1, 1]} : vector<96x1xf32> to vector<32x1xf32>
    %451 = arith.addf %450, %391 : vector<32x1xf32>
    %452 = arith.mulf %440, %451 : vector<32x1xf32>
    %453 = arith.addf %449, %452 : vector<32x1xf32>
    %454 = math.tanh %453 : vector<32x1xf32>
    %cst_280 = arith.constant 1.000000e+00 : f32
    %455 = vector.broadcast %cst_280 : f32 to vector<32x1xf32>
    %456 = arith.subf %455, %448 : vector<32x1xf32>
    %457 = arith.mulf %456, %454 : vector<32x1xf32>
    %458 = arith.mulf %448, %423 : vector<32x1xf32>
    %459 = arith.addf %457, %458 : vector<32x1xf32>
    %c1_i32 = arith.constant 1 : i32
    %460 = arith.cmpi eq, %392, %c1_i32 : i32
    %461 = arith.extui %460 : i1 to i32
    %462 = arith.sitofp %461 : i32 to f32
    %463 = arith.subf %459, %430 : vector<32x1xf32>
    %464 = vector.broadcast %462 : f32 to vector<32x1xf32>
    %465 = arith.mulf %464, %463 : vector<32x1xf32>
    %466 = arith.addf %430, %465 : vector<32x1xf32>
    %467 = vector.extract_strided_slice %389 {offsets = [0, 2], sizes = [96, 1], strides = [1, 1]} : vector<96x16xf32> to vector<96x1xf32>
    %cst_281 = arith.constant dense<0.000000e+00> : vector<96x1xf32>
    %468 = tpu.matmul %390, %459, %cst_281 {dimension_numbers = #tpu.dot_dimension_numbers<[1], [0], [0], [1], [0, 0, 1, 1], [], []>} : vector<96x32xf32>, vector<32x1xf32>, vector<96x1xf32> -> vector<96x1xf32>
    %469 = vector.extract_strided_slice %467 {offsets = [0, 0], sizes = [32, 1], strides = [1, 1]} : vector<96x1xf32> to vector<32x1xf32>
    %470 = vector.extract_strided_slice %468 {offsets = [0, 0], sizes = [32, 1], strides = [1, 1]} : vector<96x1xf32> to vector<32x1xf32>
    %471 = arith.addf %469, %470 : vector<32x1xf32>
    %472 = arith.negf %471 : vector<32x1xf32>
    %473 = math.exp %472 : vector<32x1xf32>
    %cst_282 = arith.constant 1.000000e+00 : f32
    %474 = vector.broadcast %cst_282 : f32 to vector<32x1xf32>
    %475 = arith.addf %474, %473 : vector<32x1xf32>
    %476 = arith.divf %474, %475 : vector<32x1xf32>
    %477 = vector.extract_strided_slice %467 {offsets = [32, 0], sizes = [32, 1], strides = [1, 1]} : vector<96x1xf32> to vector<32x1xf32>
    %478 = vector.extract_strided_slice %468 {offsets = [32, 0], sizes = [32, 1], strides = [1, 1]} : vector<96x1xf32> to vector<32x1xf32>
    %479 = arith.addf %477, %478 : vector<32x1xf32>
    %480 = arith.negf %479 : vector<32x1xf32>
    %481 = math.exp %480 : vector<32x1xf32>
    %cst_283 = arith.constant 1.000000e+00 : f32
    %482 = vector.broadcast %cst_283 : f32 to vector<32x1xf32>
    %483 = arith.addf %482, %481 : vector<32x1xf32>
    %484 = arith.divf %482, %483 : vector<32x1xf32>
    %485 = vector.extract_strided_slice %467 {offsets = [64, 0], sizes = [32, 1], strides = [1, 1]} : vector<96x1xf32> to vector<32x1xf32>
    %486 = vector.extract_strided_slice %468 {offsets = [64, 0], sizes = [32, 1], strides = [1, 1]} : vector<96x1xf32> to vector<32x1xf32>
    %487 = arith.addf %486, %391 : vector<32x1xf32>
    %488 = arith.mulf %476, %487 : vector<32x1xf32>
    %489 = arith.addf %485, %488 : vector<32x1xf32>
    %490 = math.tanh %489 : vector<32x1xf32>
    %cst_284 = arith.constant 1.000000e+00 : f32
    %491 = vector.broadcast %cst_284 : f32 to vector<32x1xf32>
    %492 = arith.subf %491, %484 : vector<32x1xf32>
    %493 = arith.mulf %492, %490 : vector<32x1xf32>
    %494 = arith.mulf %484, %459 : vector<32x1xf32>
    %495 = arith.addf %493, %494 : vector<32x1xf32>
    %c2_i32 = arith.constant 2 : i32
    %496 = arith.cmpi eq, %392, %c2_i32 : i32
    %497 = arith.extui %496 : i1 to i32
    %498 = arith.sitofp %497 : i32 to f32
    %499 = arith.subf %495, %466 : vector<32x1xf32>
    %500 = vector.broadcast %498 : f32 to vector<32x1xf32>
    %501 = arith.mulf %500, %499 : vector<32x1xf32>
    %502 = arith.addf %466, %501 : vector<32x1xf32>
    %503 = vector.extract_strided_slice %389 {offsets = [0, 3], sizes = [96, 1], strides = [1, 1]} : vector<96x16xf32> to vector<96x1xf32>
    %cst_285 = arith.constant dense<0.000000e+00> : vector<96x1xf32>
    %504 = tpu.matmul %390, %495, %cst_285 {dimension_numbers = #tpu.dot_dimension_numbers<[1], [0], [0], [1], [0, 0, 1, 1], [], []>} : vector<96x32xf32>, vector<32x1xf32>, vector<96x1xf32> -> vector<96x1xf32>
    %505 = vector.extract_strided_slice %503 {offsets = [0, 0], sizes = [32, 1], strides = [1, 1]} : vector<96x1xf32> to vector<32x1xf32>
    %506 = vector.extract_strided_slice %504 {offsets = [0, 0], sizes = [32, 1], strides = [1, 1]} : vector<96x1xf32> to vector<32x1xf32>
    %507 = arith.addf %505, %506 : vector<32x1xf32>
    %508 = arith.negf %507 : vector<32x1xf32>
    %509 = math.exp %508 : vector<32x1xf32>
    %cst_286 = arith.constant 1.000000e+00 : f32
    %510 = vector.broadcast %cst_286 : f32 to vector<32x1xf32>
    %511 = arith.addf %510, %509 : vector<32x1xf32>
    %512 = arith.divf %510, %511 : vector<32x1xf32>
    %513 = vector.extract_strided_slice %503 {offsets = [32, 0], sizes = [32, 1], strides = [1, 1]} : vector<96x1xf32> to vector<32x1xf32>
    %514 = vector.extract_strided_slice %504 {offsets = [32, 0], sizes = [32, 1], strides = [1, 1]} : vector<96x1xf32> to vector<32x1xf32>
    %515 = arith.addf %513, %514 : vector<32x1xf32>
    %516 = arith.negf %515 : vector<32x1xf32>
    %517 = math.exp %516 : vector<32x1xf32>
    %cst_287 = arith.constant 1.000000e+00 : f32
    %518 = vector.broadcast %cst_287 : f32 to vector<32x1xf32>
    %519 = arith.addf %518, %517 : vector<32x1xf32>
    %520 = arith.divf %518, %519 : vector<32x1xf32>
    %521 = vector.extract_strided_slice %503 {offsets = [64, 0], sizes = [32, 1], strides = [1, 1]} : vector<96x1xf32> to vector<32x1xf32>
    %522 = vector.extract_strided_slice %504 {offsets = [64, 0], sizes = [32, 1], strides = [1, 1]} : vector<96x1xf32> to vector<32x1xf32>
    %523 = arith.addf %522, %391 : vector<32x1xf32>
    %524 = arith.mulf %512, %523 : vector<32x1xf32>
    %525 = arith.addf %521, %524 : vector<32x1xf32>
    %526 = math.tanh %525 : vector<32x1xf32>
    %cst_288 = arith.constant 1.000000e+00 : f32
    %527 = vector.broadcast %cst_288 : f32 to vector<32x1xf32>
    %528 = arith.subf %527, %520 : vector<32x1xf32>
    %529 = arith.mulf %528, %526 : vector<32x1xf32>
    %530 = arith.mulf %520, %495 : vector<32x1xf32>
    %531 = arith.addf %529, %530 : vector<32x1xf32>
    %c3_i32 = arith.constant 3 : i32
    %532 = arith.cmpi eq, %392, %c3_i32 : i32
    %533 = arith.extui %532 : i1 to i32
    %534 = arith.sitofp %533 : i32 to f32
    %535 = arith.subf %531, %502 : vector<32x1xf32>
    %536 = vector.broadcast %534 : f32 to vector<32x1xf32>
    %537 = arith.mulf %536, %535 : vector<32x1xf32>
    %538 = arith.addf %502, %537 : vector<32x1xf32>
    %539 = vector.extract_strided_slice %389 {offsets = [0, 4], sizes = [96, 1], strides = [1, 1]} : vector<96x16xf32> to vector<96x1xf32>
    %cst_289 = arith.constant dense<0.000000e+00> : vector<96x1xf32>
    %540 = tpu.matmul %390, %531, %cst_289 {dimension_numbers = #tpu.dot_dimension_numbers<[1], [0], [0], [1], [0, 0, 1, 1], [], []>} : vector<96x32xf32>, vector<32x1xf32>, vector<96x1xf32> -> vector<96x1xf32>
    %541 = vector.extract_strided_slice %539 {offsets = [0, 0], sizes = [32, 1], strides = [1, 1]} : vector<96x1xf32> to vector<32x1xf32>
    %542 = vector.extract_strided_slice %540 {offsets = [0, 0], sizes = [32, 1], strides = [1, 1]} : vector<96x1xf32> to vector<32x1xf32>
    %543 = arith.addf %541, %542 : vector<32x1xf32>
    %544 = arith.negf %543 : vector<32x1xf32>
    %545 = math.exp %544 : vector<32x1xf32>
    %cst_290 = arith.constant 1.000000e+00 : f32
    %546 = vector.broadcast %cst_290 : f32 to vector<32x1xf32>
    %547 = arith.addf %546, %545 : vector<32x1xf32>
    %548 = arith.divf %546, %547 : vector<32x1xf32>
    %549 = vector.extract_strided_slice %539 {offsets = [32, 0], sizes = [32, 1], strides = [1, 1]} : vector<96x1xf32> to vector<32x1xf32>
    %550 = vector.extract_strided_slice %540 {offsets = [32, 0], sizes = [32, 1], strides = [1, 1]} : vector<96x1xf32> to vector<32x1xf32>
    %551 = arith.addf %549, %550 : vector<32x1xf32>
    %552 = arith.negf %551 : vector<32x1xf32>
    %553 = math.exp %552 : vector<32x1xf32>
    %cst_291 = arith.constant 1.000000e+00 : f32
    %554 = vector.broadcast %cst_291 : f32 to vector<32x1xf32>
    %555 = arith.addf %554, %553 : vector<32x1xf32>
    %556 = arith.divf %554, %555 : vector<32x1xf32>
    %557 = vector.extract_strided_slice %539 {offsets = [64, 0], sizes = [32, 1], strides = [1, 1]} : vector<96x1xf32> to vector<32x1xf32>
    %558 = vector.extract_strided_slice %540 {offsets = [64, 0], sizes = [32, 1], strides = [1, 1]} : vector<96x1xf32> to vector<32x1xf32>
    %559 = arith.addf %558, %391 : vector<32x1xf32>
    %560 = arith.mulf %548, %559 : vector<32x1xf32>
    %561 = arith.addf %557, %560 : vector<32x1xf32>
    %562 = math.tanh %561 : vector<32x1xf32>
    %cst_292 = arith.constant 1.000000e+00 : f32
    %563 = vector.broadcast %cst_292 : f32 to vector<32x1xf32>
    %564 = arith.subf %563, %556 : vector<32x1xf32>
    %565 = arith.mulf %564, %562 : vector<32x1xf32>
    %566 = arith.mulf %556, %531 : vector<32x1xf32>
    %567 = arith.addf %565, %566 : vector<32x1xf32>
    %c4_i32 = arith.constant 4 : i32
    %568 = arith.cmpi eq, %392, %c4_i32 : i32
    %569 = arith.extui %568 : i1 to i32
    %570 = arith.sitofp %569 : i32 to f32
    %571 = arith.subf %567, %538 : vector<32x1xf32>
    %572 = vector.broadcast %570 : f32 to vector<32x1xf32>
    %573 = arith.mulf %572, %571 : vector<32x1xf32>
    %574 = arith.addf %538, %573 : vector<32x1xf32>
    %575 = vector.extract_strided_slice %389 {offsets = [0, 5], sizes = [96, 1], strides = [1, 1]} : vector<96x16xf32> to vector<96x1xf32>
    %cst_293 = arith.constant dense<0.000000e+00> : vector<96x1xf32>
    %576 = tpu.matmul %390, %567, %cst_293 {dimension_numbers = #tpu.dot_dimension_numbers<[1], [0], [0], [1], [0, 0, 1, 1], [], []>} : vector<96x32xf32>, vector<32x1xf32>, vector<96x1xf32> -> vector<96x1xf32>
    %577 = vector.extract_strided_slice %575 {offsets = [0, 0], sizes = [32, 1], strides = [1, 1]} : vector<96x1xf32> to vector<32x1xf32>
    %578 = vector.extract_strided_slice %576 {offsets = [0, 0], sizes = [32, 1], strides = [1, 1]} : vector<96x1xf32> to vector<32x1xf32>
    %579 = arith.addf %577, %578 : vector<32x1xf32>
    %580 = arith.negf %579 : vector<32x1xf32>
    %581 = math.exp %580 : vector<32x1xf32>
    %cst_294 = arith.constant 1.000000e+00 : f32
    %582 = vector.broadcast %cst_294 : f32 to vector<32x1xf32>
    %583 = arith.addf %582, %581 : vector<32x1xf32>
    %584 = arith.divf %582, %583 : vector<32x1xf32>
    %585 = vector.extract_strided_slice %575 {offsets = [32, 0], sizes = [32, 1], strides = [1, 1]} : vector<96x1xf32> to vector<32x1xf32>
    %586 = vector.extract_strided_slice %576 {offsets = [32, 0], sizes = [32, 1], strides = [1, 1]} : vector<96x1xf32> to vector<32x1xf32>
    %587 = arith.addf %585, %586 : vector<32x1xf32>
    %588 = arith.negf %587 : vector<32x1xf32>
    %589 = math.exp %588 : vector<32x1xf32>
    %cst_295 = arith.constant 1.000000e+00 : f32
    %590 = vector.broadcast %cst_295 : f32 to vector<32x1xf32>
    %591 = arith.addf %590, %589 : vector<32x1xf32>
    %592 = arith.divf %590, %591 : vector<32x1xf32>
    %593 = vector.extract_strided_slice %575 {offsets = [64, 0], sizes = [32, 1], strides = [1, 1]} : vector<96x1xf32> to vector<32x1xf32>
    %594 = vector.extract_strided_slice %576 {offsets = [64, 0], sizes = [32, 1], strides = [1, 1]} : vector<96x1xf32> to vector<32x1xf32>
    %595 = arith.addf %594, %391 : vector<32x1xf32>
    %596 = arith.mulf %584, %595 : vector<32x1xf32>
    %597 = arith.addf %593, %596 : vector<32x1xf32>
    %598 = math.tanh %597 : vector<32x1xf32>
    %cst_296 = arith.constant 1.000000e+00 : f32
    %599 = vector.broadcast %cst_296 : f32 to vector<32x1xf32>
    %600 = arith.subf %599, %592 : vector<32x1xf32>
    %601 = arith.mulf %600, %598 : vector<32x1xf32>
    %602 = arith.mulf %592, %567 : vector<32x1xf32>
    %603 = arith.addf %601, %602 : vector<32x1xf32>
    %c5_i32 = arith.constant 5 : i32
    %604 = arith.cmpi eq, %392, %c5_i32 : i32
    %605 = arith.extui %604 : i1 to i32
    %606 = arith.sitofp %605 : i32 to f32
    %607 = arith.subf %603, %574 : vector<32x1xf32>
    %608 = vector.broadcast %606 : f32 to vector<32x1xf32>
    %609 = arith.mulf %608, %607 : vector<32x1xf32>
    %610 = arith.addf %574, %609 : vector<32x1xf32>
    %611 = vector.extract_strided_slice %389 {offsets = [0, 6], sizes = [96, 1], strides = [1, 1]} : vector<96x16xf32> to vector<96x1xf32>
    %cst_297 = arith.constant dense<0.000000e+00> : vector<96x1xf32>
    %612 = tpu.matmul %390, %603, %cst_297 {dimension_numbers = #tpu.dot_dimension_numbers<[1], [0], [0], [1], [0, 0, 1, 1], [], []>} : vector<96x32xf32>, vector<32x1xf32>, vector<96x1xf32> -> vector<96x1xf32>
    %613 = vector.extract_strided_slice %611 {offsets = [0, 0], sizes = [32, 1], strides = [1, 1]} : vector<96x1xf32> to vector<32x1xf32>
    %614 = vector.extract_strided_slice %612 {offsets = [0, 0], sizes = [32, 1], strides = [1, 1]} : vector<96x1xf32> to vector<32x1xf32>
    %615 = arith.addf %613, %614 : vector<32x1xf32>
    %616 = arith.negf %615 : vector<32x1xf32>
    %617 = math.exp %616 : vector<32x1xf32>
    %cst_298 = arith.constant 1.000000e+00 : f32
    %618 = vector.broadcast %cst_298 : f32 to vector<32x1xf32>
    %619 = arith.addf %618, %617 : vector<32x1xf32>
    %620 = arith.divf %618, %619 : vector<32x1xf32>
    %621 = vector.extract_strided_slice %611 {offsets = [32, 0], sizes = [32, 1], strides = [1, 1]} : vector<96x1xf32> to vector<32x1xf32>
    %622 = vector.extract_strided_slice %612 {offsets = [32, 0], sizes = [32, 1], strides = [1, 1]} : vector<96x1xf32> to vector<32x1xf32>
    %623 = arith.addf %621, %622 : vector<32x1xf32>
    %624 = arith.negf %623 : vector<32x1xf32>
    %625 = math.exp %624 : vector<32x1xf32>
    %cst_299 = arith.constant 1.000000e+00 : f32
    %626 = vector.broadcast %cst_299 : f32 to vector<32x1xf32>
    %627 = arith.addf %626, %625 : vector<32x1xf32>
    %628 = arith.divf %626, %627 : vector<32x1xf32>
    %629 = vector.extract_strided_slice %611 {offsets = [64, 0], sizes = [32, 1], strides = [1, 1]} : vector<96x1xf32> to vector<32x1xf32>
    %630 = vector.extract_strided_slice %612 {offsets = [64, 0], sizes = [32, 1], strides = [1, 1]} : vector<96x1xf32> to vector<32x1xf32>
    %631 = arith.addf %630, %391 : vector<32x1xf32>
    %632 = arith.mulf %620, %631 : vector<32x1xf32>
    %633 = arith.addf %629, %632 : vector<32x1xf32>
    %634 = math.tanh %633 : vector<32x1xf32>
    %cst_300 = arith.constant 1.000000e+00 : f32
    %635 = vector.broadcast %cst_300 : f32 to vector<32x1xf32>
    %636 = arith.subf %635, %628 : vector<32x1xf32>
    %637 = arith.mulf %636, %634 : vector<32x1xf32>
    %638 = arith.mulf %628, %603 : vector<32x1xf32>
    %639 = arith.addf %637, %638 : vector<32x1xf32>
    %c6_i32 = arith.constant 6 : i32
    %640 = arith.cmpi eq, %392, %c6_i32 : i32
    %641 = arith.extui %640 : i1 to i32
    %642 = arith.sitofp %641 : i32 to f32
    %643 = arith.subf %639, %610 : vector<32x1xf32>
    %644 = vector.broadcast %642 : f32 to vector<32x1xf32>
    %645 = arith.mulf %644, %643 : vector<32x1xf32>
    %646 = arith.addf %610, %645 : vector<32x1xf32>
    %647 = vector.extract_strided_slice %389 {offsets = [0, 7], sizes = [96, 1], strides = [1, 1]} : vector<96x16xf32> to vector<96x1xf32>
    %cst_301 = arith.constant dense<0.000000e+00> : vector<96x1xf32>
    %648 = tpu.matmul %390, %639, %cst_301 {dimension_numbers = #tpu.dot_dimension_numbers<[1], [0], [0], [1], [0, 0, 1, 1], [], []>} : vector<96x32xf32>, vector<32x1xf32>, vector<96x1xf32> -> vector<96x1xf32>
    %649 = vector.extract_strided_slice %647 {offsets = [0, 0], sizes = [32, 1], strides = [1, 1]} : vector<96x1xf32> to vector<32x1xf32>
    %650 = vector.extract_strided_slice %648 {offsets = [0, 0], sizes = [32, 1], strides = [1, 1]} : vector<96x1xf32> to vector<32x1xf32>
    %651 = arith.addf %649, %650 : vector<32x1xf32>
    %652 = arith.negf %651 : vector<32x1xf32>
    %653 = math.exp %652 : vector<32x1xf32>
    %cst_302 = arith.constant 1.000000e+00 : f32
    %654 = vector.broadcast %cst_302 : f32 to vector<32x1xf32>
    %655 = arith.addf %654, %653 : vector<32x1xf32>
    %656 = arith.divf %654, %655 : vector<32x1xf32>
    %657 = vector.extract_strided_slice %647 {offsets = [32, 0], sizes = [32, 1], strides = [1, 1]} : vector<96x1xf32> to vector<32x1xf32>
    %658 = vector.extract_strided_slice %648 {offsets = [32, 0], sizes = [32, 1], strides = [1, 1]} : vector<96x1xf32> to vector<32x1xf32>
    %659 = arith.addf %657, %658 : vector<32x1xf32>
    %660 = arith.negf %659 : vector<32x1xf32>
    %661 = math.exp %660 : vector<32x1xf32>
    %cst_303 = arith.constant 1.000000e+00 : f32
    %662 = vector.broadcast %cst_303 : f32 to vector<32x1xf32>
    %663 = arith.addf %662, %661 : vector<32x1xf32>
    %664 = arith.divf %662, %663 : vector<32x1xf32>
    %665 = vector.extract_strided_slice %647 {offsets = [64, 0], sizes = [32, 1], strides = [1, 1]} : vector<96x1xf32> to vector<32x1xf32>
    %666 = vector.extract_strided_slice %648 {offsets = [64, 0], sizes = [32, 1], strides = [1, 1]} : vector<96x1xf32> to vector<32x1xf32>
    %667 = arith.addf %666, %391 : vector<32x1xf32>
    %668 = arith.mulf %656, %667 : vector<32x1xf32>
    %669 = arith.addf %665, %668 : vector<32x1xf32>
    %670 = math.tanh %669 : vector<32x1xf32>
    %cst_304 = arith.constant 1.000000e+00 : f32
    %671 = vector.broadcast %cst_304 : f32 to vector<32x1xf32>
    %672 = arith.subf %671, %664 : vector<32x1xf32>
    %673 = arith.mulf %672, %670 : vector<32x1xf32>
    %674 = arith.mulf %664, %639 : vector<32x1xf32>
    %675 = arith.addf %673, %674 : vector<32x1xf32>
    %c7_i32 = arith.constant 7 : i32
    %676 = arith.cmpi eq, %392, %c7_i32 : i32
    %677 = arith.extui %676 : i1 to i32
    %678 = arith.sitofp %677 : i32 to f32
    %679 = arith.subf %675, %646 : vector<32x1xf32>
    %680 = vector.broadcast %678 : f32 to vector<32x1xf32>
    %681 = arith.mulf %680, %679 : vector<32x1xf32>
    %682 = arith.addf %646, %681 : vector<32x1xf32>
    %c1_305 = arith.constant 1 : index
    %683 = memref.load %arg0[%c1_305] : memref<2xi32, #tpu.memory_space<smem>>
    %cst_306 = arith.constant 0.000000e+00 : f32
    %684 = vector.broadcast %cst_306 : f32 to vector<32x1xf32>
    %cst_307 = arith.constant 0.000000e+00 : f32
    %685 = vector.broadcast %cst_307 : f32 to vector<32x1xf32>
    %686 = vector.extract_strided_slice %389 {offsets = [0, 8], sizes = [96, 1], strides = [1, 1]} : vector<96x16xf32> to vector<96x1xf32>
    %cst_308 = arith.constant dense<0.000000e+00> : vector<96x1xf32>
    %687 = tpu.matmul %390, %684, %cst_308 {dimension_numbers = #tpu.dot_dimension_numbers<[1], [0], [0], [1], [0, 0, 1, 1], [], []>} : vector<96x32xf32>, vector<32x1xf32>, vector<96x1xf32> -> vector<96x1xf32>
    %688 = vector.extract_strided_slice %686 {offsets = [0, 0], sizes = [32, 1], strides = [1, 1]} : vector<96x1xf32> to vector<32x1xf32>
    %689 = vector.extract_strided_slice %687 {offsets = [0, 0], sizes = [32, 1], strides = [1, 1]} : vector<96x1xf32> to vector<32x1xf32>
    %690 = arith.addf %688, %689 : vector<32x1xf32>
    %691 = arith.negf %690 : vector<32x1xf32>
    %692 = math.exp %691 : vector<32x1xf32>
    %cst_309 = arith.constant 1.000000e+00 : f32
    %693 = vector.broadcast %cst_309 : f32 to vector<32x1xf32>
    %694 = arith.addf %693, %692 : vector<32x1xf32>
    %695 = arith.divf %693, %694 : vector<32x1xf32>
    %696 = vector.extract_strided_slice %686 {offsets = [32, 0], sizes = [32, 1], strides = [1, 1]} : vector<96x1xf32> to vector<32x1xf32>
    %697 = vector.extract_strided_slice %687 {offsets = [32, 0], sizes = [32, 1], strides = [1, 1]} : vector<96x1xf32> to vector<32x1xf32>
    %698 = arith.addf %696, %697 : vector<32x1xf32>
    %699 = arith.negf %698 : vector<32x1xf32>
    %700 = math.exp %699 : vector<32x1xf32>
    %cst_310 = arith.constant 1.000000e+00 : f32
    %701 = vector.broadcast %cst_310 : f32 to vector<32x1xf32>
    %702 = arith.addf %701, %700 : vector<32x1xf32>
    %703 = arith.divf %701, %702 : vector<32x1xf32>
    %704 = vector.extract_strided_slice %686 {offsets = [64, 0], sizes = [32, 1], strides = [1, 1]} : vector<96x1xf32> to vector<32x1xf32>
    %705 = vector.extract_strided_slice %687 {offsets = [64, 0], sizes = [32, 1], strides = [1, 1]} : vector<96x1xf32> to vector<32x1xf32>
    %706 = arith.addf %705, %391 : vector<32x1xf32>
    %707 = arith.mulf %695, %706 : vector<32x1xf32>
    %708 = arith.addf %704, %707 : vector<32x1xf32>
    %709 = math.tanh %708 : vector<32x1xf32>
    %cst_311 = arith.constant 1.000000e+00 : f32
    %710 = vector.broadcast %cst_311 : f32 to vector<32x1xf32>
    %711 = arith.subf %710, %703 : vector<32x1xf32>
    %712 = arith.mulf %711, %709 : vector<32x1xf32>
    %713 = arith.mulf %703, %684 : vector<32x1xf32>
    %714 = arith.addf %712, %713 : vector<32x1xf32>
    %c0_i32_312 = arith.constant 0 : i32
    %715 = arith.cmpi eq, %683, %c0_i32_312 : i32
    %716 = arith.extui %715 : i1 to i32
    %717 = arith.sitofp %716 : i32 to f32
    %718 = arith.subf %714, %685 : vector<32x1xf32>
    %719 = vector.broadcast %717 : f32 to vector<32x1xf32>
    %720 = arith.mulf %719, %718 : vector<32x1xf32>
    %721 = arith.addf %685, %720 : vector<32x1xf32>
    %722 = vector.extract_strided_slice %389 {offsets = [0, 9], sizes = [96, 1], strides = [1, 1]} : vector<96x16xf32> to vector<96x1xf32>
    %cst_313 = arith.constant dense<0.000000e+00> : vector<96x1xf32>
    %723 = tpu.matmul %390, %714, %cst_313 {dimension_numbers = #tpu.dot_dimension_numbers<[1], [0], [0], [1], [0, 0, 1, 1], [], []>} : vector<96x32xf32>, vector<32x1xf32>, vector<96x1xf32> -> vector<96x1xf32>
    %724 = vector.extract_strided_slice %722 {offsets = [0, 0], sizes = [32, 1], strides = [1, 1]} : vector<96x1xf32> to vector<32x1xf32>
    %725 = vector.extract_strided_slice %723 {offsets = [0, 0], sizes = [32, 1], strides = [1, 1]} : vector<96x1xf32> to vector<32x1xf32>
    %726 = arith.addf %724, %725 : vector<32x1xf32>
    %727 = arith.negf %726 : vector<32x1xf32>
    %728 = math.exp %727 : vector<32x1xf32>
    %cst_314 = arith.constant 1.000000e+00 : f32
    %729 = vector.broadcast %cst_314 : f32 to vector<32x1xf32>
    %730 = arith.addf %729, %728 : vector<32x1xf32>
    %731 = arith.divf %729, %730 : vector<32x1xf32>
    %732 = vector.extract_strided_slice %722 {offsets = [32, 0], sizes = [32, 1], strides = [1, 1]} : vector<96x1xf32> to vector<32x1xf32>
    %733 = vector.extract_strided_slice %723 {offsets = [32, 0], sizes = [32, 1], strides = [1, 1]} : vector<96x1xf32> to vector<32x1xf32>
    %734 = arith.addf %732, %733 : vector<32x1xf32>
    %735 = arith.negf %734 : vector<32x1xf32>
    %736 = math.exp %735 : vector<32x1xf32>
    %cst_315 = arith.constant 1.000000e+00 : f32
    %737 = vector.broadcast %cst_315 : f32 to vector<32x1xf32>
    %738 = arith.addf %737, %736 : vector<32x1xf32>
    %739 = arith.divf %737, %738 : vector<32x1xf32>
    %740 = vector.extract_strided_slice %722 {offsets = [64, 0], sizes = [32, 1], strides = [1, 1]} : vector<96x1xf32> to vector<32x1xf32>
    %741 = vector.extract_strided_slice %723 {offsets = [64, 0], sizes = [32, 1], strides = [1, 1]} : vector<96x1xf32> to vector<32x1xf32>
    %742 = arith.addf %741, %391 : vector<32x1xf32>
    %743 = arith.mulf %731, %742 : vector<32x1xf32>
    %744 = arith.addf %740, %743 : vector<32x1xf32>
    %745 = math.tanh %744 : vector<32x1xf32>
    %cst_316 = arith.constant 1.000000e+00 : f32
    %746 = vector.broadcast %cst_316 : f32 to vector<32x1xf32>
    %747 = arith.subf %746, %739 : vector<32x1xf32>
    %748 = arith.mulf %747, %745 : vector<32x1xf32>
    %749 = arith.mulf %739, %714 : vector<32x1xf32>
    %750 = arith.addf %748, %749 : vector<32x1xf32>
    %c1_i32_317 = arith.constant 1 : i32
    %751 = arith.cmpi eq, %683, %c1_i32_317 : i32
    %752 = arith.extui %751 : i1 to i32
    %753 = arith.sitofp %752 : i32 to f32
    %754 = arith.subf %750, %721 : vector<32x1xf32>
    %755 = vector.broadcast %753 : f32 to vector<32x1xf32>
    %756 = arith.mulf %755, %754 : vector<32x1xf32>
    %757 = arith.addf %721, %756 : vector<32x1xf32>
    %758 = vector.extract_strided_slice %389 {offsets = [0, 10], sizes = [96, 1], strides = [1, 1]} : vector<96x16xf32> to vector<96x1xf32>
    %cst_318 = arith.constant dense<0.000000e+00> : vector<96x1xf32>
    %759 = tpu.matmul %390, %750, %cst_318 {dimension_numbers = #tpu.dot_dimension_numbers<[1], [0], [0], [1], [0, 0, 1, 1], [], []>} : vector<96x32xf32>, vector<32x1xf32>, vector<96x1xf32> -> vector<96x1xf32>
    %760 = vector.extract_strided_slice %758 {offsets = [0, 0], sizes = [32, 1], strides = [1, 1]} : vector<96x1xf32> to vector<32x1xf32>
    %761 = vector.extract_strided_slice %759 {offsets = [0, 0], sizes = [32, 1], strides = [1, 1]} : vector<96x1xf32> to vector<32x1xf32>
    %762 = arith.addf %760, %761 : vector<32x1xf32>
    %763 = arith.negf %762 : vector<32x1xf32>
    %764 = math.exp %763 : vector<32x1xf32>
    %cst_319 = arith.constant 1.000000e+00 : f32
    %765 = vector.broadcast %cst_319 : f32 to vector<32x1xf32>
    %766 = arith.addf %765, %764 : vector<32x1xf32>
    %767 = arith.divf %765, %766 : vector<32x1xf32>
    %768 = vector.extract_strided_slice %758 {offsets = [32, 0], sizes = [32, 1], strides = [1, 1]} : vector<96x1xf32> to vector<32x1xf32>
    %769 = vector.extract_strided_slice %759 {offsets = [32, 0], sizes = [32, 1], strides = [1, 1]} : vector<96x1xf32> to vector<32x1xf32>
    %770 = arith.addf %768, %769 : vector<32x1xf32>
    %771 = arith.negf %770 : vector<32x1xf32>
    %772 = math.exp %771 : vector<32x1xf32>
    %cst_320 = arith.constant 1.000000e+00 : f32
    %773 = vector.broadcast %cst_320 : f32 to vector<32x1xf32>
    %774 = arith.addf %773, %772 : vector<32x1xf32>
    %775 = arith.divf %773, %774 : vector<32x1xf32>
    %776 = vector.extract_strided_slice %758 {offsets = [64, 0], sizes = [32, 1], strides = [1, 1]} : vector<96x1xf32> to vector<32x1xf32>
    %777 = vector.extract_strided_slice %759 {offsets = [64, 0], sizes = [32, 1], strides = [1, 1]} : vector<96x1xf32> to vector<32x1xf32>
    %778 = arith.addf %777, %391 : vector<32x1xf32>
    %779 = arith.mulf %767, %778 : vector<32x1xf32>
    %780 = arith.addf %776, %779 : vector<32x1xf32>
    %781 = math.tanh %780 : vector<32x1xf32>
    %cst_321 = arith.constant 1.000000e+00 : f32
    %782 = vector.broadcast %cst_321 : f32 to vector<32x1xf32>
    %783 = arith.subf %782, %775 : vector<32x1xf32>
    %784 = arith.mulf %783, %781 : vector<32x1xf32>
    %785 = arith.mulf %775, %750 : vector<32x1xf32>
    %786 = arith.addf %784, %785 : vector<32x1xf32>
    %c2_i32_322 = arith.constant 2 : i32
    %787 = arith.cmpi eq, %683, %c2_i32_322 : i32
    %788 = arith.extui %787 : i1 to i32
    %789 = arith.sitofp %788 : i32 to f32
    %790 = arith.subf %786, %757 : vector<32x1xf32>
    %791 = vector.broadcast %789 : f32 to vector<32x1xf32>
    %792 = arith.mulf %791, %790 : vector<32x1xf32>
    %793 = arith.addf %757, %792 : vector<32x1xf32>
    %794 = vector.extract_strided_slice %389 {offsets = [0, 11], sizes = [96, 1], strides = [1, 1]} : vector<96x16xf32> to vector<96x1xf32>
    %cst_323 = arith.constant dense<0.000000e+00> : vector<96x1xf32>
    %795 = tpu.matmul %390, %786, %cst_323 {dimension_numbers = #tpu.dot_dimension_numbers<[1], [0], [0], [1], [0, 0, 1, 1], [], []>} : vector<96x32xf32>, vector<32x1xf32>, vector<96x1xf32> -> vector<96x1xf32>
    %796 = vector.extract_strided_slice %794 {offsets = [0, 0], sizes = [32, 1], strides = [1, 1]} : vector<96x1xf32> to vector<32x1xf32>
    %797 = vector.extract_strided_slice %795 {offsets = [0, 0], sizes = [32, 1], strides = [1, 1]} : vector<96x1xf32> to vector<32x1xf32>
    %798 = arith.addf %796, %797 : vector<32x1xf32>
    %799 = arith.negf %798 : vector<32x1xf32>
    %800 = math.exp %799 : vector<32x1xf32>
    %cst_324 = arith.constant 1.000000e+00 : f32
    %801 = vector.broadcast %cst_324 : f32 to vector<32x1xf32>
    %802 = arith.addf %801, %800 : vector<32x1xf32>
    %803 = arith.divf %801, %802 : vector<32x1xf32>
    %804 = vector.extract_strided_slice %794 {offsets = [32, 0], sizes = [32, 1], strides = [1, 1]} : vector<96x1xf32> to vector<32x1xf32>
    %805 = vector.extract_strided_slice %795 {offsets = [32, 0], sizes = [32, 1], strides = [1, 1]} : vector<96x1xf32> to vector<32x1xf32>
    %806 = arith.addf %804, %805 : vector<32x1xf32>
    %807 = arith.negf %806 : vector<32x1xf32>
    %808 = math.exp %807 : vector<32x1xf32>
    %cst_325 = arith.constant 1.000000e+00 : f32
    %809 = vector.broadcast %cst_325 : f32 to vector<32x1xf32>
    %810 = arith.addf %809, %808 : vector<32x1xf32>
    %811 = arith.divf %809, %810 : vector<32x1xf32>
    %812 = vector.extract_strided_slice %794 {offsets = [64, 0], sizes = [32, 1], strides = [1, 1]} : vector<96x1xf32> to vector<32x1xf32>
    %813 = vector.extract_strided_slice %795 {offsets = [64, 0], sizes = [32, 1], strides = [1, 1]} : vector<96x1xf32> to vector<32x1xf32>
    %814 = arith.addf %813, %391 : vector<32x1xf32>
    %815 = arith.mulf %803, %814 : vector<32x1xf32>
    %816 = arith.addf %812, %815 : vector<32x1xf32>
    %817 = math.tanh %816 : vector<32x1xf32>
    %cst_326 = arith.constant 1.000000e+00 : f32
    %818 = vector.broadcast %cst_326 : f32 to vector<32x1xf32>
    %819 = arith.subf %818, %811 : vector<32x1xf32>
    %820 = arith.mulf %819, %817 : vector<32x1xf32>
    %821 = arith.mulf %811, %786 : vector<32x1xf32>
    %822 = arith.addf %820, %821 : vector<32x1xf32>
    %c3_i32_327 = arith.constant 3 : i32
    %823 = arith.cmpi eq, %683, %c3_i32_327 : i32
    %824 = arith.extui %823 : i1 to i32
    %825 = arith.sitofp %824 : i32 to f32
    %826 = arith.subf %822, %793 : vector<32x1xf32>
    %827 = vector.broadcast %825 : f32 to vector<32x1xf32>
    %828 = arith.mulf %827, %826 : vector<32x1xf32>
    %829 = arith.addf %793, %828 : vector<32x1xf32>
    %830 = vector.extract_strided_slice %389 {offsets = [0, 12], sizes = [96, 1], strides = [1, 1]} : vector<96x16xf32> to vector<96x1xf32>
    %cst_328 = arith.constant dense<0.000000e+00> : vector<96x1xf32>
    %831 = tpu.matmul %390, %822, %cst_328 {dimension_numbers = #tpu.dot_dimension_numbers<[1], [0], [0], [1], [0, 0, 1, 1], [], []>} : vector<96x32xf32>, vector<32x1xf32>, vector<96x1xf32> -> vector<96x1xf32>
    %832 = vector.extract_strided_slice %830 {offsets = [0, 0], sizes = [32, 1], strides = [1, 1]} : vector<96x1xf32> to vector<32x1xf32>
    %833 = vector.extract_strided_slice %831 {offsets = [0, 0], sizes = [32, 1], strides = [1, 1]} : vector<96x1xf32> to vector<32x1xf32>
    %834 = arith.addf %832, %833 : vector<32x1xf32>
    %835 = arith.negf %834 : vector<32x1xf32>
    %836 = math.exp %835 : vector<32x1xf32>
    %cst_329 = arith.constant 1.000000e+00 : f32
    %837 = vector.broadcast %cst_329 : f32 to vector<32x1xf32>
    %838 = arith.addf %837, %836 : vector<32x1xf32>
    %839 = arith.divf %837, %838 : vector<32x1xf32>
    %840 = vector.extract_strided_slice %830 {offsets = [32, 0], sizes = [32, 1], strides = [1, 1]} : vector<96x1xf32> to vector<32x1xf32>
    %841 = vector.extract_strided_slice %831 {offsets = [32, 0], sizes = [32, 1], strides = [1, 1]} : vector<96x1xf32> to vector<32x1xf32>
    %842 = arith.addf %840, %841 : vector<32x1xf32>
    %843 = arith.negf %842 : vector<32x1xf32>
    %844 = math.exp %843 : vector<32x1xf32>
    %cst_330 = arith.constant 1.000000e+00 : f32
    %845 = vector.broadcast %cst_330 : f32 to vector<32x1xf32>
    %846 = arith.addf %845, %844 : vector<32x1xf32>
    %847 = arith.divf %845, %846 : vector<32x1xf32>
    %848 = vector.extract_strided_slice %830 {offsets = [64, 0], sizes = [32, 1], strides = [1, 1]} : vector<96x1xf32> to vector<32x1xf32>
    %849 = vector.extract_strided_slice %831 {offsets = [64, 0], sizes = [32, 1], strides = [1, 1]} : vector<96x1xf32> to vector<32x1xf32>
    %850 = arith.addf %849, %391 : vector<32x1xf32>
    %851 = arith.mulf %839, %850 : vector<32x1xf32>
    %852 = arith.addf %848, %851 : vector<32x1xf32>
    %853 = math.tanh %852 : vector<32x1xf32>
    %cst_331 = arith.constant 1.000000e+00 : f32
    %854 = vector.broadcast %cst_331 : f32 to vector<32x1xf32>
    %855 = arith.subf %854, %847 : vector<32x1xf32>
    %856 = arith.mulf %855, %853 : vector<32x1xf32>
    %857 = arith.mulf %847, %822 : vector<32x1xf32>
    %858 = arith.addf %856, %857 : vector<32x1xf32>
    %c4_i32_332 = arith.constant 4 : i32
    %859 = arith.cmpi eq, %683, %c4_i32_332 : i32
    %860 = arith.extui %859 : i1 to i32
    %861 = arith.sitofp %860 : i32 to f32
    %862 = arith.subf %858, %829 : vector<32x1xf32>
    %863 = vector.broadcast %861 : f32 to vector<32x1xf32>
    %864 = arith.mulf %863, %862 : vector<32x1xf32>
    %865 = arith.addf %829, %864 : vector<32x1xf32>
    %866 = vector.extract_strided_slice %389 {offsets = [0, 13], sizes = [96, 1], strides = [1, 1]} : vector<96x16xf32> to vector<96x1xf32>
    %cst_333 = arith.constant dense<0.000000e+00> : vector<96x1xf32>
    %867 = tpu.matmul %390, %858, %cst_333 {dimension_numbers = #tpu.dot_dimension_numbers<[1], [0], [0], [1], [0, 0, 1, 1], [], []>} : vector<96x32xf32>, vector<32x1xf32>, vector<96x1xf32> -> vector<96x1xf32>
    %868 = vector.extract_strided_slice %866 {offsets = [0, 0], sizes = [32, 1], strides = [1, 1]} : vector<96x1xf32> to vector<32x1xf32>
    %869 = vector.extract_strided_slice %867 {offsets = [0, 0], sizes = [32, 1], strides = [1, 1]} : vector<96x1xf32> to vector<32x1xf32>
    %870 = arith.addf %868, %869 : vector<32x1xf32>
    %871 = arith.negf %870 : vector<32x1xf32>
    %872 = math.exp %871 : vector<32x1xf32>
    %cst_334 = arith.constant 1.000000e+00 : f32
    %873 = vector.broadcast %cst_334 : f32 to vector<32x1xf32>
    %874 = arith.addf %873, %872 : vector<32x1xf32>
    %875 = arith.divf %873, %874 : vector<32x1xf32>
    %876 = vector.extract_strided_slice %866 {offsets = [32, 0], sizes = [32, 1], strides = [1, 1]} : vector<96x1xf32> to vector<32x1xf32>
    %877 = vector.extract_strided_slice %867 {offsets = [32, 0], sizes = [32, 1], strides = [1, 1]} : vector<96x1xf32> to vector<32x1xf32>
    %878 = arith.addf %876, %877 : vector<32x1xf32>
    %879 = arith.negf %878 : vector<32x1xf32>
    %880 = math.exp %879 : vector<32x1xf32>
    %cst_335 = arith.constant 1.000000e+00 : f32
    %881 = vector.broadcast %cst_335 : f32 to vector<32x1xf32>
    %882 = arith.addf %881, %880 : vector<32x1xf32>
    %883 = arith.divf %881, %882 : vector<32x1xf32>
    %884 = vector.extract_strided_slice %866 {offsets = [64, 0], sizes = [32, 1], strides = [1, 1]} : vector<96x1xf32> to vector<32x1xf32>
    %885 = vector.extract_strided_slice %867 {offsets = [64, 0], sizes = [32, 1], strides = [1, 1]} : vector<96x1xf32> to vector<32x1xf32>
    %886 = arith.addf %885, %391 : vector<32x1xf32>
    %887 = arith.mulf %875, %886 : vector<32x1xf32>
    %888 = arith.addf %884, %887 : vector<32x1xf32>
    %889 = math.tanh %888 : vector<32x1xf32>
    %cst_336 = arith.constant 1.000000e+00 : f32
    %890 = vector.broadcast %cst_336 : f32 to vector<32x1xf32>
    %891 = arith.subf %890, %883 : vector<32x1xf32>
    %892 = arith.mulf %891, %889 : vector<32x1xf32>
    %893 = arith.mulf %883, %858 : vector<32x1xf32>
    %894 = arith.addf %892, %893 : vector<32x1xf32>
    %c5_i32_337 = arith.constant 5 : i32
    %895 = arith.cmpi eq, %683, %c5_i32_337 : i32
    %896 = arith.extui %895 : i1 to i32
    %897 = arith.sitofp %896 : i32 to f32
    %898 = arith.subf %894, %865 : vector<32x1xf32>
    %899 = vector.broadcast %897 : f32 to vector<32x1xf32>
    %900 = arith.mulf %899, %898 : vector<32x1xf32>
    %901 = arith.addf %865, %900 : vector<32x1xf32>
    %902 = vector.extract_strided_slice %389 {offsets = [0, 14], sizes = [96, 1], strides = [1, 1]} : vector<96x16xf32> to vector<96x1xf32>
    %cst_338 = arith.constant dense<0.000000e+00> : vector<96x1xf32>
    %903 = tpu.matmul %390, %894, %cst_338 {dimension_numbers = #tpu.dot_dimension_numbers<[1], [0], [0], [1], [0, 0, 1, 1], [], []>} : vector<96x32xf32>, vector<32x1xf32>, vector<96x1xf32> -> vector<96x1xf32>
    %904 = vector.extract_strided_slice %902 {offsets = [0, 0], sizes = [32, 1], strides = [1, 1]} : vector<96x1xf32> to vector<32x1xf32>
    %905 = vector.extract_strided_slice %903 {offsets = [0, 0], sizes = [32, 1], strides = [1, 1]} : vector<96x1xf32> to vector<32x1xf32>
    %906 = arith.addf %904, %905 : vector<32x1xf32>
    %907 = arith.negf %906 : vector<32x1xf32>
    %908 = math.exp %907 : vector<32x1xf32>
    %cst_339 = arith.constant 1.000000e+00 : f32
    %909 = vector.broadcast %cst_339 : f32 to vector<32x1xf32>
    %910 = arith.addf %909, %908 : vector<32x1xf32>
    %911 = arith.divf %909, %910 : vector<32x1xf32>
    %912 = vector.extract_strided_slice %902 {offsets = [32, 0], sizes = [32, 1], strides = [1, 1]} : vector<96x1xf32> to vector<32x1xf32>
    %913 = vector.extract_strided_slice %903 {offsets = [32, 0], sizes = [32, 1], strides = [1, 1]} : vector<96x1xf32> to vector<32x1xf32>
    %914 = arith.addf %912, %913 : vector<32x1xf32>
    %915 = arith.negf %914 : vector<32x1xf32>
    %916 = math.exp %915 : vector<32x1xf32>
    %cst_340 = arith.constant 1.000000e+00 : f32
    %917 = vector.broadcast %cst_340 : f32 to vector<32x1xf32>
    %918 = arith.addf %917, %916 : vector<32x1xf32>
    %919 = arith.divf %917, %918 : vector<32x1xf32>
    %920 = vector.extract_strided_slice %902 {offsets = [64, 0], sizes = [32, 1], strides = [1, 1]} : vector<96x1xf32> to vector<32x1xf32>
    %921 = vector.extract_strided_slice %903 {offsets = [64, 0], sizes = [32, 1], strides = [1, 1]} : vector<96x1xf32> to vector<32x1xf32>
    %922 = arith.addf %921, %391 : vector<32x1xf32>
    %923 = arith.mulf %911, %922 : vector<32x1xf32>
    %924 = arith.addf %920, %923 : vector<32x1xf32>
    %925 = math.tanh %924 : vector<32x1xf32>
    %cst_341 = arith.constant 1.000000e+00 : f32
    %926 = vector.broadcast %cst_341 : f32 to vector<32x1xf32>
    %927 = arith.subf %926, %919 : vector<32x1xf32>
    %928 = arith.mulf %927, %925 : vector<32x1xf32>
    %929 = arith.mulf %919, %894 : vector<32x1xf32>
    %930 = arith.addf %928, %929 : vector<32x1xf32>
    %c6_i32_342 = arith.constant 6 : i32
    %931 = arith.cmpi eq, %683, %c6_i32_342 : i32
    %932 = arith.extui %931 : i1 to i32
    %933 = arith.sitofp %932 : i32 to f32
    %934 = arith.subf %930, %901 : vector<32x1xf32>
    %935 = vector.broadcast %933 : f32 to vector<32x1xf32>
    %936 = arith.mulf %935, %934 : vector<32x1xf32>
    %937 = arith.addf %901, %936 : vector<32x1xf32>
    %938 = vector.extract_strided_slice %389 {offsets = [0, 15], sizes = [96, 1], strides = [1, 1]} : vector<96x16xf32> to vector<96x1xf32>
    %cst_343 = arith.constant dense<0.000000e+00> : vector<96x1xf32>
    %939 = tpu.matmul %390, %930, %cst_343 {dimension_numbers = #tpu.dot_dimension_numbers<[1], [0], [0], [1], [0, 0, 1, 1], [], []>} : vector<96x32xf32>, vector<32x1xf32>, vector<96x1xf32> -> vector<96x1xf32>
    %940 = vector.extract_strided_slice %938 {offsets = [0, 0], sizes = [32, 1], strides = [1, 1]} : vector<96x1xf32> to vector<32x1xf32>
    %941 = vector.extract_strided_slice %939 {offsets = [0, 0], sizes = [32, 1], strides = [1, 1]} : vector<96x1xf32> to vector<32x1xf32>
    %942 = arith.addf %940, %941 : vector<32x1xf32>
    %943 = arith.negf %942 : vector<32x1xf32>
    %944 = math.exp %943 : vector<32x1xf32>
    %cst_344 = arith.constant 1.000000e+00 : f32
    %945 = vector.broadcast %cst_344 : f32 to vector<32x1xf32>
    %946 = arith.addf %945, %944 : vector<32x1xf32>
    %947 = arith.divf %945, %946 : vector<32x1xf32>
    %948 = vector.extract_strided_slice %938 {offsets = [32, 0], sizes = [32, 1], strides = [1, 1]} : vector<96x1xf32> to vector<32x1xf32>
    %949 = vector.extract_strided_slice %939 {offsets = [32, 0], sizes = [32, 1], strides = [1, 1]} : vector<96x1xf32> to vector<32x1xf32>
    %950 = arith.addf %948, %949 : vector<32x1xf32>
    %951 = arith.negf %950 : vector<32x1xf32>
    %952 = math.exp %951 : vector<32x1xf32>
    %cst_345 = arith.constant 1.000000e+00 : f32
    %953 = vector.broadcast %cst_345 : f32 to vector<32x1xf32>
    %954 = arith.addf %953, %952 : vector<32x1xf32>
    %955 = arith.divf %953, %954 : vector<32x1xf32>
    %956 = vector.extract_strided_slice %938 {offsets = [64, 0], sizes = [32, 1], strides = [1, 1]} : vector<96x1xf32> to vector<32x1xf32>
    %957 = vector.extract_strided_slice %939 {offsets = [64, 0], sizes = [32, 1], strides = [1, 1]} : vector<96x1xf32> to vector<32x1xf32>
    %958 = arith.addf %957, %391 : vector<32x1xf32>
    %959 = arith.mulf %947, %958 : vector<32x1xf32>
    %960 = arith.addf %956, %959 : vector<32x1xf32>
    %961 = math.tanh %960 : vector<32x1xf32>
    %cst_346 = arith.constant 1.000000e+00 : f32
    %962 = vector.broadcast %cst_346 : f32 to vector<32x1xf32>
    %963 = arith.subf %962, %955 : vector<32x1xf32>
    %964 = arith.mulf %963, %961 : vector<32x1xf32>
    %965 = arith.mulf %955, %930 : vector<32x1xf32>
    %966 = arith.addf %964, %965 : vector<32x1xf32>
    %c7_i32_347 = arith.constant 7 : i32
    %967 = arith.cmpi eq, %683, %c7_i32_347 : i32
    %968 = arith.extui %967 : i1 to i32
    %969 = arith.sitofp %968 : i32 to f32
    %970 = arith.subf %966, %937 : vector<32x1xf32>
    %971 = vector.broadcast %969 : f32 to vector<32x1xf32>
    %972 = arith.mulf %971, %970 : vector<32x1xf32>
    %973 = arith.addf %937, %972 : vector<32x1xf32>
    %974 = tpu.concatenate %682, %973 in 1 : vector<32x1xf32>, vector<32x1xf32> -> vector<32x2xf32>
    %c0_348 = arith.constant 0 : index
    %c0_349 = arith.constant 0 : index
    %975 = vector.load %arg15[%c0_348, %c0_349] : memref<48x32xf32, #tpu.memory_space<vmem>>, vector<48x32xf32>
    %cst_350 = arith.constant dense<0.000000e+00> : vector<48x2xf32>
    %976 = tpu.matmul %975, %974, %cst_350 {dimension_numbers = #tpu.dot_dimension_numbers<[1], [0], [0], [1], [0, 0, 1, 1], [], []>} : vector<48x32xf32>, vector<32x2xf32>, vector<48x2xf32> -> vector<48x2xf32>
    %977 = tpu.iota {dimensions = array<i32: 0>} : vector<16x30xi32>
    %c0_351 = arith.constant 0 : index
    %c0_352 = arith.constant 0 : index
    %978 = vector.load %arg1[%c0_351, %c0_352] : memref<1x30xi32, #tpu.memory_space<vmem>>, vector<1x30xi32>
    %979 = vector.broadcast %978 : vector<1x30xi32> to vector<16x30xi32>
    %980 = arith.cmpi eq, %977, %979 : vector<16x30xi32>
    %981 = arith.extui %980 : vector<16x30xi1> to vector<16x30xi32>
    %982 = arith.sitofp %981 : vector<16x30xi32> to vector<16x30xf32>
    %cst_353 = arith.constant dense<0.000000e+00> : vector<16x30xf32>
    %983 = tpu.matmul %384, %982, %cst_353 {dimension_numbers = #tpu.dot_dimension_numbers<[1], [0], [0], [1], [0, 0, 1, 1], [], []>} : vector<16x16xf32>, vector<16x30xf32>, vector<16x30xf32> -> vector<16x30xf32>
    %984 = vector.extract_strided_slice %976 {offsets = [0, 0], sizes = [16, 1], strides = [1, 1]} : vector<48x2xf32> to vector<16x1xf32>
    %985 = vector.extract_strided_slice %983 {offsets = [0, 0], sizes = [16, 5], strides = [1, 1]} : vector<16x30xf32> to vector<16x5xf32>
    %986 = vector.broadcast %984 : vector<16x1xf32> to vector<16x5xf32>
    %987 = arith.mulf %986, %985 : vector<16x5xf32>
    %cst_354 = arith.constant dense<0.000000e+00> : vector<5xf32>
    %988 = vector.multi_reduction <add>, %987, %cst_354 [0] : vector<16x5xf32> to vector<5xf32>
    %989 = vector.shape_cast %988 : vector<5xf32> to vector<1x5xf32>
    %990 = vector.extract_strided_slice %976 {offsets = [16, 0], sizes = [16, 1], strides = [1, 1]} : vector<48x2xf32> to vector<16x1xf32>
    %991 = vector.extract_strided_slice %983 {offsets = [0, 5], sizes = [16, 5], strides = [1, 1]} : vector<16x30xf32> to vector<16x5xf32>
    %992 = vector.broadcast %990 : vector<16x1xf32> to vector<16x5xf32>
    %993 = arith.mulf %992, %991 : vector<16x5xf32>
    %cst_355 = arith.constant dense<0.000000e+00> : vector<5xf32>
    %994 = vector.multi_reduction <add>, %993, %cst_355 [0] : vector<16x5xf32> to vector<5xf32>
    %995 = vector.shape_cast %994 : vector<5xf32> to vector<1x5xf32>
    %996 = vector.extract_strided_slice %976 {offsets = [32, 0], sizes = [16, 1], strides = [1, 1]} : vector<48x2xf32> to vector<16x1xf32>
    %997 = vector.extract_strided_slice %983 {offsets = [0, 10], sizes = [16, 5], strides = [1, 1]} : vector<16x30xf32> to vector<16x5xf32>
    %998 = vector.broadcast %996 : vector<16x1xf32> to vector<16x5xf32>
    %999 = arith.mulf %998, %997 : vector<16x5xf32>
    %cst_356 = arith.constant dense<0.000000e+00> : vector<5xf32>
    %1000 = vector.multi_reduction <add>, %999, %cst_356 [0] : vector<16x5xf32> to vector<5xf32>
    %1001 = vector.shape_cast %1000 : vector<5xf32> to vector<1x5xf32>
    %1002 = tpu.concatenate %989, %995, %1001 in 1 : vector<1x5xf32>, vector<1x5xf32>, vector<1x5xf32> -> vector<1x15xf32>
    %1003 = vector.extract_strided_slice %976 {offsets = [0, 1], sizes = [16, 1], strides = [1, 1]} : vector<48x2xf32> to vector<16x1xf32>
    %1004 = vector.extract_strided_slice %983 {offsets = [0, 15], sizes = [16, 5], strides = [1, 1]} : vector<16x30xf32> to vector<16x5xf32>
    %1005 = vector.broadcast %1003 : vector<16x1xf32> to vector<16x5xf32>
    %1006 = arith.mulf %1005, %1004 : vector<16x5xf32>
    %cst_357 = arith.constant dense<0.000000e+00> : vector<5xf32>
    %1007 = vector.multi_reduction <add>, %1006, %cst_357 [0] : vector<16x5xf32> to vector<5xf32>
    %1008 = vector.shape_cast %1007 : vector<5xf32> to vector<1x5xf32>
    %1009 = vector.extract_strided_slice %976 {offsets = [16, 1], sizes = [16, 1], strides = [1, 1]} : vector<48x2xf32> to vector<16x1xf32>
    %1010 = vector.extract_strided_slice %983 {offsets = [0, 20], sizes = [16, 5], strides = [1, 1]} : vector<16x30xf32> to vector<16x5xf32>
    %1011 = vector.broadcast %1009 : vector<16x1xf32> to vector<16x5xf32>
    %1012 = arith.mulf %1011, %1010 : vector<16x5xf32>
    %cst_358 = arith.constant dense<0.000000e+00> : vector<5xf32>
    %1013 = vector.multi_reduction <add>, %1012, %cst_358 [0] : vector<16x5xf32> to vector<5xf32>
    %1014 = vector.shape_cast %1013 : vector<5xf32> to vector<1x5xf32>
    %1015 = vector.extract_strided_slice %976 {offsets = [32, 1], sizes = [16, 1], strides = [1, 1]} : vector<48x2xf32> to vector<16x1xf32>
    %1016 = vector.extract_strided_slice %983 {offsets = [0, 25], sizes = [16, 5], strides = [1, 1]} : vector<16x30xf32> to vector<16x5xf32>
    %1017 = vector.broadcast %1015 : vector<16x1xf32> to vector<16x5xf32>
    %1018 = arith.mulf %1017, %1016 : vector<16x5xf32>
    %cst_359 = arith.constant dense<0.000000e+00> : vector<5xf32>
    %1019 = vector.multi_reduction <add>, %1018, %cst_359 [0] : vector<16x5xf32> to vector<5xf32>
    %1020 = vector.shape_cast %1019 : vector<5xf32> to vector<1x5xf32>
    %1021 = tpu.concatenate %1008, %1014, %1020 in 1 : vector<1x5xf32>, vector<1x5xf32>, vector<1x5xf32> -> vector<1x15xf32>
    %1022 = tpu.concatenate %1002, %1021 in 0 : vector<1x15xf32>, vector<1x15xf32> -> vector<2x15xf32>
    %c0_360 = arith.constant 0 : index
    %c0_361 = arith.constant 0 : index
    %1023 = vector.load %arg16[%c0_360, %c0_361] : memref<2x15xf32, #tpu.memory_space<vmem>>, vector<2x15xf32>
    tpu.vector_store %arg16[%c0_360, %c0_361], %1022 {strides = array<i32>} : memref<2x15xf32, #tpu.memory_space<vmem>>, vector<2x15xf32>,
    return
  }
}

</mosaic_0001>

<bundles_post_ra>
// kernel: cpc_forward.1
= control target key start
LH: loop header
LB: loop body
LE: loop exit
PB: predicated region body
PF: predicated region fallthrough
CT: control target
= control target key end

     0   :  { %s15574_s0 = inlined_call_operand.vmem [shape: s32[2], index: 0, kind: input, shape index: {}]   ;;  %s15575_s1 = inlined_call_operand.vmem [shape: s32[1,30], index: 1, kind: input, shape index: {}]   ;;  %s15576_s2 = inlined_call_operand.vmem [shape: f32[2,4,128], index: 2, kind: input, shape index: {}]   ;;  %s15577_s3 = inlined_call_operand.vmem [shape: f32[128,64], index: 3, kind: input, shape index: {}]   ;;  %s15578_s4 = inlined_call_operand.vmem [shape: f32[64,32], index: 4, kind: input, shape index: {}]   ;;  %s15579_s5 = inlined_call_operand.vmem [shape: f32[32,16], index: 5, kind: input, shape index: {}]   ;;  %s15580_s6 = inlined_call_operand.vmem [shape: f32[16,8], index: 6, kind: input, shape index: {}]   ;;  %s15581_s7 = inlined_call_operand.vmem [shape: f32[4,16,4], index: 7, kind: input, shape index: {}]   ;;  %s15582_s8 = inlined_call_operand.vmem [shape: f32[3,4,16,16], index: 8, kind: input, shape index: {}]   ;;  %s15583_s9 = inlined_call_operand.vmem [shape: f32[4,16,1], index: 9, kind: input, shape index: {}]   ;;  %s15584_s10 = inlined_call_operand.vmem [shape: f32[4,16,1], index: 10, kind: input, shape index: {}]   ;;  %s15585_s11 = inlined_call_operand.vmem [shape: f32[96,16], index: 11, kind: input, shape index: {}]   ;;  %s15586_s12 = inlined_call_operand.vmem [shape: f32[96,32], index: 12, kind: input, shape index: {}]   ;;  %s15587_s13 = inlined_call_operand.vmem [shape: f32[96,1], index: 13, kind: input, shape index: {}]   ;;  %s15588_s14 = inlined_call_operand.vmem [shape: f32[32,1], index: 14, kind: input, shape index: {}]   ;;  %s15589_s15 = inlined_call_operand.vmem [shape: f32[48,32], index: 15, kind: input, shape index: {}]   ;;  %s15590_s16 = inlined_call_operand.vmem [shape: f32[2,15], index: 16, kind: output, shape index: {}]  }
   0x1   :  { %15646 = sst [smem:[#allocation58_spill]] %s15574_s0 }
   0x2   :  { %21 = vsyncpa [#allocation3], 0  ;;  %s15647_s23 = sld [smem:[#allocation58_spill]] }
   0x8   :  { %s28_s24 = sshll.u32 %s15647_s23, 4  ;;  %s29_s24 = int_to_ptr.vmem [resolvable:$true] %s28_s24 }
   0x9   :  { %s12668_s25 = scalar_lea.vmem %s29_s24, 16  ;;  %p12673_p1 = scmp.lt.s32.totalorder %s29_s24, %s29_s24 }
   0xa   :  { %p12669_p0 = scmp.ne.s32.totalorder %s29_s24, %s12668_s25  ;;  %p12674_p2 = scmp.lt.s32.totalorder %s12668_s25, %s12668_s25 }
   0xc   :  { %p12675_p3 = por %p12674_p2, %p12673_p1 }
   0xe   :  { %p12676_p4 = pnand %p12675_p3, %p12669_p0 }
  0x10   :  { %12679 = shalt.err (!%p12676_p4)
}
  0x11   :  { %s12682_s26 = smov [#allocation2]  }
  0x12   :  { %31 = dma.vmem_to_smem %s29_s24, 16, %s12682_s26, [#allocation3]  }
  0x13   :  { %12680 = dma.done.wait [#allocation3], 16  }
  0x14   :  { %12681 = vsyncadd [#allocation3], 4294967280 }
  0x15   :  { %65 = sfence }
  0x16   :  { %v66_v0 = vld [vmem:[%s15576_s2] sm:$0xf]  ;;  %vm94_vm0 = vcmask 1043456   ;;  %vm87_vm1 = vcmask 31744   ;;  %v86_v3 = vld [vmem:[%s15581_s7 + $0x8] sm:$0xff]  ;;  %v9729_v5 = vld [vmem:[%s15581_s7 + $0x10] sm:$0xff] }
  0x17   :  { %v85_v1 = vld [vmem:[%s15581_s7] sm:$0xff]  ;;  %10645 = vmatprep.subr.msk.mxu1 %vm94_vm0, %v66_v0  ;;  %10655 = vmatprep.subr.msk.mxu0 %vm94_vm0, %v66_v0  ;;  %v9735_v4 = vld [vmem:[%s15581_s7 + $0x28] sm:$0xff]  ;;  %v9730_v6 = vld [vmem:[%s15581_s7 + $0x18] sm:$0xff]  ;;  %s12683_s22 = smov 127   ;;  %s12684_s23 = smov 1   ;;  %vm181_vm2 = vcmask 7168  }
  0x18   :  { %v9734_v2 = vld [vmem:[%s15581_s7 + $0x20] sm:$0xff]  ;;  %10646 = vmatpush3.msk.msra.mxu1 %vm94_vm0, %v66_v0  ;;  %10647 = vmatprep.mubr.msk.f32.mxu1 %vm87_vm1, %v85_v1  ;;  %v9739_v7 = vld [vmem:[%s15581_s7 + $0x30] sm:$0xff]  ;;  %v9740_v9 = vld [vmem:[%s15581_s7 + $0x38] sm:$0xff]  ;;  %vm362_vm3 = vcmask 1039360   ;;  %vm459_vm4 = vcmask 1031168   ;;  %vm539_vm5 = vcmask 523264  }
  0x19   :  { %10656 = vmatpush3.msk.msra.mxu0 %vm94_vm0, %v66_v0  ;;  %10657 = vmatprep.mubr.msk.f32.mxu0 %vm87_vm1, %v9734_v2  ;;  %v9725_v8 = vld [vmem:[%s15576_s2 + $0x4] sm:$0xf]  ;;  %v70_v11 = vld [vmem:[%s15577_s3 + $0x8] sm:$0xff]  ;;  %v71_v12 = vld [vmem:[%s15577_s3 + $0x10] sm:$0xff]  ;;  %vm1054_vm6 = vcmask 130048   ;;  %vm1324_vm7 = vcmask 515072  }
  0x1a   :  { %10648 = vmatmul.mubr.msk.f32.vlgmr.msra.gmra.mrb[0].mxu1 %vm87_vm1, %v86_v3  ;;  %10658 = vmatmul.mubr.msk.f32.vlgmr.msra.gmra.mrb[0].mxu0 %vm87_vm1, %v9735_v4  ;;  %v69_v10 = vld [vmem:[%s15577_s3] sm:$0xff]  ;;  %v72_v14 = vld [vmem:[%s15577_s3 + $0x18] sm:$0xff]  ;;  %v74_v17 = vld [vmem:[%s15577_s3 + $0x28] sm:$0xff]  ;;  %vm1421_vm8 = vcmask 506880   ;;  %vm1507_vm9 = vcmask 261120   ;;  %vm2293_vm10 = vcmask 252928  }
  0x1b   :  { %10650 = vmatprep.subr.msk.mxu1 %vm94_vm0, %v66_v0  ;;  %10652 = vmatprep.mubr.msk.f32.mxu1 %vm87_vm1, %v9729_v5  ;;  %v11427_v13 = vpack.c.bf16 %v70_v11, %v69_v10  ;;  %v11431_v15 = vpack.c.bf16 %v72_v14, %v71_v12  ;;  %v73_v16 = vld [vmem:[%s15577_s3 + $0x20] sm:$0xff]  ;;  %v75_v19 = vld [vmem:[%s15577_s3 + $0x30] sm:$0xff]  ;;  %v76_v20 = vld [vmem:[%s15577_s3 + $0x38] sm:$0xff]  ;;  %vm2390_vm11 = vcmask 244736   ;;  %vm3259_vm12 = vcmask 121856   ;;  %s12689_s21 = smov 2  }
  0x1c   :  { %10651 = vmatpush3.msk.msra.mxu1 %vm94_vm0, %v66_v0  ;;  %v11435_v18 = vpack.c.bf16 %v74_v17, %v73_v16  ;;  %v11439_v21 = vpack.c.bf16 %v76_v20, %v75_v19  ;;  %v77_v22 = vld [vmem:[%s15577_s3 + $0x40] sm:$0xff]  ;;  %v78_v23 = vld [vmem:[%s15577_s3 + $0x48] sm:$0xff]  ;;  %v79_v25 = vld [vmem:[%s15577_s3 + $0x50] sm:$0xff]  ;;  %vm3356_vm13 = vcmask 113664   ;;  %vm3442_vm14 = vcmask 64512   ;;  %s12690_s26 = smov 3  }
  0x1d   :  { %10660 = vmatprep.subr.msk.mxu1 %vm94_vm0, %v66_v0  ;;  %11428 = vmatprep.subr.bf16.mxu0 %v11427_v13  ;;  %v11443_v24 = vpack.c.bf16 %v78_v23, %v77_v22  ;;  %v80_v26 = vld [vmem:[%s15577_s3 + $0x58] sm:$0xff]  ;;  %v81_v32 = vld [vmem:[%s15577_s3 + $0x60] sm:$0xff]  ;;  %v82_v33 = vld [vmem:[%s15577_s3 + $0x68] sm:$0xff]  ;;  %s12693_s2 = smov 124   ;;  %s12694_s7 = smov 5  }
  0x1e   :  { %10653 = vmatmul.mubr.msk.f32.vlgmr.msra.gmra.mrb[2].mxu1 %vm87_vm1, %v9730_v6  ;;  %11430 = vmatpush3.bf16.msra.mxu0 %v11427_v13  ;;  %v11447_v27 = vpack.c.bf16 %v80_v26, %v79_v25  ;;  %v11451_v34 = vpack.c.bf16 %v82_v33, %v81_v32  ;;  %v83_v37 = vld [vmem:[%s15577_s3 + $0x70] sm:$0xff]  ;;  %v84_v38 = vld [vmem:[%s15577_s3 + $0x78] sm:$0xff]  ;;  %s12685_s3 = smov 126   ;;  %s12698_s28 = smov 9  }
  0x1f   :  { %10661 = vmatpush3.msk.msra.mxu1 %vm94_vm0, %v66_v0  ;;  %10662 = vmatprep.mubr.msk.f32.mxu1 %vm87_vm1, %v9739_v7  ;;  %v11455_v39 = vpack.c.bf16 %v84_v38, %v83_v37  ;;  %v15591_v38 = vmov 0   ;;  %s12699_s29 = smov 122   ;;  %s12700_s30 = smov 119  }
  0x20   :  { %10700 = vmatprep.subr.msk.mxu1 %vm94_vm0, %v9725_v8  ;;  %11432 = vmatprep.subr.bf16.mxu0 %v11431_v15  ;;  %s12701_s0 = smov 10   ;;  %s12702_s25 = smov 118  }
  0x21   :  { %11807 = vset.pattern.permute.xlu1 %v15591_v38  ;;  %11806 = vset.pattern.permute.xlu0 %v15591_v38  ;;  %s12703_s19 = smov 11   ;;  %s12704_s20 = smov 117  }
  0x22   :  { %10663 = vmatmul.mubr.msk.f32.vlgmr.msra.gmra.mrb[4].mxu1 %vm87_vm1, %v9740_v9  ;;  %11434 = vmatpush3.bf16.msra.mxu0 %v11431_v15  ;;  %s12705_s24 = smov 12   ;;  %s14774_s27 = sld [smem:[#allocation2 + $0x1]] }
  0x23   :  { %10701 = vmatpush3.msk.msra.mxu1 %vm94_vm0, %v9725_v8  ;;  %10702 = vmatprep.mubr.msk.f32.mxu1 %vm87_vm1, %v85_v1  ;;  %s12708_s17 = smov 115  }
  0x24   :  { %10705 = vmatprep.subr.msk.mxu1 %vm94_vm0, %v9725_v8  ;;  %11436 = vmatprep.subr.bf16.mxu0 %v11435_v18 }
  0x26   :  { %10703 = vmatmul.mubr.msk.f32.vlgmr.msra.gmra.mrb[6].mxu1 %vm87_vm1, %v86_v3  ;;  %11438 = vmatpush3.bf16.msra.mxu0 %v11435_v18 }
  0x27   :  { %10706 = vmatpush3.msk.msra.mxu1 %vm94_vm0, %v9725_v8  ;;  %10707 = vmatprep.mubr.msk.f32.mxu1 %vm87_vm1, %v9729_v5 }
  0x28   :  { %10710 = vmatprep.subr.msk.mxu1 %vm94_vm0, %v9725_v8  ;;  %11440 = vmatprep.subr.bf16.mxu0 %v11439_v21  ;;  %p6965_p5 = scmp.eq.s32.totalorder %s14774_s27, 0  ;;  %p7266_p7 = scmp.eq.s32.totalorder %s14774_s27, 1 }
  0x29   :  { %p7603_p9 = scmp.eq.s32.totalorder %s14774_s27, 2  ;;  %p7940_p11 = scmp.eq.s32.totalorder %s14774_s27, 3 }
  0x2a   :  { %10708 = vmatmul.mubr.msk.f32.vlgmr.msra.gmra.mrb[8].mxu1 %vm87_vm1, %v9730_v6  ;;  %11442 = vmatpush3.bf16.msra.mxu0 %v11439_v21  ;;  %p8277_p13 = scmp.eq.s32.totalorder %s14774_s27, 4  ;;  %p8614_p1 = scmp.eq.s32.totalorder %s14774_s27, 5 }
  0x2b   :  { %10711 = vmatpush3.msk.msra.mxu1 %vm94_vm0, %v9725_v8  ;;  %10712 = vmatprep.mubr.msk.f32.mxu1 %vm87_vm1, %v9734_v2  ;;  %p8951_p3 = scmp.eq.s32.totalorder %s14774_s27, 6 }
  0x2c   :  { %10715 = vmatprep.subr.msk.mxu1 %vm94_vm0, %v9725_v8  ;;  %11444 = vmatprep.subr.bf16.mxu0 %v11443_v24 }
  0x2e   :  { %10713 = vmatmul.mubr.msk.f32.vlgmr.msra.gmra.mrb[10].mxu1 %vm87_vm1, %v9735_v4  ;;  %11446 = vmatpush3.bf16.msra.mxu0 %v11443_v24 }
  0x2f   :  { %10716 = vmatpush3.msk.msra.mxu1 %vm94_vm0, %v9725_v8  ;;  %10717 = vmatprep.mubr.msk.f32.mxu1 %vm87_vm1, %v9739_v7 }
  0x30   :  { %11460 = vmatprep.subr.bf16.mxu1 %v11427_v13  ;;  %11448 = vmatprep.subr.bf16.mxu0 %v11447_v27 }
  0x32   :  { %10718 = vmatmul.mubr.msk.f32.vlgmr.msra.gmra.mrb[12].mxu1 %vm87_vm1, %v9740_v9  ;;  %11450 = vmatpush3.bf16.msra.mxu0 %v11447_v27 }
  0x33   :  { %11462 = vmatpush3.bf16.msra.mxu1 %v11427_v13  ;;  %11452 = vmatprep.subr.bf16.mxu0 %v11451_v34 }
  0x34   :  { %11464 = vmatprep.subr.bf16.mxu1 %v11431_v15 }
  0x36   :  { %11454 = vmatpush3.bf16.msra.mxu0 %v11451_v34 }
  0x37   :  { %11466 = vmatpush3.bf16.msra.mxu1 %v11431_v15  ;;  %11456 = vmatprep.subr.bf16.mxu0 %v11455_v39 }
  0x38   :  { %11468 = vmatprep.subr.bf16.mxu1 %v11435_v18 }
  0x3a   :  { %11458 = vmatpush3.bf16.msra.mxu0 %v11455_v39 }
  0x3b   :  { %11470 = vmatpush3.bf16.msra.mxu1 %v11435_v18 }
  0x3c   :  { %11472 = vmatprep.subr.bf16.mxu1 %v11439_v21 }
  0x3f   :  { %11474 = vmatpush3.bf16.msra.mxu1 %v11439_v21 }
  0x40   :  { %11476 = vmatprep.subr.bf16.mxu1 %v11443_v24 }
  0x43   :  { %11478 = vmatpush3.bf16.msra.mxu1 %v11443_v24 }
  0x44   :  { %11480 = vmatprep.subr.bf16.mxu1 %v11447_v27 }
  0x47   :  { %11482 = vmatpush3.bf16.msra.mxu1 %v11447_v27 }
  0x48   :  { %11484 = vmatprep.subr.bf16.mxu1 %v11451_v34 }
  0x4b   :  { %11486 = vmatpush3.bf16.msra.mxu1 %v11451_v34 }
  0x4c   :  { %11488 = vmatprep.subr.bf16.mxu1 %v11455_v39 }
  0x4f   :  { %11490 = vmatpush3.bf16.msra.mxu1 %v11455_v39 }
  0xed   :  { %v10649_v28 = vpop.f32.mrb[0].mxu1  ;;  %v10659_v29 = vpop.f32.mrb[0].mxu0 }
  0xee   :  { %358 = vrot.lane.b32.xlu0 %v10659_v29, %s12683_s22  ;;  %177 = vrot.lane.b32.xlu1 %v10649_v28, %s12684_s23  ;;  %v164_v30 = vpop.f32.mrb[1].mxu1  ;;  %v345_v31 = vpop.f32.mrb[1].mxu0 }
  0xf1   :  { %v10654_v35 = vpop.f32.mrb[2].mxu1 }
  0xf2   :  { %175 = vrot.lane.b32.xlu0 %v164_v30, %s12684_s23  ;;  %v259_v36 = vpop.f32.mrb[3].mxu1 }
  0xf5   :  { %v10664_v40 = vpop.f32.mrb[4].mxu1 }
  0xf6   :  { %356 = vrot.lane.b32.xlu0 %v345_v31, %s12683_s22  ;;  %v442_v41 = vpop.f32.mrb[5].mxu1 }
  0xf9   :  { %v10704_v42 = vpop.f32.mrb[6].mxu1 }
  0xfa   :  { %640 = vrot.lane.b32.xlu1 %v10704_v42, %s12684_s23  ;;  %v627_v43 = vpop.f32.mrb[7].mxu1 }
  0xfb   :  { %638 = vrot.lane.b32.xlu0 %v627_v43, %s12684_s23 }
  0xfd   :  { %v10709_v44 = vpop.f32.mrb[8].mxu1 }
  0xfe   :  { %v712_v45 = vpop.f32.mrb[9].mxu1 }
  0xff   :  { %453 = vrot.lane.b32.xlu0 %v442_v41, %s12685_s3 }
 0x101   :  { %v10714_v46 = vpop.f32.mrb[10].mxu1 }
 0x102   :  { %802 = vrot.lane.b32.xlu1 %v10714_v46, %s12683_s22  ;;  %v789_v47 = vpop.f32.mrb[11].mxu1 }
 0x103   :  { %455 = vrot.lane.b32.xlu0 %v10664_v40, %s12685_s3 }
 0x105   :  { %v10719_v48 = vpop.f32.mrb[12].mxu1 }
 0x106   :  { %800 = vrot.lane.b32.xlu1 %v789_v47, %s12683_s22  ;;  %v876_v49 = vpop.f32.mrb[13].mxu1 }
 0x10a   :  { %887 = vrot.lane.b32.xlu1 %v876_v49, %s12685_s3 }
 0x10e   :  { %889 = vrot.lane.b32.xlu1 %v10719_v48, %s12685_s3 }
 0x160   :  { %v359_v50 = vpop.permute.xlu0 %358  ;;  %v178_v53 = vpop.permute.xlu1 %177 }
 0x161   :  { %v183_v56 = vsel %vm181_vm2, 0.0, %v178_v53  ;;  %v364_v63 = vsel %vm362_vm3, %v359_v50, 0.0 }
 0x162   :  { %v269_v60 = vadd.f32 %v10654_v35, %v183_v56 }
 0x164   :  { %v176_v51 = vpop.permute.xlu0 %175  ;;  %v366_v3 = vadd.f32 %v364_v63, %v269_v60  ;;  %v999_v63 = vld [vmem:[%s15583_s9 + $0x8] sm:$0xff] }
 0x165   :  { %v182_v54 = vsel %vm181_vm2, 0.0, %v176_v51 }
 0x166   :  { %v268_v58 = vadd.f32 %v259_v36, %v182_v54 }
 0x168   :  { %v357_v52 = vpop.permute.xlu0 %356 }
 0x169   :  { %v363_v57 = vsel %vm362_vm3, %v357_v52, 0.0 }
 0x16a   :  { %v365_v61 = vadd.f32 %v363_v57, %v268_v58 }
 0x16c   :  { %v641_v59 = vpop.permute.xlu1 %640 }
 0x16d   :  { %v639_v55 = vpop.permute.xlu0 %638  ;;  %v645_v11 = vsel %vm181_vm2, 0.0, %v641_v59 }
 0x16e   :  { %v644_v6 = vsel %vm181_vm2, 0.0, %v639_v55  ;;  %v722_v16 = vadd.f32 %v10709_v44, %v645_v11 }
 0x16f   :  { %v721_v10 = vadd.f32 %v712_v45, %v644_v6 }
 0x171   :  { %v454_v62 = vpop.permute.xlu0 %453 }
 0x172   :  { %v460_v0 = vsel %vm459_vm4, %v454_v62, 0.0 }
 0x173   :  { %v462_v1 = vadd.f32 %v460_v0, %v365_v61  ;;  %v998_v61 = vld [vmem:[%s15583_s9] sm:$0xff] }
 0x174   :  { %v803_v2 = vpop.permute.xlu1 %802 }
 0x175   :  { %v456_v4 = vpop.permute.xlu0 %455  ;;  %10697 = vmatprep.mubr.f32.mxu0 %v462_v1  ;;  %v807_v14 = vsel %vm362_vm3, %v803_v2, 0.0  ;;  %v1006_v2 = vld [vmem:[%s15584_s10] sm:$0xff] }
 0x176   :  { %v461_v5 = vsel %vm459_vm4, %v456_v4, 0.0  ;;  %v809_v18 = vadd.f32 %v807_v14, %v722_v16 }
 0x177   :  { %v463_v7 = vadd.f32 %v461_v5, %v366_v3 }
 0x178   :  { %v801_v8 = vpop.permute.xlu1 %800 }
 0x179   :  { %v806_v9 = vsel %vm362_vm3, %v801_v8, 0.0  ;;  %10698 = vmatmul.mubr.f32.vlgmr.msra.gmra.mrb[2].mxu0 %v463_v7  ;;  %v1007_v7 = vld [vmem:[%s15584_s10 + $0x8] sm:$0xff]  ;;  %vm9669_vm3 = vcmask 203936  }
 0x17a   :  { %v808_v12 = vadd.f32 %v806_v9, %v721_v10  ;;  %v1052_v9 = vld [vmem:[%s15582_s8] sm:$0xff] }
 0x17b   :  { %10759 = vmatprep.mubr.msk.f32.mxu0 %vm1054_vm6, %v1052_v9 }
 0x17c   :  { %v888_v13 = vpop.permute.xlu1 %887 }
 0x17d   :  { %v893_v15 = vsel %vm459_vm4, %v888_v13, 0.0 }
 0x17e   :  { %v895_v17 = vadd.f32 %v893_v15, %v808_v12 }
 0x180   :  { %v890_v19 = vpop.permute.xlu1 %889  ;;  %10752 = vmatprep.mubr.f32.mxu1 %v895_v17 }
 0x181   :  { %v894_v20 = vsel %vm459_vm4, %v890_v19, 0.0  ;;  %vm9689_vm4 = vcmask 244936  }
 0x182   :  { %v896_v21 = vadd.f32 %v894_v20, %v809_v18 }
 0x184   :  { %10753 = vmatmul.mubr.f32.vlgmr.msra.gmra.mrb[14].mxu1 %v896_v21 }
 0x185   :  { %10806 = vmatprep.mubr.msk.f32.mxu1 %vm1054_vm6, %v1052_v9 }
 0x24c   :  { %v12939_v22 = vpop.f32.mrb[2].mxu0 }
 0x24d   :  { %v12941_v23 = vpop.f32.mrb[3].mxu0  ;;  %v543_v24 = vsel %vm539_vm5, %v12939_v22, 0.0  ;;  %v549_v27 = vmul.f32 %v12939_v22, %v12939_v22 }
 0x24e   :  { %544 = vadd.xlane.f32.xlu1 %v543_v24  ;;  %v540_v25 = vsel %vm539_vm5, %v12941_v23, 0.0  ;;  %v548_v26 = vmul.f32 %v12941_v23, %v12941_v23 }
 0x24f   :  { %541 = vadd.xlane.f32.xlu0 %v540_v25  ;;  %v553_v29 = vsel %vm539_vm5, %v549_v27, 0.0 }
 0x250   :  { %v550_v28 = vsel %vm539_vm5, %v548_v26, 0.0 }
 0x252   :  { %551 = vadd.xlane.f32.xlu1 %v550_v28 }
 0x253   :  { %554 = vadd.xlane.f32.xlu0 %v553_v29 }
 0x257   :  { %v12953_v30 = vpop.f32.mrb[14].mxu1 }
 0x258   :  { %v963_v31 = vpop.f32.mrb[15].mxu1  ;;  %v975_v32 = vsel %vm539_vm5, %v12953_v30, 0.0  ;;  %v981_v36 = vmul.f32 %v12953_v30, %v12953_v30 }
 0x259   :  { %976 = vadd.xlane.f32.xlu0 %v975_v32  ;;  %v980_v33 = vmul.f32 %v963_v31, %v963_v31  ;;  %v972_v35 = vsel %vm539_vm5, %v963_v31, 0.0  ;;  %v9763_v32 = vld [vmem:[%s15582_s8 + $0x28] sm:$0xff] }
 0x25a   :  { %v985_v37 = vsel %vm539_vm5, %v981_v36, 0.0  ;;  %v1045_v36 = vld [vmem:[%s15578_s4 + $0x8] sm:$0xff] }
 0x25b   :  { %v982_v34 = vsel %vm539_vm5, %v980_v33, 0.0  ;;  %v9766_v33 = vld [vmem:[%s15582_s8 + $0x30] sm:$0xff] }
 0x25c   :  { %983 = vadd.xlane.f32.xlu1 %v982_v34  ;;  %v9767_v34 = vld [vmem:[%s15582_s8 + $0x38] sm:$0xff] }
 0x25d   :  { %973 = vadd.xlane.f32.xlu0 %v972_v35  ;;  %v1044_v35 = vld [vmem:[%s15578_s4] sm:$0xff] }
 0x261   :  { %986 = vadd.xlane.f32.xlu0 %v985_v37  ;;  %v13025_v37 = vpack.c.bf16 %v1045_v36, %v1044_v35 }
 0x2db   :  { %v545_v40 = vpop.xlane.xlu1 %544 }
 0x2dc   :  { %v542_v39 = vpop.xlane.xlu0 %541 }
 0x2df   :  { %v552_v42 = vpop.xlane.xlu1 %551 }
 0x2e0   :  { %v555_v41 = vpop.xlane.xlu0 %554 }
 0x2e6   :  { %v977_v43 = vpop.xlane.xlu0 %976 }
 0x2e7   :  { %v979_v44 = vadd.f32 %v977_v43, %v545_v40  ;;  %v1047_v40 = vld [vmem:[%s15578_s4 + $0x18] sm:$0xff]  ;;  %v1049_v43 = vld [vmem:[%s15578_s4 + $0x28] sm:$0xff] }
 0x2e9   :  { %v984_v45 = vpop.xlane.xlu1 %983  ;;  %v991_v49 = vmul.f32 0.0078125, %v979_v44 }
 0x2ea   :  { %v974_v46 = vpop.xlane.xlu0 %973  ;;  %v988_v47 = vadd.f32 %v984_v45, %v552_v42  ;;  %v1048_v42 = vld [vmem:[%s15578_s4 + $0x20] sm:$0xff] }
 0x2eb   :  { %v978_v48 = vadd.f32 %v974_v46, %v542_v39  ;;  %v995_v55 = vmul.f32 %v991_v49, %v991_v49  ;;  %v1046_v39 = vld [vmem:[%s15578_s4 + $0x10] sm:$0xff]  ;;  %v13045_v46 = vpack.c.bf16 %v1049_v43, %v1048_v42 }
 0x2ec   :  { %v992_v52 = vmul.f32 0.0078125, %v988_v47 }
 0x2ed   :  { %v990_v50 = vmul.f32 0.0078125, %v978_v48 }
 0x2ee   :  { %v987_v51 = vpop.xlane.xlu0 %986 }
 0x2ef   :  { %v994_v53 = vmul.f32 %v990_v50, %v990_v50  ;;  %v989_v54 = vadd.f32 %v987_v51, %v555_v41  ;;  %v13035_v41 = vpack.c.bf16 %v1047_v40, %v1046_v39 }
 0x2f1   :  { %v996_v56 = vsub.f32 %v992_v52, %v994_v53  ;;  %v993_v57 = vmul.f32 0.0078125, %v989_v54 }
 0x2f3   :  { %v1000_v58 = vadd.f32 1e-05, %v996_v56  ;;  %v997_v59 = vsub.f32 %v993_v57, %v995_v55 }
 0x2f5   :  { %11953 = vrsqrt.f32 %v1000_v58  ;;  %v1001_v60 = vadd.f32 1e-05, %v997_v59 }
 0x2f7   :  { %11955 = vrsqrt.f32 %v1001_v60 }
 0x2ff   :  { %v11954_v62 = vpop.eup %11953 }
 0x300   :  { %v1004_v0 = vmul.f32 %v11954_v62, %v998_v61 }
 0x301   :  { %v11956_v1 = vpop.eup %11955 }
 0x302   :  { %1014 = vperm.xlu1 %11807, %v1004_v0   ;;  %v1005_v3 = vmul.f32 %v11956_v1, %v999_v63  ;;  %v1008_v4 = vmul.f32 %v1004_v0, %v990_v50  ;;  %v1051_v50 = vld [vmem:[%s15578_s4 + $0x38] sm:$0xff] }
 0x304   :  { %1019 = vperm.xlu0 %11806, %v1005_v3   ;;  %v1010_v5 = vsub.f32 %v1006_v2, %v1008_v4  ;;  %v1009_v6 = vmul.f32 %v1005_v3, %v991_v49  ;;  %v1050_v49 = vld [vmem:[%s15578_s4 + $0x30] sm:$0xff]  ;;  %s12692_s4 = smov 4  }
 0x305   :  { %v13059_v53 = vpack.c.bf16 %v1051_v50, %v1050_v49 }
 0x306   :  { %1026 = vperm.xlu1 %11807, %v1010_v5   ;;  %v1011_v8 = vsub.f32 %v1007_v7, %v1009_v6 }
 0x30a   :  { %1031 = vperm.xlu1 %11807, %v1011_v8  }
 0x381   :  { %v1015_v10 = vpop.permute.xlu1 %1014 }
 0x382   :  { %v1022_v13 = vmul.f32 %v1015_v10, %v12941_v23  ;;  %v1038_v14 = vmul.f32 %v1015_v10, %v963_v31  ;;  %v9758_v23 = vld [vmem:[%s15582_s8 + $0x10] sm:$0xff]  ;;  %v9762_v31 = vld [vmem:[%s15582_s8 + $0x20] sm:$0xff] }
 0x383   :  { %v1020_v11 = vpop.permute.xlu0 %1019 }
 0x384   :  { %v1023_v15 = vmul.f32 %v12939_v22, %v1020_v11  ;;  %v1039_v16 = vmul.f32 %v12953_v30, %v1020_v11  ;;  %v1053_v22 = vld [vmem:[%s15582_s8 + $0x8] sm:$0xff]  ;;  %v9759_v30 = vld [vmem:[%s15582_s8 + $0x18] sm:$0xff] }
 0x385   :  { %v1027_v12 = vpop.permute.xlu1 %1026 }
 0x386   :  { %v1034_v17 = vadd.f32 %v1027_v12, %v1022_v13  ;;  %v1040_v18 = vadd.f32 %v1038_v14, %v1027_v12 }
 0x388   :  { %v1036_v24 = vmax.f32 %v1034_v17, 0.0  ;;  %v1042_v25 = vmax.f32 %v1040_v18, 0.0 }
 0x389   :  { %v1032_v19 = vpop.permute.xlu1 %1031 }
 0x38a   :  { %v1035_v20 = vadd.f32 %v1032_v19, %v1023_v15  ;;  %v1041_v21 = vadd.f32 %v1039_v16, %v1032_v19 }
 0x38c   :  { %v1037_v26 = vmax.f32 %v1035_v20, 0.0  ;;  %v1043_v27 = vmax.f32 %v1041_v21, 0.0 }
 0x38e   :  { %v11491_v28 = vpack.c.bf16 %v1037_v26, %v1036_v24  ;;  %v11523_v29 = vpack.c.bf16 %v1043_v27, %v1042_v25 }
 0x390   :  { %11492 = vmatprep.subr.bf16.mxu0 %v11491_v28  ;;  %11524 = vmatprep.subr.bf16.mxu1 %v11523_v29 }
 0x391   :  { %11494 = vmatpush3.bf16.msra.mxu0 %v11491_v28  ;;  %11526 = vmatpush3.bf16.msra.mxu1 %v11523_v29 }
 0x392   :  { %11496 = vmatprep.subr.bf16.mxu0 %v11491_v28  ;;  %11528 = vmatprep.subr.bf16.mxu1 %v11523_v29 }
 0x394   :  { %10760 = vmatmul.mubr.msk.f32.vlgmr.msra.gmra.mrb[4].mxu0 %vm1054_vm6, %v1053_v22  ;;  %10807 = vmatmul.mubr.msk.f32.vlgmr.msra.gmra.mrb[16].mxu1 %vm1054_vm6, %v1053_v22 }
 0x395   :  { %11498 = vmatpush3.bf16.msra.mxu0 %v11491_v28  ;;  %11530 = vmatpush3.bf16.msra.mxu1 %v11523_v29 }
 0x396   :  { %11500 = vmatprep.subr.bf16.mxu0 %v11491_v28  ;;  %11532 = vmatprep.subr.bf16.mxu1 %v11523_v29 }
 0x397   :  { %10766 = vmatprep.mubr.msk.f32.mxu0 %vm1054_vm6, %v9758_v23  ;;  %10813 = vmatprep.mubr.msk.f32.mxu1 %vm1054_vm6, %v9758_v23 }
 0x398   :  { %10767 = vmatmul.mubr.msk.f32.vlgmr.msra.gmra.mrb[6].mxu0 %vm1054_vm6, %v9759_v30  ;;  %10814 = vmatmul.mubr.msk.f32.vlgmr.msra.gmra.mrb[18].mxu1 %vm1054_vm6, %v9759_v30 }
 0x399   :  { %11502 = vmatpush3.bf16.msra.mxu0 %v11491_v28  ;;  %11534 = vmatpush3.bf16.msra.mxu1 %v11523_v29 }
 0x39a   :  { %11504 = vmatprep.subr.bf16.mxu0 %v11491_v28  ;;  %11536 = vmatprep.subr.bf16.mxu1 %v11523_v29 }
 0x39b   :  { %10773 = vmatprep.mubr.msk.f32.mxu0 %vm1054_vm6, %v9762_v31  ;;  %10820 = vmatprep.mubr.msk.f32.mxu1 %vm1054_vm6, %v9762_v31 }
 0x39c   :  { %10774 = vmatmul.mubr.msk.f32.vlgmr.msra.gmra.mrb[8].mxu0 %vm1054_vm6, %v9763_v32  ;;  %10821 = vmatmul.mubr.msk.f32.vlgmr.msra.gmra.mrb[20].mxu1 %vm1054_vm6, %v9763_v32 }
 0x39d   :  { %11506 = vmatpush3.bf16.msra.mxu0 %v11491_v28  ;;  %11538 = vmatpush3.bf16.msra.mxu1 %v11523_v29 }
 0x39e   :  { %10827 = vmatprep.mubr.msk.f32.mxu1 %vm1054_vm6, %v9766_v33  ;;  %10780 = vmatprep.mubr.msk.f32.mxu0 %vm1054_vm6, %v9766_v33 }
 0x39f   :  { %11508 = vmatprep.subr.bf16.mxu0 %v13025_v37 }
 0x3a0   :  { %10828 = vmatmul.mubr.msk.f32.vlgmr.msra.gmra.mrb[22].mxu1 %vm1054_vm6, %v9767_v34  ;;  %10781 = vmatmul.mubr.msk.f32.vlgmr.msra.gmra.mrb[10].mxu0 %vm1054_vm6, %v9767_v34 }
 0x3a1   :  { %11510 = vmatpush3.bf16.msra.mxu0 %v13025_v37 }
 0x3a2   :  { %11512 = vmatprep.subr.bf16.mxu0 %v13035_v41 }
 0x3a5   :  { %11514 = vmatpush3.bf16.msra.mxu0 %v13035_v41 }
 0x3a6   :  { %11516 = vmatprep.subr.bf16.mxu0 %v13045_v46 }
 0x3a9   :  { %11518 = vmatpush3.bf16.msra.mxu0 %v13045_v46 }
 0x3aa   :  { %11520 = vmatprep.subr.bf16.mxu0 %v13059_v53 }
 0x3ad   :  { %11522 = vmatpush3.bf16.msra.mxu0 %v13059_v53 }
 0x3ae   :  { %11540 = vmatprep.subr.bf16.mxu0 %v13025_v37 }
 0x467   :  { %v10761_v44 = vpop.f32.mrb[4].mxu0  ;;  %v10808_v45 = vpop.f32.mrb[16].mxu1 }
 0x468   :  { %1140 = vrot.lane.b32.xlu1 %v10761_v44, %s12684_s23  ;;  %v1127_v47 = vpop.f32.mrb[5].mxu0  ;;  %v1592_v48 = vpop.f32.mrb[17].mxu1 }
 0x469   :  { %1603 = vrot.lane.b32.xlu0 %v1592_v48, %s12684_s23 }
 0x46b   :  { %v10768_v51 = vpop.f32.mrb[6].mxu0  ;;  %v13057_v52 = vpop.f32.mrb[18].mxu1 }
 0x46c   :  { %1138 = vrot.lane.b32.xlu1 %v1127_v47, %s12684_s23  ;;  %v1221_v54 = vpop.f32.mrb[7].mxu0  ;;  %v1677_v55 = vpop.f32.mrb[19].mxu1 }
 0x46f   :  { %v10775_v56 = vpop.f32.mrb[8].mxu0  ;;  %v10822_v57 = vpop.f32.mrb[20].mxu1 }
 0x470   :  { %1320 = vrot.lane.b32.xlu1 %v10775_v56, %s12683_s22  ;;  %v1307_v58 = vpop.f32.mrb[9].mxu0  ;;  %v1754_v59 = vpop.f32.mrb[21].mxu1 }
 0x471   :  { %1765 = vrot.lane.b32.xlu0 %v1754_v59, %s12683_s22 }
 0x473   :  { %v10829_v60 = vpop.f32.mrb[22].mxu1  ;;  %v10782_v61 = vpop.f32.mrb[10].mxu0 }
 0x474   :  { %1318 = vrot.lane.b32.xlu1 %v1307_v58, %s12683_s22  ;;  %v1841_v62 = vpop.f32.mrb[23].mxu1  ;;  %v1404_v63 = vpop.f32.mrb[11].mxu0 }
 0x475   :  { %1852 = vrot.lane.b32.xlu0 %v1841_v62, %s12685_s3 }
 0x478   :  { %1415 = vrot.lane.b32.xlu1 %v1404_v63, %s12685_s3 }
 0x47c   :  { %1417 = vrot.lane.b32.xlu1 %v10782_v61, %s12685_s3 }
 0x480   :  { %1605 = vrot.lane.b32.xlu1 %v10808_v45, %s12684_s23 }
 0x484   :  { %1767 = vrot.lane.b32.xlu1 %v10822_v57, %s12683_s22 }
 0x488   :  { %1854 = vrot.lane.b32.xlu1 %v10829_v60, %s12685_s3 }
 0x4da   :  { %v1141_v0 = vpop.permute.xlu1 %1140 }
 0x4db   :  { %v1604_v2 = vpop.permute.xlu0 %1603  ;;  %v1145_v9 = vsel %vm181_vm2, 0.0, %v1141_v0 }
 0x4dc   :  { %v1609_v10 = vsel %vm181_vm2, 0.0, %v1604_v2  ;;  %v1231_v16 = vadd.f32 %v10768_v51, %v1145_v9 }
 0x4dd   :  { %v1686_v19 = vadd.f32 %v1677_v55, %v1609_v10 }
 0x4de   :  { %v1139_v1 = vpop.permute.xlu1 %1138 }
 0x4df   :  { %v1144_v4 = vsel %vm181_vm2, 0.0, %v1139_v1 }
 0x4e0   :  { %v1230_v8 = vadd.f32 %v1221_v54, %v1144_v4 }
 0x4e2   :  { %v1321_v3 = vpop.permute.xlu1 %1320 }
 0x4e3   :  { %v1766_v5 = vpop.permute.xlu0 %1765  ;;  %v1326_v13 = vsel %vm1324_vm7, %v1321_v3, 0.0 }
 0x4e4   :  { %v1771_v17 = vsel %vm1324_vm7, %v1766_v5, 0.0  ;;  %v1328_v20 = vadd.f32 %v1326_v13, %v1231_v16  ;;  %v9783_v13 = vld [vmem:[%s15583_s9 + $0x18] sm:$0xff]  ;;  %v9784_v16 = vld [vmem:[%s15584_s10 + $0x10] sm:$0xff] }
 0x4e5   :  { %v1773_v25 = vadd.f32 %v1771_v17, %v1686_v19 }
 0x4e6   :  { %v1319_v6 = vpop.permute.xlu1 %1318 }
 0x4e7   :  { %v1325_v7 = vsel %vm1324_vm7, %v1319_v6, 0.0  ;;  %v1853_v14 = vpop.permute.xlu0 %1852 }
 0x4e8   :  { %v1327_v11 = vadd.f32 %v1325_v7, %v1230_v8  ;;  %v1858_v21 = vsel %vm1421_vm8, %v1853_v14, 0.0 }
 0x4e9   :  { %v1860_v28 = vadd.f32 %v1858_v21, %v1773_v25  ;;  %v9785_v21 = vld [vmem:[%s15584_s10 + $0x18] sm:$0xff]  ;;  %v2018_v25 = vld [vmem:[%s15579_s5 + $0x8] sm:$0xff] }
 0x4ea   :  { %v1416_v12 = vpop.permute.xlu1 %1415 }
 0x4eb   :  { %v1422_v15 = vsel %vm1421_vm8, %v1416_v12, 0.0 }
 0x4ec   :  { %v1424_v18 = vadd.f32 %v1422_v15, %v1327_v11  ;;  %v9782_v11 = vld [vmem:[%s15583_s9 + $0x10] sm:$0xff] }
 0x4ee   :  { %v1418_v24 = vpop.permute.xlu1 %1417  ;;  %10799 = vmatprep.mubr.msk.f32.mxu0 %vm539_vm5, %v1424_v18 }
 0x4ef   :  { %v1423_v26 = vsel %vm1421_vm8, %v1418_v24, 0.0  ;;  %v2017_v24 = vld [vmem:[%s15579_s5] sm:$0xff] }
 0x4f0   :  { %v1425_v27 = vadd.f32 %v1423_v26, %v1328_v20 }
 0x4f2   :  { %10800 = vmatmul.mubr.msk.f32.vlgmr.msra.gmra.mrb[12].mxu0 %vm539_vm5, %v1425_v27  ;;  %v1606_v29 = vpop.permute.xlu1 %1605  ;;  %v13144_v27 = vpack.c.bf16 %v2018_v25, %v2017_v24 }
 0x4f3   :  { %11542 = vmatpush3.bf16.msra.mxu0 %v13025_v37  ;;  %10846 = vmatprep.mubr.msk.f32.mxu0 %vm539_vm5, %v1860_v28  ;;  %v1610_v23 = vsel %vm181_vm2, 0.0, %v1606_v29  ;;  %v2019_v28 = vld [vmem:[%s15579_s5 + $0x10] sm:$0xff]  ;;  %v2020_v29 = vld [vmem:[%s15579_s5 + $0x18] sm:$0xff]  ;;  %s12688_s5 = smov 8  }
 0x4f4   :  { %11544 = vmatprep.subr.bf16.mxu0 %v13035_v41  ;;  %v1687_v32 = vadd.f32 %v13057_v52, %v1610_v23  ;;  %v9786_v23 = vld [vmem:[%s15582_s8 + $0x40] sm:$0xff] }
 0x4f5   :  { %10853 = vmatprep.mubr.msk.f32.mxu1 %vm1054_vm6, %v9786_v23 }
 0x4f6   :  { %v1768_v22 = vpop.permute.xlu1 %1767 }
 0x4f7   :  { %11546 = vmatpush3.bf16.msra.mxu0 %v13035_v41  ;;  %v1772_v31 = vsel %vm1324_vm7, %v1768_v22, 0.0  ;;  %v13154_v22 = vpack.c.bf16 %v2020_v29, %v2019_v28  ;;  %vm9626_vm7 = vcmask 121936  }
 0x4f8   :  { %11548 = vmatprep.subr.bf16.mxu0 %v13045_v46  ;;  %v1774_v34 = vadd.f32 %v1772_v31, %v1687_v32 }
 0x4fa   :  { %v1855_v30 = vpop.permute.xlu1 %1854 }
 0x4fb   :  { %11550 = vmatpush3.bf16.msra.mxu0 %v13045_v46  ;;  %v1859_v33 = vsel %vm1421_vm8, %v1855_v30, 0.0  ;;  %vm9637_vm8 = vcmask 80896  }
 0x4fc   :  { %11552 = vmatprep.subr.bf16.mxu0 %v13059_v53  ;;  %v1861_v35 = vadd.f32 %v1859_v33, %v1774_v34 }
 0x4ff   :  { %11554 = vmatpush3.bf16.msra.mxu0 %v13059_v53 }
 0x500   :  { %11572 = vmatprep.subr.bf16.mxu0 %v13144_v27 }
 0x502   :  { %10847 = vmatmul.mubr.msk.f32.vlgmr.msra.gmra.mrb[14].mxu0 %vm539_vm5, %v1861_v35  ;;  %vm9582_vm5 = vcmask 39936  }
 0x503   :  { %11574 = vmatpush3.bf16.msra.mxu0 %v13144_v27 }
 0x504   :  { %11576 = vmatprep.subr.bf16.mxu0 %v13154_v22 }
 0x507   :  { %11578 = vmatpush3.bf16.msra.mxu0 %v13154_v22 }
 0x5c5   :  { %v13098_v36 = vpop.f32.mrb[12].mxu0 }
 0x5c6   :  { %v13100_v37 = vpop.f32.mrb[13].mxu0  ;;  %v1511_v39 = vsel %vm1507_vm9, %v13098_v36, 0.0  ;;  %v1517_v42 = vmul.f32 %v13098_v36, %v13098_v36 }
 0x5c7   :  { %1512 = vadd.xlane.f32.xlu1 %v1511_v39  ;;  %v1508_v40 = vsel %vm1507_vm9, %v13100_v37, 0.0  ;;  %v1516_v41 = vmul.f32 %v13100_v37, %v13100_v37 }
 0x5c8   :  { %1509 = vadd.xlane.f32.xlu0 %v1508_v40  ;;  %v1521_v44 = vsel %vm1507_vm9, %v1517_v42, 0.0 }
 0x5c9   :  { %v1518_v43 = vsel %vm1507_vm9, %v1516_v41, 0.0 }
 0x5cb   :  { %1519 = vadd.xlane.f32.xlu1 %v1518_v43 }
 0x5cc   :  { %1522 = vadd.xlane.f32.xlu0 %v1521_v44 }
 0x5d5   :  { %v13112_v45 = vpop.f32.mrb[14].mxu0 }
 0x5d6   :  { %v13114_v46 = vpop.f32.mrb[15].mxu0  ;;  %v1946_v47 = vsel %vm1507_vm9, %v13112_v45, 0.0  ;;  %v1952_v51 = vmul.f32 %v13112_v45, %v13112_v45 }
 0x5d7   :  { %1947 = vadd.xlane.f32.xlu0 %v1946_v47  ;;  %v1951_v48 = vmul.f32 %v13114_v46, %v13114_v46  ;;  %v1943_v50 = vsel %vm1507_vm9, %v13114_v46, 0.0 }
 0x5d8   :  { %v1956_v52 = vsel %vm1507_vm9, %v1952_v51, 0.0 }
 0x5d9   :  { %v1953_v49 = vsel %vm1507_vm9, %v1951_v48, 0.0 }
 0x5da   :  { %1954 = vadd.xlane.f32.xlu1 %v1953_v49 }
 0x5db   :  { %1944 = vadd.xlane.f32.xlu0 %v1943_v50 }
 0x5df   :  { %1957 = vadd.xlane.f32.xlu0 %v1956_v52 }
 0x654   :  { %v1513_v54 = vpop.xlane.xlu1 %1512 }
 0x655   :  { %v1510_v53 = vpop.xlane.xlu0 %1509 }
 0x658   :  { %v1520_v56 = vpop.xlane.xlu1 %1519 }
 0x659   :  { %v1523_v55 = vpop.xlane.xlu0 %1522 }
 0x664   :  { %v1948_v57 = vpop.xlane.xlu0 %1947 }
 0x665   :  { %v1950_v58 = vadd.f32 %v1948_v57, %v1513_v54  ;;  %v9798_v54 = vld [vmem:[%s15582_s8 + $0x70] sm:$0xff] }
 0x667   :  { %v1955_v59 = vpop.xlane.xlu1 %1954  ;;  %v1962_v63 = vmul.f32 0.015625, %v1950_v58 }
 0x668   :  { %v1945_v60 = vpop.xlane.xlu0 %1944  ;;  %v1959_v61 = vadd.f32 %v1955_v59, %v1520_v56 }
 0x669   :  { %v1949_v62 = vadd.f32 %v1945_v60, %v1510_v53  ;;  %v1966_v5 = vmul.f32 %v1962_v63, %v1962_v63  ;;  %v13191_v53 = vld [vmem:[%s15582_s8 + $0x68] sm:$0xff] }
 0x66a   :  { %v1963_v2 = vmul.f32 0.015625, %v1959_v61 }
 0x66b   :  { %v1961_v0 = vmul.f32 0.015625, %v1949_v62 }
 0x66c   :  { %v1958_v1 = vpop.xlane.xlu0 %1957 }
 0x66d   :  { %v1965_v3 = vmul.f32 %v1961_v0, %v1961_v0  ;;  %v1960_v4 = vadd.f32 %v1958_v1, %v1523_v55  ;;  %v9799_v55 = vld [vmem:[%s15582_s8 + $0x78] sm:$0xff] }
 0x66f   :  { %v1967_v6 = vsub.f32 %v1963_v2, %v1965_v3  ;;  %v1964_v7 = vmul.f32 0.015625, %v1960_v4 }
 0x671   :  { %v1972_v8 = vadd.f32 1e-05, %v1967_v6  ;;  %v1968_v9 = vsub.f32 %v1964_v7, %v1966_v5 }
 0x673   :  { %11957 = vrsqrt.f32 %v1972_v8  ;;  %v1973_v10 = vadd.f32 1e-05, %v1968_v9 }
 0x675   :  { %11959 = vrsqrt.f32 %v1973_v10 }
 0x67d   :  { %v11958_v12 = vpop.eup %11957 }
 0x67e   :  { %v1976_v14 = vmul.f32 %v11958_v12, %v9782_v11 }
 0x67f   :  { %v11960_v15 = vpop.eup %11959 }
 0x680   :  { %1987 = vperm.xlu1 %11807, %v1976_v14   ;;  %v1977_v17 = vmul.f32 %v11960_v15, %v9783_v13  ;;  %v1981_v18 = vmul.f32 %v1976_v14, %v1961_v0 }
 0x682   :  { %1992 = vperm.xlu0 %11806, %v1977_v17   ;;  %v1983_v19 = vsub.f32 %v9784_v16, %v1981_v18  ;;  %v1982_v20 = vmul.f32 %v1977_v17, %v1962_v63 }
 0x684   :  { %1999 = vperm.xlu1 %11807, %v1983_v19   ;;  %v1984_v26 = vsub.f32 %v9785_v21, %v1982_v20 }
 0x688   :  { %2004 = vperm.xlu1 %11807, %v1984_v26  }
 0x6ff   :  { %v1988_v30 = vpop.permute.xlu1 %1987 }
 0x700   :  { %v1995_v33 = vmul.f32 %v1988_v30, %v13100_v37  ;;  %v2011_v34 = vmul.f32 %v1988_v30, %v13114_v46  ;;  %v9790_v37 = vld [vmem:[%s15582_s8 + $0x50] sm:$0xff]  ;;  %v13183_v46 = vld [vmem:[%s15582_s8 + $0x60] sm:$0xff] }
 0x701   :  { %v1993_v31 = vpop.permute.xlu0 %1992 }
 0x702   :  { %v1996_v35 = vmul.f32 %v13098_v36, %v1993_v31  ;;  %v2012_v39 = vmul.f32 %v13112_v45, %v1993_v31  ;;  %v9787_v36 = vld [vmem:[%s15582_s8 + $0x48] sm:$0xff]  ;;  %v9791_v45 = vld [vmem:[%s15582_s8 + $0x58] sm:$0xff] }
 0x703   :  { %v2000_v32 = vpop.permute.xlu1 %1999 }
 0x704   :  { %v2007_v40 = vadd.f32 %v2000_v32, %v1995_v33  ;;  %v2013_v41 = vadd.f32 %v2011_v34, %v2000_v32 }
 0x706   :  { %v2009_v47 = vmax.f32 %v2007_v40, 0.0  ;;  %v2015_v48 = vmax.f32 %v2013_v41, 0.0 }
 0x707   :  { %v2005_v42 = vpop.permute.xlu1 %2004 }
 0x708   :  { %v2008_v43 = vadd.f32 %v2005_v42, %v1996_v35  ;;  %v2014_v44 = vadd.f32 %v2012_v39, %v2005_v42 }
 0x70a   :  { %v2010_v49 = vmax.f32 %v2008_v43, 0.0  ;;  %v2016_v50 = vmax.f32 %v2014_v44, 0.0 }
 0x70c   :  { %v11555_v51 = vpack.c.bf16 %v2010_v49, %v2009_v47  ;;  %v13166_v52 = vpack.c.bf16 %v2016_v50, %v2015_v48 }
 0x70e   :  { %11556 = vmatprep.subr.bf16.mxu1 %v11555_v51  ;;  %11588 = vmatprep.subr.bf16.mxu0 %v13166_v52 }
 0x70f   :  { %11558 = vmatpush3.bf16.msra.mxu1 %v11555_v51 }
 0x710   :  { %11560 = vmatprep.subr.bf16.mxu1 %v11555_v51 }
 0x712   :  { %10854 = vmatmul.mubr.msk.f32.vlgmr.msra.gmra.mrb[24].mxu1 %vm1054_vm6, %v9787_v36 }
 0x713   :  { %11562 = vmatpush3.bf16.msra.mxu1 %v11555_v51  ;;  %10860 = vmatprep.mubr.msk.f32.mxu1 %vm1054_vm6, %v9790_v37 }
 0x714   :  { %11564 = vmatprep.subr.bf16.mxu1 %v11555_v51 }
 0x716   :  { %10861 = vmatmul.mubr.msk.f32.vlgmr.msra.gmra.mrb[26].mxu1 %vm1054_vm6, %v9791_v45 }
 0x717   :  { %11566 = vmatpush3.bf16.msra.mxu1 %v11555_v51  ;;  %10867 = vmatprep.mubr.msk.f32.mxu1 %vm1054_vm6, %v13183_v46 }
 0x718   :  { %11568 = vmatprep.subr.bf16.mxu1 %v11555_v51 }
 0x71a   :  { %10868 = vmatmul.mubr.msk.f32.vlgmr.msra.gmra.mrb[28].mxu1 %vm1054_vm6, %v13191_v53 }
 0x71b   :  { %11570 = vmatpush3.bf16.msra.mxu1 %v11555_v51  ;;  %10874 = vmatprep.mubr.msk.f32.mxu1 %vm1054_vm6, %v9798_v54 }
 0x71c   :  { %11580 = vmatprep.subr.bf16.mxu1 %v13166_v52 }
 0x71e   :  { %10875 = vmatmul.mubr.msk.f32.vlgmr.msra.gmra.mrb[30].mxu1 %vm1054_vm6, %v9799_v55 }
 0x71f   :  { %11582 = vmatpush3.bf16.msra.mxu1 %v13166_v52  ;;  %10892 = vmatprep.mubr.msk.f32.mxu1 %vm1054_vm6, %v9786_v23 }
 0x720   :  { %11584 = vmatprep.subr.bf16.mxu1 %v13166_v52 }
 0x722   :  { %10893 = vmatmul.mubr.msk.f32.vlgmr.msra.gmra.mrb[32].mxu1 %vm1054_vm6, %v9787_v36 }
 0x723   :  { %11586 = vmatpush3.bf16.msra.mxu1 %v13166_v52  ;;  %10899 = vmatprep.mubr.msk.f32.mxu1 %vm1054_vm6, %v9790_v37 }
 0x724   :  { %11592 = vmatprep.subr.bf16.mxu1 %v13166_v52 }
 0x726   :  { %10900 = vmatmul.mubr.msk.f32.vlgmr.msra.gmra.mrb[34].mxu1 %vm1054_vm6, %v9791_v45 }
 0x727   :  { %11594 = vmatpush3.bf16.msra.mxu1 %v13166_v52  ;;  %10913 = vmatprep.mubr.msk.f32.mxu1 %vm1054_vm6, %v9798_v54 }
 0x72a   :  { %10914 = vmatmul.mubr.msk.f32.vlgmr.msra.gmra.mrb[36].mxu1 %vm1054_vm6, %v9799_v55 }
 0x7e5   :  { %v10855_v56 = vpop.f32.mrb[24].mxu1 }
 0x7e6   :  { %2109 = vrot.lane.b32.xlu1 %v10855_v56, %s12684_s23  ;;  %v2096_v57 = vpop.f32.mrb[25].mxu1 }
 0x7e7   :  { %2107 = vrot.lane.b32.xlu0 %v2096_v57, %s12684_s23 }
 0x7e9   :  { %v10862_v58 = vpop.f32.mrb[26].mxu1 }
 0x7ea   :  { %v2190_v59 = vpop.f32.mrb[27].mxu1 }
 0x7ed   :  { %v10869_v60 = vpop.f32.mrb[28].mxu1 }
 0x7ee   :  { %2289 = vrot.lane.b32.xlu1 %v10869_v60, %s12683_s22  ;;  %v2276_v61 = vpop.f32.mrb[29].mxu1 }
 0x7ef   :  { %2287 = vrot.lane.b32.xlu0 %v2276_v61, %s12683_s22 }
 0x7f1   :  { %v10876_v62 = vpop.f32.mrb[30].mxu1 }
 0x7f2   :  { %2386 = vrot.lane.b32.xlu1 %v10876_v62, %s12685_s3  ;;  %v2373_v63 = vpop.f32.mrb[31].mxu1 }
 0x7f3   :  { %2384 = vrot.lane.b32.xlu0 %v2373_v63, %s12685_s3 }
 0x7f5   :  { %v10894_v0 = vpop.f32.mrb[32].mxu1 }
 0x7f6   :  { %v2560_v1 = vpop.f32.mrb[33].mxu1  ;;  %2573 = vrot.lane.b32.xlu1 %v10894_v0, %s12684_s23 }
 0x7f7   :  { %2571 = vrot.lane.b32.xlu0 %v2560_v1, %s12684_s23 }
 0x7f9   :  { %v10901_v20 = vpop.f32.mrb[34].mxu1 }
 0x7fa   :  { %v2645_v21 = vpop.f32.mrb[35].mxu1 }
 0x7fd   :  { %v10915_v24 = vpop.f32.mrb[36].mxu1 }
 0x7fe   :  { %v2809_v25 = vpop.f32.mrb[37].mxu1 }
 0x858   :  { %v2110_v2 = vpop.permute.xlu1 %2109 }
 0x859   :  { %v2108_v3 = vpop.permute.xlu0 %2107  ;;  %v2114_v6 = vsel %vm181_vm2, 0.0, %v2110_v2 }
 0x85a   :  { %v2113_v4 = vsel %vm181_vm2, 0.0, %v2108_v3  ;;  %v2200_v11 = vadd.f32 %v10862_v58, %v2114_v6 }
 0x85b   :  { %v2199_v9 = vadd.f32 %v2190_v59, %v2113_v4 }
 0x860   :  { %v2290_v5 = vpop.permute.xlu1 %2289 }
 0x861   :  { %v2288_v7 = vpop.permute.xlu0 %2287  ;;  %v2295_v10 = vsel %vm2293_vm10, %v2290_v5, 0.0 }
 0x862   :  { %v2294_v8 = vsel %vm2293_vm10, %v2288_v7, 0.0  ;;  %v2297_v16 = vadd.f32 %v2295_v10, %v2200_v11 }
 0x863   :  { %v2296_v13 = vadd.f32 %v2294_v8, %v2199_v9 }
 0x864   :  { %v2387_v12 = vpop.permute.xlu1 %2386 }
 0x865   :  { %v2392_v14 = vsel %vm2390_vm11, %v2387_v12, 0.0  ;;  %v2385_v15 = vpop.permute.xlu0 %2384 }
 0x866   :  { %v2391_v17 = vsel %vm2390_vm11, %v2385_v15, 0.0  ;;  %v2394_v19 = vadd.f32 %v2392_v14, %v2297_v16 }
 0x867   :  { %v2393_v18 = vadd.f32 %v2391_v17, %v2296_v13 }
 0x868   :  { %v2574_v34 = vpop.permute.xlu1 %2573 }
 0x869   :  { %10885 = vmatprep.mubr.msk.f32.mxu0 %vm1507_vm9, %v2393_v18  ;;  %v2572_v35 = vpop.permute.xlu0 %2571  ;;  %v2578_v41 = vsel %vm181_vm2, 0.0, %v2574_v34  ;;  %v9826_v34 = vld [vmem:[%s15582_s8 + $0xa0] sm:$0xff] }
 0x86a   :  { %10886 = vmatmul.mubr.msk.f32.vlgmr.msra.gmra.mrb[16].mxu0 %vm1507_vm9, %v2394_v19  ;;  %v2577_v39 = vsel %vm181_vm2, 0.0, %v2572_v35  ;;  %v2655_v48 = vadd.f32 %v10901_v20, %v2578_v41  ;;  %v9814_v19 = vld [vmem:[%s15583_s9 + $0x20] sm:$0xff] }
 0x86b   :  { %11590 = vmatpush3.bf16.msra.mxu0 %v13166_v52  ;;  %10906 = vmatprep.mubr.msk.f32.mxu0 %vm1054_vm6, %v13183_v46  ;;  %v2654_v44 = vadd.f32 %v2645_v21, %v2577_v39  ;;  %v9815_v21 = vld [vmem:[%s15583_s9 + $0x28] sm:$0xff] }
 0x86c   :  { %11596 = vmatprep.subr.bf16.mxu0 %v13144_v27 }
 0x86e   :  { %10907 = vmatmul.mubr.msk.f32.vlgmr.msra.gmra.mrb[18].mxu0 %vm1054_vm6, %v13191_v53 }
 0x86f   :  { %11598 = vmatpush3.bf16.msra.mxu0 %v13144_v27 }
 0x870   :  { %11600 = vmatprep.subr.bf16.mxu0 %v13154_v22 }
 0x873   :  { %11602 = vmatpush3.bf16.msra.mxu0 %v13154_v22 }
 0x93d   :  { %v13240_v26 = vpop.f32.mrb[16].mxu0 }
 0x93e   :  { %v13242_v28 = vpop.f32.mrb[17].mxu0  ;;  %v2485_v22 = vmul.f32 %v13240_v26, %v13240_v26  ;;  %v2479_v30 = vsel %vm1054_vm6, %v13240_v26, 0.0 }
 0x93f   :  { %v2476_v27 = vsel %vm1054_vm6, %v13242_v28, 0.0  ;;  %v2484_v32 = vmul.f32 %v13242_v28, %v13242_v28 }
 0x940   :  { %v2489_v31 = vsel %vm1054_vm6, %v2485_v22, 0.0 }
 0x941   :  { %v10908_v29 = vpop.f32.mrb[18].mxu0  ;;  %v2486_v33 = vsel %vm1054_vm6, %v2484_v32, 0.0 }
 0x942   :  { %v2722_v23 = vpop.f32.mrb[19].mxu0  ;;  %2735 = vrot.lane.b32.xlu1 %v10908_v29, %s12683_s22  ;;  %v9816_v29 = vld [vmem:[%s15584_s10 + $0x20] sm:$0xff] }
 0x943   :  { %2733 = vrot.lane.b32.xlu0 %v2722_v23, %s12683_s22 }
 0x946   :  { %2822 = vrot.lane.b32.xlu1 %v10915_v24, %s12685_s3 }
 0x947   :  { %2820 = vrot.lane.b32.xlu0 %v2809_v25, %s12685_s3 }
 0x966   :  { %2477 = vadd.xlane.f32.xlu0 %v2476_v27 }
 0x96a   :  { %2480 = vadd.xlane.f32.xlu1 %v2479_v30  ;;  %2490 = vadd.xlane.f32.xlu0 %v2489_v31  ;;  %v9817_v31 = vld [vmem:[%s15584_s10 + $0x28] sm:$0xff] }
 0x96e   :  { %2487 = vadd.xlane.f32.xlu1 %v2486_v33  ;;  %v9818_v33 = vld [vmem:[%s15582_s8 + $0x80] sm:$0xff] }
 0x96f   :  { %10931 = vmatprep.mubr.msk.f32.mxu1 %vm1054_vm6, %v9818_v33 }
 0x9b4   :  { %v2736_v40 = vpop.permute.xlu1 %2735 }
 0x9b5   :  { %v2734_v42 = vpop.permute.xlu0 %2733  ;;  %v2740_v47 = vsel %vm2293_vm10, %v2736_v40, 0.0 }
 0x9b6   :  { %v2739_v43 = vsel %vm2293_vm10, %v2734_v42, 0.0  ;;  %v2742_v36 = vadd.f32 %v2740_v47, %v2655_v48  ;;  %vm9718_vm10 = vcmask 115712  }
 0x9b7   :  { %v2741_v50 = vadd.f32 %v2739_v43, %v2654_v44 }
 0x9b8   :  { %v2823_v49 = vpop.permute.xlu1 %2822 }
 0x9b9   :  { %v2827_v51 = vsel %vm2390_vm11, %v2823_v49, 0.0  ;;  %v2821_v52 = vpop.permute.xlu0 %2820 }
 0x9ba   :  { %v2826_v37 = vsel %vm2390_vm11, %v2821_v52, 0.0  ;;  %v2829_v46 = vadd.f32 %v2827_v51, %v2742_v36  ;;  %v2985_v52 = vld [vmem:[%s15580_s6] sm:$0xff]  ;;  %v2986_v36 = vld [vmem:[%s15580_s6 + $0x8] sm:$0xff]  ;;  %s12697_s6 = smov 6  }
 0x9bb   :  { %v2828_v45 = vadd.f32 %v2826_v37, %v2741_v50 }
 0x9bd   :  { %10924 = vmatprep.mubr.msk.f32.mxu0 %vm1507_vm9, %v2828_v45 }
 0x9be   :  { %10925 = vmatmul.mubr.msk.f32.vlgmr.msra.gmra.mrb[20].mxu0 %vm1507_vm9, %v2829_v46 }
 0x9bf   :  { %10945 = vmatprep.mubr.msk.f32.mxu0 %vm1054_vm6, %v9826_v34 }
 0x9f3   :  { %v2478_v61 = vpop.xlane.xlu0 %2477 }
 0x9f7   :  { %v2481_v62 = vpop.xlane.xlu1 %2480  ;;  %v2491_v63 = vpop.xlane.xlu0 %2490 }
 0x9fb   :  { %v2488_v0 = vpop.xlane.xlu1 %2487 }
 0xa91   :  { %v10926_v53 = vpop.f32.mrb[20].mxu0 }
 0xa92   :  { %v2902_v54 = vpop.f32.mrb[21].mxu0  ;;  %v2914_v55 = vsel %vm1054_vm6, %v10926_v53, 0.0  ;;  %v2920_v59 = vmul.f32 %v10926_v53, %v10926_v53 }
 0xa93   :  { %2915 = vadd.xlane.f32.xlu0 %v2914_v55  ;;  %v2919_v56 = vmul.f32 %v2902_v54, %v2902_v54  ;;  %v2911_v58 = vsel %vm1054_vm6, %v2902_v54, 0.0  ;;  %v9819_v55 = vld [vmem:[%s15582_s8 + $0x88] sm:$0xff] }
 0xa94   :  { %v2924_v60 = vsel %vm1054_vm6, %v2920_v59, 0.0  ;;  %v13322_v59 = vld [vmem:[%s15582_s8 + $0xb0] sm:$0xff] }
 0xa95   :  { %v2921_v57 = vsel %vm1054_vm6, %v2919_v56, 0.0  ;;  %v9827_v56 = vld [vmem:[%s15582_s8 + $0xa8] sm:$0xff] }
 0xa96   :  { %2922 = vadd.xlane.f32.xlu1 %v2921_v57  ;;  %v13311_v57 = vld [vmem:[%s15582_s8 + $0x90] sm:$0xff] }
 0xa97   :  { %2912 = vadd.xlane.f32.xlu0 %v2911_v58  ;;  %v13316_v58 = vld [vmem:[%s15582_s8 + $0x98] sm:$0xff] }
 0xa9b   :  { %2925 = vadd.xlane.f32.xlu0 %v2924_v60  ;;  %v9831_v60 = vld [vmem:[%s15582_s8 + $0xb8] sm:$0xff]  ;;  %s12696_s8 = smov 120  }
 0xb20   :  { %v2916_v1 = vpop.xlane.xlu0 %2915 }
 0xb21   :  { %v2918_v2 = vadd.f32 %v2916_v1, %v2481_v62 }
 0xb23   :  { %v2923_v3 = vpop.xlane.xlu1 %2922  ;;  %v2930_v7 = vmul.f32 0.03125, %v2918_v2 }
 0xb24   :  { %v2913_v4 = vpop.xlane.xlu0 %2912  ;;  %v2927_v5 = vadd.f32 %v2923_v3, %v2488_v0 }
 0xb25   :  { %v2917_v6 = vadd.f32 %v2913_v4, %v2478_v61  ;;  %v2934_v13 = vmul.f32 %v2930_v7, %v2930_v7 }
 0xb26   :  { %v2931_v10 = vmul.f32 0.03125, %v2927_v5 }
 0xb27   :  { %v2929_v8 = vmul.f32 0.03125, %v2917_v6 }
 0xb28   :  { %v2926_v9 = vpop.xlane.xlu0 %2925 }
 0xb29   :  { %v2933_v11 = vmul.f32 %v2929_v8, %v2929_v8  ;;  %v2928_v12 = vadd.f32 %v2926_v9, %v2491_v63 }
 0xb2b   :  { %v2935_v14 = vsub.f32 %v2931_v10, %v2933_v11  ;;  %v2932_v15 = vmul.f32 0.03125, %v2928_v12 }
 0xb2d   :  { %v2940_v16 = vadd.f32 1e-05, %v2935_v14  ;;  %v2936_v17 = vsub.f32 %v2932_v15, %v2934_v13 }
 0xb2f   :  { %11961 = vrsqrt.f32 %v2940_v16  ;;  %v2941_v18 = vadd.f32 1e-05, %v2936_v17 }
 0xb31   :  { %11963 = vrsqrt.f32 %v2941_v18 }
 0xb39   :  { %v11962_v20 = vpop.eup %11961 }
 0xb3a   :  { %v2944_v24 = vmul.f32 %v11962_v20, %v9814_v19 }
 0xb3b   :  { %v11964_v25 = vpop.eup %11963 }
 0xb3c   :  { %2955 = vperm.xlu1 %11807, %v2944_v24   ;;  %v2945_v23 = vmul.f32 %v11964_v25, %v9815_v21  ;;  %v2949_v27 = vmul.f32 %v2944_v24, %v2929_v8 }
 0xb3e   :  { %2960 = vperm.xlu0 %11806, %v2945_v23   ;;  %v2951_v22 = vsub.f32 %v9816_v29, %v2949_v27  ;;  %v2950_v30 = vmul.f32 %v2945_v23, %v2930_v7 }
 0xb40   :  { %2967 = vperm.xlu1 %11807, %v2951_v22   ;;  %v2952_v32 = vsub.f32 %v9817_v31, %v2950_v30 }
 0xb44   :  { %2972 = vperm.xlu1 %11807, %v2952_v32  }
 0xbbb   :  { %v2956_v35 = vpop.permute.xlu1 %2955 }
 0xbbc   :  { %v2963_v41 = vmul.f32 %v2956_v35, %v13242_v28  ;;  %v2979_v42 = vmul.f32 %v2956_v35, %v2902_v54 }
 0xbbd   :  { %v2961_v39 = vpop.permute.xlu0 %2960 }
 0xbbe   :  { %v2964_v43 = vmul.f32 %v13240_v26, %v2961_v39  ;;  %v2980_v44 = vmul.f32 %v10926_v53, %v2961_v39  ;;  %v11619_v53 = vpack.c.bf16 %v2986_v36, %v2985_v52 }
 0xbbf   :  { %v2968_v40 = vpop.permute.xlu1 %2967 }
 0xbc0   :  { %v2975_v47 = vadd.f32 %v2968_v40, %v2963_v41  ;;  %v2981_v48 = vadd.f32 %v2979_v42, %v2968_v40 }
 0xbc2   :  { %v2977_v37 = vmax.f32 %v2975_v47, 0.0  ;;  %v2983_v45 = vmax.f32 %v2981_v48, 0.0 }
 0xbc3   :  { %v2973_v49 = vpop.permute.xlu1 %2972 }
 0xbc4   :  { %v2976_v50 = vadd.f32 %v2973_v49, %v2964_v43  ;;  %v2982_v51 = vadd.f32 %v2980_v44, %v2973_v49 }
 0xbc6   :  { %v2978_v28 = vmax.f32 %v2976_v50, 0.0  ;;  %v2984_v46 = vmax.f32 %v2982_v51, 0.0 }
 0xbc8   :  { %v11603_v54 = vpack.c.bf16 %v2978_v28, %v2977_v37  ;;  %v13298_v26 = vpack.c.bf16 %v2984_v46, %v2983_v45 }
 0xbca   :  { %11604 = vmatprep.subr.bf16.mxu1 %v11603_v54  ;;  %11612 = vmatprep.subr.bf16.mxu0 %v11603_v54 }
 0xbcb   :  { %11606 = vmatpush3.bf16.msra.mxu1 %v11603_v54  ;;  %11614 = vmatpush3.bf16.msra.mxu0 %v11603_v54 }
 0xbcc   :  { %11608 = vmatprep.subr.bf16.mxu1 %v11603_v54  ;;  %11620 = vmatprep.subr.bf16.mxu0 %v11619_v53 }
 0xbce   :  { %10932 = vmatmul.mubr.msk.f32.vlgmr.msra.gmra.mrb[38].mxu1 %vm1054_vm6, %v9819_v55  ;;  %10946 = vmatmul.mubr.msk.f32.vlgmr.msra.gmra.mrb[22].mxu0 %vm1054_vm6, %v9827_v56 }
 0xbcf   :  { %11610 = vmatpush3.bf16.msra.mxu1 %v11603_v54  ;;  %11622 = vmatpush3.bf16.msra.mxu0 %v11619_v53 }
 0xbd0   :  { %11616 = vmatprep.subr.bf16.mxu1 %v11603_v54  ;;  %11628 = vmatprep.subr.bf16.mxu0 %v13298_v26 }
 0xbd1   :  { %10938 = vmatprep.mubr.msk.f32.mxu1 %vm1054_vm6, %v13311_v57 }
 0xbd2   :  { %10939 = vmatmul.mubr.msk.f32.vlgmr.msra.gmra.mrb[40].mxu1 %vm1054_vm6, %v13316_v58 }
 0xbd3   :  { %11618 = vmatpush3.bf16.msra.mxu1 %v11603_v54  ;;  %10952 = vmatprep.mubr.msk.f32.mxu1 %vm1054_vm6, %v13322_v59 }
 0xbd4   :  { %11624 = vmatprep.subr.bf16.mxu1 %v13298_v26 }
 0xbd6   :  { %10953 = vmatmul.mubr.msk.f32.vlgmr.msra.gmra.mrb[42].mxu1 %vm1054_vm6, %v9831_v60 }
 0xbd7   :  { %11626 = vmatpush3.bf16.msra.mxu1 %v13298_v26  ;;  %10966 = vmatprep.mubr.msk.f32.mxu1 %vm1054_vm6, %v9818_v33 }
 0xbd8   :  { %11632 = vmatprep.subr.bf16.mxu1 %v13298_v26 }
 0xbda   :  { %10967 = vmatmul.mubr.msk.f32.vlgmr.msra.gmra.mrb[44].mxu1 %vm1054_vm6, %v9819_v55 }
 0xbdb   :  { %11634 = vmatpush3.bf16.msra.mxu1 %v13298_v26  ;;  %10980 = vmatprep.mubr.msk.f32.mxu1 %vm1054_vm6, %v9826_v34 }
 0xbdc   :  { %11640 = vmatprep.subr.bf16.mxu1 %v11619_v53 }
 0xbde   :  { %10981 = vmatmul.mubr.msk.f32.vlgmr.msra.gmra.mrb[46].mxu1 %vm1054_vm6, %v9827_v56 }
 0xbdf   :  { %11642 = vmatpush3.bf16.msra.mxu1 %v11619_v53 }
 0xca1   :  { %v10933_v61 = vpop.f32.mrb[38].mxu1  ;;  %v10947_v62 = vpop.f32.mrb[22].mxu0 }
 0xca2   :  { %3075 = vrot.lane.b32.xlu1 %v10933_v61, %s12684_s23  ;;  %v3062_v63 = vpop.f32.mrb[39].mxu1  ;;  %v3242_v0 = vpop.f32.mrb[23].mxu0 }
 0xca3   :  { %3073 = vrot.lane.b32.xlu0 %v3062_v63, %s12684_s23 }
 0xca5   :  { %v10940_v1 = vpop.f32.mrb[40].mxu1 }
 0xca6   :  { %3255 = vrot.lane.b32.xlu1 %v10947_v62, %s12683_s22  ;;  %v3156_v2 = vpop.f32.mrb[41].mxu1 }
 0xca7   :  { %3253 = vrot.lane.b32.xlu0 %v3242_v0, %s12683_s22 }
 0xca9   :  { %v10954_v3 = vpop.f32.mrb[42].mxu1 }
 0xcaa   :  { %3352 = vrot.lane.b32.xlu1 %v10954_v3, %s12685_s3  ;;  %v3339_v4 = vpop.f32.mrb[43].mxu1 }
 0xcab   :  { %3350 = vrot.lane.b32.xlu0 %v3339_v4, %s12685_s3 }
 0xcad   :  { %v10968_v5 = vpop.f32.mrb[44].mxu1 }
 0xcae   :  { %3540 = vrot.lane.b32.xlu1 %v10968_v5, %s12684_s23  ;;  %v3527_v6 = vpop.f32.mrb[45].mxu1 }
 0xcaf   :  { %3538 = vrot.lane.b32.xlu0 %v3527_v6, %s12684_s23 }
 0xcb1   :  { %v10982_v7 = vpop.f32.mrb[46].mxu1 }
 0xcb2   :  { %3702 = vrot.lane.b32.xlu1 %v10982_v7, %s12683_s22  ;;  %v3689_v8 = vpop.f32.mrb[47].mxu1 }
 0xcb3   :  { %3700 = vrot.lane.b32.xlu0 %v3689_v8, %s12683_s22 }
 0xd14   :  { %v3076_v9 = vpop.permute.xlu1 %3075 }
 0xd15   :  { %v3074_v10 = vpop.permute.xlu0 %3073  ;;  %v3080_v13 = vsel %vm181_vm2, 0.0, %v3076_v9 }
 0xd16   :  { %v3079_v11 = vsel %vm181_vm2, 0.0, %v3074_v10  ;;  %v3166_v18 = vadd.f32 %v10940_v1, %v3080_v13 }
 0xd17   :  { %v3165_v16 = vadd.f32 %v3156_v2, %v3079_v11 }
 0xd18   :  { %v3256_v12 = vpop.permute.xlu1 %3255 }
 0xd19   :  { %v3254_v14 = vpop.permute.xlu0 %3253  ;;  %v3261_v17 = vsel %vm3259_vm12, %v3256_v12, 0.0 }
 0xd1a   :  { %v3260_v15 = vsel %vm3259_vm12, %v3254_v14, 0.0  ;;  %v3263_v25 = vadd.f32 %v3261_v17, %v3166_v18 }
 0xd1b   :  { %v3262_v20 = vadd.f32 %v3260_v15, %v3165_v16 }
 0xd1c   :  { %v3353_v19 = vpop.permute.xlu1 %3352 }
 0xd1d   :  { %v3358_v21 = vsel %vm3356_vm13, %v3353_v19, 0.0  ;;  %v3351_v24 = vpop.permute.xlu0 %3350 }
 0xd1e   :  { %v3357_v29 = vsel %vm3356_vm13, %v3351_v24, 0.0  ;;  %v3360_v27 = vadd.f32 %v3358_v21, %v3263_v25 }
 0xd1f   :  { %v3359_v23 = vadd.f32 %v3357_v29, %v3262_v20  ;;  %v9846_v29 = vld [vmem:[%s15583_s9 + $0x30] sm:$0xff] }
 0xd20   :  { %v3541_v47 = vpop.permute.xlu1 %3540 }
 0xd21   :  { %10959 = vmatprep.mubr.msk.f32.mxu0 %vm1054_vm6, %v3359_v23  ;;  %v3539_v44 = vpop.permute.xlu0 %3538  ;;  %v3545_v49 = vsel %vm181_vm2, 0.0, %v3541_v47 }
 0xd22   :  { %10960 = vmatmul.mubr.msk.f32.vlgmr.msra.gmra.mrb[24].mxu0 %vm1054_vm6, %v3360_v27  ;;  %v3544_v48 = vsel %vm181_vm2, 0.0, %v3539_v44  ;;  %v9847_v27 = vld [vmem:[%s15583_s9 + $0x38] sm:$0xff]  ;;  %s12707_s9 = smov 13  }
 0xd23   :  { %11630 = vmatpush3.bf16.msra.mxu0 %v13298_v26  ;;  %10973 = vmatprep.mubr.msk.f32.mxu0 %vm1054_vm6, %v13311_v57 }
 0xd24   :  { %11636 = vmatprep.subr.bf16.mxu0 %v13298_v26  ;;  %v3703_v51 = vpop.permute.xlu1 %3702 }
 0xd25   :  { %v3701_v50 = vpop.permute.xlu0 %3700  ;;  %v3707_v45 = vsel %vm3259_vm12, %v3703_v51, 0.0  ;;  %v12687_v51 = vmov 0.0  }
 0xd26   :  { %10974 = vmatmul.mubr.msk.f32.vlgmr.msra.gmra.mrb[26].mxu0 %vm1054_vm6, %v13316_v58  ;;  %v3706_v37 = vsel %vm3259_vm12, %v3701_v50, 0.0  ;;  %11019 = vmatprep.subr.mxu1 %v12687_v51 }
 0xd27   :  { %11638 = vmatpush3.bf16.msra.mxu0 %v13298_v26  ;;  %10987 = vmatprep.mubr.msk.f32.mxu0 %vm1054_vm6, %v13322_v59 }
 0xd2a   :  { %10988 = vmatmul.mubr.msk.f32.vlgmr.msra.gmra.mrb[28].mxu0 %vm1054_vm6, %v9831_v60 }
 0xdf5   :  { %v13370_v22 = vpop.f32.mrb[24].mxu0 }
 0xdf6   :  { %v13372_v30 = vpop.f32.mrb[25].mxu0  ;;  %v3452_v39 = vmul.f32 %v13370_v22, %v13370_v22  ;;  %v3446_v40 = vsel %vm3442_vm14, %v13370_v22, 0.0 }
 0xdf7   :  { %v3443_v35 = vsel %vm3442_vm14, %v13372_v30, 0.0  ;;  %v3451_v42 = vmul.f32 %v13372_v30, %v13372_v30 }
 0xdf8   :  { %v3456_v41 = vsel %vm3442_vm14, %v3452_v39, 0.0 }
 0xdf9   :  { %v10975_v31 = vpop.f32.mrb[26].mxu0  ;;  %v3453_v43 = vsel %vm3442_vm14, %v3451_v42, 0.0 }
 0xdfa   :  { %v3612_v32 = vpop.f32.mrb[27].mxu0  ;;  %v3622_v36 = vadd.f32 %v10975_v31, %v3545_v49  ;;  %v3962_v49 = vld [vmem:[%s15585_s11] sm:$0xff] }
 0xdfb   :  { %v3621_v52 = vadd.f32 %v3612_v32, %v3544_v48  ;;  %11001 = vmatprep.mubr.msk.f32.mxu0 %vm1054_vm6, %v3962_v49 }
 0xdfc   :  { %v3709_v53 = vadd.f32 %v3707_v45, %v3622_v36  ;;  %v13431_v45 = vld [vmem:[%s15586_s12 + $0x8] sm:$0xff] }
 0xdfd   :  { %v10989_v33 = vpop.f32.mrb[28].mxu0  ;;  %v3708_v46 = vadd.f32 %v3706_v37, %v3621_v52  ;;  %v13426_v37 = vld [vmem:[%s15586_s12] sm:$0xff] }
 0xdfe   :  { %v3776_v34 = vpop.f32.mrb[29].mxu0  ;;  %3789 = vrot.lane.b32.xlu1 %v10989_v33, %s12685_s3  ;;  %v9848_v33 = vld [vmem:[%s15584_s10 + $0x30] sm:$0xff] }
 0xdff   :  { %3787 = vrot.lane.b32.xlu0 %v3776_v34, %s12685_s3 }
 0xe1e   :  { %3444 = vadd.xlane.f32.xlu0 %v3443_v35 }
 0xe22   :  { %3447 = vadd.xlane.f32.xlu1 %v3446_v40  ;;  %3457 = vadd.xlane.f32.xlu0 %v3456_v41  ;;  %v9849_v41 = vld [vmem:[%s15584_s10 + $0x38] sm:$0xff]  ;;  %s12691_s10 = smov 125  }
 0xe26   :  { %3454 = vadd.xlane.f32.xlu1 %v3453_v43 }
 0xe70   :  { %v3790_v28 = vpop.permute.xlu1 %3789 }
 0xe71   :  { %v3794_v54 = vsel %vm3356_vm13, %v3790_v28, 0.0  ;;  %v3788_v26 = vpop.permute.xlu0 %3787 }
 0xe72   :  { %v3793_v55 = vsel %vm3356_vm13, %v3788_v26, 0.0  ;;  %v3796_v57 = vadd.f32 %v3794_v54, %v3709_v53  ;;  %v3974_v54 = vld [vmem:[%s15587_s13] sm:$0xff]  ;;  %v13444_v53 = vld [vmem:[%s15586_s12 + $0x10] sm:$0xff] }
 0xe73   :  { %v3795_v56 = vadd.f32 %v3793_v55, %v3708_v46  ;;  %v13449_v55 = vld [vmem:[%s15586_s12 + $0x18] sm:$0xff] }
 0xe75   :  { %10994 = vmatprep.mubr.msk.f32.mxu1 %vm1054_vm6, %v3795_v56  ;;  %v3976_v56 = vld [vmem:[%s15587_s13 + $0x10] sm:$0xff] }
 0xe76   :  { %10995 = vmatmul.mubr.msk.f32.vlgmr.msra.gmra.mrb[48].mxu1 %vm1054_vm6, %v3796_v57  ;;  %v3975_v57 = vld [vmem:[%s15587_s13 + $0x8] sm:$0xff] }
 0xe77   :  { %11020 = vmatpush3.msra.mxu1 %v12687_v51  ;;  %11021 = vmatprep.mubr.msk.f32.mxu1 %vm1507_vm9, %v13426_v37 }
 0xe7a   :  { %11022 = vmatmul.mubr.msk.f32.vlgmr.msra.gmra.mrb[50].mxu1 %vm1507_vm9, %v13431_v45 }
 0xe7b   :  { %11024 = vmatprep.mubr.msk.f32.mxu1 %vm1507_vm9, %v13444_v53 }
 0xe7e   :  { %11025 = vmatmul.mubr.msk.f32.gmra.mrb[52].mxu1 %vm1507_vm9, %v13449_v55 }
 0xeab   :  { %v3445_v2 = vpop.xlane.xlu0 %3444 }
 0xeaf   :  { %v3448_v3 = vpop.xlane.xlu1 %3447  ;;  %v3458_v4 = vpop.xlane.xlu0 %3457 }
 0xeb3   :  { %v3455_v5 = vpop.xlane.xlu1 %3454 }
 0xf49   :  { %v10996_v58 = vpop.f32.mrb[48].mxu1 }
 0xf4a   :  { %v3869_v59 = vpop.f32.mrb[49].mxu1  ;;  %v3881_v60 = vsel %vm3442_vm14, %v10996_v58, 0.0  ;;  %v3887_v0 = vmul.f32 %v10996_v58, %v10996_v58 }
 0xf4b   :  { %3882 = vadd.xlane.f32.xlu0 %v3881_v60  ;;  %v3886_v61 = vmul.f32 %v3869_v59, %v3869_v59  ;;  %v3878_v63 = vsel %vm3442_vm14, %v3869_v59, 0.0  ;;  %v3978_v60 = vld [vmem:[%s15587_s13 + $0x20] sm:$0xff] }
 0xf4c   :  { %v3891_v1 = vsel %vm3442_vm14, %v3887_v0, 0.0  ;;  %v3980_v0 = vld [vmem:[%s15587_s13 + $0x30] sm:$0xff] }
 0xf4d   :  { %v3888_v62 = vsel %vm3442_vm14, %v3886_v61, 0.0  ;;  %v3977_v61 = vld [vmem:[%s15587_s13 + $0x18] sm:$0xff] }
 0xf4e   :  { %3889 = vadd.xlane.f32.xlu1 %v3888_v62  ;;  %v13485_v62 = vld [vmem:[%s15586_s12 + $0x30] sm:$0xff] }
 0xf4f   :  { %3879 = vadd.xlane.f32.xlu0 %v3878_v63  ;;  %v13492_v63 = vld [vmem:[%s15586_s12 + $0x38] sm:$0xff] }
 0xf53   :  { %3892 = vadd.xlane.f32.xlu0 %v3891_v1  ;;  %v3979_v1 = vld [vmem:[%s15587_s13 + $0x28] sm:$0xff] }
 0xfd8   :  { %v3883_v6 = vpop.xlane.xlu0 %3882 }
 0xfd9   :  { %v3885_v7 = vadd.f32 %v3883_v6, %v3448_v3  ;;  %v3981_v3 = vld [vmem:[%s15587_s13 + $0x38] sm:$0xff]  ;;  %v13517_v6 = vld [vmem:[%s15586_s12 + $0x40] sm:$0xff] }
 0xfdb   :  { %v3890_v8 = vpop.xlane.xlu1 %3889  ;;  %v3897_v12 = vmul.f32 0.0625, %v3885_v7  ;;  %v13522_v7 = vld [vmem:[%s15586_s12 + $0x48] sm:$0xff] }
 0xfdc   :  { %v3880_v9 = vpop.xlane.xlu0 %3879  ;;  %v3894_v10 = vadd.f32 %v3890_v8, %v3455_v5  ;;  %v3983_v5 = vld [vmem:[%s15587_s13 + $0x48] sm:$0xff]  ;;  %v3985_v8 = vld [vmem:[%s15587_s13 + $0x58] sm:$0xff] }
 0xfdd   :  { %v3884_v11 = vadd.f32 %v3880_v9, %v3445_v2  ;;  %v3901_v18 = vmul.f32 %v3897_v12, %v3897_v12  ;;  %v3982_v2 = vld [vmem:[%s15587_s13 + $0x40] sm:$0xff]  ;;  %v13534_v9 = vld [vmem:[%s15586_s12 + $0x50] sm:$0xff] }
 0xfde   :  { %v3898_v15 = vmul.f32 0.0625, %v3894_v10  ;;  %v13539_v10 = vld [vmem:[%s15586_s12 + $0x58] sm:$0xff] }
 0xfdf   :  { %v3896_v13 = vmul.f32 0.0625, %v3884_v11 }
 0xfe0   :  { %v3893_v14 = vpop.xlane.xlu0 %3892 }
 0xfe1   :  { %v3900_v16 = vmul.f32 %v3896_v13, %v3896_v13  ;;  %v3895_v17 = vadd.f32 %v3893_v14, %v3458_v4  ;;  %v3984_v4 = vld [vmem:[%s15587_s13 + $0x50] sm:$0xff] }
 0xfe3   :  { %v3902_v19 = vsub.f32 %v3898_v15, %v3900_v16  ;;  %v3899_v20 = vmul.f32 0.0625, %v3895_v17 }
 0xfe5   :  { %v3907_v21 = vadd.f32 1e-05, %v3902_v19  ;;  %v3903_v24 = vsub.f32 %v3899_v20, %v3901_v18 }
 0xfe7   :  { %11965 = vrsqrt.f32 %v3907_v21  ;;  %v3908_v25 = vadd.f32 1e-05, %v3903_v24  ;;  %v3965_v24 = vld [vmem:[%s15585_s11 + $0x18] sm:$0xff] }
 0xfe9   :  { %11967 = vrsqrt.f32 %v3908_v25  ;;  %v3966_v25 = vld [vmem:[%s15585_s11 + $0x20] sm:$0xff] }
 0xff1   :  { %v11966_v23 = vpop.eup %11965 }
 0xff2   :  { %v3911_v31 = vmul.f32 %v11966_v23, %v9846_v29  ;;  %v3967_v29 = vld [vmem:[%s15585_s11 + $0x28] sm:$0xff]  ;;  %v3968_v23 = vld [vmem:[%s15585_s11 + $0x30] sm:$0xff] }
 0xff3   :  { %v11968_v32 = vpop.eup %11967 }
 0xff4   :  { %3922 = vperm.xlu1 %11807, %v3911_v31   ;;  %v3916_v34 = vmul.f32 %v3911_v31, %v3896_v13  ;;  %v3912_v35 = vmul.f32 %v11968_v32, %v9847_v27  ;;  %v3969_v27 = vld [vmem:[%s15585_s11 + $0x38] sm:$0xff]  ;;  %v3970_v31 = vld [vmem:[%s15585_s11 + $0x40] sm:$0xff]  ;;  %v3971_v32 = vld [vmem:[%s15585_s11 + $0x48] sm:$0xff] }
 0xff6   :  { %3927 = vperm.xlu0 %11806, %v3912_v35   ;;  %v3917_v39 = vmul.f32 %v3912_v35, %v3897_v12  ;;  %v3918_v40 = vsub.f32 %v9848_v33, %v3916_v34  ;;  %v3972_v33 = vld [vmem:[%s15585_s11 + $0x50] sm:$0xff]  ;;  %v3973_v34 = vld [vmem:[%s15585_s11 + $0x58] sm:$0xff]  ;;  %v13606_v35 = vpop.f32.mrb[50].mxu1 }
 0xff8   :  { %3934 = vperm.xlu1 %11807, %v3918_v40   ;;  %v3919_v42 = vsub.f32 %v9849_v41, %v3917_v39  ;;  %v13608_v39 = vpop.f32.mrb[51].mxu1 }
 0xff9   :  { %v13610_v40 = vpop.f32.mrb[52].mxu1 }
 0xffa   :  { %v13612_v41 = vpop.f32.mrb[53].mxu1 }
 0xffc   :  { %3939 = vperm.xlu1 %11807, %v3919_v42  }
0x1073   :  { %v13410_v43 = vpop.permute.xlu1 %3922 }
0x1074   :  { %v3946_v44 = vmul.f32 %v13410_v43, %v3869_v59  ;;  %v13472_v59 = vld [vmem:[%s15586_s12 + $0x28] sm:$0xff]  ;;  %v3930_v11 = vmul.f32 %v13410_v43, %v13372_v30  ;;  %v3964_v30 = vld [vmem:[%s15585_s11 + $0x10] sm:$0xff] }
0x1075   :  { %v13413_v47 = vpop.permute.xlu0 %3927 }
0x1076   :  { %v3947_v52 = vmul.f32 %v10996_v58, %v13413_v47  ;;  %v13465_v58 = vld [vmem:[%s15586_s12 + $0x20] sm:$0xff]  ;;  %v3931_v12 = vmul.f32 %v13370_v22, %v13413_v47  ;;  %v3963_v22 = vld [vmem:[%s15585_s11 + $0x8] sm:$0xff] }
0x1077   :  { %v13415_v48 = vpop.permute.xlu1 %3934  ;;  %11027 = vmatprep.mubr.msk.f32.mxu1 %vm1507_vm9, %v13465_v58 }
0x1078   :  { %v3948_v50 = vadd.f32 %v3946_v44, %v13415_v48  ;;  %11028 = vmatmul.mubr.msk.f32.gmra.mrb[54].mxu1 %vm1507_vm9, %v13472_v59  ;;  %v3942_v13 = vadd.f32 %v13415_v48, %v3930_v11 }
0x1079   :  { %11030 = vmatprep.mubr.msk.f32.mxu1 %vm1507_vm9, %v13485_v62 }
0x107a   :  { %v3950_v36 = vmax.f32 %v3948_v50, 0.0  ;;  %v3944_v16 = vmax.f32 %v3942_v13, 0.0 }
0x107b   :  { %v3940_v28 = vpop.permute.xlu1 %3939 }
0x107c   :  { %v3949_v46 = vadd.f32 %v3947_v52, %v3940_v28  ;;  %3954 = vrot.lane.b32.xlu0 %v3950_v36, %s12688_s5  ;;  %11031 = vmatmul.mubr.msk.f32.gmra.mrb[56].mxu1 %vm1507_vm9, %v13492_v63  ;;  %v3943_v14 = vadd.f32 %v3940_v28, %v3931_v12 }
0x107d   :  { %11033 = vmatprep.mubr.msk.f32.mxu1 %vm1507_vm9, %v13517_v6 }
0x107e   :  { %v3951_v26 = vmax.f32 %v3949_v46, 0.0  ;;  %v3945_v17 = vmax.f32 %v3943_v14, 0.0 }
0x1080   :  { %3988 = vperm.xlu0 %11806, %v3974_v54   ;;  %3956 = vrot.lane.b32.xlu1 %v3951_v26, %s12688_s5 }
0x1081   :  { %11034 = vmatmul.mubr.msk.f32.gmra.mrb[58].mxu1 %vm1507_vm9, %v13522_v7 }
0x1082   :  { %11036 = vmatprep.mubr.msk.f32.mxu1 %vm1507_vm9, %v13534_v9 }
0x1084   :  { %3998 = vperm.xlu0 %11806, %v3976_v56   ;;  %3993 = vperm.xlu1 %11807, %v3975_v57  }
0x1085   :  { %11037 = vmatmul.mubr.msk.f32.gmra.mrb[60].mxu1 %vm1507_vm9, %v13539_v10 }
0x1086   :  { %11073 = vmatprep.mubr.msk.f32.mxu1 %vm1507_vm9, %v13426_v37 }
0x1088   :  { %4008 = vperm.xlu0 %11806, %v3978_v60   ;;  %4003 = vperm.xlu1 %11807, %v3977_v61  }
0x108c   :  { %4018 = vperm.xlu0 %11806, %v3980_v0   ;;  %4013 = vperm.xlu1 %11807, %v3979_v1  }
0x1090   :  { %4028 = vperm.xlu0 %11806, %v3982_v2   ;;  %4023 = vperm.xlu1 %11807, %v3981_v3  }
0x1094   :  { %4038 = vperm.xlu0 %11806, %v3984_v4   ;;  %4033 = vperm.xlu1 %11807, %v3983_v5  }
0x1098   :  { %4043 = vperm.xlu1 %11807, %v3985_v8  }
0x10ee   :  { %v3955_v15 = vpop.permute.xlu0 %3954 }
0x10ef   :  { %v13553_v19 = vsel %vm3442_vm14, %v3944_v16, %v3955_v15 }
0x10f0   :  { %15648 = vst [vmem:[#allocation5_spill] sm:$0xff] %v13553_v19 }
0x10f2   :  { %v3957_v18 = vpop.permute.xlu1 %3956 }
0x10f3   :  { %v13556_v20 = vsel %vm3442_vm14, %v3945_v17, %v3957_v18 }
0x10f4   :  { %15649 = vst [vmem:[#allocation6_spill] sm:$0xff] %v13556_v20  ;;  %v11643_v21 = vpack.c.bf16 %v13556_v20, %v13553_v19 }
0x10f6   :  { %11644 = vmatprep.subr.bf16.mxu0 %v11643_v21 }
0x10f7   :  { %11646 = vmatpush3.bf16.msra.mxu0 %v11643_v21 }
0x10fa   :  { %11002 = vmatmul.mubr.msk.f32.vlgmr.msra.gmra.mrb[30].mxu0 %vm1054_vm6, %v3963_v22 }
0x10fb   :  { %11004 = vmatprep.mubr.msk.f32.mxu0 %vm1054_vm6, %v3964_v30 }
0x10fe   :  { %11005 = vmatmul.mubr.msk.f32.gmra.mrb[32].mxu0 %vm1054_vm6, %v3965_v24 }
0x10ff   :  { %11007 = vmatprep.mubr.msk.f32.mxu0 %vm1054_vm6, %v3966_v25  ;;  %v3989_v36 = vpop.permute.xlu0 %3988 }
0x1102   :  { %11008 = vmatmul.mubr.msk.f32.gmra.mrb[34].mxu0 %vm1054_vm6, %v3967_v29 }
0x1103   :  { %11010 = vmatprep.mubr.msk.f32.mxu0 %vm1054_vm6, %v3968_v23  ;;  %v3994_v52 = vpop.permute.xlu1 %3993  ;;  %v3999_v54 = vpop.permute.xlu0 %3998 }
0x1106   :  { %11011 = vmatmul.mubr.msk.f32.gmra.mrb[36].mxu0 %vm1054_vm6, %v3969_v27 }
0x1107   :  { %11013 = vmatprep.mubr.msk.f32.mxu0 %vm1054_vm6, %v3970_v31  ;;  %v4004_v28 = vpop.permute.xlu1 %4003  ;;  %v4009_v11 = vpop.permute.xlu0 %4008 }
0x110a   :  { %11014 = vmatmul.mubr.msk.f32.gmra.mrb[38].mxu0 %vm1054_vm6, %v3971_v32 }
0x110b   :  { %11016 = vmatprep.mubr.msk.f32.mxu0 %vm1054_vm6, %v3972_v33  ;;  %v4014_v4 = vpop.permute.xlu1 %4013  ;;  %v4019_v29 = vpop.permute.xlu0 %4018 }
0x110e   :  { %11017 = vmatmul.mubr.msk.f32.gmra.mrb[40].mxu0 %vm1054_vm6, %v3973_v34 }
0x110f   :  { %11047 = vmatprep.mubr.msk.f32.mxu0 %vm1507_vm9, %v13426_v37  ;;  %v4024_v30 = vpop.permute.xlu1 %4023 }
0x114b   :  { %v13614_v42 = vpop.f32.mrb[54].mxu1 }
0x114c   :  { %v13616_v43 = vpop.f32.mrb[55].mxu1 }
0x114f   :  { %v13618_v44 = vpop.f32.mrb[56].mxu1 }
0x1150   :  { %v13620_v47 = vpop.f32.mrb[57].mxu1 }
0x1154   :  { %v13622_v48 = vpop.f32.mrb[58].mxu1 }
0x1155   :  { %v13624_v49 = vpop.f32.mrb[59].mxu1 }
0x1158   :  { %v13626_v50 = vpop.f32.mrb[60].mxu1 }
0x1159   :  { %v13628_v51 = vpop.f32.mrb[61].mxu1 }
0x11cd   :  { %v11003_v46 = vpop.f32.mrb[30].mxu0 }
0x11ce   :  { %v13630_v26 = vadd.f32 %v11003_v46, %v3994_v52  ;;  %v4148_v56 = vpop.f32.mrb[31].mxu0 }
0x11cf   :  { %v13632_v57 = vadd.f32 %v4148_v56, %v3989_v36 }
0x11d0   :  { %v4386_v60 = vadd.f32 %v13606_v35, %v13630_v26 }
0x11d1   :  { %v4385_v61 = vadd.f32 %v13608_v39, %v13632_v57  ;;  %v11006_v0 = vpop.f32.mrb[32].mxu0 }
0x11d2   :  { %v9875_v1 = vmul.f32 -1.442695, %v4386_v60  ;;  %v13638_v2 = vadd.f32 %v11006_v0, %v4004_v28  ;;  %v4158_v3 = vpop.f32.mrb[33].mxu0 }
0x11d3   :  { %v9874_v5 = vmul.f32 -1.442695, %v4385_v61  ;;  %v13640_v8 = vadd.f32 %v4158_v3, %v3999_v54 }
0x11d4   :  { %11969 = vpow2.f32 %v9875_v1  ;;  %v4388_v12 = vadd.f32 %v13610_v40, %v13638_v2 }
0x11d5   :  { %11971 = vpow2.f32 %v9874_v5  ;;  %v4387_v13 = vadd.f32 %v13612_v41, %v13640_v8  ;;  %v11009_v14 = vpop.f32.mrb[34].mxu0 }
0x11d6   :  { %v9877_v15 = vmul.f32 -1.442695, %v4388_v12  ;;  %v13646_v16 = vadd.f32 %v11009_v14, %v4014_v4  ;;  %v4168_v17 = vpop.f32.mrb[35].mxu0 }
0x11d7   :  { %v9876_v18 = vmul.f32 -1.442695, %v4387_v13  ;;  %v13648_v21 = vadd.f32 %v4168_v17, %v4009_v11  ;;  %v13665_v13 = vld [vmem:[%s15588_s14 + $0x8] sm:$0xff] }
0x11d8   :  { %11973 = vpow2.f32 %v9877_v15  ;;  %v4414_v22 = vadd.f32 %v13614_v42, %v13646_v16  ;;  %v13670_v15 = vld [vmem:[%s15588_s14] sm:$0xff] }
0x11d9   :  { %11975 = vpow2.f32 %v9876_v18  ;;  %v4413_v24 = vadd.f32 %v13616_v43, %v13648_v21  ;;  %v11012_v25 = vpop.f32.mrb[36].mxu0  ;;  %v13674_v18 = vadd.f32 %v13622_v48, %v13665_v13 }
0x11da   :  { %v9879_v23 = vmul.f32 -1.442695, %v4414_v22  ;;  %v13654_v27 = vadd.f32 %v11012_v25, %v4024_v30  ;;  %v4178_v31 = vpop.f32.mrb[37].mxu0  ;;  %v4034_v22 = vpop.permute.xlu1 %4033  ;;  %v13683_v25 = vld [vmem:[%s15588_s14 + $0x18] sm:$0xff] }
0x11db   :  { %v9878_v32 = vmul.f32 -1.442695, %v4413_v24  ;;  %v13656_v33 = vadd.f32 %v4178_v31, %v4019_v29  ;;  %v13678_v24 = vadd.f32 %v13624_v49, %v13670_v15 }
0x11dc   :  { %11977 = vpow2.f32 %v9879_v23  ;;  %v4416_v34 = vadd.f32 %v13618_v44, %v13654_v27  ;;  %v4029_v23 = vpop.permute.xlu0 %4028 }
0x11dd   :  { %11979 = vpow2.f32 %v9878_v32  ;;  %v4415_v52 = vadd.f32 %v13620_v47, %v13656_v33  ;;  %v11015_v36 = vpop.f32.mrb[38].mxu0  ;;  %15650 = vst [vmem:[#allocation7_spill] sm:$0xff] %v13678_v24  ;;  %v13688_v32 = vld [vmem:[%s15588_s14 + $0x10] sm:$0xff] }
0x11de   :  { %v11970_v28 = vpop.eup %11969  ;;  %v9881_v46 = vmul.f32 -1.442695, %v4416_v34  ;;  %v4188_v54 = vpop.f32.mrb[39].mxu0 }
0x11df   :  { %v11972_v56 = vpop.eup %11971  ;;  %v4402_v60 = vadd.f32 1.0, %v11970_v28  ;;  %v9880_v61 = vmul.f32 -1.442695, %v4415_v52  ;;  %v13690_v28 = vadd.f32 %v11015_v36, %v4034_v22 }
0x11e0   :  { %v4401_v0 = vadd.f32 1.0, %v11972_v56  ;;  %11981 = vpow2.f32 %v9881_v46  ;;  %v13695_v46 = vadd.f32 %v13626_v50, %v13683_v25 }
0x11e1   :  { %11983 = vrcp.f32 %v4402_v60  ;;  %v11018_v1 = vpop.f32.mrb[40].mxu0  ;;  %15651 = vst [vmem:[#allocation8_spill] sm:$0xff] %v13690_v28  ;;  %v13697_v60 = vadd.f32 %v4188_v54, %v4029_v23 }
0x11e2   :  { %v11974_v3 = vpop.eup %11973  ;;  %11985 = vrcp.f32 %v4401_v0  ;;  %v4198_v4 = vpop.f32.mrb[41].mxu0  ;;  %15652 = vst [vmem:[#allocation9_spill] sm:$0xff] %v13695_v46  ;;  %v13702_v0 = vadd.f32 %v13628_v51, %v13688_v32 }
0x11e3   :  { %v11976_v5 = vpop.eup %11975  ;;  %v4404_v11 = vadd.f32 1.0, %v11974_v3  ;;  %11987 = vpow2.f32 %v9880_v61  ;;  %15653 = vst [vmem:[#allocation10_spill] sm:$0xff] %v13697_v60 }
0x11e4   :  { %v4403_v12 = vadd.f32 1.0, %v11976_v5  ;;  %15654 = vst [vmem:[#allocation11_spill] sm:$0xff] %v13702_v0 }
0x11e5   :  { %11989 = vrcp.f32 %v4404_v11  ;;  %v4044_v11 = vpop.permute.xlu1 %4043 }
0x11e6   :  { %v11978_v14 = vpop.eup %11977  ;;  %11991 = vrcp.f32 %v4403_v12  ;;  %v13706_v54 = vadd.f32 %v11018_v1, %v4044_v11 }
0x11e7   :  { %v11980_v17 = vpop.eup %11979  ;;  %v4430_v30 = vadd.f32 1.0, %v11978_v14  ;;  %v4039_v14 = vpop.permute.xlu0 %4038 }
0x11e8   :  { %v4429_v31 = vadd.f32 1.0, %v11980_v17  ;;  %15655 = vst [vmem:[#allocation12_spill] sm:$0xff] %v13706_v54  ;;  %v13709_v22 = vadd.f32 %v4198_v4, %v4039_v14 }
0x11e9   :  { %11993 = vrcp.f32 %v4430_v30 }
0x11ea   :  { %v11982_v29 = vpop.eup %11981  ;;  %11995 = vrcp.f32 %v4429_v31  ;;  %15656 = vst [vmem:[#allocation13_spill] sm:$0xff] %v13709_v22 }
0x11eb   :  { %v11984_v48 = vpop.eup %11983  ;;  %v4432_v34 = vadd.f32 1.0, %v11982_v29 }
0x11ec   :  { %v11986_v52 = vpop.eup %11985  ;;  %v4446_v49 = vmul.f32 %v11984_v48, %v13674_v18 }
0x11ed   :  { %v11988_v56 = vpop.eup %11987  ;;  %v4445_v61 = vmul.f32 %v11986_v52, %v13678_v24  ;;  %11997 = vrcp.f32 %v4432_v34 }
0x11ee   :  { %v4431_v3 = vadd.f32 1.0, %v11988_v56  ;;  %v4450_v36 = vadd.f32 %v4446_v49, %v13690_v28 }
0x11ef   :  { %v11990_v5 = vpop.eup %11989  ;;  %v4449_v50 = vadd.f32 %v4445_v61, %v13697_v60 }
0x11f0   :  { %v11992_v12 = vpop.eup %11991  ;;  %11999 = vrcp.f32 %v4431_v3  ;;  %v4448_v17 = vmul.f32 %v11990_v5, %v13695_v46 }
0x11f1   :  { %12001 = vtanh.f32 %v4450_v36  ;;  %v4447_v51 = vmul.f32 %v11992_v12, %v13702_v0 }
0x11f2   :  { %12003 = vtanh.f32 %v4449_v50  ;;  %v4452_v30 = vadd.f32 %v4448_v17, %v13706_v54 }
0x11f3   :  { %v4451_v29 = vadd.f32 %v4447_v51, %v13709_v22  ;;  %v11994_v23 = vpop.eup %11993 }
0x11f4   :  { %12005 = vtanh.f32 %v4452_v30  ;;  %v11996_v31 = vpop.eup %11995  ;;  %v4458_v1 = vsub.f32 1.0, %v11994_v23  ;;  %v4466_v61 = vmul.f32 0.0, %v11994_v23 }
0x11f5   :  { %12007 = vtanh.f32 %v4451_v29  ;;  %v4457_v49 = vsub.f32 1.0, %v11996_v31  ;;  %v4465_v36 = vmul.f32 0.0, %v11996_v31 }
0x11f7   :  { %v11998_v48 = vpop.eup %11997 }
0x11f8   :  { %v4460_v5 = vsub.f32 1.0, %v11998_v48  ;;  %v4468_v30 = vmul.f32 0.0, %v11998_v48 }
0x11fa   :  { %v12000_v34 = vpop.eup %11999 }
0x11fb   :  { %v12002_v52 = vpop.eup %12001  ;;  %v4459_v12 = vsub.f32 1.0, %v12000_v34  ;;  %v4467_v38 = vmul.f32 0.0, %v12000_v34 }
0x11fc   :  { %v12004_v56 = vpop.eup %12003  ;;  %v4462_v4 = vmul.f32 %v12002_v52, %v4458_v1 }
0x11fd   :  { %v4461_v3 = vmul.f32 %v12004_v56, %v4457_v49 }
0x11fe   :  { %v12006_v11 = vpop.eup %12005  ;;  %v13714_v50 = vadd.f32 %v4466_v61, %v4462_v4 }
0x11ff   :  { %v12008_v14 = vpop.eup %12007  ;;  %v13716_v17 = vadd.f32 %v4465_v36, %v4461_v3  ;;  %v4464_v51 = vmul.f32 %v12006_v11, %v4460_v5 }
0x1200   :  { %15657 = vst [vmem:[#allocation14_spill] sm:$0xff] %v13714_v50  ;;  %v4463_v29 = vmul.f32 %v12008_v14, %v4459_v12 }
0x1201   :  { %15658 = vst [vmem:[#allocation15_spill] sm:$0xff] %v13716_v17  ;;  %v11647_v20 = vpack.c.bf16 %v13714_v50, %v13716_v17  ;;  %v13720_v19 = vadd.f32 %v4468_v30, %v4464_v51 }
0x1202   :  { %v13722_v23 = vadd.f32 %v4467_v38, %v4463_v29 }
0x1203   :  { %15659 = vst [vmem:[#allocation16_spill] sm:$0xff] %v13720_v19  ;;  %11648 = vmatprep.subr.bf16.mxu0 %v11647_v20 }
0x1204   :  { %15660 = vst [vmem:[#allocation17_spill] sm:$0xff] %v13722_v23  ;;  %11650 = vmatpush3.bf16.msra.mxu0 %v11647_v20  ;;  %v11651_v31 = vpack.c.bf16 %v13720_v19, %v13722_v23 }
0x1206   :  { %11652 = vmatprep.subr.bf16.mxu0 %v11651_v31 }
0x1208   :  { %11654 = vmatpush3.bf16.msra.mxu0 %v11651_v31 }
0x120b   :  { %11048 = vmatmul.mubr.msk.f32.vlgmr.msra.gmra.mrb[42].mxu0 %vm1507_vm9, %v13431_v45 }
0x120c   :  { %11050 = vmatprep.mubr.msk.f32.mxu0 %vm1507_vm9, %v13444_v53 }
0x120f   :  { %11051 = vmatmul.mubr.msk.f32.gmra.mrb[44].mxu0 %vm1507_vm9, %v13449_v55 }
0x1210   :  { %11053 = vmatprep.mubr.msk.f32.mxu0 %vm1507_vm9, %v13465_v58 }
0x1213   :  { %11054 = vmatmul.mubr.msk.f32.gmra.mrb[46].mxu0 %vm1507_vm9, %v13472_v59 }
0x1214   :  { %11056 = vmatprep.mubr.msk.f32.mxu0 %vm1507_vm9, %v13485_v62 }
0x1217   :  { %11057 = vmatmul.mubr.msk.f32.gmra.mrb[48].mxu0 %vm1507_vm9, %v13492_v63 }
0x1218   :  { %11059 = vmatprep.mubr.msk.f32.mxu0 %vm1507_vm9, %v13517_v6 }
0x121b   :  { %11060 = vmatmul.mubr.msk.f32.gmra.mrb[50].mxu0 %vm1507_vm9, %v13522_v7 }
0x121c   :  { %11062 = vmatprep.mubr.msk.f32.mxu0 %vm1507_vm9, %v13534_v9 }
0x121f   :  { %11063 = vmatmul.mubr.msk.f32.gmra.mrb[52].mxu0 %vm1507_vm9, %v13539_v10 }
0x1220   :  { %11099 = vmatprep.mubr.msk.f32.mxu0 %vm1507_vm9, %v13426_v37 }
0x12de   :  { %v11049_v38 = vpop.f32.mrb[42].mxu0 }
0x12df   :  { %4616 = vrot.lane.b32.xlu1 %v11049_v38, %s12684_s23  ;;  %v4551_v20 = vpop.f32.mrb[43].mxu0 }
0x12e0   :  { %4614 = vrot.lane.b32.xlu0 %v4551_v20, %s12684_s23 }
0x12e2   :  { %v11052_v48 = vpop.f32.mrb[44].mxu0 }
0x12e3   :  { %4620 = vrot.lane.b32.xlu1 %v11052_v48, %s12684_s23  ;;  %v4561_v34 = vpop.f32.mrb[45].mxu0 }
0x12e4   :  { %4618 = vrot.lane.b32.xlu0 %v4561_v34, %s12684_s23 }
0x12e6   :  { %v11055_v1 = vpop.f32.mrb[46].mxu0 }
0x12e7   :  { %4660 = vrot.lane.b32.xlu1 %v11055_v1, %s12684_s23  ;;  %v4571_v52 = vpop.f32.mrb[47].mxu0 }
0x12e8   :  { %4658 = vrot.lane.b32.xlu0 %v4571_v52, %s12684_s23 }
0x12ea   :  { %v11058_v49 = vpop.f32.mrb[48].mxu0 }
0x12eb   :  { %4664 = vrot.lane.b32.xlu1 %v11058_v49, %s12684_s23  ;;  %v4581_v56 = vpop.f32.mrb[49].mxu0 }
0x12ec   :  { %4662 = vrot.lane.b32.xlu0 %v4581_v56, %s12684_s23 }
0x12ee   :  { %v11061_v4 = vpop.f32.mrb[50].mxu0 }
0x12ef   :  { %v4699_v61 = vadd.f32 %v11061_v4, %v13665_v13  ;;  %v4591_v3 = vpop.f32.mrb[51].mxu0 }
0x12f0   :  { %v4698_v36 = vadd.f32 %v4591_v3, %v13670_v15 }
0x12f1   :  { %4708 = vrot.lane.b32.xlu1 %v4699_v61, %s12684_s23 }
0x12f2   :  { %4706 = vrot.lane.b32.xlu0 %v4698_v36, %s12684_s23  ;;  %v11064_v5 = vpop.f32.mrb[52].mxu0 }
0x12f3   :  { %v4701_v11 = vadd.f32 %v11064_v5, %v13683_v25  ;;  %v4601_v12 = vpop.f32.mrb[53].mxu0 }
0x12f4   :  { %v4700_v14 = vadd.f32 %v4601_v12, %v13688_v32 }
0x12f5   :  { %4712 = vrot.lane.b32.xlu1 %v4701_v11, %s12684_s23 }
0x12f6   :  { %4710 = vrot.lane.b32.xlu0 %v4700_v14, %s12684_s23 }
0x12f9   :  { %4744 = vrot.lane.b32.xlu1 %v13714_v50, %s12684_s23 }
0x12fa   :  { %4742 = vrot.lane.b32.xlu0 %v13716_v17, %s12684_s23 }
0x12fd   :  { %4748 = vrot.lane.b32.xlu1 %v13720_v19, %s12684_s23 }
0x12fe   :  { %4746 = vrot.lane.b32.xlu0 %v13722_v23, %s12684_s23 }
0x1351   :  { %v4617_v51 = vpop.permute.xlu1 %4616 }
0x1352   :  { %v4627_v30 = vadd.f32 %v4617_v51, %v13630_v26  ;;  %v4615_v29 = vpop.permute.xlu0 %4614 }
0x1353   :  { %v4626_v31 = vadd.f32 %v4615_v29, %v13632_v57 }
0x1354   :  { %v9895_v38 = vmul.f32 -1.442695, %v4627_v30 }
0x1355   :  { %v9894_v20 = vmul.f32 -1.442695, %v4626_v31  ;;  %v4621_v48 = vpop.permute.xlu1 %4620 }
0x1356   :  { %12009 = vpow2.f32 %v9895_v38  ;;  %v4629_v34 = vadd.f32 %v4621_v48, %v13638_v2  ;;  %v4619_v1 = vpop.permute.xlu0 %4618 }
0x1357   :  { %12011 = vpow2.f32 %v9894_v20  ;;  %v4628_v52 = vadd.f32 %v4619_v1, %v13640_v8 }
0x1358   :  { %v9897_v49 = vmul.f32 -1.442695, %v4629_v34 }
0x1359   :  { %v9896_v56 = vmul.f32 -1.442695, %v4628_v52  ;;  %v4661_v4 = vpop.permute.xlu1 %4660 }
0x135a   :  { %12013 = vpow2.f32 %v9897_v49  ;;  %v4671_v61 = vadd.f32 %v4661_v4, %v13646_v16  ;;  %v4659_v3 = vpop.permute.xlu0 %4658 }
0x135b   :  { %12015 = vpow2.f32 %v9896_v56  ;;  %v4670_v36 = vadd.f32 %v4659_v3, %v13648_v21 }
0x135c   :  { %v9899_v5 = vmul.f32 -1.442695, %v4671_v61 }
0x135d   :  { %v9898_v11 = vmul.f32 -1.442695, %v4670_v36  ;;  %v4665_v12 = vpop.permute.xlu1 %4664 }
0x135e   :  { %12017 = vpow2.f32 %v9899_v5  ;;  %v4673_v14 = vadd.f32 %v4665_v12, %v13654_v27  ;;  %v4663_v51 = vpop.permute.xlu0 %4662 }
0x135f   :  { %12019 = vpow2.f32 %v9898_v11  ;;  %v4672_v30 = vadd.f32 %v4663_v51, %v13656_v33 }
0x1360   :  { %v12010_v29 = vpop.eup %12009  ;;  %v9901_v31 = vmul.f32 -1.442695, %v4673_v14 }
0x1361   :  { %v12012_v38 = vpop.eup %12011  ;;  %v4643_v20 = vadd.f32 1.0, %v12010_v29  ;;  %v9900_v48 = vmul.f32 -1.442695, %v4672_v30 }
0x1362   :  { %v4642_v34 = vadd.f32 1.0, %v12012_v38  ;;  %12021 = vpow2.f32 %v9901_v31 }
0x1363   :  { %12023 = vrcp.f32 %v4643_v20  ;;  %v4709_v36 = vpop.permute.xlu1 %4708 }
0x1364   :  { %v12014_v1 = vpop.eup %12013  ;;  %12025 = vrcp.f32 %v4642_v34  ;;  %v4707_v12 = vpop.permute.xlu0 %4706 }
0x1365   :  { %v12016_v52 = vpop.eup %12015  ;;  %v4645_v49 = vadd.f32 1.0, %v12014_v1  ;;  %12027 = vpow2.f32 %v9900_v48 }
0x1366   :  { %v4644_v56 = vadd.f32 1.0, %v12016_v52 }
0x1367   :  { %12029 = vrcp.f32 %v4645_v49  ;;  %v4713_v52 = vpop.permute.xlu1 %4712 }
0x1368   :  { %v12018_v4 = vpop.eup %12017  ;;  %12031 = vrcp.f32 %v4644_v56 }
0x1369   :  { %v12020_v61 = vpop.eup %12019  ;;  %v4687_v3 = vadd.f32 1.0, %v12018_v4  ;;  %v4711_v4 = vpop.permute.xlu0 %4710 }
0x136a   :  { %v4686_v11 = vadd.f32 1.0, %v12020_v61 }
0x136b   :  { %12033 = vrcp.f32 %v4687_v3 }
0x136c   :  { %v12022_v5 = vpop.eup %12021  ;;  %12035 = vrcp.f32 %v4686_v11 }
0x136d   :  { %v12024_v14 = vpop.eup %12023  ;;  %v4689_v51 = vadd.f32 1.0, %v12022_v5 }
0x136e   :  { %v12026_v30 = vpop.eup %12025  ;;  %v4719_v29 = vmul.f32 %v12024_v14, %v4709_v36 }
0x136f   :  { %v12028_v31 = vpop.eup %12027  ;;  %v4718_v38 = vmul.f32 %v12026_v30, %v4707_v12  ;;  %12037 = vrcp.f32 %v4689_v51  ;;  %v4745_v12 = vpop.permute.xlu1 %4744 }
0x1370   :  { %v4688_v20 = vadd.f32 1.0, %v12028_v31  ;;  %v4723_v48 = vadd.f32 %v4719_v29, %v13690_v28  ;;  %v4743_v51 = vpop.permute.xlu0 %4742 }
0x1371   :  { %v12030_v34 = vpop.eup %12029  ;;  %v4722_v1 = vadd.f32 %v4718_v38, %v13697_v60 }
0x1372   :  { %v12032_v49 = vpop.eup %12031  ;;  %12039 = vrcp.f32 %v4688_v20  ;;  %v4721_v56 = vmul.f32 %v12030_v34, %v4713_v52 }
0x1373   :  { %12041 = vtanh.f32 %v4723_v48  ;;  %v4720_v61 = vmul.f32 %v12032_v49, %v4711_v4 }
0x1374   :  { %12043 = vtanh.f32 %v4722_v1  ;;  %v4725_v36 = vadd.f32 %v4721_v56, %v13706_v54  ;;  %v4747_v17 = vpop.permute.xlu0 %4746 }
0x1375   :  { %v4724_v3 = vadd.f32 %v4720_v61, %v13709_v22  ;;  %v12034_v5 = vpop.eup %12033  ;;  %v4749_v61 = vpop.permute.xlu1 %4748 }
0x1376   :  { %12045 = vtanh.f32 %v4725_v36  ;;  %v12036_v11 = vpop.eup %12035  ;;  %v4731_v29 = vsub.f32 1.0, %v12034_v5  ;;  %v4755_v48 = vmul.f32 %v12034_v5, %v4745_v12 }
0x1377   :  { %12047 = vtanh.f32 %v4724_v3  ;;  %v4730_v38 = vsub.f32 1.0, %v12036_v11  ;;  %v4754_v1 = vmul.f32 %v12036_v11, %v4743_v51 }
0x1379   :  { %v12038_v14 = vpop.eup %12037 }
0x137a   :  { %v4733_v49 = vsub.f32 1.0, %v12038_v14  ;;  %v4757_v50 = vmul.f32 %v12038_v14, %v4749_v61 }
0x137c   :  { %v12040_v30 = vpop.eup %12039 }
0x137d   :  { %v12042_v31 = vpop.eup %12041  ;;  %v4732_v36 = vsub.f32 1.0, %v12040_v30  ;;  %v4756_v46 = vmul.f32 %v12040_v30, %v4747_v17 }
0x137e   :  { %v12044_v20 = vpop.eup %12043  ;;  %v4735_v34 = vmul.f32 %v12042_v31, %v4731_v29 }
0x137f   :  { %v4734_v52 = vmul.f32 %v12044_v20, %v4730_v38 }
0x1380   :  { %v12046_v56 = vpop.eup %12045  ;;  %v13786_v4 = vadd.f32 %v4755_v48, %v4735_v34 }
0x1381   :  { %v12048_v3 = vpop.eup %12047  ;;  %v13788_v19 = vadd.f32 %v4754_v1, %v4734_v52  ;;  %v4737_v23 = vmul.f32 %v12046_v56, %v4733_v49 }
0x1382   :  { %15661 = vst [vmem:[#allocation18_spill] sm:$0xff] %v13786_v4  ;;  %v4736_v0 = vmul.f32 %v12048_v3, %v4732_v36 }
0x1383   :  { %15662 = vst [vmem:[#allocation19_spill] sm:$0xff] %v13788_v19  ;;  %v13790_v24 = vadd.f32 %v4757_v50, %v4737_v23  ;;  %v11808_v5 = vpack.i.bf16 %v13786_v4, %v13788_v19 }
0x1384   :  { %v13794_v11 = vadd.f32 %v4756_v46, %v4736_v0 }
0x1385   :  { %15663 = vst [vmem:[#allocation20_spill] sm:$0xff] %v13790_v24  ;;  %11809 = vrot.lane.b32.xlu0 %v11808_v5, %s12683_s22 }
0x1386   :  { %15664 = vst [vmem:[#allocation21_spill] sm:$0xff] %v13794_v11  ;;  %v11813_v12 = vpack.i.bf16 %v13790_v24, %v13794_v11 }
0x1388   :  { %11814 = vrot.lane.b32.xlu1 %v11813_v12, %s12683_s22 }
0x13f7   :  { %v11810_v51 = vpop.permute.xlu0 %11809 }
0x13f8   :  { %v11812_v29 = vunpack.i.h.bf16 %v11810_v51  ;;  %v11811_v14 = vunpack.i.l.bf16 %v11810_v51 }
0x13fa   :  { %v11815_v31 = vpop.permute.xlu1 %11814  ;;  %v11655_v38 = vpack.c.bf16 %v11812_v29, %v11811_v14 }
0x13fb   :  { %v11817_v17 = vunpack.i.h.bf16 %v11815_v31  ;;  %v11816_v50 = vunpack.i.l.bf16 %v11815_v31 }
0x13fc   :  { %11656 = vmatprep.subr.bf16.mxu1 %v11655_v38 }
0x13fd   :  { %11658 = vmatpush3.bf16.msra.mxu1 %v11655_v38  ;;  %v11659_v23 = vpack.c.bf16 %v11817_v17, %v11816_v50 }
0x13ff   :  { %11660 = vmatprep.subr.bf16.mxu1 %v11659_v23 }
0x1401   :  { %11662 = vmatpush3.bf16.msra.mxu1 %v11659_v23 }
0x1404   :  { %11074 = vmatmul.mubr.msk.f32.vlgmr.msra.gmra.mrb[62].mxu1 %vm1507_vm9, %v13431_v45 }
0x1405   :  { %11076 = vmatprep.mubr.msk.f32.mxu1 %vm1507_vm9, %v13444_v53 }
0x1408   :  { %11077 = vmatmul.mubr.msk.f32.gmra.mrb[64].mxu1 %vm1507_vm9, %v13449_v55 }
0x1409   :  { %11079 = vmatprep.mubr.msk.f32.mxu1 %vm1507_vm9, %v13465_v58 }
0x140c   :  { %11080 = vmatmul.mubr.msk.f32.gmra.mrb[66].mxu1 %vm1507_vm9, %v13472_v59 }
0x140d   :  { %11082 = vmatprep.mubr.msk.f32.mxu1 %vm1507_vm9, %v13485_v62 }
0x1410   :  { %11083 = vmatmul.mubr.msk.f32.gmra.mrb[68].mxu1 %vm1507_vm9, %v13492_v63 }
0x1411   :  { %11085 = vmatprep.mubr.msk.f32.mxu1 %vm1507_vm9, %v13517_v6 }
0x1414   :  { %11086 = vmatmul.mubr.msk.f32.gmra.mrb[70].mxu1 %vm1507_vm9, %v13522_v7 }
0x1415   :  { %11088 = vmatprep.mubr.msk.f32.mxu1 %vm1507_vm9, %v13534_v9 }
0x1418   :  { %11089 = vmatmul.mubr.msk.f32.gmra.mrb[72].mxu1 %vm1507_vm9, %v13539_v10 }
0x1419   :  { %11125 = vmatprep.mubr.msk.f32.mxu1 %vm1507_vm9, %v13426_v37 }
0x14d7   :  { %v11075_v45 = vpop.f32.mrb[62].mxu1 }
0x14d8   :  { %4957 = vrot.lane.b32.xlu1 %v11075_v45, %s12689_s21  ;;  %v4892_v53 = vpop.f32.mrb[63].mxu1 }
0x14d9   :  { %4955 = vrot.lane.b32.xlu0 %v4892_v53, %s12689_s21 }
0x14db   :  { %v11078_v55 = vpop.f32.mrb[64].mxu1 }
0x14dc   :  { %4961 = vrot.lane.b32.xlu1 %v11078_v55, %s12689_s21  ;;  %v4902_v58 = vpop.f32.mrb[65].mxu1 }
0x14dd   :  { %4959 = vrot.lane.b32.xlu0 %v4902_v58, %s12689_s21 }
0x14df   :  { %v11081_v59 = vpop.f32.mrb[66].mxu1 }
0x14e0   :  { %5001 = vrot.lane.b32.xlu1 %v11081_v59, %s12689_s21  ;;  %v4912_v62 = vpop.f32.mrb[67].mxu1 }
0x14e1   :  { %4999 = vrot.lane.b32.xlu0 %v4912_v62, %s12689_s21 }
0x14e3   :  { %v11084_v37 = vpop.f32.mrb[68].mxu1 }
0x14e4   :  { %5005 = vrot.lane.b32.xlu1 %v11084_v37, %s12689_s21  ;;  %v4922_v63 = vpop.f32.mrb[69].mxu1 }
0x14e5   :  { %5003 = vrot.lane.b32.xlu0 %v4922_v63, %s12689_s21 }
0x14e7   :  { %v11087_v6 = vpop.f32.mrb[70].mxu1 }
0x14e8   :  { %v5040_v7 = vadd.f32 %v11087_v6, %v13665_v13  ;;  %v4932_v9 = vpop.f32.mrb[71].mxu1 }
0x14e9   :  { %v5039_v10 = vadd.f32 %v4932_v9, %v13670_v15 }
0x14ea   :  { %5049 = vrot.lane.b32.xlu1 %v5040_v7, %s12689_s21 }
0x14eb   :  { %5047 = vrot.lane.b32.xlu0 %v5039_v10, %s12689_s21  ;;  %v11090_v46 = vpop.f32.mrb[72].mxu1 }
0x14ec   :  { %v5042_v0 = vadd.f32 %v11090_v46, %v13683_v25  ;;  %v4942_v30 = vpop.f32.mrb[73].mxu1 }
0x14ed   :  { %v5041_v20 = vadd.f32 %v4942_v30, %v13688_v32 }
0x14ee   :  { %5053 = vrot.lane.b32.xlu1 %v5042_v0, %s12689_s21 }
0x14ef   :  { %5051 = vrot.lane.b32.xlu0 %v5041_v20, %s12689_s21 }
0x14f2   :  { %5081 = vrot.lane.b32.xlu1 %v13786_v4, %s12684_s23 }
0x14f3   :  { %5079 = vrot.lane.b32.xlu0 %v13788_v19, %s12684_s23 }
0x14f6   :  { %5085 = vrot.lane.b32.xlu1 %v13790_v24, %s12684_s23 }
0x14f7   :  { %5083 = vrot.lane.b32.xlu0 %v13794_v11, %s12684_s23 }
0x154a   :  { %v4958_v34 = vpop.permute.xlu1 %4957 }
0x154b   :  { %v4968_v48 = vadd.f32 %v4958_v34, %v13630_v26  ;;  %v4956_v52 = vpop.permute.xlu0 %4955 }
0x154c   :  { %v4967_v1 = vadd.f32 %v4956_v52, %v13632_v57 }
0x154d   :  { %v9915_v49 = vmul.f32 -1.442695, %v4968_v48 }
0x154e   :  { %v9914_v56 = vmul.f32 -1.442695, %v4967_v1  ;;  %v4962_v61 = vpop.permute.xlu1 %4961 }
0x154f   :  { %12049 = vpow2.f32 %v9915_v49  ;;  %v4970_v36 = vadd.f32 %v4962_v61, %v13638_v2  ;;  %v4960_v3 = vpop.permute.xlu0 %4959 }
0x1550   :  { %12051 = vpow2.f32 %v9914_v56  ;;  %v4969_v5 = vadd.f32 %v4960_v3, %v13640_v8 }
0x1551   :  { %v9917_v12 = vmul.f32 -1.442695, %v4970_v36 }
0x1552   :  { %v9916_v51 = vmul.f32 -1.442695, %v4969_v5  ;;  %v5002_v29 = vpop.permute.xlu1 %5001 }
0x1553   :  { %12053 = vpow2.f32 %v9917_v12  ;;  %v5012_v14 = vadd.f32 %v5002_v29, %v13646_v16  ;;  %v5000_v31 = vpop.permute.xlu0 %4999 }
0x1554   :  { %12055 = vpow2.f32 %v9916_v51  ;;  %v5011_v38 = vadd.f32 %v5000_v31, %v13648_v21 }
0x1555   :  { %v9919_v17 = vmul.f32 -1.442695, %v5012_v14 }
0x1556   :  { %v9918_v50 = vmul.f32 -1.442695, %v5011_v38  ;;  %v5006_v23 = vpop.permute.xlu1 %5005 }
0x1557   :  { %12057 = vpow2.f32 %v9919_v17  ;;  %v5014_v45 = vadd.f32 %v5006_v23, %v13654_v27  ;;  %v5004_v53 = vpop.permute.xlu0 %5003 }
0x1558   :  { %12059 = vpow2.f32 %v9918_v50  ;;  %v5013_v55 = vadd.f32 %v5004_v53, %v13656_v33 }
0x1559   :  { %v12050_v58 = vpop.eup %12049  ;;  %v9921_v59 = vmul.f32 -1.442695, %v5014_v45 }
0x155a   :  { %v12052_v62 = vpop.eup %12051  ;;  %v4984_v37 = vadd.f32 1.0, %v12050_v58  ;;  %v9920_v63 = vmul.f32 -1.442695, %v5013_v55 }
0x155b   :  { %v4983_v6 = vadd.f32 1.0, %v12052_v62  ;;  %12061 = vpow2.f32 %v9921_v59 }
0x155c   :  { %12063 = vrcp.f32 %v4984_v37  ;;  %v5050_v34 = vpop.permute.xlu1 %5049 }
0x155d   :  { %v12054_v7 = vpop.eup %12053  ;;  %12065 = vrcp.f32 %v4983_v6  ;;  %v5048_v1 = vpop.permute.xlu0 %5047 }
0x155e   :  { %v12056_v9 = vpop.eup %12055  ;;  %v4986_v10 = vadd.f32 1.0, %v12054_v7  ;;  %12067 = vpow2.f32 %v9920_v63 }
0x155f   :  { %v4985_v46 = vadd.f32 1.0, %v12056_v9 }
0x1560   :  { %12069 = vrcp.f32 %v4986_v10  ;;  %v5054_v31 = vpop.permute.xlu1 %5053 }
0x1561   :  { %v12058_v0 = vpop.eup %12057  ;;  %12071 = vrcp.f32 %v4985_v46  ;;  %v5052_v50 = vpop.permute.xlu0 %5051 }
0x1562   :  { %v12060_v30 = vpop.eup %12059  ;;  %v5028_v20 = vadd.f32 1.0, %v12058_v0 }
0x1563   :  { %v5027_v52 = vadd.f32 1.0, %v12060_v30 }
0x1564   :  { %12073 = vrcp.f32 %v5028_v20  ;;  %v5082_v59 = vpop.permute.xlu1 %5081 }
0x1565   :  { %v12062_v48 = vpop.eup %12061  ;;  %12075 = vrcp.f32 %v5027_v52  ;;  %v5080_v37 = vpop.permute.xlu0 %5079 }
0x1566   :  { %v12064_v49 = vpop.eup %12063  ;;  %v5030_v56 = vadd.f32 1.0, %v12062_v48 }
0x1567   :  { %v12066_v61 = vpop.eup %12065  ;;  %v5060_v36 = vmul.f32 %v12064_v49, %v5050_v34 }
0x1568   :  { %v12068_v3 = vpop.eup %12067  ;;  %v5059_v5 = vmul.f32 %v12066_v61, %v5048_v1  ;;  %12077 = vrcp.f32 %v5030_v56  ;;  %v5086_v1 = vpop.permute.xlu1 %5085 }
0x1569   :  { %v5029_v12 = vadd.f32 1.0, %v12068_v3  ;;  %v5064_v51 = vadd.f32 %v5060_v36, %v13690_v28 }
0x156a   :  { %v12070_v29 = vpop.eup %12069  ;;  %v5063_v14 = vadd.f32 %v5059_v5, %v13697_v60  ;;  %v5084_v5 = vpop.permute.xlu0 %5083 }
0x156b   :  { %v12072_v38 = vpop.eup %12071  ;;  %12079 = vrcp.f32 %v5029_v12  ;;  %v5062_v17 = vmul.f32 %v12070_v29, %v5054_v31 }
0x156c   :  { %12081 = vtanh.f32 %v5064_v51  ;;  %v5061_v23 = vmul.f32 %v12072_v38, %v5052_v50 }
0x156d   :  { %12083 = vtanh.f32 %v5063_v14  ;;  %v5066_v45 = vadd.f32 %v5062_v17, %v13706_v54 }
0x156e   :  { %v5065_v53 = vadd.f32 %v5061_v23, %v13709_v22  ;;  %v12074_v55 = vpop.eup %12073 }
0x156f   :  { %12085 = vtanh.f32 %v5066_v45  ;;  %v12076_v58 = vpop.eup %12075  ;;  %v5072_v6 = vsub.f32 1.0, %v12074_v55  ;;  %v5092_v0 = vmul.f32 %v12074_v55, %v5082_v59 }
0x1570   :  { %12087 = vtanh.f32 %v5065_v53  ;;  %v5071_v9 = vsub.f32 1.0, %v12076_v58  ;;  %v5091_v20 = vmul.f32 %v12076_v58, %v5080_v37  ;;  %v13884_v37 = vld [vmem:[%s15586_s12 + $0x10] sm:$0xff] }
0x1572   :  { %v12078_v62 = vpop.eup %12077 }
0x1573   :  { %v5074_v34 = vsub.f32 1.0, %v12078_v62  ;;  %v5094_v3 = vmul.f32 %v12078_v62, %v5086_v1  ;;  %v13877_v62 = vld [vmem:[%s15586_s12 + $0x8] sm:$0xff] }
0x1575   :  { %v12080_v63 = vpop.eup %12079 }
0x1576   :  { %v12082_v7 = vpop.eup %12081  ;;  %v5073_v49 = vsub.f32 1.0, %v12080_v63  ;;  %v5093_v51 = vmul.f32 %v12080_v63, %v5084_v5  ;;  %v13891_v63 = vld [vmem:[%s15586_s12 + $0x18] sm:$0xff] }
0x1577   :  { %v12084_v10 = vpop.eup %12083  ;;  %v5076_v46 = vmul.f32 %v12082_v7, %v5072_v6  ;;  %v13898_v6 = vld [vmem:[%s15586_s12 + $0x20] sm:$0xff]  ;;  %v13905_v7 = vld [vmem:[%s15586_s12 + $0x28] sm:$0xff] }
0x1578   :  { %v5075_v30 = vmul.f32 %v12084_v10, %v5071_v9  ;;  %v13912_v9 = vld [vmem:[%s15586_s12 + $0x30] sm:$0xff]  ;;  %v13919_v10 = vld [vmem:[%s15586_s12 + $0x38] sm:$0xff] }
0x1579   :  { %v12086_v48 = vpop.eup %12085  ;;  %v13860_v52 = vadd.f32 %v5092_v0, %v5076_v46  ;;  %v13926_v46 = vld [vmem:[%s15586_s12 + $0x40] sm:$0xff]  ;;  %v13933_v0 = vld [vmem:[%s15586_s12 + $0x48] sm:$0xff] }
0x157a   :  { %v12088_v56 = vpop.eup %12087  ;;  %v13862_v61 = vadd.f32 %v5091_v20, %v5075_v30  ;;  %v5078_v36 = vmul.f32 %v12086_v48, %v5074_v34  ;;  %v13940_v30 = vld [vmem:[%s15586_s12 + $0x50] sm:$0xff]  ;;  %v13947_v20 = vld [vmem:[%s15586_s12 + $0x58] sm:$0xff]  ;;  %v13954_v34 = vld [vmem:[%s15586_s12] sm:$0xff] }
0x157b   :  { %15665 = vst [vmem:[#allocation22_spill] sm:$0xff] %v13860_v52  ;;  %v5077_v12 = vmul.f32 %v12088_v56, %v5073_v49 }
0x157c   :  { %15666 = vst [vmem:[#allocation23_spill] sm:$0xff] %v13862_v61  ;;  %v13864_v29 = vadd.f32 %v5094_v3, %v5078_v36  ;;  %v11818_v14 = vpack.i.bf16 %v13860_v52, %v13862_v61 }
0x157d   :  { %v13868_v31 = vadd.f32 %v5093_v51, %v5077_v12 }
0x157e   :  { %15667 = vst [vmem:[#allocation24_spill] sm:$0xff] %v13864_v29  ;;  %11819 = vrot.lane.b32.xlu0 %v11818_v14, %s12685_s3 }
0x157f   :  { %15668 = vst [vmem:[#allocation25_spill] sm:$0xff] %v13868_v31  ;;  %v11823_v38 = vpack.i.bf16 %v13864_v29, %v13868_v31 }
0x1581   :  { %11824 = vrot.lane.b32.xlu1 %v11823_v38, %s12685_s3 }
0x15f0   :  { %v11820_v17 = vpop.permute.xlu0 %11819 }
0x15f1   :  { %v11822_v50 = vunpack.i.h.bf16 %v11820_v17  ;;  %v11821_v23 = vunpack.i.l.bf16 %v11820_v17 }
0x15f3   :  { %v11825_v45 = vpop.permute.xlu1 %11824  ;;  %v11663_v53 = vpack.c.bf16 %v11822_v50, %v11821_v23 }
0x15f4   :  { %v11827_v55 = vunpack.i.h.bf16 %v11825_v45  ;;  %v11826_v58 = vunpack.i.l.bf16 %v11825_v45 }
0x15f5   :  { %11664 = vmatprep.subr.bf16.mxu0 %v11663_v53 }
0x15f6   :  { %11666 = vmatpush3.bf16.msra.mxu0 %v11663_v53  ;;  %v11667_v59 = vpack.c.bf16 %v11827_v55, %v11826_v58 }
0x15f8   :  { %11668 = vmatprep.subr.bf16.mxu0 %v11667_v59 }
0x15fa   :  { %11670 = vmatpush3.bf16.msra.mxu0 %v11667_v59 }
0x15fd   :  { %11100 = vmatmul.mubr.msk.f32.vlgmr.msra.gmra.mrb[54].mxu0 %vm1507_vm9, %v13877_v62 }
0x15fe   :  { %11102 = vmatprep.mubr.msk.f32.mxu0 %vm1507_vm9, %v13884_v37 }
0x1601   :  { %11103 = vmatmul.mubr.msk.f32.gmra.mrb[56].mxu0 %vm1507_vm9, %v13891_v63 }
0x1602   :  { %11105 = vmatprep.mubr.msk.f32.mxu0 %vm1507_vm9, %v13898_v6 }
0x1605   :  { %11106 = vmatmul.mubr.msk.f32.gmra.mrb[58].mxu0 %vm1507_vm9, %v13905_v7 }
0x1606   :  { %11108 = vmatprep.mubr.msk.f32.mxu0 %vm1507_vm9, %v13912_v9 }
0x1609   :  { %11109 = vmatmul.mubr.msk.f32.gmra.mrb[60].mxu0 %vm1507_vm9, %v13919_v10 }
0x160a   :  { %11111 = vmatprep.mubr.msk.f32.mxu0 %vm1507_vm9, %v13926_v46 }
0x160d   :  { %11112 = vmatmul.mubr.msk.f32.gmra.mrb[62].mxu0 %vm1507_vm9, %v13933_v0 }
0x160e   :  { %11114 = vmatprep.mubr.msk.f32.mxu0 %vm1507_vm9, %v13940_v30 }
0x1611   :  { %11115 = vmatmul.mubr.msk.f32.gmra.mrb[64].mxu0 %vm1507_vm9, %v13947_v20 }
0x1612   :  { %11151 = vmatprep.mubr.msk.f32.mxu0 %vm1507_vm9, %v13954_v34 }
0x16d0   :  { %v11101_v48 = vpop.f32.mrb[54].mxu0 }
0x16d1   :  { %5294 = vrot.lane.b32.xlu1 %v11101_v48, %s12690_s26  ;;  %v5229_v1 = vpop.f32.mrb[55].mxu0 }
0x16d2   :  { %5292 = vrot.lane.b32.xlu0 %v5229_v1, %s12690_s26 }
0x16d4   :  { %v11104_v49 = vpop.f32.mrb[56].mxu0 }
0x16d5   :  { %5298 = vrot.lane.b32.xlu1 %v11104_v49, %s12690_s26  ;;  %v5239_v56 = vpop.f32.mrb[57].mxu0 }
0x16d6   :  { %5296 = vrot.lane.b32.xlu0 %v5239_v56, %s12690_s26 }
0x16d8   :  { %v11107_v36 = vpop.f32.mrb[58].mxu0 }
0x16d9   :  { %5338 = vrot.lane.b32.xlu1 %v11107_v36, %s12690_s26  ;;  %v5249_v3 = vpop.f32.mrb[59].mxu0 }
0x16da   :  { %5336 = vrot.lane.b32.xlu0 %v5249_v3, %s12690_s26 }
0x16dc   :  { %v11110_v5 = vpop.f32.mrb[60].mxu0 }
0x16dd   :  { %5342 = vrot.lane.b32.xlu1 %v11110_v5, %s12690_s26  ;;  %v5259_v12 = vpop.f32.mrb[61].mxu0 }
0x16de   :  { %5340 = vrot.lane.b32.xlu0 %v5259_v12, %s12690_s26 }
0x16e0   :  { %v11113_v51 = vpop.f32.mrb[62].mxu0 }
0x16e1   :  { %v5377_v14 = vadd.f32 %v11113_v51, %v13665_v13  ;;  %v5269_v38 = vpop.f32.mrb[63].mxu0 }
0x16e2   :  { %v5376_v17 = vadd.f32 %v5269_v38, %v13670_v15 }
0x16e3   :  { %5386 = vrot.lane.b32.xlu1 %v5377_v14, %s12690_s26 }
0x16e4   :  { %5384 = vrot.lane.b32.xlu0 %v5376_v17, %s12690_s26  ;;  %v11116_v50 = vpop.f32.mrb[64].mxu0 }
0x16e5   :  { %v5379_v23 = vadd.f32 %v11116_v50, %v13683_v25  ;;  %v5279_v45 = vpop.f32.mrb[65].mxu0 }
0x16e6   :  { %v5378_v53 = vadd.f32 %v5279_v45, %v13688_v32 }
0x16e7   :  { %5390 = vrot.lane.b32.xlu1 %v5379_v23, %s12690_s26 }
0x16e8   :  { %5388 = vrot.lane.b32.xlu0 %v5378_v53, %s12690_s26 }
0x16eb   :  { %5418 = vrot.lane.b32.xlu1 %v13860_v52, %s12684_s23 }
0x16ec   :  { %5416 = vrot.lane.b32.xlu0 %v13862_v61, %s12684_s23 }
0x16ef   :  { %5422 = vrot.lane.b32.xlu1 %v13864_v29, %s12684_s23 }
0x16f0   :  { %5420 = vrot.lane.b32.xlu0 %v13868_v31, %s12684_s23 }
0x1743   :  { %v5295_v13 = vpop.permute.xlu1 %5294 }
0x1744   :  { %v5305_v15 = vadd.f32 %v5295_v13, %v13630_v26  ;;  %v5293_v25 = vpop.permute.xlu0 %5292 }
0x1745   :  { %v5304_v32 = vadd.f32 %v5293_v25, %v13632_v57 }
0x1746   :  { %v9935_v55 = vmul.f32 -1.442695, %v5305_v15 }
0x1747   :  { %v9934_v58 = vmul.f32 -1.442695, %v5304_v32  ;;  %v5299_v59 = vpop.permute.xlu1 %5298 }
0x1748   :  { %12089 = vpow2.f32 %v9935_v55  ;;  %v5307_v48 = vadd.f32 %v5299_v59, %v13638_v2  ;;  %v5297_v1 = vpop.permute.xlu0 %5296 }
0x1749   :  { %12091 = vpow2.f32 %v9934_v58  ;;  %v5306_v49 = vadd.f32 %v5297_v1, %v13640_v8 }
0x174a   :  { %v9937_v56 = vmul.f32 -1.442695, %v5307_v48 }
0x174b   :  { %v9936_v36 = vmul.f32 -1.442695, %v5306_v49  ;;  %v5339_v3 = vpop.permute.xlu1 %5338 }
0x174c   :  { %12093 = vpow2.f32 %v9937_v56  ;;  %v5349_v5 = vadd.f32 %v5339_v3, %v13646_v16  ;;  %v5337_v12 = vpop.permute.xlu0 %5336 }
0x174d   :  { %12095 = vpow2.f32 %v9936_v36  ;;  %v5348_v51 = vadd.f32 %v5337_v12, %v13648_v21 }
0x174e   :  { %v9939_v14 = vmul.f32 -1.442695, %v5349_v5 }
0x174f   :  { %v9938_v38 = vmul.f32 -1.442695, %v5348_v51  ;;  %v5343_v17 = vpop.permute.xlu1 %5342 }
0x1750   :  { %12097 = vpow2.f32 %v9939_v14  ;;  %v5351_v50 = vadd.f32 %v5343_v17, %v13654_v27  ;;  %v5341_v23 = vpop.permute.xlu0 %5340 }
0x1751   :  { %12099 = vpow2.f32 %v9938_v38  ;;  %v5350_v45 = vadd.f32 %v5341_v23, %v13656_v33 }
0x1752   :  { %v12090_v53 = vpop.eup %12089  ;;  %v9941_v13 = vmul.f32 -1.442695, %v5351_v50 }
0x1753   :  { %v12092_v15 = vpop.eup %12091  ;;  %v5321_v25 = vadd.f32 1.0, %v12090_v53  ;;  %v9940_v32 = vmul.f32 -1.442695, %v5350_v45 }
0x1754   :  { %v5320_v55 = vadd.f32 1.0, %v12092_v15  ;;  %12101 = vpow2.f32 %v9941_v13 }
0x1755   :  { %12103 = vrcp.f32 %v5321_v25  ;;  %v5387_v3 = vpop.permute.xlu1 %5386 }
0x1756   :  { %v12094_v58 = vpop.eup %12093  ;;  %12105 = vrcp.f32 %v5320_v55  ;;  %v5385_v51 = vpop.permute.xlu0 %5384 }
0x1757   :  { %v12096_v59 = vpop.eup %12095  ;;  %v5323_v48 = vadd.f32 1.0, %v12094_v58  ;;  %12107 = vpow2.f32 %v9940_v32 }
0x1758   :  { %v5322_v1 = vadd.f32 1.0, %v12096_v59 }
0x1759   :  { %12109 = vrcp.f32 %v5323_v48  ;;  %v5391_v32 = vpop.permute.xlu1 %5390 }
0x175a   :  { %v12098_v49 = vpop.eup %12097  ;;  %12111 = vrcp.f32 %v5322_v1  ;;  %v5389_v59 = vpop.permute.xlu0 %5388 }
0x175b   :  { %v12100_v56 = vpop.eup %12099  ;;  %v5365_v36 = vadd.f32 1.0, %v12098_v49 }
0x175c   :  { %v5364_v12 = vadd.f32 1.0, %v12100_v56 }
0x175d   :  { %12113 = vrcp.f32 %v5365_v36 }
0x175e   :  { %v12102_v5 = vpop.eup %12101  ;;  %12115 = vrcp.f32 %v5364_v12  ;;  %v5417_v12 = vpop.permute.xlu0 %5416 }
0x175f   :  { %v12104_v14 = vpop.eup %12103  ;;  %v5367_v38 = vadd.f32 1.0, %v12102_v5 }
0x1760   :  { %v12106_v17 = vpop.eup %12105  ;;  %v5397_v50 = vmul.f32 %v12104_v14, %v5387_v3  ;;  %v5419_v3 = vpop.permute.xlu1 %5418 }
0x1761   :  { %v12108_v23 = vpop.eup %12107  ;;  %v5396_v45 = vmul.f32 %v12106_v17, %v5385_v51  ;;  %12117 = vrcp.f32 %v5367_v38 }
0x1762   :  { %v5366_v53 = vadd.f32 1.0, %v12108_v23  ;;  %v5401_v13 = vadd.f32 %v5397_v50, %v13690_v28  ;;  %v5421_v29 = vpop.permute.xlu0 %5420 }
0x1763   :  { %v12110_v15 = vpop.eup %12109  ;;  %v5400_v25 = vadd.f32 %v5396_v45, %v13697_v60 }
0x1764   :  { %v12112_v55 = vpop.eup %12111  ;;  %12119 = vrcp.f32 %v5366_v53  ;;  %v5399_v58 = vmul.f32 %v12110_v15, %v5391_v32 }
0x1765   :  { %12121 = vtanh.f32 %v5401_v13  ;;  %v5398_v48 = vmul.f32 %v12112_v55, %v5389_v59  ;;  %v5423_v55 = vpop.permute.xlu1 %5422 }
0x1766   :  { %12123 = vtanh.f32 %v5400_v25  ;;  %v5403_v1 = vadd.f32 %v5399_v58, %v13706_v54 }
0x1767   :  { %v5402_v49 = vadd.f32 %v5398_v48, %v13709_v22  ;;  %v12114_v56 = vpop.eup %12113 }
0x1768   :  { %12125 = vtanh.f32 %v5403_v1  ;;  %v12116_v36 = vpop.eup %12115  ;;  %v5409_v14 = vsub.f32 1.0, %v12114_v56  ;;  %v5429_v45 = vmul.f32 %v12114_v56, %v5419_v3 }
0x1769   :  { %12127 = vtanh.f32 %v5402_v49  ;;  %v5408_v17 = vsub.f32 1.0, %v12116_v36  ;;  %v5428_v13 = vmul.f32 %v12116_v36, %v5417_v12 }
0x176b   :  { %v12118_v5 = vpop.eup %12117 }
0x176c   :  { %v5411_v15 = vsub.f32 1.0, %v12118_v5  ;;  %v5431_v49 = vmul.f32 %v12118_v5, %v5423_v55 }
0x176e   :  { %v12120_v51 = vpop.eup %12119 }
0x176f   :  { %v12122_v38 = vpop.eup %12121  ;;  %v5410_v58 = vsub.f32 1.0, %v12120_v51  ;;  %v5430_v52 = vmul.f32 %v12120_v51, %v5421_v29 }
0x1770   :  { %v12124_v50 = vpop.eup %12123  ;;  %v5413_v23 = vmul.f32 %v12122_v38, %v5409_v14 }
0x1771   :  { %v5412_v53 = vmul.f32 %v12124_v50, %v5408_v17 }
0x1772   :  { %v12126_v25 = vpop.eup %12125  ;;  %v13994_v32 = vadd.f32 %v5429_v45, %v5413_v23 }
0x1773   :  { %v12128_v59 = vpop.eup %12127  ;;  %v13996_v48 = vadd.f32 %v5428_v13, %v5412_v53  ;;  %v5415_v1 = vmul.f32 %v12126_v25, %v5411_v15 }
0x1774   :  { %15669 = vst [vmem:[#allocation26_spill] sm:$0xff] %v13994_v32  ;;  %v5414_v31 = vmul.f32 %v12128_v59, %v5410_v58  ;;  %v14043_v58 = vld [vmem:[%s15588_s14 + $0x8] sm:$0xff] }
0x1775   :  { %15670 = vst [vmem:[#allocation27_spill] sm:$0xff] %v13996_v48  ;;  %v13998_v61 = vadd.f32 %v5431_v49, %v5415_v1  ;;  %v11828_v56 = vpack.i.bf16 %v13994_v32, %v13996_v48  ;;  %v14049_v49 = vld [vmem:[%s15588_s14] sm:$0xff] }
0x1776   :  { %v14002_v36 = vadd.f32 %v5430_v52, %v5414_v31 }
0x1777   :  { %15671 = vst [vmem:[#allocation28_spill] sm:$0xff] %v13998_v61  ;;  %11829 = vrot.lane.b32.xlu0 %v11828_v56, %s12691_s10 }
0x1778   :  { %15672 = vst [vmem:[#allocation29_spill] sm:$0xff] %v14002_v36  ;;  %v11833_v3 = vpack.i.bf16 %v13998_v61, %v14002_v36 }
0x177a   :  { %11834 = vrot.lane.b32.xlu1 %v11833_v3, %s12691_s10 }
0x17e9   :  { %v11830_v12 = vpop.permute.xlu0 %11829 }
0x17ea   :  { %v11832_v5 = vunpack.i.h.bf16 %v11830_v12  ;;  %v11831_v14 = vunpack.i.l.bf16 %v11830_v12  ;;  %v14057_v12 = vld [vmem:[%s15588_s14 + $0x18] sm:$0xff] }
0x17ec   :  { %v11835_v38 = vpop.permute.xlu1 %11834  ;;  %v11671_v29 = vpack.c.bf16 %v11832_v5, %v11831_v14 }
0x17ed   :  { %v11837_v51 = vunpack.i.h.bf16 %v11835_v38  ;;  %v11836_v17 = vunpack.i.l.bf16 %v11835_v38  ;;  %v14063_v38 = vld [vmem:[%s15588_s14 + $0x10] sm:$0xff] }
0x17ee   :  { %11672 = vmatprep.subr.bf16.mxu1 %v11671_v29 }
0x17ef   :  { %11674 = vmatpush3.bf16.msra.mxu1 %v11671_v29  ;;  %v11675_v50 = vpack.c.bf16 %v11837_v51, %v11836_v17 }
0x17f1   :  { %11676 = vmatprep.subr.bf16.mxu1 %v11675_v50 }
0x17f3   :  { %11678 = vmatpush3.bf16.msra.mxu1 %v11675_v50 }
0x17f6   :  { %11126 = vmatmul.mubr.msk.f32.vlgmr.msra.gmra.mrb[74].mxu1 %vm1507_vm9, %v13877_v62 }
0x17f7   :  { %11128 = vmatprep.mubr.msk.f32.mxu1 %vm1507_vm9, %v13884_v37 }
0x17fa   :  { %11129 = vmatmul.mubr.msk.f32.gmra.mrb[76].mxu1 %vm1507_vm9, %v13891_v63 }
0x17fb   :  { %11131 = vmatprep.mubr.msk.f32.mxu1 %vm1507_vm9, %v13898_v6 }
0x17fe   :  { %11132 = vmatmul.mubr.msk.f32.gmra.mrb[78].mxu1 %vm1507_vm9, %v13905_v7 }
0x17ff   :  { %11134 = vmatprep.mubr.msk.f32.mxu1 %vm1507_vm9, %v13912_v9 }
0x1802   :  { %11135 = vmatmul.mubr.msk.f32.gmra.mrb[80].mxu1 %vm1507_vm9, %v13919_v10 }
0x1803   :  { %11137 = vmatprep.mubr.msk.f32.mxu1 %vm1507_vm9, %v13926_v46 }
0x1806   :  { %11138 = vmatmul.mubr.msk.f32.gmra.mrb[82].mxu1 %vm1507_vm9, %v13933_v0 }
0x1807   :  { %11140 = vmatprep.mubr.msk.f32.mxu1 %vm1507_vm9, %v13940_v30 }
0x180a   :  { %11141 = vmatmul.mubr.msk.f32.gmra.mrb[84].mxu1 %vm1507_vm9, %v13947_v20 }
0x180b   :  { %11177 = vmatprep.mubr.msk.f32.mxu1 %vm1507_vm9, %v13954_v34 }
0x18c9   :  { %v11127_v52 = vpop.f32.mrb[74].mxu1 }
0x18ca   :  { %5631 = vrot.lane.b32.xlu1 %v11127_v52, %s12692_s4  ;;  %v5566_v31 = vpop.f32.mrb[75].mxu1 }
0x18cb   :  { %5629 = vrot.lane.b32.xlu0 %v5566_v31, %s12692_s4 }
0x18cd   :  { %v11130_v23 = vpop.f32.mrb[76].mxu1 }
0x18ce   :  { %5635 = vrot.lane.b32.xlu1 %v11130_v23, %s12692_s4  ;;  %v5576_v45 = vpop.f32.mrb[77].mxu1 }
0x18cf   :  { %5633 = vrot.lane.b32.xlu0 %v5576_v45, %s12692_s4 }
0x18d1   :  { %v11133_v53 = vpop.f32.mrb[78].mxu1 }
0x18d2   :  { %5675 = vrot.lane.b32.xlu1 %v11133_v53, %s12692_s4  ;;  %v5586_v13 = vpop.f32.mrb[79].mxu1 }
0x18d3   :  { %5673 = vrot.lane.b32.xlu0 %v5586_v13, %s12692_s4 }
0x18d5   :  { %v11136_v15 = vpop.f32.mrb[80].mxu1 }
0x18d6   :  { %5679 = vrot.lane.b32.xlu1 %v11136_v15, %s12692_s4  ;;  %v5596_v25 = vpop.f32.mrb[81].mxu1 }
0x18d7   :  { %5677 = vrot.lane.b32.xlu0 %v5596_v25, %s12692_s4 }
0x18d9   :  { %v11139_v55 = vpop.f32.mrb[82].mxu1 }
0x18da   :  { %v5714_v59 = vadd.f32 %v14043_v58, %v11139_v55  ;;  %v5606_v1 = vpop.f32.mrb[83].mxu1 }
0x18db   :  { %v5713_v56 = vadd.f32 %v14049_v49, %v5606_v1 }
0x18dc   :  { %5723 = vrot.lane.b32.xlu1 %v5714_v59, %s12692_s4 }
0x18dd   :  { %5721 = vrot.lane.b32.xlu0 %v5713_v56, %s12692_s4  ;;  %v11142_v3 = vpop.f32.mrb[84].mxu1 }
0x18de   :  { %v5716_v5 = vadd.f32 %v14057_v12, %v11142_v3  ;;  %v5616_v14 = vpop.f32.mrb[85].mxu1 }
0x18df   :  { %v5715_v29 = vadd.f32 %v14063_v38, %v5616_v14 }
0x18e0   :  { %5727 = vrot.lane.b32.xlu1 %v5716_v5, %s12692_s4 }
0x18e1   :  { %5725 = vrot.lane.b32.xlu0 %v5715_v29, %s12692_s4 }
0x18e4   :  { %5755 = vrot.lane.b32.xlu1 %v13994_v32, %s12684_s23 }
0x18e5   :  { %5753 = vrot.lane.b32.xlu0 %v13996_v48, %s12684_s23 }
0x18e8   :  { %5759 = vrot.lane.b32.xlu1 %v13998_v61, %s12684_s23 }
0x18e9   :  { %5757 = vrot.lane.b32.xlu0 %v14002_v36, %s12684_s23 }
0x193c   :  { %v5632_v51 = vpop.permute.xlu1 %5631 }
0x193d   :  { %v5642_v17 = vadd.f32 %v5632_v51, %v13630_v26  ;;  %v5630_v50 = vpop.permute.xlu0 %5629 }
0x193e   :  { %v5641_v52 = vadd.f32 %v5630_v50, %v13632_v57 }
0x193f   :  { %v9955_v31 = vmul.f32 -1.442695, %v5642_v17 }
0x1940   :  { %v9954_v23 = vmul.f32 -1.442695, %v5641_v52  ;;  %v5636_v45 = vpop.permute.xlu1 %5635 }
0x1941   :  { %12129 = vpow2.f32 %v9955_v31  ;;  %v5644_v53 = vadd.f32 %v5636_v45, %v13638_v2  ;;  %v5634_v13 = vpop.permute.xlu0 %5633 }
0x1942   :  { %12131 = vpow2.f32 %v9954_v23  ;;  %v5643_v15 = vadd.f32 %v5634_v13, %v13640_v8 }
0x1943   :  { %v9957_v25 = vmul.f32 -1.442695, %v5644_v53 }
0x1944   :  { %v9956_v55 = vmul.f32 -1.442695, %v5643_v15  ;;  %v5676_v59 = vpop.permute.xlu1 %5675 }
0x1945   :  { %12133 = vpow2.f32 %v9957_v25  ;;  %v5686_v1 = vadd.f32 %v5676_v59, %v13646_v16  ;;  %v5674_v56 = vpop.permute.xlu0 %5673 }
0x1946   :  { %12135 = vpow2.f32 %v9956_v55  ;;  %v5685_v3 = vadd.f32 %v5674_v56, %v13648_v21 }
0x1947   :  { %v9959_v5 = vmul.f32 -1.442695, %v5686_v1 }
0x1948   :  { %v9958_v14 = vmul.f32 -1.442695, %v5685_v3  ;;  %v5680_v29 = vpop.permute.xlu1 %5679 }
0x1949   :  { %12137 = vpow2.f32 %v9959_v5  ;;  %v5688_v51 = vadd.f32 %v5680_v29, %v13654_v27  ;;  %v5678_v17 = vpop.permute.xlu0 %5677 }
0x194a   :  { %12139 = vpow2.f32 %v9958_v14  ;;  %v5687_v50 = vadd.f32 %v5678_v17, %v13656_v33 }
0x194b   :  { %v12130_v52 = vpop.eup %12129  ;;  %v9961_v31 = vmul.f32 -1.442695, %v5688_v51 }
0x194c   :  { %v12132_v23 = vpop.eup %12131  ;;  %v5658_v45 = vadd.f32 1.0, %v12130_v52  ;;  %v9960_v53 = vmul.f32 -1.442695, %v5687_v50 }
0x194d   :  { %v5657_v13 = vadd.f32 1.0, %v12132_v23  ;;  %12141 = vpow2.f32 %v9961_v31 }
0x194e   :  { %12143 = vrcp.f32 %v5658_v45  ;;  %v5724_v5 = vpop.permute.xlu1 %5723 }
0x194f   :  { %v12134_v15 = vpop.eup %12133  ;;  %12145 = vrcp.f32 %v5657_v13  ;;  %v5722_v51 = vpop.permute.xlu0 %5721 }
0x1950   :  { %v12136_v25 = vpop.eup %12135  ;;  %v5660_v55 = vadd.f32 1.0, %v12134_v15  ;;  %12147 = vpow2.f32 %v9960_v53 }
0x1951   :  { %v5659_v59 = vadd.f32 1.0, %v12136_v25 }
0x1952   :  { %12149 = vrcp.f32 %v5660_v55  ;;  %v5728_v55 = vpop.permute.xlu1 %5727 }
0x1953   :  { %v12138_v1 = vpop.eup %12137  ;;  %12151 = vrcp.f32 %v5659_v59 }
0x1954   :  { %v12140_v56 = vpop.eup %12139  ;;  %v5702_v3 = vadd.f32 1.0, %v12138_v1 }
0x1955   :  { %v5701_v29 = vadd.f32 1.0, %v12140_v56  ;;  %v5726_v56 = vpop.permute.xlu0 %5725 }
0x1956   :  { %12153 = vrcp.f32 %v5702_v3 }
0x1957   :  { %v12142_v14 = vpop.eup %12141  ;;  %12155 = vrcp.f32 %v5701_v29 }
0x1958   :  { %v12144_v17 = vpop.eup %12143  ;;  %v5704_v50 = vadd.f32 1.0, %v12142_v14 }
0x1959   :  { %v12146_v52 = vpop.eup %12145  ;;  %v5734_v31 = vmul.f32 %v12144_v17, %v5724_v5  ;;  %v5756_v17 = vpop.permute.xlu1 %5755 }
0x195a   :  { %v12148_v23 = vpop.eup %12147  ;;  %v5733_v45 = vmul.f32 %v12146_v52, %v5722_v51  ;;  %12157 = vrcp.f32 %v5704_v50  ;;  %v5754_v52 = vpop.permute.xlu0 %5753 }
0x195b   :  { %v5703_v13 = vadd.f32 1.0, %v12148_v23  ;;  %v5738_v53 = vadd.f32 %v5734_v31, %v13690_v28 }
0x195c   :  { %v12150_v15 = vpop.eup %12149  ;;  %v5737_v25 = vadd.f32 %v5733_v45, %v13697_v60 }
0x195d   :  { %v12152_v59 = vpop.eup %12151  ;;  %12159 = vrcp.f32 %v5703_v13  ;;  %v5736_v1 = vmul.f32 %v12150_v15, %v5728_v55 }
0x195e   :  { %12161 = vtanh.f32 %v5738_v53  ;;  %v5735_v14 = vmul.f32 %v12152_v59, %v5726_v56  ;;  %v5758_v24 = vpop.permute.xlu0 %5757 }
0x195f   :  { %12163 = vtanh.f32 %v5737_v25  ;;  %v5740_v5 = vadd.f32 %v5736_v1, %v13706_v54 }
0x1960   :  { %v5739_v3 = vadd.f32 %v5735_v14, %v13709_v22  ;;  %v12154_v29 = vpop.eup %12153  ;;  %v5760_v14 = vpop.permute.xlu1 %5759 }
0x1961   :  { %12165 = vtanh.f32 %v5740_v5  ;;  %v12156_v51 = vpop.eup %12155  ;;  %v5746_v23 = vsub.f32 1.0, %v12154_v29  ;;  %v5766_v53 = vmul.f32 %v12154_v29, %v5756_v17 }
0x1962   :  { %12167 = vtanh.f32 %v5739_v3  ;;  %v5745_v13 = vsub.f32 1.0, %v12156_v51  ;;  %v5765_v25 = vmul.f32 %v12156_v51, %v5754_v52 }
0x1964   :  { %v12158_v50 = vpop.eup %12157 }
0x1965   :  { %v5748_v56 = vsub.f32 1.0, %v12158_v50  ;;  %v5768_v48 = vmul.f32 %v12158_v50, %v5760_v14 }
0x1967   :  { %v12160_v31 = vpop.eup %12159 }
0x1968   :  { %v12162_v45 = vpop.eup %12161  ;;  %v5747_v5 = vsub.f32 1.0, %v12160_v31  ;;  %v5767_v4 = vmul.f32 %v12160_v31, %v5758_v24 }
0x1969   :  { %v12164_v15 = vpop.eup %12163  ;;  %v5750_v55 = vmul.f32 %v12162_v45, %v5746_v23 }
0x196a   :  { %v5749_v59 = vmul.f32 %v12164_v15, %v5745_v13 }
0x196b   :  { %v12166_v1 = vpop.eup %12165  ;;  %v14088_v61 = vadd.f32 %v5766_v53, %v5750_v55 }
0x196c   :  { %v12168_v3 = vpop.eup %12167  ;;  %v14090_v36 = vadd.f32 %v5765_v25, %v5749_v59  ;;  %v5752_v32 = vmul.f32 %v12166_v1, %v5748_v56 }
0x196d   :  { %15673 = vst [vmem:[#allocation30_spill] sm:$0xff] %v14088_v61  ;;  %v5751_v11 = vmul.f32 %v12168_v3, %v5747_v5 }
0x196e   :  { %15674 = vst [vmem:[#allocation31_spill] sm:$0xff] %v14090_v36  ;;  %v14092_v19 = vadd.f32 %v5768_v48, %v5752_v32  ;;  %v11838_v29 = vpack.i.bf16 %v14088_v61, %v14090_v36 }
0x196f   :  { %v14096_v51 = vadd.f32 %v5767_v4, %v5751_v11 }
0x1970   :  { %15675 = vst [vmem:[#allocation32_spill] sm:$0xff] %v14092_v19  ;;  %11839 = vrot.lane.b32.xlu0 %v11838_v29, %s12693_s2 }
0x1971   :  { %15676 = vst [vmem:[#allocation33_spill] sm:$0xff] %v14096_v51  ;;  %v11843_v17 = vpack.i.bf16 %v14092_v19, %v14096_v51 }
0x1973   :  { %11844 = vrot.lane.b32.xlu1 %v11843_v17, %s12693_s2 }
0x19e2   :  { %v11840_v52 = vpop.permute.xlu0 %11839 }
0x19e3   :  { %v11842_v50 = vunpack.i.h.bf16 %v11840_v52  ;;  %v11841_v23 = vunpack.i.l.bf16 %v11840_v52 }
0x19e5   :  { %v11845_v45 = vpop.permute.xlu1 %11844  ;;  %v11679_v24 = vpack.c.bf16 %v11842_v50, %v11841_v23 }
0x19e6   :  { %v11847_v32 = vunpack.i.h.bf16 %v11845_v45  ;;  %v11846_v48 = vunpack.i.l.bf16 %v11845_v45 }
0x19e7   :  { %11680 = vmatprep.subr.bf16.mxu0 %v11679_v24 }
0x19e8   :  { %11682 = vmatpush3.bf16.msra.mxu0 %v11679_v24  ;;  %v11683_v31 = vpack.c.bf16 %v11847_v32, %v11846_v48 }
0x19ea   :  { %11684 = vmatprep.subr.bf16.mxu0 %v11683_v31 }
0x19ec   :  { %11686 = vmatpush3.bf16.msra.mxu0 %v11683_v31 }
0x19ef   :  { %11152 = vmatmul.mubr.msk.f32.vlgmr.msra.gmra.mrb[66].mxu0 %vm1507_vm9, %v13877_v62 }
0x19f0   :  { %11154 = vmatprep.mubr.msk.f32.mxu0 %vm1507_vm9, %v13884_v37 }
0x19f3   :  { %11155 = vmatmul.mubr.msk.f32.gmra.mrb[68].mxu0 %vm1507_vm9, %v13891_v63 }
0x19f4   :  { %11157 = vmatprep.mubr.msk.f32.mxu0 %vm1507_vm9, %v13898_v6 }
0x19f7   :  { %11158 = vmatmul.mubr.msk.f32.gmra.mrb[70].mxu0 %vm1507_vm9, %v13905_v7 }
0x19f8   :  { %11160 = vmatprep.mubr.msk.f32.mxu0 %vm1507_vm9, %v13912_v9 }
0x19fb   :  { %11161 = vmatmul.mubr.msk.f32.gmra.mrb[72].mxu0 %vm1507_vm9, %v13919_v10 }
0x19fc   :  { %11163 = vmatprep.mubr.msk.f32.mxu0 %vm1507_vm9, %v13926_v46 }
0x19ff   :  { %11164 = vmatmul.mubr.msk.f32.gmra.mrb[74].mxu0 %vm1507_vm9, %v13933_v0 }
0x1a00   :  { %11166 = vmatprep.mubr.msk.f32.mxu0 %vm1507_vm9, %v13940_v30 }
0x1a03   :  { %11167 = vmatmul.mubr.msk.f32.gmra.mrb[76].mxu0 %vm1507_vm9, %v13947_v20 }
0x1a04   :  { %11203 = vmatprep.mubr.msk.f32.mxu0 %vm1507_vm9, %v13954_v34 }
0x1ac2   :  { %v11153_v4 = vpop.f32.mrb[66].mxu0 }
0x1ac3   :  { %5968 = vrot.lane.b32.xlu1 %v11153_v4, %s12694_s7  ;;  %v5903_v11 = vpop.f32.mrb[67].mxu0 }
0x1ac4   :  { %5966 = vrot.lane.b32.xlu0 %v5903_v11, %s12694_s7 }
0x1ac6   :  { %v11156_v62 = vpop.f32.mrb[68].mxu0 }
0x1ac7   :  { %5972 = vrot.lane.b32.xlu1 %v11156_v62, %s12694_s7  ;;  %v5913_v37 = vpop.f32.mrb[69].mxu0 }
0x1ac8   :  { %5970 = vrot.lane.b32.xlu0 %v5913_v37, %s12694_s7 }
0x1aca   :  { %v11159_v63 = vpop.f32.mrb[70].mxu0 }
0x1acb   :  { %6012 = vrot.lane.b32.xlu1 %v11159_v63, %s12694_s7  ;;  %v5923_v6 = vpop.f32.mrb[71].mxu0 }
0x1acc   :  { %6010 = vrot.lane.b32.xlu0 %v5923_v6, %s12694_s7 }
0x1ace   :  { %v11162_v7 = vpop.f32.mrb[72].mxu0 }
0x1acf   :  { %6016 = vrot.lane.b32.xlu1 %v11162_v7, %s12694_s7  ;;  %v5933_v9 = vpop.f32.mrb[73].mxu0 }
0x1ad0   :  { %6014 = vrot.lane.b32.xlu0 %v5933_v9, %s12694_s7 }
0x1ad2   :  { %v11165_v10 = vpop.f32.mrb[74].mxu0 }
0x1ad3   :  { %6839 = vrot.lane.b32.xlu1 %v13606_v35, %s12688_s5  ;;  %v5943_v46 = vpop.f32.mrb[75].mxu0  ;;  %v6051_v30 = vadd.f32 %v14043_v58, %v11165_v10 }
0x1ad4   :  { %6837 = vrot.lane.b32.xlu0 %v13608_v39, %s12688_s5  ;;  %v6050_v34 = vadd.f32 %v14049_v49, %v5943_v46 }
0x1ad6   :  { %v11168_v0 = vpop.f32.mrb[76].mxu0 }
0x1ad7   :  { %6843 = vrot.lane.b32.xlu1 %v13610_v40, %s12688_s5  ;;  %v5953_v20 = vpop.f32.mrb[77].mxu0  ;;  %v6053_v35 = vadd.f32 %v14057_v12, %v11168_v0  ;;  %v15677_v40 = vld [vmem:[#allocation7_spill] sm:$0xff] }
0x1ad8   :  { %6841 = vrot.lane.b32.xlu0 %v13612_v41, %s12688_s5  ;;  %v6052_v39 = vadd.f32 %v14063_v38, %v5953_v20  ;;  %v15678_v41 = vld [vmem:[#allocation9_spill] sm:$0xff] }
0x1adb   :  { %6060 = vrot.lane.b32.xlu1 %v6051_v30, %s12694_s7 }
0x1adc   :  { %6058 = vrot.lane.b32.xlu0 %v6050_v34, %s12694_s7 }
0x1adf   :  { %6064 = vrot.lane.b32.xlu1 %v6053_v35, %s12694_s7 }
0x1ae0   :  { %6062 = vrot.lane.b32.xlu0 %v6052_v39, %s12694_s7 }
0x1ae3   :  { %6883 = vrot.lane.b32.xlu1 %v13614_v42, %s12688_s5  ;;  %v15679_v42 = vld [vmem:[#allocation11_spill] sm:$0xff] }
0x1ae4   :  { %6881 = vrot.lane.b32.xlu0 %v13616_v43, %s12688_s5 }
0x1ae7   :  { %6887 = vrot.lane.b32.xlu1 %v13618_v44, %s12688_s5 }
0x1ae8   :  { %6885 = vrot.lane.b32.xlu0 %v13620_v47, %s12688_s5 }
0x1aeb   :  { %6092 = vrot.lane.b32.xlu1 %v14088_v61, %s12684_s23 }
0x1aec   :  { %6090 = vrot.lane.b32.xlu0 %v14090_v36, %s12684_s23 }
0x1aef   :  { %6096 = vrot.lane.b32.xlu1 %v14092_v19, %s12684_s23 }
0x1af0   :  { %6094 = vrot.lane.b32.xlu0 %v14096_v51, %s12684_s23 }
0x1af3   :  { %6927 = vrot.lane.b32.xlu1 %v13674_v18, %s12688_s5 }
0x1af4   :  { %6925 = vrot.lane.b32.xlu0 %v15677_v40, %s12688_s5 }
0x1af7   :  { %6931 = vrot.lane.b32.xlu1 %v15678_v41, %s12688_s5 }
0x1af8   :  { %6929 = vrot.lane.b32.xlu0 %v15679_v42, %s12688_s5  ;;  %s12695_s5 = smov 123  }
0x1b35   :  { %v5969_v43 = vpop.permute.xlu1 %5968 }
0x1b36   :  { %v5979_v44 = vadd.f32 %v5969_v43, %v13630_v26  ;;  %v5967_v47 = vpop.permute.xlu0 %5966 }
0x1b37   :  { %v5978_v13 = vadd.f32 %v5967_v47, %v13632_v57 }
0x1b38   :  { %v9975_v15 = vmul.f32 -1.442695, %v5979_v44 }
0x1b39   :  { %v9974_v55 = vmul.f32 -1.442695, %v5978_v13  ;;  %v5973_v53 = vpop.permute.xlu1 %5972 }
0x1b3a   :  { %12169 = vpow2.f32 %v9975_v15  ;;  %v5981_v18 = vadd.f32 %v5973_v53, %v13638_v2  ;;  %v5971_v59 = vpop.permute.xlu0 %5970 }
0x1b3b   :  { %12171 = vpow2.f32 %v9974_v55  ;;  %v5980_v25 = vadd.f32 %v5971_v59, %v13640_v8 }
0x1b3c   :  { %v9977_v56 = vmul.f32 -1.442695, %v5981_v18 }
0x1b3d   :  { %v9976_v1 = vmul.f32 -1.442695, %v5980_v25  ;;  %v6013_v14 = vpop.permute.xlu1 %6012 }
0x1b3e   :  { %12173 = vpow2.f32 %v9977_v56  ;;  %v6023_v5 = vadd.f32 %v6013_v14, %v13646_v16  ;;  %v6011_v3 = vpop.permute.xlu0 %6010 }
0x1b3f   :  { %12175 = vpow2.f32 %v9976_v1  ;;  %v6022_v29 = vadd.f32 %v6011_v3, %v13648_v21 }
0x1b40   :  { %v9979_v17 = vmul.f32 -1.442695, %v6023_v5 }
0x1b41   :  { %v9978_v52 = vmul.f32 -1.442695, %v6022_v29  ;;  %v6017_v50 = vpop.permute.xlu1 %6016 }
0x1b42   :  { %12177 = vpow2.f32 %v9979_v17  ;;  %v6025_v23 = vadd.f32 %v6017_v50, %v13654_v27  ;;  %v6015_v45 = vpop.permute.xlu0 %6014 }
0x1b43   :  { %12179 = vpow2.f32 %v9978_v52  ;;  %v6024_v24 = vadd.f32 %v6015_v45, %v13656_v33 }
0x1b44   :  { %v12170_v32 = vpop.eup %12169  ;;  %v9981_v48 = vmul.f32 -1.442695, %v6025_v23 }
0x1b45   :  { %v12172_v31 = vpop.eup %12171  ;;  %v5995_v4 = vadd.f32 1.0, %v12170_v32  ;;  %v9980_v11 = vmul.f32 -1.442695, %v6024_v24  ;;  %v6840_v62 = vpop.permute.xlu1 %6839 }
0x1b46   :  { %v5994_v37 = vadd.f32 1.0, %v12172_v31  ;;  %12181 = vpow2.f32 %v9981_v48  ;;  %v6850_v63 = vadd.f32 %v6840_v62, %v13630_v26  ;;  %v6838_v6 = vpop.permute.xlu0 %6837 }
0x1b47   :  { %12183 = vrcp.f32 %v5995_v4  ;;  %v6849_v7 = vadd.f32 %v6838_v6, %v13632_v57 }
0x1b48   :  { %v12174_v9 = vpop.eup %12173  ;;  %12185 = vrcp.f32 %v5994_v37  ;;  %v10024_v10 = vmul.f32 -1.442695, %v6850_v63 }
0x1b49   :  { %v12176_v46 = vpop.eup %12175  ;;  %v5997_v0 = vadd.f32 1.0, %v12174_v9  ;;  %12187 = vpow2.f32 %v9980_v11  ;;  %v10023_v30 = vmul.f32 -1.442695, %v6849_v7  ;;  %v6844_v20 = vpop.permute.xlu1 %6843 }
0x1b4a   :  { %v5996_v34 = vadd.f32 1.0, %v12176_v46  ;;  %12189 = vpow2.f32 %v10024_v10  ;;  %v6852_v35 = vadd.f32 %v6844_v20, %v13638_v2  ;;  %v6842_v39 = vpop.permute.xlu0 %6841 }
0x1b4b   :  { %12191 = vrcp.f32 %v5997_v0  ;;  %v6851_v40 = vadd.f32 %v6842_v39, %v13640_v8 }
0x1b4c   :  { %v12178_v41 = vpop.eup %12177  ;;  %12193 = vrcp.f32 %v5996_v34  ;;  %v10026_v42 = vmul.f32 -1.442695, %v6852_v35 }
0x1b4d   :  { %v12180_v43 = vpop.eup %12179  ;;  %12195 = vpow2.f32 %v10023_v30  ;;  %v10025_v44 = vmul.f32 -1.442695, %v6851_v40  ;;  %v6061_v47 = vpop.permute.xlu1 %6060  ;;  %v6039_v15 = vadd.f32 1.0, %v12178_v41 }
0x1b4e   :  { %12197 = vpow2.f32 %v10026_v42  ;;  %v6059_v13 = vpop.permute.xlu0 %6058  ;;  %v6038_v53 = vadd.f32 1.0, %v12180_v43 }
0x1b4f   :  { %12199 = vpow2.f32 %v10025_v44 }
0x1b50   :  { %v12182_v55 = vpop.eup %12181  ;;  %12201 = vrcp.f32 %v6039_v15 }
0x1b51   :  { %v12184_v18 = vpop.eup %12183  ;;  %v6041_v59 = vadd.f32 1.0, %v12182_v55  ;;  %v6065_v25 = vpop.permute.xlu1 %6064  ;;  %12203 = vrcp.f32 %v6038_v53 }
0x1b52   :  { %v12186_v56 = vpop.eup %12185  ;;  %v6071_v1 = vmul.f32 %v12184_v18, %v6061_v47  ;;  %v6063_v14 = vpop.permute.xlu0 %6062 }
0x1b53   :  { %v12188_v5 = vpop.eup %12187  ;;  %v6070_v3 = vmul.f32 %v12186_v56, %v6059_v13  ;;  %12205 = vrcp.f32 %v6041_v59 }
0x1b54   :  { %v12190_v29 = vpop.eup %12189  ;;  %v6040_v17 = vadd.f32 1.0, %v12188_v5  ;;  %v6075_v52 = vadd.f32 %v6071_v1, %v13690_v28 }
0x1b55   :  { %v12192_v50 = vpop.eup %12191  ;;  %v6866_v23 = vadd.f32 1.0, %v12190_v29  ;;  %v6074_v45 = vadd.f32 %v6070_v3, %v13697_v60  ;;  %v6884_v24 = vpop.permute.xlu1 %6883 }
0x1b56   :  { %v12194_v32 = vpop.eup %12193  ;;  %12207 = vrcp.f32 %v6040_v17  ;;  %v6073_v48 = vmul.f32 %v12192_v50, %v6065_v25  ;;  %v6882_v31 = vpop.permute.xlu0 %6881  ;;  %v6894_v62 = vadd.f32 %v6884_v24, %v13646_v16 }
0x1b57   :  { %v12196_v4 = vpop.eup %12195  ;;  %12209 = vrcp.f32 %v6866_v23  ;;  %v6072_v11 = vmul.f32 %v12194_v32, %v6063_v14  ;;  %v6893_v7 = vadd.f32 %v6882_v31, %v13648_v21 }
0x1b58   :  { %v12198_v37 = vpop.eup %12197  ;;  %v6865_v63 = vadd.f32 1.0, %v12196_v4  ;;  %12211 = vtanh.f32 %v6075_v52  ;;  %v6077_v6 = vadd.f32 %v6073_v48, %v13706_v54  ;;  %v10028_v34 = vmul.f32 -1.442695, %v6894_v62 }
0x1b59   :  { %v6868_v9 = vadd.f32 1.0, %v12198_v37  ;;  %12213 = vtanh.f32 %v6074_v45  ;;  %v6076_v10 = vadd.f32 %v6072_v11, %v13709_v22  ;;  %v6888_v46 = vpop.permute.xlu1 %6887  ;;  %v12200_v20 = vpop.eup %12199  ;;  %v10027_v40 = vmul.f32 -1.442695, %v6893_v7 }
0x1b5a   :  { %12215 = vrcp.f32 %v6865_v63  ;;  %v6896_v0 = vadd.f32 %v6888_v46, %v13654_v27  ;;  %v6886_v30 = vpop.permute.xlu0 %6885  ;;  %v6867_v39 = vadd.f32 1.0, %v12200_v20  ;;  %v12202_v41 = vpop.eup %12201 }
0x1b5b   :  { %12217 = vrcp.f32 %v6868_v9  ;;  %v6895_v35 = vadd.f32 %v6886_v30, %v13656_v33  ;;  %v12204_v44 = vpop.eup %12203  ;;  %v6083_v18 = vsub.f32 1.0, %v12202_v41 }
0x1b5c   :  { %12219 = vtanh.f32 %v6077_v6  ;;  %v10030_v42 = vmul.f32 -1.442695, %v6896_v0  ;;  %v6082_v56 = vsub.f32 1.0, %v12204_v44 }
0x1b5d   :  { %12221 = vtanh.f32 %v6076_v10  ;;  %v6093_v43 = vpop.permute.xlu1 %6092  ;;  %v10029_v47 = vmul.f32 -1.442695, %v6895_v35  ;;  %v12206_v15 = vpop.eup %12205 }
0x1b5e   :  { %12223 = vrcp.f32 %v6867_v39  ;;  %v6091_v13 = vpop.permute.xlu0 %6090  ;;  %v6103_v3 = vmul.f32 %v12202_v41, %v6093_v43  ;;  %v6085_v45 = vsub.f32 1.0, %v12206_v15 }
0x1b5f   :  { %12225 = vpow2.f32 %v10028_v34  ;;  %v6102_v52 = vmul.f32 %v12204_v44, %v6091_v13 }
0x1b60   :  { %v12208_v55 = vpop.eup %12207  ;;  %12227 = vpow2.f32 %v10027_v40 }
0x1b61   :  { %v12210_v53 = vpop.eup %12209  ;;  %12229 = vpow2.f32 %v10030_v42  ;;  %v6097_v59 = vpop.permute.xlu1 %6096  ;;  %v6084_v31 = vsub.f32 1.0, %v12208_v55 }
0x1b62   :  { %v12212_v25 = vpop.eup %12211  ;;  %12231 = vpow2.f32 %v10029_v47  ;;  %v6095_v1 = vpop.permute.xlu0 %6094  ;;  %v6105_v63 = vmul.f32 %v12206_v15, %v6097_v59 }
0x1b63   :  { %v12214_v14 = vpop.eup %12213  ;;  %v6087_v5 = vmul.f32 %v12212_v25, %v6083_v18  ;;  %v6104_v10 = vmul.f32 %v12208_v55, %v6095_v1 }
0x1b64   :  { %v12216_v29 = vpop.eup %12215  ;;  %v6086_v17 = vmul.f32 %v12214_v14, %v6082_v56 }
0x1b65   :  { %v12218_v50 = vpop.eup %12217  ;;  %v14194_v23 = vadd.f32 %v6103_v3, %v6087_v5  ;;  %v6928_v24 = vpop.permute.xlu1 %6927 }
0x1b66   :  { %v12220_v32 = vpop.eup %12219  ;;  %v14196_v48 = vadd.f32 %v6102_v52, %v6086_v17  ;;  %v6938_v4 = vmul.f32 %v12210_v53, %v6928_v24  ;;  %v6926_v11 = vpop.permute.xlu0 %6925 }
0x1b67   :  { %15680 = vst [vmem:[#allocation7_spill] sm:$0xff] %v14194_v23  ;;  %v12222_v62 = vpop.eup %12221  ;;  %v6089_v37 = vmul.f32 %v12220_v32, %v6085_v45  ;;  %v6937_v6 = vmul.f32 %v12216_v29, %v6926_v11 }
0x1b68   :  { %15681 = vst [vmem:[#allocation9_spill] sm:$0xff] %v14196_v48  ;;  %v12224_v7 = vpop.eup %12223  ;;  %v6088_v9 = vmul.f32 %v12222_v62, %v6084_v31  ;;  %v6942_v46 = vadd.f32 %v6938_v4, %v13690_v28  ;;  %v11848_v0 = vpack.i.bf16 %v14194_v23, %v14196_v48 }
0x1b69   :  { %v12226_v30 = vpop.eup %12225  ;;  %v14201_v20 = vadd.f32 %v6105_v63, %v6089_v37  ;;  %v6941_v34 = vadd.f32 %v6937_v6, %v13697_v60  ;;  %v6932_v35 = vpop.permute.xlu1 %6931 }
0x1b6a   :  { %v12228_v39 = vpop.eup %12227  ;;  %v6910_v40 = vadd.f32 1.0, %v12226_v30  ;;  %v14204_v41 = vadd.f32 %v6104_v10, %v6088_v9  ;;  %12233 = vtanh.f32 %v6942_v46  ;;  %11849 = vrot.lane.b32.xlu0 %v11848_v0, %s12695_s5  ;;  %v6940_v42 = vmul.f32 %v12218_v50, %v6932_v35  ;;  %v6930_v43 = vpop.permute.xlu0 %6929 }
0x1b6b   :  { %15682 = vst [vmem:[#allocation11_spill] sm:$0xff] %v14201_v20  ;;  %v12230_v44 = vpop.eup %12229  ;;  %v6909_v47 = vadd.f32 1.0, %v12228_v39  ;;  %12235 = vtanh.f32 %v6941_v34  ;;  %v6939_v13 = vmul.f32 %v12224_v7, %v6930_v43 }
0x1b6c   :  { %15683 = vst [vmem:[#allocation34_spill] sm:$0xff] %v14204_v41  ;;  %v12232_v15 = vpop.eup %12231  ;;  %12237 = vrcp.f32 %v6910_v40  ;;  %v6912_v55 = vadd.f32 1.0, %v12230_v44  ;;  %v6944_v53 = vadd.f32 %v6940_v42, %v13706_v54  ;;  %v11853_v18 = vpack.i.bf16 %v14201_v20, %v14204_v41 }
0x1b6d   :  { %12239 = vrcp.f32 %v6909_v47  ;;  %v6911_v59 = vadd.f32 1.0, %v12232_v15  ;;  %v6943_v25 = vadd.f32 %v6939_v13, %v13709_v22  ;;  %v14227_v15 = vld [vmem:[%s15586_s12 + $0x8] sm:$0xff] }
0x1b6e   :  { %12241 = vrcp.f32 %v6912_v55  ;;  %11854 = vrot.lane.b32.xlu1 %v11853_v18, %s12695_s5  ;;  %v14234_v55 = vld [vmem:[%s15586_s12 + $0x10] sm:$0xff]  ;;  %v14248_v18 = vld [vmem:[%s15586_s12 + $0x20] sm:$0xff] }
0x1b6f   :  { %12243 = vrcp.f32 %v6911_v59  ;;  %v14255_v59 = vld [vmem:[%s15586_s12 + $0x28] sm:$0xff] }
0x1b70   :  { %12245 = vtanh.f32 %v6944_v53  ;;  %v14241_v53 = vld [vmem:[%s15586_s12 + $0x18] sm:$0xff] }
0x1b71   :  { %12247 = vtanh.f32 %v6943_v25 }
0x1b74   :  { %v12234_v56 = vpop.eup %12233 }
0x1b75   :  { %v12236_v1 = vpop.eup %12235 }
0x1b76   :  { %v12238_v14 = vpop.eup %12237 }
0x1b77   :  { %v12240_v5 = vpop.eup %12239  ;;  %v6950_v3 = vsub.f32 1.0, %v12238_v14  ;;  %v6958_v45 = vmul.f32 0.0, %v12238_v14 }
0x1b78   :  { %v12242_v29 = vpop.eup %12241  ;;  %v6949_v17 = vsub.f32 1.0, %v12240_v5  ;;  %v6957_v4 = vmul.f32 0.0, %v12240_v5 }
0x1b79   :  { %v12244_v52 = vpop.eup %12243  ;;  %v6954_v50 = vmul.f32 %v12234_v56, %v6950_v3  ;;  %v6952_v24 = vsub.f32 1.0, %v12242_v29  ;;  %v6960_v6 = vmul.f32 0.0, %v12242_v29  ;;  %v14262_v56 = vld [vmem:[%s15586_s12 + $0x30] sm:$0xff] }
0x1b7a   :  { %v12246_v32 = vpop.eup %12245  ;;  %v6953_v31 = vmul.f32 %v12236_v1, %v6949_v17  ;;  %v6951_v11 = vsub.f32 1.0, %v12244_v52  ;;  %v6959_v10 = vmul.f32 0.0, %v12244_v52  ;;  %v14269_v17 = vld [vmem:[%s15586_s12 + $0x38] sm:$0xff] }
0x1b7b   :  { %v12248_v62 = vpop.eup %12247  ;;  %v14212_v37 = vadd.f32 %v6958_v45, %v6954_v50  ;;  %v6956_v63 = vmul.f32 %v12246_v32, %v6952_v24  ;;  %v14276_v50 = vld [vmem:[%s15586_s12 + $0x40] sm:$0xff]  ;;  %v14283_v24 = vld [vmem:[%s15586_s12 + $0x48] sm:$0xff]  ;;  %v14290_v32 = vld [vmem:[%s15586_s12 + $0x50] sm:$0xff] }
0x1b7c   :  { %v14214_v7 = vadd.f32 %v6957_v4, %v6953_v31  ;;  %v6955_v9 = vmul.f32 %v12248_v62, %v6951_v11  ;;  %v14297_v31 = vld [vmem:[%s15586_s12 + $0x58] sm:$0xff]  ;;  %v14304_v4 = vld [vmem:[%s15586_s12] sm:$0xff] }
0x1b7d   :  { %v14216_v46 = vadd.f32 %v6960_v6, %v6956_v63 }
0x1b7e   :  { %v11858_v0 = vpack.i.bf16 %v14212_v37, %v14214_v7  ;;  %v14220_v30 = vadd.f32 %v6959_v10, %v6955_v9 }
0x1b80   :  { %11859 = vrot.lane.b32.xlu0 %v11858_v0, %s12696_s8  ;;  %v11863_v34 = vpack.i.bf16 %v14216_v46, %v14220_v30 }
0x1b82   :  { %11864 = vrot.lane.b32.xlu1 %v11863_v34, %s12696_s8  ;;  %s7267_s8 = scalar_select %p7266_p7, 1, 0 }
0x1b84   :  { %s7268_s18 = scvt.s32.f32 %s7267_s8 }
0x1bdc   :  { %v11850_v35 = vpop.permute.xlu0 %11849 }
0x1bdd   :  { %v11852_v39 = vunpack.i.h.bf16 %v11850_v35  ;;  %v11851_v40 = vunpack.i.l.bf16 %v11850_v35 }
0x1bdf   :  { %v11687_v42 = vpack.c.bf16 %v11852_v39, %v11851_v40 }
0x1be0   :  { %v11855_v43 = vpop.permute.xlu1 %11854 }
0x1be1   :  { %v11857_v44 = vunpack.i.h.bf16 %v11855_v43  ;;  %v11856_v47 = vunpack.i.l.bf16 %v11855_v43  ;;  %11688 = vmatprep.subr.bf16.mxu1 %v11687_v42 }
0x1be2   :  { %11690 = vmatpush3.bf16.msra.mxu1 %v11687_v42 }
0x1be3   :  { %v11691_v13 = vpack.c.bf16 %v11857_v44, %v11856_v47 }
0x1be5   :  { %11692 = vmatprep.subr.bf16.mxu1 %v11691_v13 }
0x1be6   :  { %11694 = vmatpush3.bf16.msra.mxu1 %v11691_v13 }
0x1be9   :  { %11178 = vmatmul.mubr.msk.f32.vlgmr.msra.gmra.mrb[86].mxu1 %vm1507_vm9, %v14227_v15 }
0x1bea   :  { %11180 = vmatprep.mubr.msk.f32.mxu1 %vm1507_vm9, %v14234_v55 }
0x1bed   :  { %11181 = vmatmul.mubr.msk.f32.gmra.mrb[88].mxu1 %vm1507_vm9, %v14241_v53 }
0x1bee   :  { %11183 = vmatprep.mubr.msk.f32.mxu1 %vm1507_vm9, %v14248_v18 }
0x1bf1   :  { %11184 = vmatmul.mubr.msk.f32.gmra.mrb[90].mxu1 %vm1507_vm9, %v14255_v59 }
0x1bf2   :  { %v11860_v25 = vpop.permute.xlu0 %11859  ;;  %11186 = vmatprep.mubr.msk.f32.mxu1 %vm1507_vm9, %v14262_v56 }
0x1bf3   :  { %v11862_v1 = vunpack.i.h.bf16 %v11860_v25  ;;  %v11861_v14 = vunpack.i.l.bf16 %v11860_v25 }
0x1bf4   :  { %v11865_v5 = vpop.permute.xlu1 %11864 }
0x1bf5   :  { %v11867_v3 = vunpack.i.h.bf16 %v11865_v5  ;;  %v11866_v29 = vunpack.i.l.bf16 %v11865_v5  ;;  %11187 = vmatmul.mubr.msk.f32.gmra.mrb[92].mxu1 %vm1507_vm9, %v14269_v17  ;;  %v11703_v52 = vpack.c.bf16 %v11862_v1, %v11861_v14 }
0x1bf6   :  { %11189 = vmatprep.mubr.msk.f32.mxu1 %vm1507_vm9, %v14276_v50 }
0x1bf7   :  { %11704 = vmatprep.subr.bf16.mxu1 %v11703_v52  ;;  %v11707_v45 = vpack.c.bf16 %v11867_v3, %v11866_v29 }
0x1bf8   :  { %11706 = vmatpush3.bf16.msra.mxu1 %v11703_v52 }
0x1bf9   :  { %11190 = vmatmul.mubr.msk.f32.gmra.mrb[94].mxu1 %vm1507_vm9, %v14283_v24  ;;  %11708 = vmatprep.subr.bf16.mxu1 %v11707_v45 }
0x1bfa   :  { %11192 = vmatprep.mubr.msk.f32.mxu1 %vm1507_vm9, %v14290_v32 }
0x1bfc   :  { %11710 = vmatpush3.bf16.msra.mxu1 %v11707_v45 }
0x1bfd   :  { %11193 = vmatmul.mubr.msk.f32.gmra.mrb[96].mxu1 %vm1507_vm9, %v14297_v31 }
0x1bfe   :  { %11229 = vmatprep.mubr.msk.f32.mxu1 %vm1507_vm9, %v14304_v4 }
0x1c01   :  { %11230 = vmatmul.mubr.msk.f32.vlgmr.msra.gmra.mrb[98].mxu1 %vm1507_vm9, %v14227_v15 }
0x1c02   :  { %11232 = vmatprep.mubr.msk.f32.mxu1 %vm1507_vm9, %v14234_v55 }
0x1c05   :  { %11233 = vmatmul.mubr.msk.f32.gmra.mrb[100].mxu1 %vm1507_vm9, %v14241_v53 }
0x1c06   :  { %11235 = vmatprep.mubr.msk.f32.mxu1 %vm1507_vm9, %v14248_v18 }
0x1c09   :  { %11236 = vmatmul.mubr.msk.f32.gmra.mrb[102].mxu1 %vm1507_vm9, %v14255_v59 }
0x1c0a   :  { %11238 = vmatprep.mubr.msk.f32.mxu1 %vm1507_vm9, %v14262_v56 }
0x1c0d   :  { %11239 = vmatmul.mubr.msk.f32.gmra.mrb[104].mxu1 %vm1507_vm9, %v14269_v17 }
0x1c0e   :  { %11241 = vmatprep.mubr.msk.f32.mxu1 %vm1507_vm9, %v14276_v50 }
0x1c11   :  { %11242 = vmatmul.mubr.msk.f32.gmra.mrb[106].mxu1 %vm1507_vm9, %v14283_v24 }
0x1c12   :  { %11244 = vmatprep.mubr.msk.f32.mxu1 %vm1507_vm9, %v14290_v32 }
0x1c15   :  { %11245 = vmatmul.mubr.msk.f32.gmra.mrb[108].mxu1 %vm1507_vm9, %v14297_v31 }
0x1c16   :  { %11281 = vmatprep.mubr.msk.f32.mxu1 %vm1507_vm9, %v14304_v4 }
0x1cbc   :  { %v11179_v11 = vpop.f32.mrb[86].mxu1 }
0x1cbd   :  { %6305 = vrot.lane.b32.xlu1 %v11179_v11, %s12697_s6  ;;  %v6240_v62 = vpop.f32.mrb[87].mxu1 }
0x1cbe   :  { %6303 = vrot.lane.b32.xlu0 %v6240_v62, %s12697_s6 }
0x1cc0   :  { %v11182_v63 = vpop.f32.mrb[88].mxu1 }
0x1cc1   :  { %6309 = vrot.lane.b32.xlu1 %v11182_v63, %s12697_s6  ;;  %v6250_v6 = vpop.f32.mrb[89].mxu1 }
0x1cc2   :  { %6307 = vrot.lane.b32.xlu0 %v6250_v6, %s12697_s6 }
0x1cc4   :  { %v11185_v9 = vpop.f32.mrb[90].mxu1 }
0x1cc5   :  { %6349 = vrot.lane.b32.xlu1 %v11185_v9, %s12697_s6  ;;  %v6260_v10 = vpop.f32.mrb[91].mxu1 }
0x1cc6   :  { %6347 = vrot.lane.b32.xlu0 %v6260_v10, %s12697_s6 }
0x1cc8   :  { %v11188_v0 = vpop.f32.mrb[92].mxu1 }
0x1cc9   :  { %6353 = vrot.lane.b32.xlu1 %v11188_v0, %s12697_s6  ;;  %v6270_v34 = vpop.f32.mrb[93].mxu1 }
0x1cca   :  { %6351 = vrot.lane.b32.xlu0 %v6270_v34, %s12697_s6 }
0x1ccc   :  { %v11191_v35 = vpop.f32.mrb[94].mxu1 }
0x1ccd   :  { %v6388_v39 = vadd.f32 %v14043_v58, %v11191_v35  ;;  %v6280_v40 = vpop.f32.mrb[95].mxu1 }
0x1cce   :  { %v6387_v42 = vadd.f32 %v14049_v49, %v6280_v40 }
0x1ccf   :  { %6397 = vrot.lane.b32.xlu1 %v6388_v39, %s12697_s6 }
0x1cd0   :  { %6395 = vrot.lane.b32.xlu0 %v6387_v42, %s12697_s6  ;;  %v11194_v43 = vpop.f32.mrb[96].mxu1 }
0x1cd1   :  { %v6290_v44 = vpop.f32.mrb[97].mxu1  ;;  %v6390_v14 = vadd.f32 %v14057_v12, %v11194_v43 }
0x1cd2   :  { %v6389_v5 = vadd.f32 %v14063_v38, %v6290_v44 }
0x1cd4   :  { %v11231_v47 = vpop.f32.mrb[98].mxu1 }
0x1cd5   :  { %7124 = vrot.lane.b32.xlu1 %v11231_v47, %s12698_s28  ;;  %v7059_v13 = vpop.f32.mrb[99].mxu1 }
0x1cd6   :  { %7122 = vrot.lane.b32.xlu0 %v7059_v13, %s12698_s28 }
0x1cd8   :  { %v11234_v25 = vpop.f32.mrb[100].mxu1 }
0x1cd9   :  { %7128 = vrot.lane.b32.xlu1 %v11234_v25, %s12698_s28  ;;  %v7069_v1 = vpop.f32.mrb[101].mxu1 }
0x1cda   :  { %7126 = vrot.lane.b32.xlu0 %v7069_v1, %s12698_s28 }
0x1cdc   :  { %v11237_v3 = vpop.f32.mrb[102].mxu1 }
0x1cdd   :  { %6401 = vrot.lane.b32.xlu1 %v6390_v14, %s12697_s6  ;;  %v7079_v29 = vpop.f32.mrb[103].mxu1 }
0x1cde   :  { %6399 = vrot.lane.b32.xlu0 %v6389_v5, %s12697_s6 }
0x1ce0   :  { %v11240_v52 = vpop.f32.mrb[104].mxu1 }
0x1ce1   :  { %7168 = vrot.lane.b32.xlu1 %v11237_v3, %s12698_s28  ;;  %v7089_v45 = vpop.f32.mrb[105].mxu1 }
0x1ce2   :  { %7166 = vrot.lane.b32.xlu0 %v7079_v29, %s12698_s28 }
0x1ce4   :  { %v11243_v11 = vpop.f32.mrb[106].mxu1 }
0x1ce5   :  { %7172 = vrot.lane.b32.xlu1 %v11240_v52, %s12698_s28  ;;  %v7099_v62 = vpop.f32.mrb[107].mxu1  ;;  %v7207_v9 = vadd.f32 %v14043_v58, %v11243_v11 }
0x1ce6   :  { %7170 = vrot.lane.b32.xlu0 %v7089_v45, %s12698_s28  ;;  %v7206_v10 = vadd.f32 %v14049_v49, %v7099_v62 }
0x1ce8   :  { %v11246_v63 = vpop.f32.mrb[108].mxu1 }
0x1ce9   :  { %6429 = vrot.lane.b32.xlu1 %v14194_v23, %s12684_s23  ;;  %v7109_v6 = vpop.f32.mrb[109].mxu1  ;;  %v7209_v0 = vadd.f32 %v14057_v12, %v11246_v63 }
0x1cea   :  { %6427 = vrot.lane.b32.xlu0 %v14196_v48, %s12684_s23  ;;  %v7208_v34 = vadd.f32 %v14063_v38, %v7109_v6 }
0x1ced   :  { %6433 = vrot.lane.b32.xlu1 %v14201_v20, %s12684_s23 }
0x1cee   :  { %6431 = vrot.lane.b32.xlu0 %v14204_v41, %s12684_s23 }
0x1cf1   :  { %7216 = vrot.lane.b32.xlu1 %v7207_v9, %s12698_s28 }
0x1cf2   :  { %7214 = vrot.lane.b32.xlu0 %v7206_v10, %s12698_s28 }
0x1cf5   :  { %7220 = vrot.lane.b32.xlu1 %v7209_v0, %s12698_s28 }
0x1cf6   :  { %7218 = vrot.lane.b32.xlu0 %v7208_v34, %s12698_s28  ;;  %s6966_s28 = scalar_select %p6965_p5, 1, 0 }
0x1cf7   :  { %p9288_p5 = scmp.eq.s32.totalorder %s14774_s27, 7  ;;  %s12714_s27 = smov 121  }
0x1cf9   :  { %7248 = vrot.lane.b32.xlu1 %v14212_v37, %s12684_s23 }
0x1cfa   :  { %7246 = vrot.lane.b32.xlu0 %v14214_v7, %s12684_s23 }
0x1cfd   :  { %7252 = vrot.lane.b32.xlu1 %v14216_v46, %s12684_s23 }
0x1cfe   :  { %7250 = vrot.lane.b32.xlu0 %v14220_v30, %s12684_s23 }
0x1d2f   :  { %v6306_v58 = vpop.permute.xlu1 %6305 }
0x1d30   :  { %v6316_v49 = vadd.f32 %v6306_v58, %v13630_v26  ;;  %v6304_v12 = vpop.permute.xlu0 %6303 }
0x1d31   :  { %v6315_v38 = vadd.f32 %v6304_v12, %v13632_v57 }
0x1d32   :  { %v9995_v35 = vmul.f32 -1.442695, %v6316_v49 }
0x1d33   :  { %v9994_v39 = vmul.f32 -1.442695, %v6315_v38  ;;  %v6310_v40 = vpop.permute.xlu1 %6309 }
0x1d34   :  { %12249 = vpow2.f32 %v9995_v35  ;;  %v6318_v42 = vadd.f32 %v6310_v40, %v13638_v2  ;;  %v6308_v43 = vpop.permute.xlu0 %6307 }
0x1d35   :  { %12251 = vpow2.f32 %v9994_v39  ;;  %v6317_v44 = vadd.f32 %v6308_v43, %v13640_v8 }
0x1d36   :  { %v9997_v47 = vmul.f32 -1.442695, %v6318_v42 }
0x1d37   :  { %v9996_v13 = vmul.f32 -1.442695, %v6317_v44  ;;  %v6350_v25 = vpop.permute.xlu1 %6349 }
0x1d38   :  { %12253 = vpow2.f32 %v9997_v47  ;;  %v6360_v1 = vadd.f32 %v6350_v25, %v13646_v16  ;;  %v6348_v14 = vpop.permute.xlu0 %6347 }
0x1d39   :  { %12255 = vpow2.f32 %v9996_v13  ;;  %v6359_v5 = vadd.f32 %v6348_v14, %v13648_v21 }
0x1d3a   :  { %v9999_v3 = vmul.f32 -1.442695, %v6360_v1 }
0x1d3b   :  { %v9998_v29 = vmul.f32 -1.442695, %v6359_v5  ;;  %v6354_v52 = vpop.permute.xlu1 %6353 }
0x1d3c   :  { %12257 = vpow2.f32 %v9999_v3  ;;  %v6362_v45 = vadd.f32 %v6354_v52, %v13654_v27  ;;  %v6352_v11 = vpop.permute.xlu0 %6351 }
0x1d3d   :  { %12259 = vpow2.f32 %v9998_v29  ;;  %v6361_v62 = vadd.f32 %v6352_v11, %v13656_v33 }
0x1d3e   :  { %v12250_v63 = vpop.eup %12249  ;;  %v10001_v6 = vmul.f32 -1.442695, %v6362_v45 }
0x1d3f   :  { %v12252_v9 = vpop.eup %12251  ;;  %v6332_v10 = vadd.f32 1.0, %v12250_v63  ;;  %v10000_v0 = vmul.f32 -1.442695, %v6361_v62 }
0x1d40   :  { %v6331_v34 = vadd.f32 1.0, %v12252_v9  ;;  %12261 = vpow2.f32 %v10001_v6 }
0x1d41   :  { %12263 = vrcp.f32 %v6332_v10  ;;  %v6398_v38 = vpop.permute.xlu1 %6397 }
0x1d42   :  { %v12254_v58 = vpop.eup %12253  ;;  %12265 = vrcp.f32 %v6331_v34  ;;  %v6396_v39 = vpop.permute.xlu0 %6395 }
0x1d43   :  { %v12256_v49 = vpop.eup %12255  ;;  %v6334_v12 = vadd.f32 1.0, %v12254_v58  ;;  %12267 = vpow2.f32 %v10000_v0 }
0x1d44   :  { %v6333_v35 = vadd.f32 1.0, %v12256_v49 }
0x1d45   :  { %12269 = vrcp.f32 %v6334_v12 }
0x1d46   :  { %v12258_v40 = vpop.eup %12257  ;;  %12271 = vrcp.f32 %v6333_v35 }
0x1d47   :  { %v12260_v42 = vpop.eup %12259  ;;  %v6376_v43 = vadd.f32 1.0, %v12258_v40  ;;  %v7125_v44 = vpop.permute.xlu1 %7124 }
0x1d48   :  { %v7135_v47 = vadd.f32 %v7125_v44, %v13630_v26  ;;  %v7123_v13 = vpop.permute.xlu0 %7122  ;;  %v6375_v25 = vadd.f32 1.0, %v12260_v42 }
0x1d49   :  { %v7134_v1 = vadd.f32 %v7123_v13, %v13632_v57  ;;  %12273 = vrcp.f32 %v6376_v43 }
0x1d4a   :  { %v12262_v14 = vpop.eup %12261  ;;  %v10044_v5 = vmul.f32 -1.442695, %v7135_v47 }
0x1d4b   :  { %v12264_v3 = vpop.eup %12263  ;;  %v6378_v29 = vadd.f32 1.0, %v12262_v14  ;;  %v10043_v52 = vmul.f32 -1.442695, %v7134_v1  ;;  %v7129_v45 = vpop.permute.xlu1 %7128 }
0x1d4c   :  { %v12266_v11 = vpop.eup %12265  ;;  %v6408_v62 = vmul.f32 %v12264_v3, %v6398_v38  ;;  %12275 = vpow2.f32 %v10044_v5  ;;  %v7137_v63 = vadd.f32 %v7129_v45, %v13638_v2  ;;  %v7127_v6 = vpop.permute.xlu0 %7126 }
0x1d4d   :  { %v12268_v9 = vpop.eup %12267  ;;  %12277 = vrcp.f32 %v6375_v25  ;;  %v6407_v10 = vmul.f32 %v12266_v11, %v6396_v39  ;;  %v7136_v0 = vadd.f32 %v7127_v6, %v13640_v8 }
0x1d4e   :  { %v6377_v34 = vadd.f32 1.0, %v12268_v9  ;;  %v6412_v58 = vadd.f32 %v6408_v62, %v13690_v28  ;;  %12279 = vpow2.f32 %v10043_v52  ;;  %v10046_v35 = vmul.f32 -1.442695, %v7137_v63 }
0x1d4f   :  { %v12270_v49 = vpop.eup %12269  ;;  %12281 = vrcp.f32 %v6378_v29  ;;  %v6411_v12 = vadd.f32 %v6407_v10, %v13697_v60  ;;  %v6402_v40 = vpop.permute.xlu1 %6401  ;;  %v10045_v42 = vmul.f32 -1.442695, %v7136_v0 }
0x1d50   :  { %v12272_v38 = vpop.eup %12271  ;;  %12283 = vrcp.f32 %v6377_v34  ;;  %v6410_v43 = vmul.f32 %v12270_v49, %v6402_v40  ;;  %v6400_v44 = vpop.permute.xlu0 %6399 }
0x1d51   :  { %12285 = vtanh.f32 %v6412_v58  ;;  %v6409_v47 = vmul.f32 %v12272_v38, %v6400_v44 }
0x1d52   :  { %12287 = vtanh.f32 %v6411_v12  ;;  %v6414_v39 = vadd.f32 %v6410_v43, %v13706_v54 }
0x1d53   :  { %12289 = vpow2.f32 %v10046_v35  ;;  %v6413_v13 = vadd.f32 %v6409_v47, %v13709_v22  ;;  %v7169_v25 = vpop.permute.xlu1 %7168  ;;  %v12274_v5 = vpop.eup %12273 }
0x1d54   :  { %12291 = vpow2.f32 %v10045_v42  ;;  %v7179_v1 = vadd.f32 %v7169_v25, %v13646_v16  ;;  %v7167_v14 = vpop.permute.xlu0 %7166  ;;  %v6420_v35 = vsub.f32 1.0, %v12274_v5 }
0x1d55   :  { %12293 = vtanh.f32 %v6414_v39  ;;  %v7178_v3 = vadd.f32 %v7167_v14, %v13648_v21 }
0x1d56   :  { %v12276_v29 = vpop.eup %12275  ;;  %12295 = vtanh.f32 %v6413_v13  ;;  %v10048_v52 = vmul.f32 -1.442695, %v7179_v1 }
0x1d57   :  { %v12278_v45 = vpop.eup %12277  ;;  %v7151_v11 = vadd.f32 1.0, %v12276_v29  ;;  %v10047_v62 = vmul.f32 -1.442695, %v7178_v3  ;;  %v7173_v63 = vpop.permute.xlu1 %7172 }
0x1d58   :  { %v12280_v6 = vpop.eup %12279  ;;  %12297 = vpow2.f32 %v10048_v52  ;;  %v7181_v9 = vadd.f32 %v7173_v63, %v13654_v27  ;;  %v7171_v10 = vpop.permute.xlu0 %7170  ;;  %v6419_v43 = vsub.f32 1.0, %v12278_v45 }
0x1d59   :  { %v12282_v0 = vpop.eup %12281  ;;  %12299 = vrcp.f32 %v7151_v11  ;;  %v7150_v34 = vadd.f32 1.0, %v12280_v6  ;;  %v7180_v58 = vadd.f32 %v7171_v10, %v13656_v33 }
0x1d5a   :  { %v12284_v49 = vpop.eup %12283  ;;  %12301 = vpow2.f32 %v10047_v62  ;;  %v10050_v12 = vmul.f32 -1.442695, %v7181_v9  ;;  %v6422_v11 = vsub.f32 1.0, %v12282_v0 }
0x1d5b   :  { %v12286_v40 = vpop.eup %12285  ;;  %12303 = vrcp.f32 %v7150_v34  ;;  %v10049_v38 = vmul.f32 -1.442695, %v7180_v58  ;;  %v6430_v42 = vpop.permute.xlu1 %6429  ;;  %v6421_v10 = vsub.f32 1.0, %v12284_v49 }
0x1d5c   :  { %v12288_v44 = vpop.eup %12287  ;;  %12305 = vpow2.f32 %v10050_v12  ;;  %v6424_v47 = vmul.f32 %v12286_v40, %v6420_v35  ;;  %v6440_v39 = vmul.f32 %v12274_v5, %v6430_v42  ;;  %v6428_v13 = vpop.permute.xlu0 %6427 }
0x1d5d   :  { %v12290_v25 = vpop.eup %12289  ;;  %12307 = vpow2.f32 %v10049_v38  ;;  %v6423_v1 = vmul.f32 %v12288_v44, %v6419_v43  ;;  %v6439_v14 = vmul.f32 %v12278_v45, %v6428_v13 }
0x1d5e   :  { %v12292_v3 = vpop.eup %12291  ;;  %v7153_v29 = vadd.f32 1.0, %v12290_v25  ;;  %v14400_v52 = vadd.f32 %v6440_v39, %v6424_v47 }
0x1d5f   :  { %v12294_v62 = vpop.eup %12293  ;;  %v7152_v63 = vadd.f32 1.0, %v12292_v3  ;;  %v14402_v6 = vadd.f32 %v6439_v14, %v6423_v1  ;;  %v6434_v9 = vpop.permute.xlu1 %6433 }
0x1d60   :  { %15684 = vst [vmem:[#allocation35_spill] sm:$0xff] %v14400_v52  ;;  %v12296_v34 = vpop.eup %12295  ;;  %12309 = vrcp.f32 %v7153_v29  ;;  %v6426_v58 = vmul.f32 %v12294_v62, %v6422_v11  ;;  %v6442_v5 = vmul.f32 %v12282_v0, %v6434_v9  ;;  %v6432_v12 = vpop.permute.xlu0 %6431 }
0x1d61   :  { %15685 = vst [vmem:[#allocation36_spill] sm:$0xff] %v14402_v6  ;;  %12311 = vrcp.f32 %v7152_v63  ;;  %v6425_v35 = vmul.f32 %v12296_v34, %v6421_v10  ;;  %v6441_v40 = vmul.f32 %v12284_v49, %v6432_v12  ;;  %v11868_v45 = vpack.i.bf16 %v14400_v52, %v14402_v6 }
0x1d62   :  { %v12298_v38 = vpop.eup %12297  ;;  %v14406_v42 = vadd.f32 %v6442_v5, %v6426_v58 }
0x1d63   :  { %v12300_v43 = vpop.eup %12299  ;;  %v7195_v44 = vadd.f32 1.0, %v12298_v38  ;;  %v14408_v47 = vadd.f32 %v6441_v40, %v6425_v35  ;;  %v7217_v39 = vpop.permute.xlu1 %7216  ;;  %11869 = vrot.lane.b32.xlu0 %v11868_v45, %s12699_s29 }
0x1d64   :  { %15686 = vst [vmem:[#allocation37_spill] sm:$0xff] %v14406_v42  ;;  %v12302_v13 = vpop.eup %12301  ;;  %v7227_v0 = vmul.f32 %v12300_v43, %v7217_v39  ;;  %v7215_v25 = vpop.permute.xlu0 %7214 }
0x1d65   :  { %15687 = vst [vmem:[#allocation38_spill] sm:$0xff] %v14408_v47  ;;  %v12304_v1 = vpop.eup %12303  ;;  %12313 = vrcp.f32 %v7195_v44  ;;  %v7194_v49 = vadd.f32 1.0, %v12302_v13  ;;  %v11873_v14 = vpack.i.bf16 %v14406_v42, %v14408_v47 }
0x1d66   :  { %v12306_v3 = vpop.eup %12305  ;;  %v7231_v29 = vadd.f32 %v7227_v0, %v13690_v28  ;;  %v7226_v11 = vmul.f32 %v12304_v1, %v7215_v25 }
0x1d67   :  { %v12308_v62 = vpop.eup %12307  ;;  %12315 = vrcp.f32 %v7194_v49  ;;  %v7197_v63 = vadd.f32 1.0, %v12306_v3  ;;  %11874 = vrot.lane.b32.xlu1 %v11873_v14, %s12699_s29  ;;  %v7221_v34 = vpop.permute.xlu1 %7220 }
0x1d68   :  { %v7196_v9 = vadd.f32 1.0, %v12308_v62  ;;  %12317 = vtanh.f32 %v7231_v29  ;;  %v7230_v10 = vadd.f32 %v7226_v11, %v13697_v60  ;;  %v7219_v58 = vpop.permute.xlu0 %7218 }
0x1d69   :  { %12319 = vrcp.f32 %v7197_v63 }
0x1d6a   :  { %v12310_v5 = vpop.eup %12309  ;;  %12321 = vrcp.f32 %v7196_v9 }
0x1d6b   :  { %v12312_v12 = vpop.eup %12311  ;;  %12323 = vtanh.f32 %v7230_v10  ;;  %v7229_v35 = vmul.f32 %v12310_v5, %v7221_v34  ;;  %v7249_v49 = vpop.permute.xlu1 %7248 }
0x1d6c   :  { %v7228_v40 = vmul.f32 %v12312_v12, %v7219_v58  ;;  %v7247_v29 = vpop.permute.xlu0 %7246 }
0x1d6d   :  { %v7233_v45 = vadd.f32 %v7229_v35, %v13706_v54 }
0x1d6e   :  { %v7232_v38 = vadd.f32 %v7228_v40, %v13709_v22 }
0x1d6f   :  { %v12314_v43 = vpop.eup %12313  ;;  %12325 = vtanh.f32 %v7233_v45  ;;  %v7253_v12 = vpop.permute.xlu1 %7252 }
0x1d70   :  { %12327 = vtanh.f32 %v7232_v38  ;;  %v7239_v44 = vsub.f32 1.0, %v12314_v43  ;;  %v7259_v3 = vmul.f32 %v12314_v43, %v7249_v49  ;;  %v7251_v38 = vpop.permute.xlu0 %7250 }
0x1d71   :  { %v12316_v39 = vpop.eup %12315 }
0x1d72   :  { %v12318_v13 = vpop.eup %12317  ;;  %v7238_v0 = vsub.f32 1.0, %v12316_v39  ;;  %v7258_v9 = vmul.f32 %v12316_v39, %v7247_v29 }
0x1d73   :  { %v12320_v25 = vpop.eup %12319  ;;  %v7243_v1 = vmul.f32 %v12318_v13, %v7239_v44 }
0x1d74   :  { %v12322_v14 = vpop.eup %12321  ;;  %v7241_v10 = vsub.f32 1.0, %v12320_v25  ;;  %v7261_v45 = vmul.f32 %v12320_v25, %v7253_v12 }
0x1d75   :  { %v12324_v11 = vpop.eup %12323  ;;  %v14418_v62 = vadd.f32 %v7259_v3, %v7243_v1  ;;  %v7240_v34 = vsub.f32 1.0, %v12322_v14  ;;  %v7260_v13 = vmul.f32 %v12322_v14, %v7251_v38 }
0x1d76   :  { %v7242_v63 = vmul.f32 %v12324_v11, %v7238_v0 }
0x1d78   :  { %v14420_v58 = vadd.f32 %v7258_v9, %v7242_v63 }
0x1d79   :  { %v12326_v5 = vpop.eup %12325 }
0x1d7a   :  { %v12328_v35 = vpop.eup %12327  ;;  %v7245_v40 = vmul.f32 %v12326_v5, %v7241_v10  ;;  %v11878_v44 = vpack.i.bf16 %v14418_v62, %v14420_v58 }
0x1d7b   :  { %v7244_v43 = vmul.f32 %v12328_v35, %v7240_v34 }
0x1d7c   :  { %v14424_v49 = vadd.f32 %v7261_v45, %v7245_v40  ;;  %11879 = vrot.lane.b32.xlu0 %v11878_v44, %s12700_s30 }
0x1d7d   :  { %v14426_v39 = vadd.f32 %v7260_v13, %v7244_v43 }
0x1d7f   :  { %v11883_v0 = vpack.i.bf16 %v14424_v49, %v14426_v39 }
0x1d81   :  { %11884 = vrot.lane.b32.xlu1 %v11883_v0, %s12700_s30  ;;  %s6967_s30 = scvt.s32.f32 %s6966_s28 }
0x1dd5   :  { %v11870_v1 = vpop.permute.xlu0 %11869 }
0x1dd6   :  { %v11872_v3 = vunpack.i.h.bf16 %v11870_v1  ;;  %v11871_v29 = vunpack.i.l.bf16 %v11870_v1 }
0x1dd8   :  { %v11695_v25 = vpack.c.bf16 %v11872_v3, %v11871_v29 }
0x1dd9   :  { %v11875_v11 = vpop.permute.xlu1 %11874 }
0x1dda   :  { %v11877_v63 = vunpack.i.h.bf16 %v11875_v11  ;;  %v11876_v9 = vunpack.i.l.bf16 %v11875_v11  ;;  %11696 = vmatprep.subr.bf16.mxu0 %v11695_v25 }
0x1ddb   :  { %11698 = vmatpush3.bf16.msra.mxu0 %v11695_v25 }
0x1ddc   :  { %v11699_v14 = vpack.c.bf16 %v11877_v63, %v11876_v9  ;;  %v14513_v63 = vld [vmem:[%s15588_s14 + $0x8] sm:$0xff] }
0x1dde   :  { %11700 = vmatprep.subr.bf16.mxu0 %v11699_v14 }
0x1ddf   :  { %11702 = vmatpush3.bf16.msra.mxu0 %v11699_v14 }
0x1de2   :  { %11204 = vmatmul.mubr.msk.f32.vlgmr.msra.gmra.mrb[78].mxu0 %vm1507_vm9, %v14227_v15 }
0x1de3   :  { %11206 = vmatprep.mubr.msk.f32.mxu0 %vm1507_vm9, %v14234_v55 }
0x1de6   :  { %11207 = vmatmul.mubr.msk.f32.gmra.mrb[80].mxu0 %vm1507_vm9, %v14241_v53 }
0x1de7   :  { %11209 = vmatprep.mubr.msk.f32.mxu0 %vm1507_vm9, %v14248_v18 }
0x1dea   :  { %11210 = vmatmul.mubr.msk.f32.gmra.mrb[82].mxu0 %vm1507_vm9, %v14255_v59 }
0x1deb   :  { %11212 = vmatprep.mubr.msk.f32.mxu0 %vm1507_vm9, %v14262_v56 }
0x1dee   :  { %v11880_v10 = vpop.permute.xlu0 %11879  ;;  %11213 = vmatmul.mubr.msk.f32.gmra.mrb[84].mxu0 %vm1507_vm9, %v14269_v17 }
0x1def   :  { %v11882_v34 = vunpack.i.h.bf16 %v11880_v10  ;;  %v11881_v5 = vunpack.i.l.bf16 %v11880_v10  ;;  %11215 = vmatprep.mubr.msk.f32.mxu0 %vm1507_vm9, %v14276_v50  ;;  %v14519_v10 = vld [vmem:[%s15588_s14] sm:$0xff] }
0x1df1   :  { %v11711_v12 = vpack.c.bf16 %v11882_v34, %v11881_v5 }
0x1df2   :  { %11216 = vmatmul.mubr.msk.f32.gmra.mrb[86].mxu0 %vm1507_vm9, %v14283_v24 }
0x1df3   :  { %v11885_v35 = vpop.permute.xlu1 %11884  ;;  %11712 = vmatprep.subr.bf16.mxu0 %v11711_v12  ;;  %11218 = vmatprep.mubr.msk.f32.mxu0 %vm1507_vm9, %v14290_v32 }
0x1df4   :  { %v11887_v40 = vunpack.i.h.bf16 %v11885_v35  ;;  %v11886_v45 = vunpack.i.l.bf16 %v11885_v35  ;;  %11714 = vmatpush3.bf16.msra.mxu0 %v11711_v12  ;;  %v14527_v12 = vld [vmem:[%s15588_s14 + $0x18] sm:$0xff] }
0x1df6   :  { %v11715_v38 = vpack.c.bf16 %v11887_v40, %v11886_v45  ;;  %11219 = vmatmul.mubr.msk.f32.gmra.mrb[88].mxu0 %vm1507_vm9, %v14297_v31  ;;  %v14533_v45 = vld [vmem:[%s15588_s14 + $0x10] sm:$0xff] }
0x1df7   :  { %11255 = vmatprep.mubr.msk.f32.mxu0 %vm1507_vm9, %v14304_v4 }
0x1df8   :  { %11716 = vmatprep.subr.bf16.mxu0 %v11715_v38 }
0x1df9   :  { %11718 = vmatpush3.bf16.msra.mxu0 %v11715_v38 }
0x1dfc   :  { %11256 = vmatmul.mubr.msk.f32.vlgmr.msra.gmra.mrb[90].mxu0 %vm1507_vm9, %v14227_v15 }
0x1dfd   :  { %11258 = vmatprep.mubr.msk.f32.mxu0 %vm1507_vm9, %v14234_v55 }
0x1e00   :  { %11259 = vmatmul.mubr.msk.f32.gmra.mrb[92].mxu0 %vm1507_vm9, %v14241_v53 }
0x1e01   :  { %11261 = vmatprep.mubr.msk.f32.mxu0 %vm1507_vm9, %v14248_v18 }
0x1e04   :  { %11262 = vmatmul.mubr.msk.f32.gmra.mrb[94].mxu0 %vm1507_vm9, %v14255_v59 }
0x1e05   :  { %11264 = vmatprep.mubr.msk.f32.mxu0 %vm1507_vm9, %v14262_v56 }
0x1e08   :  { %11265 = vmatmul.mubr.msk.f32.gmra.mrb[96].mxu0 %vm1507_vm9, %v14269_v17 }
0x1e09   :  { %11267 = vmatprep.mubr.msk.f32.mxu0 %vm1507_vm9, %v14276_v50 }
0x1e0c   :  { %11268 = vmatmul.mubr.msk.f32.gmra.mrb[98].mxu0 %vm1507_vm9, %v14283_v24 }
0x1e0d   :  { %11270 = vmatprep.mubr.msk.f32.mxu0 %vm1507_vm9, %v14290_v32 }
0x1e10   :  { %11271 = vmatmul.mubr.msk.f32.gmra.mrb[100].mxu0 %vm1507_vm9, %v14297_v31 }
0x1e11   :  { %11307 = vmatprep.mubr.msk.f32.mxu0 %vm1507_vm9, %v14304_v4 }
0x1eb5   :  { %v14478_v15 = vpop.f32.mrb[78].mxu0 }
0x1eb6   :  { %15688 = vst [vmem:[#allocation39_spill] sm:$0xff] %v14478_v15  ;;  %v14480_v55 = vpop.f32.mrb[79].mxu0 }
0x1eb7   :  { %15689 = vst [vmem:[#allocation40_spill] sm:$0xff] %v14480_v55 }
0x1eb9   :  { %v14482_v53 = vpop.f32.mrb[80].mxu0 }
0x1eba   :  { %15690 = vst [vmem:[#allocation41_spill] sm:$0xff] %v14482_v53  ;;  %v14484_v18 = vpop.f32.mrb[81].mxu0 }
0x1ebb   :  { %15691 = vst [vmem:[#allocation42_spill] sm:$0xff] %v14484_v18 }
0x1ebd   :  { %v14486_v59 = vpop.f32.mrb[82].mxu0 }
0x1ebe   :  { %15692 = vst [vmem:[#allocation43_spill] sm:$0xff] %v14486_v59  ;;  %v14488_v56 = vpop.f32.mrb[83].mxu0 }
0x1ebf   :  { %15693 = vst [vmem:[#allocation44_spill] sm:$0xff] %v14488_v56 }
0x1ec1   :  { %v14490_v17 = vpop.f32.mrb[84].mxu0 }
0x1ec2   :  { %15694 = vst [vmem:[#allocation45_spill] sm:$0xff] %v14490_v17  ;;  %v14492_v50 = vpop.f32.mrb[85].mxu0 }
0x1ec3   :  { %15695 = vst [vmem:[#allocation46_spill] sm:$0xff] %v14492_v50 }
0x1ec5   :  { %v14494_v24 = vpop.f32.mrb[86].mxu0 }
0x1ec6   :  { %15696 = vst [vmem:[#allocation47_spill] sm:$0xff] %v14494_v24  ;;  %v14496_v32 = vpop.f32.mrb[87].mxu0 }
0x1ec7   :  { %15697 = vst [vmem:[#allocation48_spill] sm:$0xff] %v14496_v32 }
0x1ec9   :  { %v14498_v31 = vpop.f32.mrb[88].mxu0 }
0x1eca   :  { %15698 = vst [vmem:[#allocation49_spill] sm:$0xff] %v14498_v31  ;;  %v14500_v4 = vpop.f32.mrb[89].mxu0 }
0x1ecb   :  { %15699 = vst [vmem:[#allocation50_spill] sm:$0xff] %v14500_v4 }
0x1ecf   :  { %v11257_v44 = vpop.f32.mrb[90].mxu0 }
0x1ed0   :  { %7461 = vrot.lane.b32.xlu1 %v11257_v44, %s12701_s0  ;;  %v7396_v43 = vpop.f32.mrb[91].mxu0 }
0x1ed1   :  { %7459 = vrot.lane.b32.xlu0 %v7396_v43, %s12701_s0 }
0x1ed3   :  { %v11260_v13 = vpop.f32.mrb[92].mxu0 }
0x1ed4   :  { %7465 = vrot.lane.b32.xlu1 %v11260_v13, %s12701_s0  ;;  %v7406_v0 = vpop.f32.mrb[93].mxu0 }
0x1ed5   :  { %7463 = vrot.lane.b32.xlu0 %v7406_v0, %s12701_s0 }
0x1ed7   :  { %v11263_v1 = vpop.f32.mrb[94].mxu0 }
0x1ed8   :  { %7505 = vrot.lane.b32.xlu1 %v11263_v1, %s12701_s0  ;;  %v7416_v3 = vpop.f32.mrb[95].mxu0 }
0x1ed9   :  { %7503 = vrot.lane.b32.xlu0 %v7416_v3, %s12701_s0 }
0x1edb   :  { %v11266_v29 = vpop.f32.mrb[96].mxu0 }
0x1edc   :  { %7509 = vrot.lane.b32.xlu1 %v11266_v29, %s12701_s0  ;;  %v7426_v25 = vpop.f32.mrb[97].mxu0 }
0x1edd   :  { %7507 = vrot.lane.b32.xlu0 %v7426_v25, %s12701_s0 }
0x1edf   :  { %v11269_v11 = vpop.f32.mrb[98].mxu0 }
0x1ee0   :  { %v7544_v9 = vadd.f32 %v14513_v63, %v11269_v11  ;;  %v7436_v14 = vpop.f32.mrb[99].mxu0 }
0x1ee1   :  { %v7543_v34 = vadd.f32 %v14519_v10, %v7436_v14 }
0x1ee2   :  { %7553 = vrot.lane.b32.xlu1 %v7544_v9, %s12701_s0 }
0x1ee3   :  { %7551 = vrot.lane.b32.xlu0 %v7543_v34, %s12701_s0  ;;  %v11272_v5 = vpop.f32.mrb[100].mxu0 }
0x1ee4   :  { %v7546_v35 = vadd.f32 %v14527_v12, %v11272_v5  ;;  %v7446_v40 = vpop.f32.mrb[101].mxu0 }
0x1ee5   :  { %v7545_v38 = vadd.f32 %v14533_v45, %v7446_v40 }
0x1ee6   :  { %7557 = vrot.lane.b32.xlu1 %v7546_v35, %s12701_s0 }
0x1ee7   :  { %7555 = vrot.lane.b32.xlu0 %v7545_v38, %s12701_s0  ;;  %s14818_s0 = sld [smem:[#allocation2]] }
0x1eea   :  { %7585 = vrot.lane.b32.xlu1 %v14418_v62, %s12684_s23 }
0x1eeb   :  { %7583 = vrot.lane.b32.xlu0 %v14420_v58, %s12684_s23 }
0x1eed   :  { %p4473_p6 = scmp.eq.s32.totalorder %s14818_s0, 0  ;;  %p4762_p8 = scmp.eq.s32.totalorder %s14818_s0, 1 }
0x1eee   :  { %7589 = vrot.lane.b32.xlu1 %v14424_v49, %s12684_s23  ;;  %p5099_p10 = scmp.eq.s32.totalorder %s14818_s0, 2  ;;  %p5436_p12 = scmp.eq.s32.totalorder %s14818_s0, 3 }
0x1eef   :  { %7587 = vrot.lane.b32.xlu0 %v14426_v39, %s12684_s23  ;;  %s4474_s13 = scalar_select %p4473_p6, 1, 0 }
0x1ef0   :  { %p5773_p0 = scmp.eq.s32.totalorder %s14818_s0, 4  ;;  %p6110_p2 = scmp.eq.s32.totalorder %s14818_s0, 5 }
0x1ef1   :  { %s4475_s11 = scvt.s32.f32 %s4474_s13  ;;  %p6447_p4 = scmp.eq.s32.totalorder %s14818_s0, 6 }
0x1ef2   :  { %p6784_p6 = scmp.eq.s32.totalorder %s14818_s0, 7 }
0x1f42   :  { %v7462_v44 = vpop.permute.xlu1 %7461 }
0x1f43   :  { %v7472_v43 = vadd.f32 %v7462_v44, %v13630_v26  ;;  %v7460_v13 = vpop.permute.xlu0 %7459 }
0x1f44   :  { %v7471_v0 = vadd.f32 %v7460_v13, %v13632_v57 }
0x1f45   :  { %v10064_v1 = vmul.f32 -1.442695, %v7472_v43 }
0x1f46   :  { %v10063_v3 = vmul.f32 -1.442695, %v7471_v0  ;;  %v7466_v29 = vpop.permute.xlu1 %7465 }
0x1f47   :  { %12329 = vpow2.f32 %v10064_v1  ;;  %v7474_v25 = vadd.f32 %v7466_v29, %v13638_v2  ;;  %v7464_v11 = vpop.permute.xlu0 %7463 }
0x1f48   :  { %12331 = vpow2.f32 %v10063_v3  ;;  %v7473_v9 = vadd.f32 %v7464_v11, %v13640_v8 }
0x1f49   :  { %v10066_v14 = vmul.f32 -1.442695, %v7474_v25 }
0x1f4a   :  { %v10065_v34 = vmul.f32 -1.442695, %v7473_v9  ;;  %v7506_v5 = vpop.permute.xlu1 %7505 }
0x1f4b   :  { %12333 = vpow2.f32 %v10066_v14  ;;  %v7516_v35 = vadd.f32 %v7506_v5, %v13646_v16  ;;  %v7504_v40 = vpop.permute.xlu0 %7503 }
0x1f4c   :  { %12335 = vpow2.f32 %v10065_v34  ;;  %v7515_v38 = vadd.f32 %v7504_v40, %v13648_v21 }
0x1f4d   :  { %v10068_v44 = vmul.f32 -1.442695, %v7516_v35 }
0x1f4e   :  { %v10067_v43 = vmul.f32 -1.442695, %v7515_v38  ;;  %v7510_v13 = vpop.permute.xlu1 %7509 }
0x1f4f   :  { %12337 = vpow2.f32 %v10068_v44  ;;  %v7518_v0 = vadd.f32 %v7510_v13, %v13654_v27  ;;  %v7508_v1 = vpop.permute.xlu0 %7507 }
0x1f50   :  { %12339 = vpow2.f32 %v10067_v43  ;;  %v7517_v3 = vadd.f32 %v7508_v1, %v13656_v33 }
0x1f51   :  { %v12330_v29 = vpop.eup %12329  ;;  %v10070_v25 = vmul.f32 -1.442695, %v7518_v0 }
0x1f52   :  { %v12332_v11 = vpop.eup %12331  ;;  %v7488_v9 = vadd.f32 1.0, %v12330_v29  ;;  %v10069_v14 = vmul.f32 -1.442695, %v7517_v3 }
0x1f53   :  { %v7487_v5 = vadd.f32 1.0, %v12332_v11  ;;  %12341 = vpow2.f32 %v10070_v25 }
0x1f54   :  { %12343 = vrcp.f32 %v7488_v9  ;;  %v7554_v1 = vpop.permute.xlu1 %7553 }
0x1f55   :  { %v12334_v34 = vpop.eup %12333  ;;  %12345 = vrcp.f32 %v7487_v5  ;;  %v7552_v4 = vpop.permute.xlu0 %7551 }
0x1f56   :  { %v12336_v35 = vpop.eup %12335  ;;  %v7490_v40 = vadd.f32 1.0, %v12334_v34  ;;  %12347 = vpow2.f32 %v10069_v14 }
0x1f57   :  { %v7489_v38 = vadd.f32 1.0, %v12336_v35 }
0x1f58   :  { %12349 = vrcp.f32 %v7490_v40 }
0x1f59   :  { %v12338_v44 = vpop.eup %12337  ;;  %12351 = vrcp.f32 %v7489_v38  ;;  %v7558_v38 = vpop.permute.xlu1 %7557 }
0x1f5a   :  { %v12340_v43 = vpop.eup %12339  ;;  %v7532_v13 = vadd.f32 1.0, %v12338_v44  ;;  %v7556_v24 = vpop.permute.xlu0 %7555 }
0x1f5b   :  { %v7531_v0 = vadd.f32 1.0, %v12340_v43 }
0x1f5c   :  { %12353 = vrcp.f32 %v7532_v13 }
0x1f5d   :  { %v12342_v31 = vpop.eup %12341  ;;  %12355 = vrcp.f32 %v7531_v0 }
0x1f5e   :  { %v12344_v29 = vpop.eup %12343  ;;  %v7534_v3 = vadd.f32 1.0, %v12342_v31 }
0x1f5f   :  { %v12346_v11 = vpop.eup %12345  ;;  %v7564_v25 = vmul.f32 %v12344_v29, %v7554_v1  ;;  %v7586_v29 = vpop.permute.xlu1 %7585 }
0x1f60   :  { %v12348_v9 = vpop.eup %12347  ;;  %v7563_v5 = vmul.f32 %v12346_v11, %v7552_v4  ;;  %12357 = vrcp.f32 %v7534_v3  ;;  %v7584_v11 = vpop.permute.xlu0 %7583 }
0x1f61   :  { %v7533_v34 = vadd.f32 1.0, %v12348_v9  ;;  %v7568_v14 = vadd.f32 %v7564_v25, %v13690_v28 }
0x1f62   :  { %v12350_v35 = vpop.eup %12349  ;;  %v7567_v40 = vadd.f32 %v7563_v5, %v13697_v60 }
0x1f63   :  { %v12352_v44 = vpop.eup %12351  ;;  %12359 = vrcp.f32 %v7533_v34  ;;  %v7566_v43 = vmul.f32 %v12350_v35, %v7558_v38 }
0x1f64   :  { %12361 = vtanh.f32 %v7568_v14  ;;  %v7565_v31 = vmul.f32 %v12352_v44, %v7556_v24  ;;  %v7588_v56 = vpop.permute.xlu0 %7587 }
0x1f65   :  { %12363 = vtanh.f32 %v7567_v40  ;;  %v7570_v1 = vadd.f32 %v7566_v43, %v13706_v54 }
0x1f66   :  { %v7569_v4 = vadd.f32 %v7565_v31, %v13709_v22  ;;  %v12354_v13 = vpop.eup %12353  ;;  %v7590_v31 = vpop.permute.xlu1 %7589 }
0x1f67   :  { %12365 = vtanh.f32 %v7570_v1  ;;  %v12356_v0 = vpop.eup %12355  ;;  %v7576_v9 = vsub.f32 1.0, %v12354_v13  ;;  %v7596_v14 = vmul.f32 %v12354_v13, %v7586_v29 }
0x1f68   :  { %12367 = vtanh.f32 %v7569_v4  ;;  %v7575_v34 = vsub.f32 1.0, %v12356_v0  ;;  %v7595_v40 = vmul.f32 %v12356_v0, %v7584_v11 }
0x1f6a   :  { %v12358_v3 = vpop.eup %12357 }
0x1f6b   :  { %v7578_v44 = vsub.f32 1.0, %v12358_v3  ;;  %v7598_v59 = vmul.f32 %v12358_v3, %v7590_v31  ;;  %v14643_v31 = vld [vmem:[%s15586_s12 + $0x58] sm:$0xff] }
0x1f6d   :  { %v12360_v25 = vpop.eup %12359 }
0x1f6e   :  { %v12362_v5 = vpop.eup %12361  ;;  %v7577_v1 = vsub.f32 1.0, %v12360_v25  ;;  %v7597_v18 = vmul.f32 %v12360_v25, %v7588_v56  ;;  %v14594_v25 = vld [vmem:[%s15586_s12 + $0x20] sm:$0xff] }
0x1f6f   :  { %v12364_v35 = vpop.eup %12363  ;;  %v7580_v38 = vmul.f32 %v12362_v5, %v7576_v9 }
0x1f70   :  { %v7579_v24 = vmul.f32 %v12364_v35, %v7575_v34 }
0x1f71   :  { %v12366_v43 = vpop.eup %12365  ;;  %v14558_v17 = vadd.f32 %v7596_v14, %v7580_v38  ;;  %v14601_v38 = vld [vmem:[%s15586_s12 + $0x28] sm:$0xff]  ;;  %v14608_v14 = vld [vmem:[%s15586_s12 + $0x30] sm:$0xff] }
0x1f72   :  { %v12368_v4 = vpop.eup %12367  ;;  %v14560_v32 = vadd.f32 %v7595_v40, %v7579_v24  ;;  %v7582_v50 = vmul.f32 %v12366_v43, %v7578_v44  ;;  %v14615_v24 = vld [vmem:[%s15586_s12 + $0x38] sm:$0xff]  ;;  %v14622_v40 = vld [vmem:[%s15586_s12 + $0x40] sm:$0xff]  ;;  %v14629_v44 = vld [vmem:[%s15586_s12 + $0x48] sm:$0xff] }
0x1f73   :  { %15700 = vst [vmem:[#allocation51_spill] sm:$0xff] %v14558_v17  ;;  %v7581_v53 = vmul.f32 %v12368_v4, %v7577_v1  ;;  %v14636_v43 = vld [vmem:[%s15586_s12 + $0x50] sm:$0xff]  ;;  %v14650_v1 = vld [vmem:[%s15586_s12] sm:$0xff] }
0x1f74   :  { %v14562_v15 = vadd.f32 %v7598_v59, %v7582_v50  ;;  %v11888_v13 = vpack.i.bf16 %v14558_v17, %v14560_v32  ;;  %v14587_v50 = vld [vmem:[%s15586_s12 + $0x18] sm:$0xff] }
0x1f75   :  { %v14566_v0 = vadd.f32 %v7597_v18, %v7581_v53  ;;  %v14573_v53 = vld [vmem:[%s15586_s12 + $0x8] sm:$0xff]  ;;  %v14580_v18 = vld [vmem:[%s15586_s12 + $0x10] sm:$0xff] }
0x1f76   :  { %15701 = vst [vmem:[#allocation52_spill] sm:$0xff] %v14562_v15  ;;  %11889 = vrot.lane.b32.xlu0 %v11888_v13, %s12702_s25 }
0x1f77   :  { %15702 = vst [vmem:[#allocation53_spill] sm:$0xff] %v14566_v0  ;;  %v11893_v29 = vpack.i.bf16 %v14562_v15, %v14566_v0 }
0x1f79   :  { %11894 = vrot.lane.b32.xlu1 %v11893_v29, %s12702_s25  ;;  %s12706_s25 = smov 116  }
0x1fe8   :  { %v11890_v11 = vpop.permute.xlu0 %11889 }
0x1fe9   :  { %v11892_v9 = vunpack.i.h.bf16 %v11890_v11  ;;  %v11891_v5 = vunpack.i.l.bf16 %v11890_v11 }
0x1feb   :  { %v11895_v3 = vpop.permute.xlu1 %11894  ;;  %v11719_v34 = vpack.c.bf16 %v11892_v9, %v11891_v5 }
0x1fec   :  { %v11897_v35 = vunpack.i.h.bf16 %v11895_v3  ;;  %v11896_v56 = vunpack.i.l.bf16 %v11895_v3 }
0x1fed   :  { %11720 = vmatprep.subr.bf16.mxu1 %v11719_v34 }
0x1fee   :  { %11722 = vmatpush3.bf16.msra.mxu1 %v11719_v34  ;;  %v11723_v59 = vpack.c.bf16 %v11897_v35, %v11896_v56 }
0x1ff0   :  { %11724 = vmatprep.subr.bf16.mxu1 %v11723_v59 }
0x1ff2   :  { %11726 = vmatpush3.bf16.msra.mxu1 %v11723_v59 }
0x1ff5   :  { %11282 = vmatmul.mubr.msk.f32.vlgmr.msra.gmra.mrb[110].mxu1 %vm1507_vm9, %v14573_v53 }
0x1ff6   :  { %11284 = vmatprep.mubr.msk.f32.mxu1 %vm1507_vm9, %v14580_v18 }
0x1ff9   :  { %11285 = vmatmul.mubr.msk.f32.gmra.mrb[112].mxu1 %vm1507_vm9, %v14587_v50 }
0x1ffa   :  { %11287 = vmatprep.mubr.msk.f32.mxu1 %vm1507_vm9, %v14594_v25 }
0x1ffd   :  { %11288 = vmatmul.mubr.msk.f32.gmra.mrb[114].mxu1 %vm1507_vm9, %v14601_v38 }
0x1ffe   :  { %11290 = vmatprep.mubr.msk.f32.mxu1 %vm1507_vm9, %v14608_v14 }
0x2001   :  { %11291 = vmatmul.mubr.msk.f32.gmra.mrb[116].mxu1 %vm1507_vm9, %v14615_v24 }
0x2002   :  { %11293 = vmatprep.mubr.msk.f32.mxu1 %vm1507_vm9, %v14622_v40 }
0x2005   :  { %11294 = vmatmul.mubr.msk.f32.gmra.mrb[118].mxu1 %vm1507_vm9, %v14629_v44 }
0x2006   :  { %11296 = vmatprep.mubr.msk.f32.mxu1 %vm1507_vm9, %v14636_v43 }
0x2009   :  { %11297 = vmatmul.mubr.msk.f32.gmra.mrb[120].mxu1 %vm1507_vm9, %v14643_v31 }
0x200a   :  { %11333 = vmatprep.mubr.msk.f32.mxu1 %vm1507_vm9, %v14650_v1 }
0x20c8   :  { %v11283_v4 = vpop.f32.mrb[110].mxu1 }
0x20c9   :  { %7798 = vrot.lane.b32.xlu1 %v11283_v4, %s12703_s19  ;;  %v7733_v13 = vpop.f32.mrb[111].mxu1 }
0x20ca   :  { %7796 = vrot.lane.b32.xlu0 %v7733_v13, %s12703_s19 }
0x20cc   :  { %v11286_v29 = vpop.f32.mrb[112].mxu1 }
0x20cd   :  { %7802 = vrot.lane.b32.xlu1 %v11286_v29, %s12703_s19  ;;  %v7743_v11 = vpop.f32.mrb[113].mxu1 }
0x20ce   :  { %7800 = vrot.lane.b32.xlu0 %v7743_v11, %s12703_s19 }
0x20d0   :  { %v11289_v9 = vpop.f32.mrb[114].mxu1 }
0x20d1   :  { %7842 = vrot.lane.b32.xlu1 %v11289_v9, %s12703_s19  ;;  %v7753_v5 = vpop.f32.mrb[115].mxu1 }
0x20d2   :  { %7840 = vrot.lane.b32.xlu0 %v7753_v5, %s12703_s19 }
0x20d4   :  { %v11292_v3 = vpop.f32.mrb[116].mxu1 }
0x20d5   :  { %7846 = vrot.lane.b32.xlu1 %v11292_v3, %s12703_s19  ;;  %v7763_v34 = vpop.f32.mrb[117].mxu1 }
0x20d6   :  { %7844 = vrot.lane.b32.xlu0 %v7763_v34, %s12703_s19 }
0x20d8   :  { %v11295_v35 = vpop.f32.mrb[118].mxu1 }
0x20d9   :  { %v7881_v56 = vadd.f32 %v14513_v63, %v11295_v35  ;;  %v7773_v59 = vpop.f32.mrb[119].mxu1 }
0x20da   :  { %v7880_v4 = vadd.f32 %v14519_v10, %v7773_v59 }
0x20db   :  { %7890 = vrot.lane.b32.xlu1 %v7881_v56, %s12703_s19 }
0x20dc   :  { %7888 = vrot.lane.b32.xlu0 %v7880_v4, %s12703_s19  ;;  %v11298_v13 = vpop.f32.mrb[120].mxu1 }
0x20dd   :  { %v7883_v29 = vadd.f32 %v14527_v12, %v11298_v13  ;;  %v7783_v11 = vpop.f32.mrb[121].mxu1 }
0x20de   :  { %v7882_v9 = vadd.f32 %v14533_v45, %v7783_v11 }
0x20df   :  { %7894 = vrot.lane.b32.xlu1 %v7883_v29, %s12703_s19 }
0x20e0   :  { %7892 = vrot.lane.b32.xlu0 %v7882_v9, %s12703_s19  ;;  %s4763_s19 = scalar_select %p4762_p8, 1, 0 }
0x20e3   :  { %7922 = vrot.lane.b32.xlu1 %v14558_v17, %s12684_s23 }
0x20e4   :  { %7920 = vrot.lane.b32.xlu0 %v14560_v32, %s12684_s23 }
0x20e7   :  { %7926 = vrot.lane.b32.xlu1 %v14562_v15, %s12684_s23 }
0x20e8   :  { %7924 = vrot.lane.b32.xlu0 %v14566_v0, %s12684_s23 }
0x213b   :  { %v7799_v5 = vpop.permute.xlu1 %7798 }
0x213c   :  { %v7809_v3 = vadd.f32 %v7799_v5, %v13630_v26  ;;  %v7797_v34 = vpop.permute.xlu0 %7796 }
0x213d   :  { %v7808_v35 = vadd.f32 %v7797_v34, %v13632_v57 }
0x213e   :  { %v10084_v56 = vmul.f32 -1.442695, %v7809_v3 }
0x213f   :  { %v10083_v59 = vmul.f32 -1.442695, %v7808_v35  ;;  %v7803_v4 = vpop.permute.xlu1 %7802 }
0x2140   :  { %12369 = vpow2.f32 %v10084_v56  ;;  %v7811_v13 = vadd.f32 %v7803_v4, %v13638_v2  ;;  %v7801_v29 = vpop.permute.xlu0 %7800 }
0x2141   :  { %12371 = vpow2.f32 %v10083_v59  ;;  %v7810_v11 = vadd.f32 %v7801_v29, %v13640_v8 }
0x2142   :  { %v10086_v9 = vmul.f32 -1.442695, %v7811_v13 }
0x2143   :  { %v10085_v55 = vmul.f32 -1.442695, %v7810_v11  ;;  %v7843_v42 = vpop.permute.xlu1 %7842 }
0x2144   :  { %12373 = vpow2.f32 %v10086_v9  ;;  %v7853_v47 = vadd.f32 %v7843_v42, %v13646_v16  ;;  %v7841_v5 = vpop.permute.xlu0 %7840 }
0x2145   :  { %12375 = vpow2.f32 %v10085_v55  ;;  %v7852_v34 = vadd.f32 %v7841_v5, %v13648_v21 }
0x2146   :  { %v10088_v3 = vmul.f32 -1.442695, %v7853_v47 }
0x2147   :  { %v10087_v35 = vmul.f32 -1.442695, %v7852_v34  ;;  %v7847_v52 = vpop.permute.xlu1 %7846 }
0x2148   :  { %12377 = vpow2.f32 %v10088_v3  ;;  %v7855_v56 = vadd.f32 %v7847_v52, %v13654_v27  ;;  %v7845_v4 = vpop.permute.xlu0 %7844 }
0x2149   :  { %12379 = vpow2.f32 %v10087_v35  ;;  %v7854_v59 = vadd.f32 %v7845_v4, %v13656_v33 }
0x214a   :  { %v12370_v13 = vpop.eup %12369  ;;  %v10090_v29 = vmul.f32 -1.442695, %v7855_v56 }
0x214b   :  { %v12372_v11 = vpop.eup %12371  ;;  %v7825_v9 = vadd.f32 1.0, %v12370_v13  ;;  %v10089_v6 = vmul.f32 -1.442695, %v7854_v59 }
0x214c   :  { %v7824_v42 = vadd.f32 1.0, %v12372_v11  ;;  %12381 = vpow2.f32 %v10090_v29 }
0x214d   :  { %12383 = vrcp.f32 %v7825_v9  ;;  %v7891_v4 = vpop.permute.xlu1 %7890 }
0x214e   :  { %v12374_v55 = vpop.eup %12373  ;;  %12385 = vrcp.f32 %v7824_v42  ;;  %v7889_v41 = vpop.permute.xlu0 %7888 }
0x214f   :  { %v12376_v47 = vpop.eup %12375  ;;  %v7827_v5 = vadd.f32 1.0, %v12374_v55  ;;  %12387 = vpow2.f32 %v10089_v6 }
0x2150   :  { %v7826_v34 = vadd.f32 1.0, %v12376_v47 }
0x2151   :  { %12389 = vrcp.f32 %v7827_v5 }
0x2152   :  { %v12378_v52 = vpop.eup %12377  ;;  %12391 = vrcp.f32 %v7826_v34  ;;  %v7895_v34 = vpop.permute.xlu1 %7894 }
0x2153   :  { %v12380_v3 = vpop.eup %12379  ;;  %v7869_v35 = vadd.f32 1.0, %v12378_v52  ;;  %v7893_v23 = vpop.permute.xlu0 %7892 }
0x2154   :  { %v7868_v56 = vadd.f32 1.0, %v12380_v3 }
0x2155   :  { %12393 = vrcp.f32 %v7869_v35 }
0x2156   :  { %v12382_v20 = vpop.eup %12381  ;;  %12395 = vrcp.f32 %v7868_v56 }
0x2157   :  { %v12384_v13 = vpop.eup %12383  ;;  %v7871_v59 = vadd.f32 1.0, %v12382_v20 }
0x2158   :  { %v12386_v11 = vpop.eup %12385  ;;  %v7901_v29 = vmul.f32 %v12384_v13, %v7891_v4  ;;  %v7923_v13 = vpop.permute.xlu1 %7922 }
0x2159   :  { %v12388_v9 = vpop.eup %12387  ;;  %v7900_v42 = vmul.f32 %v12386_v11, %v7889_v41  ;;  %12397 = vrcp.f32 %v7871_v59  ;;  %v7921_v11 = vpop.permute.xlu0 %7920 }
0x215a   :  { %v7870_v55 = vadd.f32 1.0, %v12388_v9  ;;  %v7905_v6 = vadd.f32 %v7901_v29, %v13690_v28 }
0x215b   :  { %v12390_v47 = vpop.eup %12389  ;;  %v7904_v5 = vadd.f32 %v7900_v42, %v13697_v60 }
0x215c   :  { %v12392_v52 = vpop.eup %12391  ;;  %12399 = vrcp.f32 %v7870_v55  ;;  %v7903_v3 = vmul.f32 %v12390_v47, %v7895_v34 }
0x215d   :  { %12401 = vtanh.f32 %v7905_v6  ;;  %v7902_v20 = vmul.f32 %v12392_v52, %v7893_v23  ;;  %v7925_v36 = vpop.permute.xlu0 %7924 }
0x215e   :  { %12403 = vtanh.f32 %v7904_v5  ;;  %v7907_v4 = vadd.f32 %v7903_v3, %v13706_v54 }
0x215f   :  { %v7906_v41 = vadd.f32 %v7902_v20, %v13709_v22  ;;  %v12394_v35 = vpop.eup %12393  ;;  %v7927_v20 = vpop.permute.xlu1 %7926 }
0x2160   :  { %12405 = vtanh.f32 %v7907_v4  ;;  %v12396_v56 = vpop.eup %12395  ;;  %v7913_v9 = vsub.f32 1.0, %v12394_v35  ;;  %v7933_v6 = vmul.f32 %v12394_v35, %v7923_v13 }
0x2161   :  { %12407 = vtanh.f32 %v7906_v41  ;;  %v7912_v55 = vsub.f32 1.0, %v12396_v56  ;;  %v7932_v5 = vmul.f32 %v12396_v56, %v7921_v11 }
0x2163   :  { %v12398_v59 = vpop.eup %12397 }
0x2164   :  { %v7915_v52 = vsub.f32 1.0, %v12398_v59  ;;  %v7935_v61 = vmul.f32 %v12398_v59, %v7927_v20 }
0x2166   :  { %v12400_v29 = vpop.eup %12399 }
0x2167   :  { %v12402_v42 = vpop.eup %12401  ;;  %v7914_v4 = vsub.f32 1.0, %v12400_v29  ;;  %v7934_v0 = vmul.f32 %v12400_v29, %v7925_v36 }
0x2168   :  { %v12404_v47 = vpop.eup %12403  ;;  %v7917_v34 = vmul.f32 %v12402_v42, %v7913_v9 }
0x2169   :  { %v7916_v23 = vmul.f32 %v12404_v47, %v7912_v55 }
0x216a   :  { %v12406_v3 = vpop.eup %12405  ;;  %v14678_v48 = vadd.f32 %v7933_v6, %v7917_v34 }
0x216b   :  { %v12408_v41 = vpop.eup %12407  ;;  %v14680_v19 = vadd.f32 %v7932_v5, %v7916_v23  ;;  %v7919_v51 = vmul.f32 %v12406_v3, %v7915_v52 }
0x216c   :  { %15703 = vst [vmem:[#allocation54_spill] sm:$0xff] %v14678_v48  ;;  %v7918_v15 = vmul.f32 %v12408_v41, %v7914_v4 }
0x216d   :  { %15704 = vst [vmem:[#allocation55_spill] sm:$0xff] %v14680_v19  ;;  %v14682_v17 = vadd.f32 %v7935_v61, %v7919_v51  ;;  %v11898_v35 = vpack.i.bf16 %v14678_v48, %v14680_v19 }
0x216e   :  { %v14686_v56 = vadd.f32 %v7934_v0, %v7918_v15 }
0x216f   :  { %15705 = vst [vmem:[#allocation56_spill] sm:$0xff] %v14682_v17  ;;  %11899 = vrot.lane.b32.xlu0 %v11898_v35, %s12704_s20 }
0x2170   :  { %15706 = vst [vmem:[#allocation57_spill] sm:$0xff] %v14686_v56  ;;  %v11903_v13 = vpack.i.bf16 %v14682_v17, %v14686_v56 }
0x2172   :  { %11904 = vrot.lane.b32.xlu1 %v11903_v13, %s12704_s20  ;;  %s4764_s20 = scvt.s32.f32 %s4763_s19 }
0x2173   :  { %s5100_s19 = scalar_select %p5099_p10, 1, 0 }
0x21e1   :  { %v11900_v11 = vpop.permute.xlu0 %11899 }
0x21e2   :  { %v11902_v9 = vunpack.i.h.bf16 %v11900_v11  ;;  %v11901_v42 = vunpack.i.l.bf16 %v11900_v11 }
0x21e4   :  { %v11905_v59 = vpop.permute.xlu1 %11904  ;;  %v11727_v55 = vpack.c.bf16 %v11902_v9, %v11901_v42 }
0x21e5   :  { %v11907_v47 = vunpack.i.h.bf16 %v11905_v59  ;;  %v11906_v36 = vunpack.i.l.bf16 %v11905_v59 }
0x21e6   :  { %11728 = vmatprep.subr.bf16.mxu0 %v11727_v55 }
0x21e7   :  { %11730 = vmatpush3.bf16.msra.mxu0 %v11727_v55  ;;  %v11731_v61 = vpack.c.bf16 %v11907_v47, %v11906_v36 }
0x21e9   :  { %11732 = vmatprep.subr.bf16.mxu0 %v11731_v61 }
0x21eb   :  { %11734 = vmatpush3.bf16.msra.mxu0 %v11731_v61 }
0x21ee   :  { %11308 = vmatmul.mubr.msk.f32.vlgmr.msra.gmra.mrb[102].mxu0 %vm1507_vm9, %v14573_v53 }
0x21ef   :  { %11310 = vmatprep.mubr.msk.f32.mxu0 %vm1507_vm9, %v14580_v18 }
0x21f2   :  { %11311 = vmatmul.mubr.msk.f32.gmra.mrb[104].mxu0 %vm1507_vm9, %v14587_v50 }
0x21f3   :  { %11313 = vmatprep.mubr.msk.f32.mxu0 %vm1507_vm9, %v14594_v25 }
0x21f6   :  { %11314 = vmatmul.mubr.msk.f32.gmra.mrb[106].mxu0 %vm1507_vm9, %v14601_v38 }
0x21f7   :  { %11316 = vmatprep.mubr.msk.f32.mxu0 %vm1507_vm9, %v14608_v14 }
0x21fa   :  { %11317 = vmatmul.mubr.msk.f32.gmra.mrb[108].mxu0 %vm1507_vm9, %v14615_v24 }
0x21fb   :  { %11319 = vmatprep.mubr.msk.f32.mxu0 %vm1507_vm9, %v14622_v40 }
0x21fe   :  { %11320 = vmatmul.mubr.msk.f32.gmra.mrb[110].mxu0 %vm1507_vm9, %v14629_v44 }
0x21ff   :  { %11322 = vmatprep.mubr.msk.f32.mxu0 %vm1507_vm9, %v14636_v43 }
0x2202   :  { %11323 = vmatmul.mubr.msk.f32.gmra.mrb[112].mxu0 %vm1507_vm9, %v14643_v31 }
0x2203   :  { %11359 = vmatprep.mubr.msk.f32.mxu0 %vm1507_vm9, %v14650_v1 }
0x22c1   :  { %v11309_v51 = vpop.f32.mrb[102].mxu0 }
0x22c2   :  { %8135 = vrot.lane.b32.xlu1 %v11309_v51, %s12705_s24  ;;  %v8070_v15 = vpop.f32.mrb[103].mxu0 }
0x22c3   :  { %8133 = vrot.lane.b32.xlu0 %v8070_v15, %s12705_s24 }
0x22c5   :  { %v11312_v0 = vpop.f32.mrb[104].mxu0 }
0x22c6   :  { %8139 = vrot.lane.b32.xlu1 %v11312_v0, %s12705_s24  ;;  %v8080_v29 = vpop.f32.mrb[105].mxu0 }
0x22c7   :  { %8137 = vrot.lane.b32.xlu0 %v8080_v29, %s12705_s24 }
0x22c9   :  { %v11315_v34 = vpop.f32.mrb[106].mxu0 }
0x22ca   :  { %8179 = vrot.lane.b32.xlu1 %v11315_v34, %s12705_s24  ;;  %v8090_v6 = vpop.f32.mrb[107].mxu0 }
0x22cb   :  { %8177 = vrot.lane.b32.xlu0 %v8090_v6, %s12705_s24 }
0x22cd   :  { %v11318_v23 = vpop.f32.mrb[108].mxu0 }
0x22ce   :  { %8183 = vrot.lane.b32.xlu1 %v11318_v23, %s12705_s24  ;;  %v8100_v5 = vpop.f32.mrb[109].mxu0 }
0x22cf   :  { %8181 = vrot.lane.b32.xlu0 %v8100_v5, %s12705_s24 }
0x22d1   :  { %v11321_v52 = vpop.f32.mrb[110].mxu0 }
0x22d2   :  { %v8218_v3 = vadd.f32 %v14513_v63, %v11321_v52  ;;  %v8110_v20 = vpop.f32.mrb[111].mxu0 }
0x22d3   :  { %v8217_v4 = vadd.f32 %v14519_v10, %v8110_v20 }
0x22d4   :  { %8227 = vrot.lane.b32.xlu1 %v8218_v3, %s12705_s24 }
0x22d5   :  { %8225 = vrot.lane.b32.xlu0 %v8217_v4, %s12705_s24  ;;  %v11324_v41 = vpop.f32.mrb[112].mxu0 }
0x22d6   :  { %v8220_v35 = vadd.f32 %v14527_v12, %v11324_v41  ;;  %v8120_v13 = vpop.f32.mrb[113].mxu0 }
0x22d7   :  { %v8219_v11 = vadd.f32 %v14533_v45, %v8120_v13 }
0x22d8   :  { %8231 = vrot.lane.b32.xlu1 %v8220_v35, %s12705_s24 }
0x22d9   :  { %8229 = vrot.lane.b32.xlu0 %v8219_v11, %s12705_s24  ;;  %s12709_s24 = smov 14  }
0x22dc   :  { %8259 = vrot.lane.b32.xlu1 %v14678_v48, %s12684_s23 }
0x22dd   :  { %8257 = vrot.lane.b32.xlu0 %v14680_v19, %s12684_s23 }
0x22e0   :  { %8263 = vrot.lane.b32.xlu1 %v14682_v17, %s12684_s23 }
0x22e1   :  { %8261 = vrot.lane.b32.xlu0 %v14686_v56, %s12684_s23 }
0x2334   :  { %v8136_v9 = vpop.permute.xlu1 %8135 }
0x2335   :  { %v8146_v42 = vadd.f32 %v8136_v9, %v13630_v26  ;;  %v8134_v59 = vpop.permute.xlu0 %8133 }
0x2336   :  { %v8145_v55 = vadd.f32 %v8134_v59, %v13632_v57 }
0x2337   :  { %v10104_v47 = vmul.f32 -1.442695, %v8146_v42 }
0x2338   :  { %v10103_v36 = vmul.f32 -1.442695, %v8145_v55  ;;  %v8140_v61 = vpop.permute.xlu1 %8139 }
0x2339   :  { %12409 = vpow2.f32 %v10104_v47  ;;  %v8148_v51 = vadd.f32 %v8140_v61, %v13638_v2  ;;  %v8138_v15 = vpop.permute.xlu0 %8137 }
0x233a   :  { %12411 = vpow2.f32 %v10103_v36  ;;  %v8147_v0 = vadd.f32 %v8138_v15, %v13640_v8 }
0x233b   :  { %v10106_v29 = vmul.f32 -1.442695, %v8148_v51 }
0x233c   :  { %v10105_v34 = vmul.f32 -1.442695, %v8147_v0  ;;  %v8180_v6 = vpop.permute.xlu1 %8179 }
0x233d   :  { %12413 = vpow2.f32 %v10106_v29  ;;  %v8190_v23 = vadd.f32 %v8180_v6, %v13646_v16  ;;  %v8178_v5 = vpop.permute.xlu0 %8177 }
0x233e   :  { %12415 = vpow2.f32 %v10105_v34  ;;  %v8189_v52 = vadd.f32 %v8178_v5, %v13648_v21 }
0x233f   :  { %v10108_v3 = vmul.f32 -1.442695, %v8190_v23 }
0x2340   :  { %v10107_v20 = vmul.f32 -1.442695, %v8189_v52  ;;  %v8184_v4 = vpop.permute.xlu1 %8183 }
0x2341   :  { %12417 = vpow2.f32 %v10108_v3  ;;  %v8192_v41 = vadd.f32 %v8184_v4, %v13654_v27  ;;  %v8182_v35 = vpop.permute.xlu0 %8181 }
0x2342   :  { %12419 = vpow2.f32 %v10107_v20  ;;  %v8191_v13 = vadd.f32 %v8182_v35, %v13656_v33 }
0x2343   :  { %v12410_v11 = vpop.eup %12409  ;;  %v10110_v9 = vmul.f32 -1.442695, %v8192_v41 }
0x2344   :  { %v12412_v42 = vpop.eup %12411  ;;  %v8162_v59 = vadd.f32 1.0, %v12410_v11  ;;  %v10109_v55 = vmul.f32 -1.442695, %v8191_v13 }
0x2345   :  { %v8161_v47 = vadd.f32 1.0, %v12412_v42  ;;  %12421 = vpow2.f32 %v10110_v9 }
0x2346   :  { %12423 = vrcp.f32 %v8162_v59  ;;  %v8228_v6 = vpop.permute.xlu1 %8227 }
0x2347   :  { %v12414_v36 = vpop.eup %12413  ;;  %12425 = vrcp.f32 %v8161_v47  ;;  %v8226_v52 = vpop.permute.xlu0 %8225 }
0x2348   :  { %v12416_v61 = vpop.eup %12415  ;;  %v8164_v51 = vadd.f32 1.0, %v12414_v36  ;;  %12427 = vpow2.f32 %v10109_v55 }
0x2349   :  { %v8163_v15 = vadd.f32 1.0, %v12416_v61 }
0x234a   :  { %12429 = vrcp.f32 %v8164_v51  ;;  %v8232_v55 = vpop.permute.xlu1 %8231 }
0x234b   :  { %v12418_v0 = vpop.eup %12417  ;;  %12431 = vrcp.f32 %v8163_v15  ;;  %v8230_v61 = vpop.permute.xlu0 %8229 }
0x234c   :  { %v12420_v29 = vpop.eup %12419  ;;  %v8206_v34 = vadd.f32 1.0, %v12418_v0 }
0x234d   :  { %v8205_v5 = vadd.f32 1.0, %v12420_v29 }
0x234e   :  { %12433 = vrcp.f32 %v8206_v34 }
0x234f   :  { %v12422_v23 = vpop.eup %12421  ;;  %12435 = vrcp.f32 %v8205_v5  ;;  %v8258_v5 = vpop.permute.xlu0 %8257 }
0x2350   :  { %v12424_v3 = vpop.eup %12423  ;;  %v8208_v20 = vadd.f32 1.0, %v12422_v23 }
0x2351   :  { %v12426_v4 = vpop.eup %12425  ;;  %v8238_v41 = vmul.f32 %v12424_v3, %v8228_v6  ;;  %v8260_v6 = vpop.permute.xlu1 %8259 }
0x2352   :  { %v12428_v35 = vpop.eup %12427  ;;  %v8237_v13 = vmul.f32 %v12426_v4, %v8226_v52  ;;  %12437 = vrcp.f32 %v8208_v20 }
0x2353   :  { %v8207_v11 = vadd.f32 1.0, %v12428_v35  ;;  %v8242_v9 = vadd.f32 %v8238_v41, %v13690_v28  ;;  %v8262_v17 = vpop.permute.xlu0 %8261 }
0x2354   :  { %v12430_v42 = vpop.eup %12429  ;;  %v8241_v59 = vadd.f32 %v8237_v13, %v13697_v60 }
0x2355   :  { %v12432_v47 = vpop.eup %12431  ;;  %12439 = vrcp.f32 %v8207_v11  ;;  %v8240_v36 = vmul.f32 %v12430_v42, %v8232_v55 }
0x2356   :  { %12441 = vtanh.f32 %v8242_v9  ;;  %v8239_v51 = vmul.f32 %v12432_v47, %v8230_v61  ;;  %v8264_v47 = vpop.permute.xlu1 %8263 }
0x2357   :  { %12443 = vtanh.f32 %v8241_v59  ;;  %v8244_v15 = vadd.f32 %v8240_v36, %v13706_v54 }
0x2358   :  { %v8243_v0 = vadd.f32 %v8239_v51, %v13709_v22  ;;  %v12434_v29 = vpop.eup %12433 }
0x2359   :  { %12445 = vtanh.f32 %v8244_v15  ;;  %v12436_v34 = vpop.eup %12435  ;;  %v8250_v3 = vsub.f32 1.0, %v12434_v29  ;;  %v8270_v13 = vmul.f32 %v12434_v29, %v8260_v6 }
0x235a   :  { %12447 = vtanh.f32 %v8243_v0  ;;  %v8249_v4 = vsub.f32 1.0, %v12436_v34  ;;  %v8269_v9 = vmul.f32 %v12436_v34, %v8258_v5 }
0x235c   :  { %v12438_v23 = vpop.eup %12437 }
0x235d   :  { %v8252_v42 = vsub.f32 1.0, %v12438_v23  ;;  %v8272_v0 = vmul.f32 %v12438_v23, %v8264_v47 }
0x235f   :  { %v12440_v52 = vpop.eup %12439 }
0x2360   :  { %v12442_v20 = vpop.eup %12441  ;;  %v8251_v36 = vsub.f32 1.0, %v12440_v52  ;;  %v8271_v48 = vmul.f32 %v12440_v52, %v8262_v17 }
0x2361   :  { %v12444_v41 = vpop.eup %12443  ;;  %v8254_v35 = vmul.f32 %v12442_v20, %v8250_v3 }
0x2362   :  { %v8253_v11 = vmul.f32 %v12444_v41, %v8249_v4 }
0x2363   :  { %v12446_v59 = vpop.eup %12445  ;;  %v14738_v55 = vadd.f32 %v8270_v13, %v8254_v35 }
0x2364   :  { %v12448_v61 = vpop.eup %12447  ;;  %v14740_v51 = vadd.f32 %v8269_v9, %v8253_v11  ;;  %v8256_v15 = vmul.f32 %v12446_v59, %v8252_v42 }
0x2365   :  { %v8255_v56 = vmul.f32 %v12448_v61, %v8251_v36 }
0x2366   :  { %v14742_v19 = vadd.f32 %v8272_v0, %v8256_v15  ;;  %v11908_v29 = vpack.i.bf16 %v14738_v55, %v14740_v51 }
0x2367   :  { %v14746_v34 = vadd.f32 %v8271_v48, %v8255_v56 }
0x2368   :  { %11909 = vrot.lane.b32.xlu0 %v11908_v29, %s12706_s25 }
0x2369   :  { %v11913_v6 = vpack.i.bf16 %v14742_v19, %v14746_v34 }
0x236b   :  { %11914 = vrot.lane.b32.xlu1 %v11913_v6, %s12706_s25  ;;  %s12713_s25 = smov 7  }
0x23da   :  { %v11910_v5 = vpop.permute.xlu0 %11909 }
0x23db   :  { %v11912_v3 = vunpack.i.h.bf16 %v11910_v5  ;;  %v11911_v20 = vunpack.i.l.bf16 %v11910_v5 }
0x23dd   :  { %v11915_v23 = vpop.permute.xlu1 %11914  ;;  %v11735_v4 = vpack.c.bf16 %v11912_v3, %v11911_v20 }
0x23de   :  { %v11917_v41 = vunpack.i.h.bf16 %v11915_v23  ;;  %v11916_v17 = vunpack.i.l.bf16 %v11915_v23 }
0x23df   :  { %11736 = vmatprep.subr.bf16.mxu1 %v11735_v4 }
0x23e0   :  { %11738 = vmatpush3.bf16.msra.mxu1 %v11735_v4  ;;  %v11739_v52 = vpack.c.bf16 %v11917_v41, %v11916_v17 }
0x23e2   :  { %11740 = vmatprep.subr.bf16.mxu1 %v11739_v52 }
0x23e4   :  { %11742 = vmatpush3.bf16.msra.mxu1 %v11739_v52 }
0x23e7   :  { %11334 = vmatmul.mubr.msk.f32.vlgmr.msra.gmra.mrb[122].mxu1 %vm1507_vm9, %v14573_v53 }
0x23e8   :  { %11336 = vmatprep.mubr.msk.f32.mxu1 %vm1507_vm9, %v14580_v18 }
0x23eb   :  { %11337 = vmatmul.mubr.msk.f32.gmra.mrb[124].mxu1 %vm1507_vm9, %v14587_v50 }
0x23ec   :  { %11339 = vmatprep.mubr.msk.f32.mxu1 %vm1507_vm9, %v14594_v25 }
0x23ef   :  { %11340 = vmatmul.mubr.msk.f32.gmra.mrb[126].mxu1 %vm1507_vm9, %v14601_v38 }
0x23f0   :  { %11342 = vmatprep.mubr.msk.f32.mxu1 %vm1507_vm9, %v14608_v14 }
0x23f3   :  { %11343 = vmatmul.mubr.msk.f32.gmra.mrb[128].mxu1 %vm1507_vm9, %v14615_v24 }
0x23f4   :  { %11345 = vmatprep.mubr.msk.f32.mxu1 %vm1507_vm9, %v14622_v40 }
0x23f7   :  { %11346 = vmatmul.mubr.msk.f32.gmra.mrb[130].mxu1 %vm1507_vm9, %v14629_v44 }
0x23f8   :  { %11348 = vmatprep.mubr.msk.f32.mxu1 %vm1507_vm9, %v14636_v43 }
0x23fb   :  { %11349 = vmatmul.mubr.msk.f32.gmra.mrb[132].mxu1 %vm1507_vm9, %v14643_v31 }
0x23fc   :  { %11385 = vmatprep.mubr.msk.f32.mxu1 %vm1507_vm9, %v14650_v1 }
0x24ba   :  { %v11335_v48 = vpop.f32.mrb[122].mxu1 }
0x24bb   :  { %8472 = vrot.lane.b32.xlu1 %v11335_v48, %s12707_s9  ;;  %v8407_v53 = vpop.f32.mrb[123].mxu1 }
0x24bc   :  { %8470 = vrot.lane.b32.xlu0 %v8407_v53, %s12707_s9 }
0x24be   :  { %v11338_v18 = vpop.f32.mrb[124].mxu1 }
0x24bf   :  { %8476 = vrot.lane.b32.xlu1 %v11338_v18, %s12707_s9  ;;  %v8417_v50 = vpop.f32.mrb[125].mxu1 }
0x24c0   :  { %8474 = vrot.lane.b32.xlu0 %v8417_v50, %s12707_s9 }
0x24c2   :  { %v11341_v25 = vpop.f32.mrb[126].mxu1 }
0x24c3   :  { %8516 = vrot.lane.b32.xlu1 %v11341_v25, %s12707_s9  ;;  %v8427_v38 = vpop.f32.mrb[127].mxu1 }
0x24c4   :  { %8514 = vrot.lane.b32.xlu0 %v8427_v38, %s12707_s9 }
0x24c6   :  { %v11344_v14 = vpop.f32.mrb[128].mxu1 }
0x24c7   :  { %8520 = vrot.lane.b32.xlu1 %v11344_v14, %s12707_s9  ;;  %v8437_v24 = vpop.f32.mrb[129].mxu1 }
0x24c8   :  { %8518 = vrot.lane.b32.xlu0 %v8437_v24, %s12707_s9 }
0x24ca   :  { %v11347_v40 = vpop.f32.mrb[130].mxu1 }
0x24cb   :  { %v8555_v44 = vadd.f32 %v14513_v63, %v11347_v40  ;;  %v8447_v43 = vpop.f32.mrb[131].mxu1  ;;  %v6968_v63 = vstv %s6967_s30 }
0x24cc   :  { %v8554_v31 = vadd.f32 %v14519_v10, %v8447_v43  ;;  %v14790_v10 = vmul.f32 %v6968_v63, %v14212_v37  ;;  %v14803_v11 = vmul.f32 %v6968_v63, %v14220_v30 }
0x24cd   :  { %8564 = vrot.lane.b32.xlu1 %v8555_v44, %s12707_s9 }
0x24ce   :  { %8562 = vrot.lane.b32.xlu0 %v8554_v31, %s12707_s9  ;;  %v11350_v1 = vpop.f32.mrb[132].mxu1 }
0x24cf   :  { %v8557_v56 = vadd.f32 %v14527_v12, %v11350_v1  ;;  %v8457_v35 = vpop.f32.mrb[133].mxu1  ;;  %v14793_v12 = vmul.f32 %v6968_v63, %v14214_v7 }
0x24d0   :  { %v8556_v13 = vadd.f32 %v14533_v45, %v8457_v35  ;;  %v14800_v45 = vmul.f32 %v6968_v63, %v14216_v46 }
0x24d1   :  { %8568 = vrot.lane.b32.xlu1 %v8557_v56, %s12707_s9 }
0x24d2   :  { %8566 = vrot.lane.b32.xlu0 %v8556_v13, %s12707_s9 }
0x24d5   :  { %8596 = vrot.lane.b32.xlu1 %v14738_v55, %s12684_s23 }
0x24d6   :  { %8594 = vrot.lane.b32.xlu0 %v14740_v51, %s12684_s23 }
0x24d9   :  { %8600 = vrot.lane.b32.xlu1 %v14742_v19, %s12684_s23 }
0x24da   :  { %8598 = vrot.lane.b32.xlu0 %v14746_v34, %s12684_s23 }
0x24dd   :  { %7275 = vrot.lane.b32.xlu1 %v14790_v10, %s12684_s23 }
0x24de   :  { %7273 = vrot.lane.b32.xlu0 %v14793_v12, %s12684_s23 }
0x24e1   :  { %7279 = vrot.lane.b32.xlu1 %v14800_v45, %s12684_s23 }
0x24e2   :  { %7277 = vrot.lane.b32.xlu0 %v14803_v11, %s12684_s23 }
0x252d   :  { %v8473_v37 = vpop.permute.xlu1 %8472 }
0x252e   :  { %v8483_v7 = vadd.f32 %v8473_v37, %v13630_v26  ;;  %v8471_v9 = vpop.permute.xlu0 %8470 }
0x252f   :  { %v8482_v42 = vadd.f32 %v8471_v9, %v13632_v57 }
0x2530   :  { %v10124_v59 = vmul.f32 -1.442695, %v8483_v7 }
0x2531   :  { %v10123_v47 = vmul.f32 -1.442695, %v8482_v42  ;;  %v8477_v36 = vpop.permute.xlu1 %8476 }
0x2532   :  { %12449 = vpow2.f32 %v10124_v59  ;;  %v8485_v46 = vadd.f32 %v8477_v36, %v13638_v2  ;;  %v8475_v30 = vpop.permute.xlu0 %8474 }
0x2533   :  { %12451 = vpow2.f32 %v10123_v47  ;;  %v8484_v61 = vadd.f32 %v8475_v30, %v13640_v8 }
0x2534   :  { %v10126_v15 = vmul.f32 -1.442695, %v8485_v46 }
0x2535   :  { %v10125_v0 = vmul.f32 -1.442695, %v8484_v61  ;;  %v8517_v29 = vpop.permute.xlu1 %8516 }
0x2536   :  { %12453 = vpow2.f32 %v10126_v15  ;;  %v8527_v6 = vadd.f32 %v8517_v29, %v13646_v16  ;;  %v8515_v5 = vpop.permute.xlu0 %8514 }
0x2537   :  { %12455 = vpow2.f32 %v10125_v0  ;;  %v8526_v3 = vadd.f32 %v8515_v5, %v13648_v21 }
0x2538   :  { %v10128_v20 = vmul.f32 -1.442695, %v8527_v6 }
0x2539   :  { %v10127_v23 = vmul.f32 -1.442695, %v8526_v3  ;;  %v8521_v4 = vpop.permute.xlu1 %8520 }
0x253a   :  { %12457 = vpow2.f32 %v10128_v20  ;;  %v8529_v41 = vadd.f32 %v8521_v4, %v13654_v27  ;;  %v8519_v17 = vpop.permute.xlu0 %8518 }
0x253b   :  { %12459 = vpow2.f32 %v10127_v23  ;;  %v8528_v52 = vadd.f32 %v8519_v17, %v13656_v33 }
0x253c   :  { %v12450_v48 = vpop.eup %12449  ;;  %v10130_v53 = vmul.f32 -1.442695, %v8529_v41 }
0x253d   :  { %v12452_v18 = vpop.eup %12451  ;;  %v8499_v50 = vadd.f32 1.0, %v12450_v48  ;;  %v10129_v25 = vmul.f32 -1.442695, %v8528_v52 }
0x253e   :  { %v8498_v38 = vadd.f32 1.0, %v12452_v18  ;;  %12461 = vpow2.f32 %v10130_v53 }
0x253f   :  { %12463 = vrcp.f32 %v8499_v50  ;;  %v8565_v56 = vpop.permute.xlu1 %8564 }
0x2540   :  { %v12454_v14 = vpop.eup %12453  ;;  %12465 = vrcp.f32 %v8498_v38  ;;  %v8563_v63 = vpop.permute.xlu0 %8562 }
0x2541   :  { %v12456_v24 = vpop.eup %12455  ;;  %v8501_v40 = vadd.f32 1.0, %v12454_v14  ;;  %12467 = vpow2.f32 %v10129_v25 }
0x2542   :  { %v8500_v44 = vadd.f32 1.0, %v12456_v24 }
0x2543   :  { %12469 = vrcp.f32 %v8501_v40  ;;  %v8569_v15 = vpop.permute.xlu1 %8568 }
0x2544   :  { %v12458_v43 = vpop.eup %12457  ;;  %12471 = vrcp.f32 %v8500_v44  ;;  %v8567_v6 = vpop.permute.xlu0 %8566 }
0x2545   :  { %v12460_v31 = vpop.eup %12459  ;;  %v8543_v1 = vadd.f32 1.0, %v12458_v43 }
0x2546   :  { %v8542_v13 = vadd.f32 1.0, %v12460_v31 }
0x2547   :  { %12473 = vrcp.f32 %v8543_v1  ;;  %v8597_v41 = vpop.permute.xlu1 %8596 }
0x2548   :  { %v12462_v35 = vpop.eup %12461  ;;  %12475 = vrcp.f32 %v8542_v13  ;;  %v8595_v17 = vpop.permute.xlu0 %8594 }
0x2549   :  { %v12464_v37 = vpop.eup %12463  ;;  %v8545_v7 = vadd.f32 1.0, %v12462_v35 }
0x254a   :  { %v12466_v9 = vpop.eup %12465  ;;  %v8575_v42 = vmul.f32 %v12464_v37, %v8565_v56 }
0x254b   :  { %v12468_v59 = vpop.eup %12467  ;;  %v8574_v47 = vmul.f32 %v12466_v9, %v8563_v63  ;;  %12477 = vrcp.f32 %v8545_v7  ;;  %v8601_v1 = vpop.permute.xlu1 %8600 }
0x254c   :  { %v8544_v36 = vadd.f32 1.0, %v12468_v59  ;;  %v8579_v46 = vadd.f32 %v8575_v42, %v13690_v28  ;;  %v8599_v35 = vpop.permute.xlu0 %8598 }
0x254d   :  { %v12470_v30 = vpop.eup %12469  ;;  %v8578_v61 = vadd.f32 %v8574_v47, %v13697_v60 }
0x254e   :  { %v12472_v0 = vpop.eup %12471  ;;  %12479 = vrcp.f32 %v8544_v36  ;;  %v8577_v29 = vmul.f32 %v12470_v30, %v8569_v15  ;;  %v15707_v15 = vld [vmem:[#allocation15_spill] sm:$0xff] }
0x254f   :  { %12481 = vtanh.f32 %v8579_v46  ;;  %v8576_v5 = vmul.f32 %v12472_v0, %v8567_v6  ;;  %v4476_v46 = vstv %s4475_s11  ;;  %v15708_v6 = vld [vmem:[#allocation14_spill] sm:$0xff] }
0x2550   :  { %12483 = vtanh.f32 %v8578_v61  ;;  %v8581_v3 = vadd.f32 %v8577_v29, %v13706_v54  ;;  %v7274_v30 = vpop.permute.xlu0 %7273  ;;  %v14838_v0 = vmul.f32 %v4476_v46, %v15707_v15  ;;  %v7276_v29 = vpop.permute.xlu1 %7275 }
0x2551   :  { %v8580_v20 = vadd.f32 %v8576_v5, %v13709_v22  ;;  %v12474_v23 = vpop.eup %12473  ;;  %v14843_v5 = vmul.f32 %v4476_v46, %v15708_v6 }
0x2552   :  { %12485 = vtanh.f32 %v8581_v3  ;;  %v12476_v4 = vpop.eup %12475  ;;  %v8587_v53 = vsub.f32 1.0, %v12474_v23  ;;  %v8607_v14 = vmul.f32 %v12474_v23, %v8597_v41  ;;  %v7285_v3 = vsub.f32 %v14420_v58, %v7274_v30 }
0x2553   :  { %12487 = vtanh.f32 %v8580_v20  ;;  %v8586_v50 = vsub.f32 1.0, %v12476_v4  ;;  %v8606_v40 = vmul.f32 %v12476_v4, %v8595_v17  ;;  %v15709_v20 = vld [vmem:[#allocation17_spill] sm:$0xff]  ;;  %v7289_v4 = vstv %s7268_s18  ;;  %s7604_s18 = scalar_select %p7603_p9, 1, 0 }
0x2554   :  { %v14847_v23 = vmul.f32 %v4476_v46, %v15709_v20  ;;  %v7278_v41 = vpop.permute.xlu0 %7277  ;;  %v7286_v17 = vsub.f32 %v14418_v62, %v7276_v29  ;;  %v15713_v29 = vld [vmem:[#allocation21_spill] sm:$0xff]  ;;  %v14877_v20 = vld [vmem:[%s15586_s12 + $0x8] sm:$0xff] }
0x2555   :  { %v12478_v52 = vpop.eup %12477  ;;  %v7287_v58 = vsub.f32 %v14426_v39, %v7278_v41  ;;  %v15714_v41 = vld [vmem:[#allocation20_spill] sm:$0xff] }
0x2556   :  { %v8589_v44 = vsub.f32 1.0, %v12478_v52  ;;  %v8609_v7 = vmul.f32 %v12478_v52, %v8601_v1  ;;  %v15710_v52 = vld [vmem:[#allocation16_spill] sm:$0xff] }
0x2558   :  { %v12480_v48 = vpop.eup %12479 }
0x2559   :  { %v12482_v18 = vpop.eup %12481  ;;  %v8588_v56 = vsub.f32 1.0, %v12480_v48  ;;  %v8608_v42 = vmul.f32 %v12480_v48, %v8599_v35  ;;  %v14855_v48 = vmul.f32 %v4476_v46, %v15710_v52  ;;  %v15711_v35 = vld [vmem:[#allocation19_spill] sm:$0xff] }
0x255a   :  { %v12484_v25 = vpop.eup %12483  ;;  %v8591_v38 = vmul.f32 %v12482_v18, %v8587_v53  ;;  %v7290_v53 = vmul.f32 %v7289_v4, %v7285_v3  ;;  %v7280_v18 = vpop.permute.xlu1 %7279 }
0x255b   :  { %v8590_v24 = vmul.f32 %v12484_v25, %v8586_v50  ;;  %v7291_v50 = vmul.f32 %v7289_v4, %v7286_v17  ;;  %v7288_v25 = vsub.f32 %v14424_v49, %v7280_v18  ;;  %v14897_v18 = vld [vmem:[%s15586_s12 + $0x18] sm:$0xff] }
0x255c   :  { %v12486_v43 = vpop.eup %12485  ;;  %v14824_v31 = vadd.f32 %v8607_v14, %v8591_v38  ;;  %v7292_v38 = vmul.f32 %v7289_v4, %v7287_v58 }
0x255d   :  { %v12488_v13 = vpop.eup %12487  ;;  %v14827_v63 = vadd.f32 %v8606_v40, %v8590_v24  ;;  %v8593_v37 = vmul.f32 %v12486_v43, %v8589_v44  ;;  %v7293_v62 = vmul.f32 %v7289_v4, %v7288_v25  ;;  %v14884_v4 = vld [vmem:[%s15586_s12 + $0x10] sm:$0xff] }
0x255e   :  { %v8592_v9 = vmul.f32 %v12488_v13, %v8588_v56  ;;  %v4785_v56 = vstv %s4764_s20  ;;  %s5101_s20 = scvt.s32.f32 %s5100_s19 }
0x255f   :  { %v14829_v59 = vadd.f32 %v8609_v7, %v8593_v37  ;;  %v11918_v47 = vpack.i.bf16 %v14824_v31, %v14827_v63 }
0x2560   :  { %v14833_v36 = vadd.f32 %v8608_v42, %v8592_v9  ;;  %v15712_v42 = vld [vmem:[#allocation18_spill] sm:$0xff] }
0x2561   :  { %11919 = vrot.lane.b32.xlu0 %v11918_v47, %s12708_s17 }
0x2562   :  { %v11923_v61 = vpack.i.bf16 %v14829_v59, %v14833_v36 }
0x2564   :  { %11924 = vrot.lane.b32.xlu1 %v11923_v61, %s12708_s17  ;;  %s8278_s17 = scalar_select %p8277_p13, 1, 0 }
0x2565   :  { %4769 = vrot.lane.b32.xlu0 %v14838_v0, %s12684_s23 }
0x2568   :  { %4771 = vrot.lane.b32.xlu1 %v14843_v5, %s12684_s23 }
0x2569   :  { %4773 = vrot.lane.b32.xlu0 %v14847_v23, %s12684_s23 }
0x256c   :  { %4775 = vrot.lane.b32.xlu1 %v14855_v48, %s12684_s23 }
0x256d   :  { %7298 = vrot.lane.b32.xlu0 %v7290_v53, %s12683_s22 }
0x2570   :  { %7300 = vrot.lane.b32.xlu1 %v7291_v50, %s12683_s22  ;;  %v14906_v50 = vld [vmem:[%s15586_s12 + $0x20] sm:$0xff] }
0x2571   :  { %7302 = vrot.lane.b32.xlu0 %v7292_v38, %s12683_s22 }
0x2574   :  { %7304 = vrot.lane.b32.xlu1 %v7293_v62, %s12683_s22  ;;  %v14917_v62 = vld [vmem:[%s15586_s12 + $0x28] sm:$0xff] }
0x25d3   :  { %v11920_v14 = vpop.permute.xlu0 %11919 }
0x25d4   :  { %v11922_v39 = vunpack.i.h.bf16 %v11920_v14  ;;  %v11921_v24 = vunpack.i.l.bf16 %v11920_v14  ;;  %v14925_v14 = vld [vmem:[%s15586_s12 + $0x30] sm:$0xff] }
0x25d6   :  { %v11925_v40 = vpop.permute.xlu1 %11924  ;;  %v11743_v44 = vpack.c.bf16 %v11922_v39, %v11921_v24  ;;  %v14937_v39 = vld [vmem:[%s15586_s12 + $0x38] sm:$0xff]  ;;  %v14946_v24 = vld [vmem:[%s15586_s12 + $0x40] sm:$0xff] }
0x25d7   :  { %v11927_v43 = vunpack.i.h.bf16 %v11925_v40  ;;  %v11926_v1 = vunpack.i.l.bf16 %v11925_v40  ;;  %v4770_v49 = vpop.permute.xlu0 %4769  ;;  %v14960_v40 = vld [vmem:[%s15586_s12 + $0x50] sm:$0xff] }
0x25d8   :  { %v4781_v13 = vsub.f32 %v15711_v35, %v4770_v49  ;;  %11744 = vmatprep.subr.bf16.mxu0 %v11743_v44 }
0x25d9   :  { %11746 = vmatpush3.bf16.msra.mxu0 %v11743_v44  ;;  %v11747_v37 = vpack.c.bf16 %v11927_v43, %v11926_v1  ;;  %v14967_v44 = vld [vmem:[%s15586_s12 + $0x58] sm:$0xff] }
0x25da   :  { %v4786_v7 = vmul.f32 %v4785_v56, %v4781_v13  ;;  %v4772_v9 = vpop.permute.xlu1 %4771  ;;  %15715 = vst [vmem:[#allocation15_spill] sm:$0xff] %v14967_v44 }
0x25db   :  { %v4782_v47 = vsub.f32 %v15712_v42, %v4772_v9  ;;  %v4774_v46 = vpop.permute.xlu0 %4773  ;;  %11748 = vmatprep.subr.bf16.mxu0 %v11747_v37 }
0x25dc   :  { %4794 = vrot.lane.b32.xlu0 %v4786_v7, %s12683_s22  ;;  %v4783_v6 = vsub.f32 %v15713_v29, %v4774_v46 }
0x25dd   :  { %v4787_v30 = vmul.f32 %v4785_v56, %v4782_v47  ;;  %11750 = vmatpush3.bf16.msra.mxu0 %v11747_v37 }
0x25de   :  { %v4776_v61 = vpop.permute.xlu1 %4775  ;;  %v4788_v53 = vmul.f32 %v4785_v56, %v4783_v6  ;;  %v15718_v6 = vld [vmem:[#allocation52_spill] sm:$0xff] }
0x25df   :  { %v7299_v15 = vpop.permute.xlu0 %7298  ;;  %4796 = vrot.lane.b32.xlu1 %v4787_v30, %s12683_s22  ;;  %v4784_v17 = vsub.f32 %v15714_v41, %v4776_v61 }
0x25e0   :  { %v14872_v3 = vadd.f32 %v7299_v15, %v14793_v12  ;;  %11360 = vmatmul.mubr.msk.f32.vlgmr.msra.gmra.mrb[114].mxu0 %vm1507_vm9, %v14877_v20  ;;  %v15717_v15 = vld [vmem:[#allocation53_spill] sm:$0xff] }
0x25e1   :  { %11362 = vmatprep.mubr.msk.f32.mxu0 %vm1507_vm9, %v14884_v4 }
0x25e2   :  { %7610 = vrot.lane.b32.xlu0 %v14872_v3, %s12689_s21  ;;  %v7301_v12 = vpop.permute.xlu1 %7300 }
0x25e3   :  { %v14892_v52 = vadd.f32 %v7301_v12, %v14790_v10  ;;  %v7303_v58 = vpop.permute.xlu0 %7302  ;;  %v4789_v10 = vmul.f32 %v4785_v56, %v4784_v17 }
0x25e4   :  { %11363 = vmatmul.mubr.msk.f32.gmra.mrb[116].mxu0 %vm1507_vm9, %v14897_v18  ;;  %v14912_v25 = vadd.f32 %v7303_v58, %v14803_v11  ;;  %v15719_v58 = vld [vmem:[#allocation23_spill] sm:$0xff] }
0x25e5   :  { %7612 = vrot.lane.b32.xlu1 %v14892_v52, %s12689_s21  ;;  %11365 = vmatprep.mubr.msk.f32.mxu0 %vm1507_vm9, %v14906_v50 }
0x25e6   :  { %4798 = vrot.lane.b32.xlu0 %v4788_v53, %s12683_s22  ;;  %v7305_v38 = vpop.permute.xlu1 %7304 }
0x25e7   :  { %v14932_v11 = vadd.f32 %v7305_v38, %v14800_v45  ;;  %v14953_v45 = vld [vmem:[%s15586_s12 + $0x48] sm:$0xff]  ;;  %s7605_s12 = scvt.s32.f32 %s7604_s18  ;;  %s8279_s18 = scvt.s32.f32 %s8278_s17 }
0x25e8   :  { %11366 = vmatmul.mubr.msk.f32.gmra.mrb[118].mxu0 %vm1507_vm9, %v14917_v62 }
0x25e9   :  { %4800 = vrot.lane.b32.xlu1 %v4789_v10, %s12683_s22  ;;  %11368 = vmatprep.mubr.msk.f32.mxu0 %vm1507_vm9, %v14925_v14  ;;  %v7626_v9 = vstv %s7605_s12  ;;  %s6785_s22 = scalar_select %p6784_p6, 1, 0 }
0x25ea   :  { %7614 = vrot.lane.b32.xlu0 %v14912_v25, %s12689_s21 }
0x25eb   :  { %s6786_s9 = scvt.s32.f32 %s6785_s22 }
0x25ec   :  { %11369 = vmatmul.mubr.msk.f32.gmra.mrb[120].mxu0 %vm1507_vm9, %v14937_v39 }
0x25ed   :  { %7616 = vrot.lane.b32.xlu1 %v14932_v11, %s12689_s21  ;;  %11371 = vmatprep.mubr.msk.f32.mxu0 %vm1507_vm9, %v14946_v24 }
0x25f0   :  { %11372 = vmatmul.mubr.msk.f32.gmra.mrb[122].mxu0 %vm1507_vm9, %v14953_v45 }
0x25f1   :  { %11374 = vmatprep.mubr.msk.f32.mxu0 %vm1507_vm9, %v14960_v40 }
0x25f4   :  { %11375 = vmatmul.mubr.msk.f32.gmra.mrb[124].mxu0 %vm1507_vm9, %v14967_v44 }
0x264e   :  { %v4795_v43 = vpop.permute.xlu0 %4794 }
0x264f   :  { %v14973_v1 = vadd.f32 %v4795_v43, %v14838_v0 }
0x2651   :  { %5106 = vrot.lane.b32.xlu0 %v14973_v1, %s12689_s21  ;;  %v4797_v56 = vpop.permute.xlu1 %4796 }
0x2652   :  { %v14978_v49 = vadd.f32 %v4797_v56, %v14843_v5  ;;  %v15716_v5 = vld [vmem:[#allocation51_spill] sm:$0xff]  ;;  %v15720_v56 = vld [vmem:[#allocation22_spill] sm:$0xff] }
0x2654   :  { %v7611_v35 = vpop.permute.xlu0 %7610  ;;  %5108 = vrot.lane.b32.xlu1 %v14978_v49, %s12689_s21 }
0x2655   :  { %v7622_v7 = vsub.f32 %v14560_v32, %v7611_v35 }
0x2657   :  { %v7613_v13 = vpop.permute.xlu1 %7612  ;;  %v7627_v61 = vmul.f32 %v7626_v9, %v7622_v7 }
0x2658   :  { %v4799_v37 = vpop.permute.xlu0 %4798  ;;  %v7623_v47 = vsub.f32 %v15716_v5, %v7613_v13 }
0x2659   :  { %v14984_v0 = vadd.f32 %v4799_v37, %v14847_v23 }
0x265a   :  { %v7628_v23 = vmul.f32 %v7626_v9, %v7623_v47  ;;  %v15721_v47 = vld [vmem:[#allocation25_spill] sm:$0xff] }
0x265b   :  { %5110 = vrot.lane.b32.xlu0 %v14984_v0, %s12689_s21  ;;  %v4801_v42 = vpop.permute.xlu1 %4800 }
0x265c   :  { %v7615_v46 = vpop.permute.xlu0 %7614  ;;  %v14990_v30 = vadd.f32 %v4801_v42, %v14855_v48  ;;  %v5122_v48 = vstv %s5101_s20 }
0x265d   :  { %v7624_v29 = vsub.f32 %v15717_v15, %v7615_v46 }
0x265e   :  { %5112 = vrot.lane.b32.xlu1 %v14990_v30, %s12689_s21 }
0x265f   :  { %7635 = vrot.lane.b32.xlu0 %v7627_v61, %s12685_s3  ;;  %v7617_v32 = vpop.permute.xlu1 %7616  ;;  %v7629_v41 = vmul.f32 %v7626_v9, %v7624_v29 }
0x2660   :  { %v7625_v12 = vsub.f32 %v15718_v6, %v7617_v32  ;;  %v15722_v32 = vld [vmem:[#allocation24_spill] sm:$0xff] }
0x2662   :  { %7637 = vrot.lane.b32.xlu1 %v7628_v23, %s12685_s3  ;;  %v7630_v17 = vmul.f32 %v7626_v9, %v7625_v12 }
0x2663   :  { %7639 = vrot.lane.b32.xlu0 %v7629_v41, %s12685_s3 }
0x2666   :  { %7641 = vrot.lane.b32.xlu1 %v7630_v17, %s12685_s3 }
0x26b3   :  { %v11361_v9 = vpop.f32.mrb[114].mxu0 }
0x26b4   :  { %v8744_v5 = vpop.f32.mrb[115].mxu0 }
0x26b7   :  { %v11364_v29 = vpop.f32.mrb[116].mxu0 }
0x26b8   :  { %v8754_v12 = vpop.f32.mrb[117].mxu0 }
0x26c3   :  { %v5107_v53 = vpop.permute.xlu0 %5106 }
0x26c4   :  { %v5118_v10 = vsub.f32 %v15719_v58, %v5107_v53 }
0x26c6   :  { %v5123_v38 = vmul.f32 %v5122_v48, %v5118_v10  ;;  %v5109_v43 = vpop.permute.xlu1 %5108  ;;  %v11367_v10 = vpop.f32.mrb[118].mxu0 }
0x26c7   :  { %v5119_v35 = vsub.f32 %v15720_v56, %v5109_v43 }
0x26c8   :  { %5131 = vrot.lane.b32.xlu0 %v5123_v38, %s12685_s3  ;;  %v8764_v38 = vpop.f32.mrb[119].mxu0 }
0x26c9   :  { %v5124_v13 = vmul.f32 %v5122_v48, %v5119_v35  ;;  %v11370_v43 = vpop.f32.mrb[120].mxu0 }
0x26cb   :  { %5133 = vrot.lane.b32.xlu1 %v5124_v13, %s12685_s3 }
0x26cd   :  { %v5111_v37 = vpop.permute.xlu0 %5110 }
0x26ce   :  { %v5120_v46 = vsub.f32 %v15721_v47, %v5111_v37 }
0x26d0   :  { %v5113_v7 = vpop.permute.xlu1 %5112  ;;  %v5125_v41 = vmul.f32 %v5122_v48, %v5120_v46 }
0x26d1   :  { %v7636_v42 = vpop.permute.xlu0 %7635  ;;  %v5121_v23 = vsub.f32 %v15722_v32, %v5113_v7 }
0x26d2   :  { %v15007_v61 = vadd.f32 %v7636_v42, %v14872_v3 }
0x26d3   :  { %v5126_v3 = vmul.f32 %v5122_v48, %v5121_v23  ;;  %v8774_v48 = vpop.f32.mrb[121].mxu0 }
0x26d4   :  { %7947 = vrot.lane.b32.xlu0 %v15007_v61, %s12690_s26  ;;  %v7638_v15 = vpop.permute.xlu1 %7637  ;;  %v11373_v56 = vpop.f32.mrb[122].mxu0 }
0x26d5   :  { %v15013_v6 = vadd.f32 %v7638_v15, %v14892_v52  ;;  %v7640_v17 = vpop.permute.xlu0 %7639 }
0x26d6   :  { %v15019_v53 = vadd.f32 %v7640_v17, %v14912_v25  ;;  %v8784_v25 = vpop.f32.mrb[123].mxu0 }
0x26d7   :  { %7949 = vrot.lane.b32.xlu1 %v15013_v6, %s12690_s26  ;;  %v11376_v35 = vpop.f32.mrb[124].mxu0 }
0x26d8   :  { %5135 = vrot.lane.b32.xlu0 %v5125_v41, %s12685_s3  ;;  %v7642_v58 = vpop.permute.xlu1 %7641  ;;  %v8794_v13 = vpop.f32.mrb[125].mxu0 }
0x26d9   :  { %v15025_v52 = vadd.f32 %v7642_v58, %v14932_v11 }
0x26db   :  { %5137 = vrot.lane.b32.xlu1 %v5126_v3, %s12685_s3  ;;  %s7941_s3 = scalar_select %p7940_p11, 1, 0  ;;  %v15724_v3 = vld [vmem:[#allocation54_spill] sm:$0xff] }
0x26dc   :  { %7951 = vrot.lane.b32.xlu0 %v15019_v53, %s12690_s26 }
0x26dd   :  { %s7942_s21 = scvt.s32.f32 %s7941_s3 }
0x26df   :  { %7953 = vrot.lane.b32.xlu1 %v15025_v52, %s12690_s26  ;;  %v7963_v17 = vstv %s7942_s21 }
0x273a   :  { %v5132_v37 = vpop.permute.xlu0 %5131 }
0x273b   :  { %v15030_v7 = vadd.f32 %v5132_v37, %v14973_v1 }
0x273d   :  { %5443 = vrot.lane.b32.xlu0 %v15030_v7, %s12690_s26  ;;  %v5134_v11 = vpop.permute.xlu1 %5133 }
0x273e   :  { %v15035_v42 = vadd.f32 %v5134_v11, %v14978_v49  ;;  %v15723_v49 = vld [vmem:[#allocation55_spill] sm:$0xff] }
0x2740   :  { %5445 = vrot.lane.b32.xlu1 %v15035_v42, %s12690_s26 }
0x2746   :  { %v7948_v47 = vpop.permute.xlu0 %7947 }
0x2747   :  { %v7959_v41 = vsub.f32 %v15723_v49, %v7948_v47 }
0x2749   :  { %v7950_v46 = vpop.permute.xlu1 %7949  ;;  %v7964_v37 = vmul.f32 %v7963_v17, %v7959_v41 }
0x274a   :  { %v5136_v15 = vpop.permute.xlu0 %5135  ;;  %v7960_v58 = vsub.f32 %v15724_v3, %v7950_v46 }
0x274b   :  { %v15041_v32 = vadd.f32 %v5136_v15, %v14984_v0 }
0x274d   :  { %5447 = vrot.lane.b32.xlu0 %v15041_v32, %s12690_s26  ;;  %v5138_v1 = vpop.permute.xlu1 %5137 }
0x274e   :  { %v15046_v23 = vadd.f32 %v5138_v1, %v14990_v30  ;;  %v7952_v0 = vpop.permute.xlu0 %7951  ;;  %v15725_v30 = vld [vmem:[#allocation57_spill] sm:$0xff]  ;;  %v7965_v1 = vmul.f32 %v7963_v17, %v7960_v58 }
0x274f   :  { %v7961_v11 = vsub.f32 %v15725_v30, %v7952_v0 }
0x2750   :  { %5449 = vrot.lane.b32.xlu1 %v15046_v23, %s12690_s26 }
0x2751   :  { %8807 = vrot.lane.b32.xlu0 %v8744_v5, %s12709_s24  ;;  %v7954_v15 = vpop.permute.xlu1 %7953  ;;  %v15726_v5 = vld [vmem:[#allocation56_spill] sm:$0xff]  ;;  %v7966_v47 = vmul.f32 %v7963_v17, %v7961_v11 }
0x2752   :  { %v7962_v44 = vsub.f32 %v15726_v5, %v7954_v15 }
0x2754   :  { %8809 = vrot.lane.b32.xlu1 %v11361_v9, %s12709_s24  ;;  %v7967_v9 = vmul.f32 %v7963_v17, %v7962_v44  ;;  %v15074_v44 = vld [vmem:[%s15588_s14 + $0x8] sm:$0xff] }
0x2755   :  { %8811 = vrot.lane.b32.xlu0 %v8754_v12, %s12709_s24  ;;  %v8892_v46 = vadd.f32 %v15074_v44, %v11373_v56  ;;  %v15728_v17 = vld [vmem:[#allocation26_spill] sm:$0xff] }
0x2758   :  { %8813 = vrot.lane.b32.xlu1 %v11364_v29, %s12709_s24  ;;  %v15068_v29 = vld [vmem:[%s15588_s14] sm:$0xff] }
0x2759   :  { %7972 = vrot.lane.b32.xlu0 %v7964_v37, %s12691_s10  ;;  %v8891_v12 = vadd.f32 %v15068_v29, %v8784_v25 }
0x275c   :  { %7974 = vrot.lane.b32.xlu1 %v7965_v1, %s12691_s10 }
0x275d   :  { %7976 = vrot.lane.b32.xlu0 %v7966_v47, %s12691_s10 }
0x2760   :  { %7978 = vrot.lane.b32.xlu1 %v7967_v9, %s12691_s10 }
0x2761   :  { %8851 = vrot.lane.b32.xlu0 %v8764_v38, %s12709_s24 }
0x2764   :  { %8853 = vrot.lane.b32.xlu1 %v11367_v10, %s12709_s24  ;;  %v15082_v10 = vld [vmem:[%s15588_s14 + $0x10] sm:$0xff] }
0x2765   :  { %8855 = vrot.lane.b32.xlu0 %v8774_v48, %s12709_s24  ;;  %v8893_v38 = vadd.f32 %v15082_v10, %v8794_v13  ;;  %v15088_v48 = vld [vmem:[%s15588_s14 + $0x18] sm:$0xff]  ;;  %s5437_s14 = scalar_select %p5436_p12, 1, 0 }
0x2766   :  { %v8894_v25 = vadd.f32 %v15088_v48, %v11376_v35  ;;  %v15727_v35 = vld [vmem:[#allocation27_spill] sm:$0xff] }
0x2767   :  { %s5438_s8 = scvt.s32.f32 %s5437_s14 }
0x2768   :  { %8857 = vrot.lane.b32.xlu1 %v11370_v43, %s12709_s24 }
0x2769   :  { %8899 = vrot.lane.b32.xlu0 %v8891_v12, %s12709_s24  ;;  %v5459_v43 = vstv %s5438_s8 }
0x276c   :  { %8901 = vrot.lane.b32.xlu1 %v8892_v46, %s12709_s24 }
0x276d   :  { %8903 = vrot.lane.b32.xlu0 %v8893_v38, %s12709_s24 }
0x2770   :  { %8905 = vrot.lane.b32.xlu1 %v8894_v25, %s12709_s24  ;;  %s12712_s24 = smov 15  }
0x2771   :  { %8931 = vrot.lane.b32.xlu0 %v14827_v63, %s12684_s23 }
0x2774   :  { %8933 = vrot.lane.b32.xlu1 %v14824_v31, %s12684_s23 }
0x2775   :  { %8935 = vrot.lane.b32.xlu0 %v14833_v36, %s12684_s23 }
0x2778   :  { %8937 = vrot.lane.b32.xlu1 %v14829_v59, %s12684_s23 }
0x27af   :  { %v5444_v56 = vpop.permute.xlu0 %5443 }
0x27b0   :  { %v5455_v13 = vsub.f32 %v15727_v35, %v5444_v56  ;;  %v15729_v35 = vld [vmem:[#allocation29_spill] sm:$0xff] }
0x27b2   :  { %v5460_v49 = vmul.f32 %v5459_v43, %v5455_v13  ;;  %v5446_v41 = vpop.permute.xlu1 %5445 }
0x27b3   :  { %v5456_v0 = vsub.f32 %v15728_v17, %v5446_v41 }
0x27b4   :  { %5468 = vrot.lane.b32.xlu0 %v5460_v49, %s12691_s10 }
0x27b5   :  { %v5461_v3 = vmul.f32 %v5459_v43, %v5456_v0  ;;  %v15730_v0 = vld [vmem:[#allocation28_spill] sm:$0xff] }
0x27b7   :  { %5470 = vrot.lane.b32.xlu1 %v5461_v3, %s12691_s10 }
0x27bf   :  { %v5448_v58 = vpop.permute.xlu0 %5447 }
0x27c0   :  { %v5457_v13 = vsub.f32 %v15729_v35, %v5448_v58 }
0x27c2   :  { %v5450_v37 = vpop.permute.xlu1 %5449 }
0x27c3   :  { %v8808_v30 = vpop.permute.xlu0 %8807  ;;  %v5458_v3 = vsub.f32 %v15730_v0, %v5450_v37 }
0x27c4   :  { %v8819_v11 = vadd.f32 %v8808_v30, %v13632_v57 }
0x27c6   :  { %v10143_v15 = vmul.f32 -1.442695, %v8819_v11  ;;  %v8810_v1 = vpop.permute.xlu1 %8809 }
0x27c7   :  { %v8812_v5 = vpop.permute.xlu0 %8811  ;;  %v8820_v47 = vadd.f32 %v8810_v1, %v13630_v26 }
0x27c8   :  { %12489 = vpow2.f32 %v10143_v15  ;;  %v8821_v9 = vadd.f32 %v8812_v5, %v13640_v8  ;;  %v5462_v15 = vmul.f32 %v5459_v43, %v5457_v13  ;;  %v5463_v5 = vmul.f32 %v5459_v43, %v5458_v3 }
0x27c9   :  { %v10144_v12 = vmul.f32 -1.442695, %v8820_v47 }
0x27ca   :  { %v10145_v46 = vmul.f32 -1.442695, %v8821_v9  ;;  %v8814_v38 = vpop.permute.xlu1 %8813 }
0x27cb   :  { %12491 = vpow2.f32 %v10144_v12  ;;  %v7973_v25 = vpop.permute.xlu0 %7972  ;;  %v8822_v56 = vadd.f32 %v8814_v38, %v13638_v2 }
0x27cc   :  { %12493 = vpow2.f32 %v10145_v46  ;;  %v15113_v49 = vadd.f32 %v7973_v25, %v15007_v61 }
0x27cd   :  { %v10146_v41 = vmul.f32 -1.442695, %v8822_v56 }
0x27ce   :  { %8284 = vrot.lane.b32.xlu0 %v15113_v49, %s12692_s4  ;;  %v7975_v17 = vpop.permute.xlu1 %7974 }
0x27cf   :  { %12495 = vpow2.f32 %v10146_v41  ;;  %v7977_v30 = vpop.permute.xlu0 %7976  ;;  %v15119_v11 = vadd.f32 %v7975_v17, %v15013_v6 }
0x27d0   :  { %v15125_v9 = vadd.f32 %v7977_v30, %v15019_v53 }
0x27d1   :  { %8286 = vrot.lane.b32.xlu1 %v15119_v11, %s12692_s4 }
0x27d2   :  { %v12490_v58 = vpop.eup %12489  ;;  %5472 = vrot.lane.b32.xlu0 %v5462_v15, %s12691_s10  ;;  %v7979_v61 = vpop.permute.xlu1 %7978 }
0x27d3   :  { %v8835_v1 = vadd.f32 1.0, %v12490_v58  ;;  %v8852_v47 = vpop.permute.xlu0 %8851  ;;  %v15132_v43 = vadd.f32 %v7979_v61, %v15025_v52 }
0x27d4   :  { %v8863_v37 = vadd.f32 %v8852_v47, %v13648_v21 }
0x27d5   :  { %v12492_v12 = vpop.eup %12491  ;;  %12497 = vrcp.f32 %v8835_v1  ;;  %5474 = vrot.lane.b32.xlu1 %v5463_v5, %s12691_s10  ;;  %s12710_s10 = smov 114  }
0x27d6   :  { %v12494_v6 = vpop.eup %12493  ;;  %v8836_v46 = vadd.f32 1.0, %v12492_v12  ;;  %v10147_v38 = vmul.f32 -1.442695, %v8863_v37  ;;  %8288 = vrot.lane.b32.xlu0 %v15125_v9, %s12692_s4  ;;  %v8854_v25 = vpop.permute.xlu1 %8853 }
0x27d7   :  { %v8837_v56 = vadd.f32 1.0, %v12494_v6  ;;  %v8856_v35 = vpop.permute.xlu0 %8855  ;;  %v8864_v53 = vadd.f32 %v8854_v25, %v13646_v16 }
0x27d8   :  { %12499 = vrcp.f32 %v8836_v46  ;;  %v8865_v13 = vadd.f32 %v8856_v35, %v13656_v33 }
0x27d9   :  { %v12496_v41 = vpop.eup %12495  ;;  %12501 = vrcp.f32 %v8837_v56  ;;  %v10148_v17 = vmul.f32 -1.442695, %v8864_v53  ;;  %8290 = vrot.lane.b32.xlu1 %v15132_v43, %s12692_s4 }
0x27da   :  { %v8838_v0 = vadd.f32 1.0, %v12496_v41  ;;  %12503 = vpow2.f32 %v10147_v38  ;;  %v10149_v3 = vmul.f32 -1.442695, %v8865_v13  ;;  %v8858_v30 = vpop.permute.xlu1 %8857 }
0x27db   :  { %12505 = vpow2.f32 %v10148_v17  ;;  %v8866_v52 = vadd.f32 %v8858_v30, %v13654_v27  ;;  %v8900_v15 = vpop.permute.xlu0 %8899 }
0x27dc   :  { %12507 = vrcp.f32 %v8838_v0 }
0x27dd   :  { %12509 = vpow2.f32 %v10149_v3  ;;  %v10150_v58 = vmul.f32 -1.442695, %v8866_v52 }
0x27de   :  { %v8902_v5 = vpop.permute.xlu1 %8901 }
0x27df   :  { %v12498_v61 = vpop.eup %12497  ;;  %12511 = vpow2.f32 %v10150_v58  ;;  %v8904_v6 = vpop.permute.xlu0 %8903 }
0x27e0   :  { %v8911_v1 = vmul.f32 %v12498_v61, %v8900_v15 }
0x27e2   :  { %v12500_v47 = vpop.eup %12499  ;;  %v8915_v37 = vadd.f32 %v8911_v1, %v13697_v60  ;;  %v8906_v17 = vpop.permute.xlu1 %8905 }
0x27e3   :  { %v12502_v12 = vpop.eup %12501  ;;  %v8912_v46 = vmul.f32 %v12500_v47, %v8902_v5 }
0x27e4   :  { %v12504_v38 = vpop.eup %12503  ;;  %v8913_v25 = vmul.f32 %v12502_v12, %v8904_v6  ;;  %12513 = vtanh.f32 %v8915_v37  ;;  %v8932_v12 = vpop.permute.xlu0 %8931 }
0x27e5   :  { %v12506_v56 = vpop.eup %12505  ;;  %v8879_v35 = vadd.f32 1.0, %v12504_v38  ;;  %v8916_v3 = vadd.f32 %v8912_v46, %v13690_v28 }
0x27e6   :  { %v12508_v53 = vpop.eup %12507  ;;  %v8880_v13 = vadd.f32 1.0, %v12506_v56  ;;  %v8917_v41 = vadd.f32 %v8913_v25, %v13709_v22  ;;  %v8934_v6 = vpop.permute.xlu1 %8933 }
0x27e7   :  { %v12510_v0 = vpop.eup %12509  ;;  %12515 = vrcp.f32 %v8879_v35  ;;  %v8914_v30 = vmul.f32 %v12508_v53, %v8906_v17 }
0x27e8   :  { %v8881_v52 = vadd.f32 1.0, %v12510_v0  ;;  %12517 = vrcp.f32 %v8880_v13 }
0x27e9   :  { %v12512_v15 = vpop.eup %12511  ;;  %12519 = vtanh.f32 %v8917_v41  ;;  %v8918_v61 = vadd.f32 %v8914_v30, %v13706_v54 }
0x27ea   :  { %12521 = vrcp.f32 %v8881_v52  ;;  %v8882_v58 = vadd.f32 1.0, %v12512_v15  ;;  %v8938_v54 = vpop.permute.xlu1 %8937 }
0x27eb   :  { %12523 = vtanh.f32 %v8916_v3 }
0x27ec   :  { %12525 = vrcp.f32 %v8882_v58  ;;  %v8936_v58 = vpop.permute.xlu0 %8935 }
0x27ed   :  { %12527 = vtanh.f32 %v8918_v61 }
0x27ee   :  { %v12514_v1 = vpop.eup %12513 }
0x27f1   :  { %v12516_v5 = vpop.eup %12515 }
0x27f2   :  { %v12518_v47 = vpop.eup %12517  ;;  %v8923_v37 = vsub.f32 1.0, %v12516_v5  ;;  %v8943_v41 = vmul.f32 %v12516_v5, %v8932_v12 }
0x27f3   :  { %v12520_v38 = vpop.eup %12519  ;;  %v8924_v46 = vsub.f32 1.0, %v12518_v47  ;;  %v8944_v0 = vmul.f32 %v12518_v47, %v8934_v6 }
0x27f4   :  { %v12522_v25 = vpop.eup %12521  ;;  %v8927_v56 = vmul.f32 %v12514_v1, %v8923_v37 }
0x27f5   :  { %v12524_v35 = vpop.eup %12523  ;;  %v8925_v53 = vsub.f32 1.0, %v12522_v25  ;;  %v8945_v22 = vmul.f32 %v12522_v25, %v8936_v58  ;;  %v8300_v25 = vstv %s8279_s18 }
0x27f6   :  { %v12526_v13 = vpop.eup %12525  ;;  %v8928_v17 = vmul.f32 %v12524_v35, %v8924_v46  ;;  %v15143_v15 = vadd.f32 %v8943_v41, %v8927_v56 }
0x27f7   :  { %v8929_v30 = vmul.f32 %v12520_v38, %v8925_v53  ;;  %v8926_v3 = vsub.f32 1.0, %v12526_v13  ;;  %v12528_v52 = vpop.eup %12527  ;;  %v8946_v60 = vmul.f32 %v12526_v13, %v8938_v54 }
0x27f8   :  { %v15145_v61 = vadd.f32 %v8944_v0, %v8928_v17 }
0x27f9   :  { %v8930_v28 = vmul.f32 %v12528_v52, %v8926_v3  ;;  %v15149_v37 = vadd.f32 %v8945_v22, %v8929_v30 }
0x27fa   :  { %v11928_v1 = vpack.i.bf16 %v15145_v61, %v15143_v15 }
0x27fb   :  { %v15151_v5 = vadd.f32 %v8946_v60, %v8930_v28 }
0x27fc   :  { %11929 = vrot.lane.b32.xlu0 %v11928_v1, %s12710_s10  ;;  %v10177_v1 = vld [vmem:[%s15575_s1] ss:$0 sm:$0xff]  ;;  %s5774_s1 = scalar_select %p5773_p0, 1, 0 }
0x27fd   :  { %v11933_v47 = vpack.i.bf16 %v15151_v5, %v15149_v37 }
0x27fe   :  { %s5775_s19 = scvt.s32.f32 %s5774_s1 }
0x27ff   :  { %11934 = vrot.lane.b32.xlu1 %v11933_v47, %s12710_s10 }
0x2826   :  { %v5469_v12 = vpop.permute.xlu0 %5468 }
0x2827   :  { %v15156_v6 = vadd.f32 %v5469_v12, %v15030_v7 }
0x2829   :  { %5780 = vrot.lane.b32.xlu0 %v15156_v6, %s12692_s4  ;;  %v5471_v54 = vpop.permute.xlu1 %5470 }
0x282a   :  { %v15161_v38 = vadd.f32 %v5471_v54, %v15035_v42 }
0x282c   :  { %5782 = vrot.lane.b32.xlu1 %v15161_v38, %s12692_s4 }
0x2840   :  { %v8285_v28 = vpop.permute.xlu0 %8284 }
0x2841   :  { %v8296_v46 = vsub.f32 %v14740_v51, %v8285_v28 }
0x2843   :  { %v8287_v60 = vpop.permute.xlu1 %8286  ;;  %v8301_v13 = vmul.f32 %v8300_v25, %v8296_v46 }
0x2844   :  { %v5473_v22 = vpop.permute.xlu0 %5472  ;;  %v8297_v56 = vsub.f32 %v14738_v55, %v8287_v60  ;;  %v12711_v60 = vmov 1.0|1.0  }
0x2845   :  { %v15168_v7 = vadd.f32 %v5473_v22, %v15041_v32  ;;  %v15735_v22 = vld [vmem:[#allocation30_spill] sm:$0xff] }
0x2846   :  { %v8302_v32 = vmul.f32 %v8300_v25, %v8297_v56 }
0x2847   :  { %5784 = vrot.lane.b32.xlu0 %v15168_v7, %s12692_s4  ;;  %v5475_v42 = vpop.permute.xlu1 %5474 }
0x2848   :  { %v8289_v35 = vpop.permute.xlu0 %8288  ;;  %v15174_v53 = vadd.f32 %v5475_v42, %v15046_v23  ;;  %v9475_v23 = vlaneseq }
0x2849   :  { %v8298_v41 = vsub.f32 %v14746_v34, %v8289_v35  ;;  %v15736_v35 = vld [vmem:[#allocation33_spill] sm:$0xff] }
0x284a   :  { %5786 = vrot.lane.b32.xlu1 %v15174_v53, %s12692_s4  ;;  %v9476_v30 = vshrl.u32 %v9475_v23, 7 }
0x284b   :  { %8309 = vrot.lane.b32.xlu0 %v8301_v13, %s12693_s2  ;;  %v8291_v51 = vpop.permute.xlu1 %8290  ;;  %v8303_v0 = vmul.f32 %v8300_v25, %v8298_v41 }
0x284c   :  { %v8299_v17 = vsub.f32 %v14742_v19, %v8291_v51  ;;  %v9477_v58 = vadd.s32 8, %v9476_v30  ;;  %vm9483_vm15 = vcmp.eq.s32.totalorder %v9476_v30, %v10177_v1 }
0x284e   :  { %8311 = vrot.lane.b32.xlu1 %v8302_v32, %s12693_s2  ;;  %v8304_v55 = vmul.f32 %v8300_v25, %v8299_v17  ;;  %vm9484_vm0 = vcmp.eq.s32.totalorder %v9477_v58, %v10177_v1  ;;  %v15737_v32 = vld [vmem:[#allocation32_spill] sm:$0xff] }
0x284f   :  { %8313 = vrot.lane.b32.xlu0 %v8303_v0, %s12693_s2  ;;  %vm11767_vm1 = vmpackc.low %vm9484_vm0, %vm9483_vm15 }
0x2852   :  { %8315 = vrot.lane.b32.xlu1 %v8304_v55, %s12693_s2 }
0x286e   :  { %v11930_v34 = vpop.permute.xlu0 %11929 }
0x286f   :  { %v11932_v3 = vunpack.i.h.bf16 %v11930_v34  ;;  %v11931_v52 = vunpack.i.l.bf16 %v11930_v34 }
0x2871   :  { %v11935_v47 = vpop.permute.xlu1 %11934  ;;  %v11751_v19 = vpack.c.bf16 %v11932_v3, %v11931_v52 }
0x2872   :  { %v11937_v12 = vunpack.i.h.bf16 %v11935_v47  ;;  %v11936_v54 = vunpack.i.l.bf16 %v11935_v47 }
0x2873   :  { %11752 = vmatprep.subr.bf16.mxu1 %v11751_v19 }
0x2874   :  { %11754 = vmatpush3.bf16.msra.mxu1 %v11751_v19  ;;  %v11755_v28 = vpack.c.bf16 %v11937_v12, %v11936_v54 }
0x2876   :  { %11756 = vmatprep.subr.bf16.mxu1 %v11755_v28 }
0x2878   :  { %11758 = vmatpush3.bf16.msra.mxu1 %v11755_v28 }
0x2879   :  { %11768 = vmatprep.subr.msk.bf16.mxu1 %vm11767_vm1, %v12711_v60 }
0x287b   :  { %11386 = vmatmul.mubr.msk.f32.vlgmr.msra.gmra.mrb[134].mxu1 %vm1507_vm9, %v14877_v20  ;;  %v15731_v20 = vld [vmem:[#allocation15_spill] sm:$0xff] }
0x287c   :  { %11388 = vmatprep.mubr.msk.f32.mxu1 %vm1507_vm9, %v14884_v4  ;;  %11770 = vmatpush3.bf16.msk.msra.mxu1 %vm11767_vm1, %v12711_v60  ;;  %v15732_v4 = vld [vmem:[#allocation5_spill] sm:$0xff] }
0x287f   :  { %11389 = vmatmul.mubr.msk.f32.gmra.mrb[136].mxu1 %vm1507_vm9, %v14897_v18  ;;  %v15733_v18 = vld [vmem:[#allocation6_spill] sm:$0xff] }
0x2880   :  { %11391 = vmatprep.mubr.msk.f32.mxu1 %vm1507_vm9, %v14906_v50  ;;  %v5796_v50 = vstv %s5775_s19 }
0x2883   :  { %11392 = vmatmul.mubr.msk.f32.gmra.mrb[138].mxu1 %vm1507_vm9, %v14917_v62 }
0x2884   :  { %11394 = vmatprep.mubr.msk.f32.mxu1 %vm1507_vm9, %v14925_v14  ;;  %v15734_v14 = vld [vmem:[#allocation31_spill] sm:$0xff] }
0x2887   :  { %11395 = vmatmul.mubr.msk.f32.gmra.mrb[140].mxu1 %vm1507_vm9, %v14937_v39 }
0x2888   :  { %11397 = vmatprep.mubr.msk.f32.mxu1 %vm1507_vm9, %v14946_v24 }
0x288b   :  { %11398 = vmatmul.mubr.msk.f32.gmra.mrb[142].mxu1 %vm1507_vm9, %v14953_v45 }
0x288c   :  { %11400 = vmatprep.mubr.msk.f32.mxu1 %vm1507_vm9, %v14960_v40 }
0x288f   :  { %11401 = vmatmul.mubr.msk.f32.gmra.mrb[144].mxu1 %vm1507_vm9, %v15731_v20 }
0x2890   :  { %11424 = vmatprep.mubr.msk.f32.mxu1 %vm1054_vm6, %v15732_v4 }
0x2893   :  { %11425 = vmatmul.mubr.msk.f32.vlgmr.msra.gmra.mrb[146].mxu1 %vm1054_vm6, %v15733_v18  ;;  %vm9604_vm6 = vcmask 80936  }
0x289b   :  { %v5781_v62 = vpop.permute.xlu0 %5780 }
0x289c   :  { %v5792_v39 = vsub.f32 %v15734_v14, %v5781_v62 }
0x289e   :  { %v5797_v24 = vmul.f32 %v5796_v50, %v5792_v39  ;;  %v5783_v45 = vpop.permute.xlu1 %5782 }
0x289f   :  { %v5793_v40 = vsub.f32 %v15735_v22, %v5783_v45 }
0x28a0   :  { %5805 = vrot.lane.b32.xlu0 %v5797_v24, %s12693_s2 }
0x28a1   :  { %v5798_v46 = vmul.f32 %v5796_v50, %v5793_v40 }
0x28a3   :  { %5807 = vrot.lane.b32.xlu1 %v5798_v46, %s12693_s2 }
0x28b9   :  { %v5785_v25 = vpop.permute.xlu0 %5784 }
0x28ba   :  { %v5794_v13 = vsub.f32 %v15736_v35, %v5785_v25 }
0x28bc   :  { %v5787_v42 = vpop.permute.xlu1 %5786  ;;  %v5799_v55 = vmul.f32 %v5796_v50, %v5794_v13 }
0x28bd   :  { %v8310_v56 = vpop.permute.xlu0 %8309  ;;  %v5795_v17 = vsub.f32 %v15737_v32, %v5787_v42 }
0x28be   :  { %v15220_v41 = vadd.f32 %v8310_v56, %v15113_v49 }
0x28bf   :  { %v5800_v30 = vmul.f32 %v5796_v50, %v5795_v17 }
0x28c0   :  { %8621 = vrot.lane.b32.xlu0 %v15220_v41, %s12694_s7  ;;  %v8312_v51 = vpop.permute.xlu1 %8311 }
0x28c1   :  { %v15226_v0 = vadd.f32 %v8312_v51, %v15119_v11  ;;  %v8314_v23 = vpop.permute.xlu0 %8313  ;;  %v15738_v51 = vld [vmem:[#allocation9_spill] sm:$0xff] }
0x28c2   :  { %v15232_v49 = vadd.f32 %v8314_v23, %v15125_v9  ;;  %v15739_v23 = vld [vmem:[#allocation7_spill] sm:$0xff] }
0x28c3   :  { %8623 = vrot.lane.b32.xlu1 %v15226_v0, %s12694_s7 }
0x28c4   :  { %5809 = vrot.lane.b32.xlu0 %v5799_v55, %s12693_s2  ;;  %v8316_v34 = vpop.permute.xlu1 %8315 }
0x28c5   :  { %v15238_v11 = vadd.f32 %v8316_v34, %v15132_v43 }
0x28c7   :  { %5811 = vrot.lane.b32.xlu1 %v5800_v30, %s12693_s2  ;;  %s8615_s2 = scalar_select %p8614_p1, 1, 0 }
0x28c8   :  { %8625 = vrot.lane.b32.xlu0 %v15232_v49, %s12694_s7 }
0x28c9   :  { %s8616_s20 = scvt.s32.f32 %s8615_s2 }
0x28cb   :  { %8627 = vrot.lane.b32.xlu1 %v15238_v11, %s12694_s7  ;;  %v8637_v12 = vstv %s8616_s20 }
0x2912   :  { %v5806_v3 = vpop.permute.xlu0 %5805 }
0x2913   :  { %v15243_v52 = vadd.f32 %v5806_v3, %v15156_v6 }
0x2915   :  { %6117 = vrot.lane.b32.xlu0 %v15243_v52, %s12694_s7  ;;  %v5808_v9 = vpop.permute.xlu1 %5807 }
0x2916   :  { %v15248_v58 = vadd.f32 %v5808_v9, %v15161_v38 }
0x2918   :  { %6119 = vrot.lane.b32.xlu1 %v15248_v58, %s12694_s7 }
0x2932   :  { %v8622_v43 = vpop.permute.xlu0 %8621 }
0x2933   :  { %v8633_v19 = vsub.f32 %v14827_v63, %v8622_v43 }
0x2935   :  { %v8624_v1 = vpop.permute.xlu1 %8623  ;;  %v8638_v20 = vmul.f32 %v8637_v12, %v8633_v19 }
0x2936   :  { %v5810_v47 = vpop.permute.xlu0 %5809  ;;  %v8634_v54 = vsub.f32 %v14824_v31, %v8624_v1  ;;  %v15740_v1 = vld [vmem:[#allocation34_spill] sm:$0xff] }
0x2937   :  { %v15255_v6 = vadd.f32 %v5810_v47, %v15168_v7 }
0x2938   :  { %v8639_v7 = vmul.f32 %v8637_v12, %v8634_v54 }
0x2939   :  { %6121 = vrot.lane.b32.xlu0 %v15255_v6, %s12694_s7  ;;  %v5812_v38 = vpop.permute.xlu1 %5811 }
0x293a   :  { %v8626_v28 = vpop.permute.xlu0 %8625  ;;  %v15261_v60 = vadd.f32 %v5812_v38, %v15174_v53  ;;  %v15741_v38 = vld [vmem:[#allocation11_spill] sm:$0xff] }
0x293b   :  { %v8635_v4 = vsub.f32 %v14833_v36, %v8626_v28 }
0x293c   :  { %6123 = vrot.lane.b32.xlu1 %v15261_v60, %s12694_s7  ;;  %s6111_s7 = scalar_select %p6110_p2, 1, 0 }
0x293d   :  { %8646 = vrot.lane.b32.xlu0 %v8638_v20, %s12695_s5  ;;  %v8628_v63 = vpop.permute.xlu1 %8627  ;;  %v8640_v50 = vmul.f32 %v8637_v12, %v8635_v4 }
0x293e   :  { %v8636_v18 = vsub.f32 %v14829_v59, %v8628_v63  ;;  %s6112_s3 = scvt.s32.f32 %s6111_s7 }
0x2940   :  { %8648 = vrot.lane.b32.xlu1 %v8639_v7, %s12695_s5  ;;  %v8641_v31 = vmul.f32 %v8637_v12, %v8636_v18  ;;  %v6133_v35 = vstv %s6112_s3 }
0x2941   :  { %8650 = vrot.lane.b32.xlu0 %v8640_v50, %s12695_s5 }
0x2944   :  { %8652 = vrot.lane.b32.xlu1 %v8641_v31, %s12695_s5 }
0x294e   :  { %v15271_v53 = vpop.f32.mrb[134].mxu1 }
0x294f   :  { %v15273_v36 = vpop.f32.mrb[135].mxu1 }
0x2952   :  { %v15275_v62 = vpop.f32.mrb[136].mxu1 }
0x2953   :  { %v15277_v14 = vpop.f32.mrb[137].mxu1 }
0x2956   :  { %v15279_v39 = vpop.f32.mrb[138].mxu1 }
0x2957   :  { %v15281_v59 = vpop.f32.mrb[139].mxu1 }
0x295a   :  { %v15283_v24 = vpop.f32.mrb[140].mxu1 }
0x295b   :  { %v15285_v45 = vpop.f32.mrb[141].mxu1 }
0x295e   :  { %v15287_v22 = vpop.f32.mrb[142].mxu1 }
0x295f   :  { %v15289_v40 = vpop.f32.mrb[143].mxu1 }
0x2962   :  { %v15291_v46 = vpop.f32.mrb[144].mxu1 }
0x2963   :  { %v15293_v25 = vpop.f32.mrb[145].mxu1 }
0x2966   :  { %v15295_v42 = vpop.f32.mrb[146].mxu1 }
0x2967   :  { %v15297_v56 = vpop.f32.mrb[147].mxu1 }
0x2987   :  { %v6118_v13 = vpop.permute.xlu0 %6117 }
0x2988   :  { %v6129_v32 = vsub.f32 %v15738_v51, %v6118_v13 }
0x298a   :  { %v6134_v17 = vmul.f32 %v6133_v35, %v6129_v32  ;;  %v6120_v55 = vpop.permute.xlu1 %6119 }
0x298b   :  { %v6130_v30 = vsub.f32 %v15739_v23, %v6120_v55 }
0x298c   :  { %6142 = vrot.lane.b32.xlu0 %v6134_v17, %s12695_s5 }
0x298d   :  { %v6135_v34 = vmul.f32 %v6133_v35, %v6130_v30 }
0x298f   :  { %6144 = vrot.lane.b32.xlu1 %v6135_v34, %s12695_s5 }
0x29ab   :  { %v6122_v3 = vpop.permute.xlu0 %6121 }
0x29ac   :  { %v6131_v47 = vsub.f32 %v15740_v1, %v6122_v3 }
0x29ae   :  { %v6124_v9 = vpop.permute.xlu1 %6123  ;;  %v6136_v20 = vmul.f32 %v6133_v35, %v6131_v47 }
0x29af   :  { %v8647_v43 = vpop.permute.xlu0 %8646  ;;  %v6132_v54 = vsub.f32 %v15741_v38, %v6124_v9 }
0x29b0   :  { %v15306_v19 = vadd.f32 %v8647_v43, %v15220_v41 }
0x29b1   :  { %v6137_v63 = vmul.f32 %v6133_v35, %v6132_v54 }
0x29b2   :  { %8958 = vrot.lane.b32.xlu0 %v15306_v19, %s12697_s6  ;;  %v8649_v12 = vpop.permute.xlu1 %8648 }
0x29b3   :  { %v15312_v28 = vadd.f32 %v8649_v12, %v15226_v0  ;;  %v8651_v4 = vpop.permute.xlu0 %8650  ;;  %v15744_v12 = vld [vmem:[#allocation38_spill] sm:$0xff] }
0x29b4   :  { %v15318_v41 = vadd.f32 %v8651_v4, %v15232_v49  ;;  %v15745_v4 = vld [vmem:[#allocation37_spill] sm:$0xff] }
0x29b5   :  { %8960 = vrot.lane.b32.xlu1 %v15312_v28, %s12697_s6 }
0x29b6   :  { %6146 = vrot.lane.b32.xlu0 %v6136_v20, %s12695_s5  ;;  %v8653_v7 = vpop.permute.xlu1 %8652 }
0x29b7   :  { %v15324_v0 = vadd.f32 %v8653_v7, %v15238_v11 }
0x29b9   :  { %6148 = vrot.lane.b32.xlu1 %v6137_v63, %s12695_s5  ;;  %s8952_s5 = scalar_select %p8951_p3, 1, 0 }
0x29ba   :  { %8962 = vrot.lane.b32.xlu0 %v15318_v41, %s12697_s6 }
0x29bb   :  { %s8953_s21 = scvt.s32.f32 %s8952_s5 }
0x29bd   :  { %8964 = vrot.lane.b32.xlu1 %v15324_v0, %s12697_s6  ;;  %v8974_v32 = vstv %s8953_s21 }
0x29fe   :  { %v6143_v18 = vpop.permute.xlu0 %6142 }
0x29ff   :  { %v15329_v50 = vadd.f32 %v6143_v18, %v15243_v52 }
0x2a01   :  { %6454 = vrot.lane.b32.xlu0 %v15329_v50, %s12697_s6  ;;  %v6145_v49 = vpop.permute.xlu1 %6144 }
0x2a02   :  { %v15334_v31 = vadd.f32 %v6145_v49, %v15248_v58 }
0x2a04   :  { %6456 = vrot.lane.b32.xlu1 %v15334_v31, %s12697_s6 }
0x2a24   :  { %v8959_v11 = vpop.permute.xlu0 %8958 }
0x2a25   :  { %v8970_v51 = vsub.f32 %v15143_v15, %v8959_v11  ;;  %v15746_v11 = vld [vmem:[#allocation40_spill] sm:$0xff] }
0x2a27   :  { %v8961_v35 = vpop.permute.xlu1 %8960  ;;  %v8975_v30 = vmul.f32 %v8974_v32, %v8970_v51  ;;  %v15750_v51 = vld [vmem:[#allocation44_spill] sm:$0xff] }
0x2a28   :  { %v6147_v13 = vpop.permute.xlu0 %6146  ;;  %v8971_v17 = vsub.f32 %v15145_v61, %v8961_v35  ;;  %v15747_v35 = vld [vmem:[#allocation39_spill] sm:$0xff] }
0x2a29   :  { %v15341_v52 = vadd.f32 %v6147_v13, %v15255_v6  ;;  %v15749_v13 = vld [vmem:[#allocation41_spill] sm:$0xff] }
0x2a2a   :  { %v8976_v3 = vmul.f32 %v8974_v32, %v8971_v17 }
0x2a2b   :  { %6458 = vrot.lane.b32.xlu0 %v15341_v52, %s12697_s6  ;;  %v6149_v58 = vpop.permute.xlu1 %6148 }
0x2a2c   :  { %v8963_v55 = vpop.permute.xlu0 %8962  ;;  %v15347_v23 = vadd.f32 %v6149_v58, %v15261_v60  ;;  %v9228_v60 = vadd.f32 %v15068_v29, %v15289_v40  ;;  %v15753_v58 = vld [vmem:[#allocation48_spill] sm:$0xff] }
0x2a2d   :  { %v8972_v34 = vsub.f32 %v15149_v37, %v8963_v55  ;;  %v6724_v17 = vadd.f32 %v15068_v29, %v15753_v58  ;;  %v15754_v55 = vld [vmem:[#allocation45_spill] sm:$0xff] }
0x2a2e   :  { %6460 = vrot.lane.b32.xlu1 %v15347_v23, %s12697_s6  ;;  %s6448_s6 = scalar_select %p6447_p4, 1, 0 }
0x2a2f   :  { %8983 = vrot.lane.b32.xlu0 %v8975_v30, %s12699_s29  ;;  %v8965_v6 = vpop.permute.xlu1 %8964  ;;  %v8977_v43 = vmul.f32 %v8974_v32, %v8972_v34  ;;  %v15755_v30 = vld [vmem:[#allocation47_spill] sm:$0xff] }
0x2a30   :  { %v8973_v9 = vsub.f32 %v15151_v5, %v8965_v6  ;;  %s6449_s26 = scvt.s32.f32 %s6448_s6  ;;  %v6725_v34 = vadd.f32 %v15074_v44, %v15755_v30  ;;  %v15756_v6 = vld [vmem:[#allocation50_spill] sm:$0xff] }
0x2a32   :  { %8985 = vrot.lane.b32.xlu1 %v8976_v3, %s12699_s29  ;;  %v8978_v1 = vmul.f32 %v8974_v32, %v8973_v9  ;;  %v15752_v32 = vld [vmem:[#allocation46_spill] sm:$0xff]  ;;  %v6726_v3 = vadd.f32 %v15082_v10, %v15756_v6 }
0x2a33   :  { %8987 = vrot.lane.b32.xlu0 %v8977_v43, %s12699_s29  ;;  %v15757_v43 = vld [vmem:[#allocation49_spill] sm:$0xff] }
0x2a36   :  { %8989 = vrot.lane.b32.xlu1 %v8978_v1, %s12699_s29  ;;  %v6727_v1 = vadd.f32 %v15088_v48, %v15757_v43 }
0x2a37   :  { %9144 = vrot.lane.b32.xlu0 %v15273_v36, %s12712_s24  ;;  %v9230_v36 = vadd.f32 %v15082_v10, %v15293_v25 }
0x2a3a   :  { %9146 = vrot.lane.b32.xlu1 %v15271_v53, %s12712_s24  ;;  %v9229_v53 = vadd.f32 %v15074_v44, %v15287_v22 }
0x2a3b   :  { %9148 = vrot.lane.b32.xlu0 %v15277_v14, %s12712_s24 }
0x2a3e   :  { %9150 = vrot.lane.b32.xlu1 %v15275_v62, %s12712_s24  ;;  %v9231_v62 = vadd.f32 %v15088_v48, %v15291_v46 }
0x2a3f   :  { %9188 = vrot.lane.b32.xlu0 %v15281_v59, %s12712_s24 }
0x2a42   :  { %9190 = vrot.lane.b32.xlu1 %v15279_v39, %s12712_s24  ;;  %v15742_v39 = vld [vmem:[#allocation36_spill] sm:$0xff] }
0x2a43   :  { %9192 = vrot.lane.b32.xlu0 %v15285_v45, %s12712_s24 }
0x2a46   :  { %9194 = vrot.lane.b32.xlu1 %v15283_v24, %s12712_s24 }
0x2a47   :  { %9268 = vrot.lane.b32.xlu0 %v15143_v15, %s12684_s23  ;;  %v6470_v15 = vstv %s6449_s26 }
0x2a4a   :  { %9270 = vrot.lane.b32.xlu1 %v15145_v61, %s12684_s23  ;;  %v15743_v61 = vld [vmem:[#allocation35_spill] sm:$0xff] }
0x2a4b   :  { %9236 = vrot.lane.b32.xlu0 %v9228_v60, %s12712_s24 }
0x2a4e   :  { %9238 = vrot.lane.b32.xlu1 %v9229_v53, %s12712_s24 }
0x2a4f   :  { %9240 = vrot.lane.b32.xlu0 %v9230_v36, %s12712_s24 }
0x2a52   :  { %9242 = vrot.lane.b32.xlu1 %v9231_v62, %s12712_s24 }
0x2a73   :  { %v6455_v14 = vpop.permute.xlu0 %6454 }
0x2a74   :  { %v6466_v59 = vsub.f32 %v15742_v39, %v6455_v14 }
0x2a76   :  { %v6471_v24 = vmul.f32 %v6470_v15, %v6466_v59  ;;  %v6457_v45 = vpop.permute.xlu1 %6456 }
0x2a77   :  { %v6467_v22 = vsub.f32 %v15743_v61, %v6457_v45 }
0x2a78   :  { %6479 = vrot.lane.b32.xlu0 %v6471_v24, %s12699_s29 }
0x2a79   :  { %v6472_v40 = vmul.f32 %v6470_v15, %v6467_v22 }
0x2a7b   :  { %6481 = vrot.lane.b32.xlu1 %v6472_v40, %s12699_s29 }
0x2a7c   :  { %9272 = vrot.lane.b32.xlu0 %v15149_v37, %s12684_s23 }
0x2a7f   :  { %9274 = vrot.lane.b32.xlu1 %v15151_v5, %s12684_s23 }
0x2a9d   :  { %v6459_v46 = vpop.permute.xlu0 %6458 }
0x2a9e   :  { %v6468_v38 = vsub.f32 %v15744_v12, %v6459_v46 }
0x2aa0   :  { %v6461_v25 = vpop.permute.xlu1 %6460  ;;  %v6473_v7 = vmul.f32 %v6470_v15, %v6468_v38 }
0x2aa1   :  { %v8984_v47 = vpop.permute.xlu0 %8983  ;;  %v6469_v63 = vsub.f32 %v15745_v4, %v6461_v25 }
0x2aa2   :  { %v15388_v54 = vadd.f32 %v8984_v47, %v15306_v19 }
0x2aa3   :  { %v6474_v18 = vmul.f32 %v6470_v15, %v6469_v63 }
0x2aa4   :  { %9295 = vrot.lane.b32.xlu0 %v15388_v54, %s12713_s25  ;;  %v8986_v20 = vpop.permute.xlu1 %8985 }
0x2aa5   :  { %v15394_v37 = vadd.f32 %v8986_v20, %v15312_v28  ;;  %v8988_v5 = vpop.permute.xlu0 %8987 }
0x2aa6   :  { %v15400_v19 = vadd.f32 %v8988_v5, %v15318_v41  ;;  %v15748_v41 = vld [vmem:[#allocation42_spill] sm:$0xff] }
0x2aa7   :  { %9297 = vrot.lane.b32.xlu1 %v15394_v37, %s12713_s25 }
0x2aa8   :  { %6483 = vrot.lane.b32.xlu0 %v6473_v7, %s12699_s29  ;;  %v8990_v49 = vpop.permute.xlu1 %8989 }
0x2aa9   :  { %v15406_v28 = vadd.f32 %v8990_v49, %v15324_v0  ;;  %v15751_v0 = vld [vmem:[#allocation43_spill] sm:$0xff]  ;;  %v9145_v9 = vpop.permute.xlu0 %9144 }
0x2aaa   :  { %v9156_v62 = vadd.f32 %v9145_v9, %v13632_v57 }
0x2aab   :  { %6485 = vrot.lane.b32.xlu1 %v6474_v18, %s12699_s29 }
0x2aac   :  { %9299 = vrot.lane.b32.xlu0 %v15400_v19, %s12713_s25  ;;  %v9147_v29 = vpop.permute.xlu1 %9146 }
0x2aad   :  { %v9149_v60 = vpop.permute.xlu0 %9148  ;;  %v9157_v14 = vadd.f32 %v9147_v29, %v13630_v26 }
0x2aae   :  { %v9158_v24 = vadd.f32 %v9149_v60, %v13640_v8  ;;  %v15758_v60 = vld [vmem:[#allocation10_spill] sm:$0xff] }
0x2aaf   :  { %9301 = vrot.lane.b32.xlu1 %v15406_v28, %s12713_s25 }
0x2ab0   :  { %6640 = vrot.lane.b32.xlu0 %v15746_v11, %s12713_s25  ;;  %v9151_v44 = vpop.permute.xlu1 %9150  ;;  %v10165_v46 = vmul.f32 -1.442695, %v9158_v24 }
0x2ab1   :  { %v9189_v10 = vpop.permute.xlu0 %9188  ;;  %v9159_v22 = vadd.f32 %v9151_v44, %v13638_v2 }
0x2ab2   :  { %v9200_v63 = vadd.f32 %v9189_v10, %v13648_v21 }
0x2ab3   :  { %6642 = vrot.lane.b32.xlu1 %v15747_v35, %s12713_s25  ;;  %v10166_v47 = vmul.f32 -1.442695, %v9159_v22 }
0x2ab4   :  { %6644 = vrot.lane.b32.xlu0 %v15748_v41, %s12713_s25  ;;  %v9191_v53 = vpop.permute.xlu1 %9190  ;;  %v10167_v35 = vmul.f32 -1.442695, %v9200_v63 }
0x2ab5   :  { %v9193_v48 = vpop.permute.xlu0 %9192  ;;  %v9201_v11 = vadd.f32 %v9191_v53, %v13646_v16 }
0x2ab7   :  { %6646 = vrot.lane.b32.xlu1 %v15749_v13, %s12713_s25  ;;  %v9202_v13 = vadd.f32 %v9193_v48, %v13656_v33 }
0x2ab8   :  { %6684 = vrot.lane.b32.xlu0 %v15750_v51, %s12713_s25  ;;  %v9195_v36 = vpop.permute.xlu1 %9194  ;;  %v10168_v51 = vmul.f32 -1.442695, %v9201_v11 }
0x2ab9   :  { %v15447_v15 = vpop.permute.xlu0 %9268  ;;  %v10169_v58 = vmul.f32 -1.442695, %v9202_v13 }
0x2abb   :  { %6686 = vrot.lane.b32.xlu1 %v15751_v0, %s12713_s25 }
0x2abc   :  { %6688 = vrot.lane.b32.xlu0 %v15752_v32, %s12713_s25  ;;  %v15450_v59 = vpop.permute.xlu1 %9270 }
0x2abd   :  { %v9237_v45 = vpop.permute.xlu0 %9236 }
0x2abf   :  { %6690 = vrot.lane.b32.xlu1 %v15754_v55, %s12713_s25 }
0x2ac0   :  { %6732 = vrot.lane.b32.xlu0 %v6724_v17, %s12713_s25  ;;  %v9239_v40 = vpop.permute.xlu1 %9238 }
0x2ac1   :  { %v9241_v25 = vpop.permute.xlu0 %9240 }
0x2ac3   :  { %6734 = vrot.lane.b32.xlu1 %v6725_v34, %s12713_s25 }
0x2ac4   :  { %6736 = vrot.lane.b32.xlu0 %v6726_v3, %s12713_s25 }
0x2ac7   :  { %6738 = vrot.lane.b32.xlu1 %v6727_v1, %s12713_s25 }
0x2ac8   :  { %6764 = vrot.lane.b32.xlu0 %v15742_v39, %s12684_s23  ;;  %v10163_v39 = vmul.f32 -1.442695, %v9156_v62  ;;  %v15759_v62 = vld [vmem:[#allocation8_spill] sm:$0xff] }
0x2aca   :  { %12529 = vpow2.f32 %v10163_v39 }
0x2acb   :  { %6766 = vrot.lane.b32.xlu1 %v15743_v61, %s12684_s23  ;;  %v10164_v61 = vmul.f32 -1.442695, %v9157_v14 }
0x2acc   :  { %6768 = vrot.lane.b32.xlu0 %v15744_v12, %s12684_s23  ;;  %v9243_v12 = vpop.permute.xlu1 %9242 }
0x2acd   :  { %12531 = vpow2.f32 %v10164_v61 }
0x2ace   :  { %12533 = vpow2.f32 %v10165_v46 }
0x2acf   :  { %6770 = vrot.lane.b32.xlu1 %v15745_v4, %s12684_s23  ;;  %12535 = vpow2.f32 %v10166_v47  ;;  %s9289_s23 = scalar_select %p9288_p5, 1, 0 }
0x2ad1   :  { %s9290_s29 = scvt.s32.f32 %s9289_s23 }
0x2ad4   :  { %v12530_v4 = vpop.eup %12529 }
0x2ad5   :  { %v9172_v49 = vadd.f32 1.0, %v12530_v4 }
0x2ad7   :  { %v12532_v18 = vpop.eup %12531  ;;  %12537 = vrcp.f32 %v9172_v49 }
0x2ad8   :  { %v9173_v41 = vadd.f32 1.0, %v12532_v18  ;;  %12539 = vpow2.f32 %v10167_v35 }
0x2ada   :  { %12541 = vrcp.f32 %v9173_v41 }
0x2adb   :  { %12543 = vpow2.f32 %v10168_v51 }
0x2aea   :  { %v6480_v38 = vpop.permute.xlu0 %6479 }
0x2aeb   :  { %v15455_v20 = vadd.f32 %v6480_v38, %v15329_v50  ;;  %v12534_v50 = vpop.eup %12533 }
0x2aec   :  { %v12536_v0 = vpop.eup %12535  ;;  %v9174_v32 = vadd.f32 1.0, %v12534_v50 }
0x2aed   :  { %6791 = vrot.lane.b32.xlu0 %v15455_v20, %s12713_s25  ;;  %v6482_v7 = vpop.permute.xlu1 %6481  ;;  %v9175_v17 = vadd.f32 1.0, %v12536_v0  ;;  %v12538_v30 = vpop.eup %12537 }
0x2aee   :  { %v15461_v5 = vadd.f32 %v6482_v7, %v15334_v31  ;;  %v9203_v31 = vadd.f32 %v9195_v36, %v13654_v27  ;;  %12545 = vrcp.f32 %v9174_v32  ;;  %v12540_v34 = vpop.eup %12539  ;;  %v9248_v3 = vmul.f32 %v12538_v30, %v9237_v45  ;;  %v15760_v45 = vld [vmem:[#allocation13_spill] sm:$0xff]  ;;  %v9273_v4 = vpop.permute.xlu0 %9272 }
0x2aef   :  { %12547 = vpow2.f32 %v10169_v58  ;;  %v12542_v6 = vpop.eup %12541  ;;  %v9216_v43 = vadd.f32 1.0, %v12540_v34 }
0x2af0   :  { %6793 = vrot.lane.b32.xlu1 %v15461_v5, %s12713_s25  ;;  %v10170_v55 = vmul.f32 -1.442695, %v9203_v31  ;;  %12549 = vrcp.f32 %v9175_v17  ;;  %v12544_v9 = vpop.eup %12543  ;;  %v9249_v29 = vmul.f32 %v12542_v6, %v9239_v40  ;;  %v9252_v44 = vadd.f32 %v9248_v3, %v15758_v60  ;;  %v15761_v40 = vld [vmem:[#allocation12_spill] sm:$0xff] }
0x2af1   :  { %v9217_v53 = vadd.f32 1.0, %v12544_v9  ;;  %v9275_v49 = vpop.permute.xlu1 %9274 }
0x2af2   :  { %12551 = vpow2.f32 %v10170_v55  ;;  %v9253_v14 = vadd.f32 %v9249_v29, %v15759_v62 }
0x2af3   :  { %12553 = vrcp.f32 %v9216_v43 }
0x2af4   :  { %12555 = vtanh.f32 %v9252_v44 }
0x2af5   :  { %12557 = vrcp.f32 %v9217_v53 }
0x2af6   :  { %12559 = vtanh.f32 %v9253_v14 }
0x2af8   :  { %v12546_v1 = vpop.eup %12545 }
0x2af9   :  { %v12548_v10 = vpop.eup %12547  ;;  %v9250_v36 = vmul.f32 %v12546_v1, %v9241_v25  ;;  %v9311_v1 = vstv %s9290_s29 }
0x2afa   :  { %v12550_v48 = vpop.eup %12549  ;;  %v9218_v24 = vadd.f32 1.0, %v12548_v10 }
0x2afb   :  { %v9251_v61 = vmul.f32 %v12550_v48, %v9243_v12  ;;  %v9254_v22 = vadd.f32 %v9250_v36, %v15760_v45 }
0x2afc   :  { %v12552_v39 = vpop.eup %12551  ;;  %12561 = vrcp.f32 %v9218_v24 }
0x2afd   :  { %v9219_v46 = vadd.f32 1.0, %v12552_v39  ;;  %v9255_v47 = vadd.f32 %v9251_v61, %v15761_v40  ;;  %12563 = vtanh.f32 %v9254_v22  ;;  %v12554_v38 = vpop.eup %12553 }
0x2afe   :  { %v12556_v25 = vpop.eup %12555  ;;  %v9260_v7 = vsub.f32 1.0, %v12554_v38  ;;  %v9280_v41 = vmul.f32 %v12554_v38, %v15447_v15 }
0x2aff   :  { %12565 = vrcp.f32 %v9219_v46  ;;  %v12558_v63 = vpop.eup %12557 }
0x2b00   :  { %12567 = vtanh.f32 %v9255_v47  ;;  %v12560_v18 = vpop.eup %12559  ;;  %v9264_v12 = vmul.f32 %v12556_v25, %v9260_v7  ;;  %v9261_v50 = vsub.f32 1.0, %v12558_v63  ;;  %v9281_v55 = vmul.f32 %v12558_v63, %v15450_v59 }
0x2b02   :  { %v9265_v51 = vmul.f32 %v12560_v18, %v9261_v50  ;;  %v9284_v31 = vadd.f32 %v9280_v41, %v9264_v12 }
0x2b04   :  { %v9285_v15 = vadd.f32 %v9281_v55, %v9265_v51 }
0x2b06   :  { %v12562_v11 = vpop.eup %12561 }
0x2b07   :  { %v12564_v13 = vpop.eup %12563  ;;  %v9282_v32 = vmul.f32 %v12562_v11, %v9273_v4  ;;  %v9262_v17 = vsub.f32 1.0, %v12562_v11 }
0x2b09   :  { %v12566_v0 = vpop.eup %12565  ;;  %v9266_v9 = vmul.f32 %v12564_v13, %v9262_v17 }
0x2b0a   :  { %v12568_v34 = vpop.eup %12567  ;;  %v9283_v43 = vmul.f32 %v12566_v0, %v9275_v49  ;;  %v9263_v29 = vsub.f32 1.0, %v12566_v0 }
0x2b0b   :  { %v9286_v10 = vadd.f32 %v9282_v32, %v9266_v9 }
0x2b0c   :  { %v9267_v36 = vmul.f32 %v12568_v34, %v9263_v29 }
0x2b16   :  { %v9296_v35 = vpop.permute.xlu0 %9295 }
0x2b17   :  { %v9307_v6 = vsub.f32 %v9284_v31, %v9296_v35 }
0x2b19   :  { %v9298_v58 = vpop.permute.xlu1 %9297  ;;  %v9312_v14 = vmul.f32 %v9311_v1, %v9307_v6 }
0x2b1a   :  { %v6484_v30 = vpop.permute.xlu0 %6483  ;;  %v9308_v53 = vsub.f32 %v9285_v15, %v9298_v58 }
0x2b1b   :  { %v15476_v3 = vadd.f32 %v6484_v30, %v15341_v52  ;;  %v9287_v52 = vadd.f32 %v9283_v43, %v9267_v36 }
0x2b1c   :  { %v9313_v61 = vmul.f32 %v9311_v1, %v9308_v53 }
0x2b1d   :  { %6795 = vrot.lane.b32.xlu0 %v15476_v3, %s12713_s25  ;;  %v6486_v44 = vpop.permute.xlu1 %6485 }
0x2b1e   :  { %v15481_v48 = vadd.f32 %v6486_v44, %v15347_v23  ;;  %v9300_v59 = vpop.permute.xlu0 %9299 }
0x2b1f   :  { %v9309_v39 = vsub.f32 %v9286_v10, %v9300_v59 }
0x2b20   :  { %6797 = vrot.lane.b32.xlu1 %v15481_v48, %s12713_s25 }
0x2b21   :  { %9320 = vrot.lane.b32.xlu0 %v9312_v14, %s12714_s27  ;;  %v9302_v24 = vpop.permute.xlu1 %9301  ;;  %v9314_v47 = vmul.f32 %v9311_v1, %v9309_v39 }
0x2b22   :  { %v9310_v22 = vsub.f32 %v9287_v52, %v9302_v24  ;;  %v6641_v46 = vpop.permute.xlu0 %6640 }
0x2b23   :  { %v6652_v38 = vadd.f32 %v6641_v46, %v13632_v57 }
0x2b24   :  { %9322 = vrot.lane.b32.xlu1 %v9313_v61, %s12714_s27  ;;  %v9315_v4 = vmul.f32 %v9311_v1, %v9310_v22 }
0x2b25   :  { %v10014_v23 = vmul.f32 -1.442695, %v6652_v38  ;;  %9324 = vrot.lane.b32.xlu0 %v9314_v47, %s12714_s27  ;;  %v6643_v25 = vpop.permute.xlu1 %6642 }
0x2b26   :  { %v6653_v63 = vadd.f32 %v6643_v25, %v13630_v26  ;;  %v6645_v18 = vpop.permute.xlu0 %6644 }
0x2b27   :  { %12569 = vpow2.f32 %v10014_v23  ;;  %v6654_v29 = vadd.f32 %v6645_v18, %v13640_v8 }
0x2b28   :  { %v10015_v7 = vmul.f32 -1.442695, %v6653_v63  ;;  %9326 = vrot.lane.b32.xlu1 %v9315_v4, %s12714_s27  ;;  %v15498_v63 = vstv %s6786_s9 }
0x2b29   :  { %v6647_v49 = vpop.permute.xlu1 %6646  ;;  %v10016_v53 = vmul.f32 -1.442695, %v6654_v29 }
0x2b2a   :  { %12571 = vpow2.f32 %v10015_v7  ;;  %v6685_v12 = vpop.permute.xlu0 %6684 }
0x2b2b   :  { %v6696_v57 = vadd.f32 %v6685_v12, %v13648_v21 }
0x2b2d   :  { %v6687_v35 = vpop.permute.xlu1 %6686  ;;  %v10018_v51 = vmul.f32 -1.442695, %v6696_v57 }
0x2b2e   :  { %v6697_v13 = vadd.f32 %v6687_v35, %v13646_v16  ;;  %v6689_v32 = vpop.permute.xlu0 %6688 }
0x2b30   :  { %v10019_v26 = vmul.f32 -1.442695, %v6697_v13 }
0x2b31   :  { %v12570_v11 = vpop.eup %12569  ;;  %v6691_v31 = vpop.permute.xlu1 %6690 }
0x2b32   :  { %v6668_v41 = vadd.f32 1.0, %v12570_v11  ;;  %v6733_v55 = vpop.permute.xlu0 %6732 }
0x2b34   :  { %v12572_v50 = vpop.eup %12571  ;;  %12573 = vrcp.f32 %v6668_v41 }
0x2b35   :  { %v6669_v0 = vadd.f32 1.0, %v12572_v50  ;;  %12575 = vpow2.f32 %v10018_v51  ;;  %v6735_v9 = vpop.permute.xlu1 %6734 }
0x2b36   :  { %v6737_v44 = vpop.permute.xlu0 %6736 }
0x2b37   :  { %12577 = vrcp.f32 %v6669_v0  ;;  %v6699_v0 = vadd.f32 %v6691_v31, %v13654_v27 }
0x2b38   :  { %12579 = vpow2.f32 %v10019_v26 }
0x2b39   :  { %v6739_v10 = vpop.permute.xlu1 %6738 }
0x2b3a   :  { %v6765_v36 = vpop.permute.xlu0 %6764 }
0x2b3d   :  { %v6767_v52 = vpop.permute.xlu1 %6766 }
0x2b3e   :  { %v12574_v58 = vpop.eup %12573  ;;  %v6769_v22 = vpop.permute.xlu0 %6768 }
0x2b3f   :  { %v12576_v17 = vpop.eup %12575  ;;  %v6744_v34 = vmul.f32 %v12574_v58, %v6733_v55  ;;  %v10021_v58 = vmul.f32 -1.442695, %v6699_v0 }
0x2b40   :  { %v6712_v6 = vadd.f32 1.0, %v12576_v17 }
0x2b41   :  { %v12578_v30 = vpop.eup %12577  ;;  %v6748_v16 = vadd.f32 %v6744_v34, %v15758_v60  ;;  %v6655_v60 = vadd.f32 %v6647_v49, %v13638_v2  ;;  %v6771_v23 = vpop.permute.xlu1 %6770  ;;  %v6698_v49 = vadd.f32 %v6689_v32, %v13656_v33 }
0x2b42   :  { %v12580_v21 = vpop.eup %12579  ;;  %v6745_v43 = vmul.f32 %v12578_v30, %v6735_v9  ;;  %12581 = vrcp.f32 %v6712_v6 }
0x2b43   :  { %v6713_v1 = vadd.f32 1.0, %v12580_v21  ;;  %12583 = vtanh.f32 %v6748_v16  ;;  %v10017_v46 = vmul.f32 -1.442695, %v6655_v60  ;;  %v10020_v13 = vmul.f32 -1.442695, %v6698_v49 }
0x2b44   :  { %v6749_v15 = vadd.f32 %v6745_v43, %v15759_v62 }
0x2b45   :  { %12585 = vrcp.f32 %v6713_v1 }
0x2b46   :  { %12587 = vtanh.f32 %v6749_v15 }
0x2b47   :  { %12589 = vpow2.f32 %v10016_v53 }
0x2b48   :  { %12591 = vpow2.f32 %v10017_v46 }
0x2b4c   :  { %v12582_v59 = vpop.eup %12581 }
0x2b4d   :  { %v12584_v14 = vpop.eup %12583  ;;  %v6756_v24 = vsub.f32 1.0, %v12582_v59  ;;  %v6776_v47 = vmul.f32 %v12582_v59, %v6765_v36 }
0x2b4f   :  { %v12586_v39 = vpop.eup %12585  ;;  %v6760_v61 = vmul.f32 %v12584_v14, %v6756_v24 }
0x2b50   :  { %v12588_v62 = vpop.eup %12587  ;;  %v6757_v8 = vsub.f32 1.0, %v12586_v39  ;;  %v6777_v4 = vmul.f32 %v12586_v39, %v6767_v52 }
0x2b51   :  { %v6780_v25 = vadd.f32 %v6776_v47, %v6760_v61  ;;  %v12590_v12 = vpop.eup %12589 }
0x2b52   :  { %v6761_v38 = vmul.f32 %v12588_v62, %v6757_v8  ;;  %v6670_v50 = vadd.f32 1.0, %v12590_v12  ;;  %v12592_v51 = vpop.eup %12591  ;;  %v9356_v8 = vld [vmem:[%s15589_s15] sm:$0xff] }
0x2b53   :  { %v6671_v26 = vadd.f32 1.0, %v12592_v51  ;;  %11411 = vmatprep.mubr.msk.f32.mxu0 %vm1507_vm9, %v9356_v8 }
0x2b54   :  { %v6781_v2 = vadd.f32 %v6777_v4, %v6761_v38  ;;  %12593 = vrcp.f32 %v6670_v50 }
0x2b55   :  { %12595 = vpow2.f32 %v10020_v13 }
0x2b56   :  { %12597 = vrcp.f32 %v6671_v26 }
0x2b57   :  { %12599 = vpow2.f32 %v10021_v58 }
0x2b5e   :  { %v12594_v33 = vpop.eup %12593 }
0x2b5f   :  { %v6792_v7 = vpop.permute.xlu0 %6791  ;;  %v12596_v32 = vpop.eup %12595  ;;  %v6746_v17 = vmul.f32 %v12594_v33, %v6737_v44  ;;  %v9357_v33 = vld [vmem:[%s15589_s15 + $0x8] sm:$0xff] }
0x2b60   :  { %v6803_v18 = vsub.f32 %v6780_v25, %v6792_v7  ;;  %v6714_v55 = vadd.f32 1.0, %v12596_v32  ;;  %v12598_v34 = vpop.eup %12597  ;;  %v9360_v32 = vld [vmem:[%s15589_s15 + $0x20] sm:$0xff] }
0x2b61   :  { %v6750_v30 = vadd.f32 %v6746_v17, %v15760_v45  ;;  %v12600_v21 = vpop.eup %12599  ;;  %v6747_v6 = vmul.f32 %v12598_v34, %v6739_v10  ;;  %v9361_v17 = vld [vmem:[%s15589_s15 + $0x28] sm:$0xff] }
0x2b62   :  { %v6808_v11 = vmul.f32 %v15498_v63, %v6803_v18  ;;  %v6794_v57 = vpop.permute.xlu1 %6793  ;;  %12601 = vrcp.f32 %v6714_v55  ;;  %v6715_v9 = vadd.f32 1.0, %v12600_v21 }
0x2b63   :  { %v6804_v35 = vsub.f32 %v6781_v2, %v6794_v57  ;;  %12603 = vtanh.f32 %v6750_v30  ;;  %v6751_v43 = vadd.f32 %v6747_v6, %v15761_v40 }
0x2b64   :  { %6816 = vrot.lane.b32.xlu0 %v6808_v11, %s12714_s27  ;;  %12605 = vrcp.f32 %v6715_v9 }
0x2b65   :  { %v6809_v41 = vmul.f32 %v15498_v63, %v6804_v35  ;;  %12607 = vtanh.f32 %v6751_v43  ;;  %v15762_v43 = vmov 0  }
0x2b67   :  { %6818 = vrot.lane.b32.xlu1 %v6809_v41, %s12714_s27 }
0x2b6c   :  { %v12602_v27 = vpop.eup %12601 }
0x2b6d   :  { %v12604_v31 = vpop.eup %12603  ;;  %v6758_v16 = vsub.f32 1.0, %v12602_v27  ;;  %v6778_v15 = vmul.f32 %v12602_v27, %v6769_v22 }
0x2b6e   :  { %v12606_v29 = vpop.eup %12605 }
0x2b6f   :  { %v6762_v1 = vmul.f32 %v12604_v31, %v6758_v16  ;;  %v12608_v59 = vpop.eup %12607  ;;  %v6759_v36 = vsub.f32 1.0, %v12606_v29  ;;  %v6779_v40 = vmul.f32 %v12606_v29, %v6771_v23 }
0x2b71   :  { %v6782_v44 = vadd.f32 %v6778_v15, %v6762_v1  ;;  %v6763_v10 = vmul.f32 %v12608_v59, %v6759_v36 }
0x2b73   :  { %v6783_v24 = vadd.f32 %v6779_v40, %v6763_v10 }
0x2b8f   :  { %v6796_v53 = vpop.permute.xlu0 %6795 }
0x2b90   :  { %v6805_v45 = vsub.f32 %v6782_v44, %v6796_v53 }
0x2b92   :  { %v6810_v14 = vmul.f32 %v15498_v63, %v6805_v45  ;;  %v6798_v39 = vpop.permute.xlu1 %6797 }
0x2b93   :  { %v9321_v60 = vpop.permute.xlu0 %9320  ;;  %v6806_v46 = vsub.f32 %v6783_v24, %v6798_v39 }
0x2b94   :  { %6820 = vrot.lane.b32.xlu1 %v6810_v14, %s12714_s27  ;;  %v9332_v62 = vadd.f32 %v9321_v60, %v15388_v54 }
0x2b95   :  { %v6811_v54 = vmul.f32 %v15498_v63, %v6806_v46 }
0x2b96   :  { %v9323_v52 = vpop.permute.xlu1 %9322 }
0x2b97   :  { %v9333_v61 = vadd.f32 %v9323_v52, %v15394_v37  ;;  %v9325_v22 = vpop.permute.xlu0 %9324  ;;  %v12715_v37 = vmov 1  }
0x2b98   :  { %v9334_v25 = vadd.f32 %v9325_v22, %v15400_v19  ;;  %11948 = vset.pattern.permute.xlu0 %v12715_v37  ;;  %11949 = vset.pattern.permute.xlu1 %v12715_v37 }
0x2b99   :  { %v11938_v47 = vpack.i.bf16 %v9333_v61, %v9332_v62 }
0x2b9a   :  { %v9327_v38 = vpop.permute.xlu1 %9326 }
0x2b9b   :  { %v9335_v23 = vadd.f32 %v9327_v38, %v15406_v28  ;;  %11939 = vrot.lane.b32.xlu0 %v11938_v47, %s12714_s27 }
0x2b9d   :  { %v11943_v4 = vpack.i.bf16 %v9335_v23, %v9334_v25 }
0x2b9f   :  { %6822 = vrot.lane.b32.xlu0 %v6811_v54, %s12714_s27  ;;  %11944 = vrot.lane.b32.xlu1 %v11943_v4, %s12714_s27 }
0x2bd6   :  { %v6817_v7 = vpop.permute.xlu0 %6816 }
0x2bd7   :  { %v6828_v19 = vadd.f32 %v6817_v7, %v15455_v20 }
0x2bd9   :  { %v6819_v18 = vpop.permute.xlu1 %6818 }
0x2bda   :  { %v6829_v28 = vadd.f32 %v6819_v18, %v15461_v5 }
0x2c06   :  { %v6821_v12 = vpop.permute.xlu1 %6820 }
0x2c07   :  { %v6830_v13 = vadd.f32 %v6821_v12, %v15476_v3  ;;  %v9358_v3 = vld [vmem:[%s15589_s15 + $0x10] sm:$0xff] }
0x2c0d   :  { %v11940_v2 = vpop.permute.xlu0 %11939 }
0x2c0e   :  { %v11942_v49 = vunpack.i.h.bf16 %v11940_v2  ;;  %v11941_v11 = vunpack.i.l.bf16 %v11940_v2 }
0x2c10   :  { %v9352_v63 = vsel %vm181_vm2, %v6828_v19, %v11941_v11  ;;  %v9353_v57 = vsel %vm181_vm2, %v6829_v28, %v11942_v49 }
0x2c11   :  { %v11945_v35 = vpop.permute.xlu1 %11944  ;;  %v6823_v50 = vpop.permute.xlu0 %6822  ;;  %v11759_v41 = vpack.c.bf16 %v9353_v57, %v9352_v63 }
0x2c12   :  { %v11947_v51 = vunpack.i.h.bf16 %v11945_v35  ;;  %v11946_v0 = vunpack.i.l.bf16 %v11945_v35  ;;  %v6831_v26 = vadd.f32 %v6823_v50, %v15481_v48  ;;  %v9359_v48 = vld [vmem:[%s15589_s15 + $0x18] sm:$0xff]  ;;  %s12716_s15 = smov 113  }
0x2c13   :  { %11760 = vmatprep.subr.bf16.mxu0 %v11759_v41 }
0x2c14   :  { %11762 = vmatpush3.bf16.msra.mxu0 %v11759_v41  ;;  %v9354_v20 = vsel %vm181_vm2, %v6830_v13, %v11946_v0  ;;  %v9355_v5 = vsel %vm181_vm2, %v6831_v26, %v11947_v51  ;;  %vm9649_vm2 = vcmask 162936  }
0x2c15   :  { %v11763_v58 = vpack.c.bf16 %v9355_v5, %v9354_v20 }
0x2c17   :  { %11764 = vmatprep.subr.bf16.mxu0 %v11763_v58 }
0x2c18   :  { %11766 = vmatpush3.bf16.msra.mxu0 %v11763_v58 }
0x2c1b   :  { %11412 = vmatmul.mubr.msk.f32.vlgmr.msra.gmra.mrb[126].mxu0 %vm1507_vm9, %v9357_v33 }
0x2c1c   :  { %11414 = vmatprep.mubr.msk.f32.mxu0 %vm1507_vm9, %v9358_v3 }
0x2c1f   :  { %11415 = vmatmul.mubr.msk.f32.gmra.mrb[128].mxu0 %vm1507_vm9, %v9359_v48 }
0x2c20   :  { %11417 = vmatprep.mubr.msk.f32.mxu0 %vm1507_vm9, %v9360_v32 }
0x2c23   :  { %11418 = vmatmul.mubr.msk.f32.gmra.mrb[130].mxu0 %vm1507_vm9, %v9361_v17  ;;  %vm9716_vm9 = vcmask 1040384  }
0x2cee   :  { %v11413_v55 = vpop.f32.mrb[126].mxu0 }
0x2cef   :  { %9644 = vperm.xlu0 %11948, %v11413_v55   ;;  %v9446_v30 = vpop.f32.mrb[127].mxu0 }
0x2cf0   :  { %9640 = vperm.xlu1 %11949, %v9446_v30  }
0x2cf2   :  { %v11416_v34 = vpop.f32.mrb[128].mxu0 }
0x2cf3   :  { %v9456_v21 = vpop.f32.mrb[129].mxu0 }
0x2cf4   :  { %9664 = vperm.xlu1 %11949, %v11416_v34  }
0x2cf6   :  { %v11419_v6 = vpop.f32.mrb[130].mxu0 }
0x2cf7   :  { %v9466_v9 = vpop.f32.mrb[131].mxu0 }
0x2cf8   :  { %9660 = vperm.xlu1 %11949, %v9456_v21   ;;  %9680 = vperm.xlu0 %11948, %v9466_v9  }
0x2cfc   :  { %9684 = vperm.xlu1 %11949, %v11419_v6   ;;  %11950 = vset.pattern.permute.xlu0 %v15762_v43 }
0x2cfd   :  { %9572 = vperm.xlu0 %11950, %v9446_v30  }
0x2d00   :  { %11951 = vset.pattern.permute.xlu1 %v15762_v43 }
0x2d01   :  { %9594 = vperm.xlu1 %11951, %v9456_v21   ;;  %9577 = vperm.xlu0 %11950, %v11413_v55  }
0x2d05   :  { %9599 = vperm.xlu1 %11951, %v11416_v34   ;;  %9616 = vperm.xlu0 %11950, %v9466_v9  }
0x2d09   :  { %9621 = vperm.xlu1 %11951, %v11419_v6   ;;  %11952 = vset.pattern.permute.xlu0 %v12715_v37 }
0x2d6e   :  { %v9645_v27 = vpop.permute.xlu0 %9644 }
0x2d6f   :  { %v9648_v31 = vmul.f32 %v15295_v42, %v9645_v27  ;;  %v9641_v16 = vpop.permute.xlu1 %9640 }
0x2d70   :  { %v9647_v1 = vmul.f32 %v9641_v16, %v15297_v56 }
0x2d71   :  { %v9651_v15 = vsel %vm9649_vm2, %v9648_v31, 0.0 }
0x2d72   :  { %v9650_v29 = vsel %vm9649_vm2, %v9647_v1, 0.0 }
0x2d73   :  { %v9652_v44 = vadd.f32 %v9651_v15, %v9650_v29  ;;  %v9665_v53 = vpop.permute.xlu1 %9664 }
0x2d74   :  { %v9668_v45 = vmul.f32 %v15295_v42, %v9665_v53 }
0x2d75   :  { %v9653_v59 = vrot.slane %v9652_v44, 4 }
0x2d76   :  { %v9671_v40 = vsel %vm9669_vm3, %v9668_v45, 0.0 }
0x2d77   :  { %v9654_v36 = vadd.f32 %v9653_v59, %v9652_v44  ;;  %v9661_v14 = vpop.permute.xlu1 %9660  ;;  %v9681_v39 = vpop.permute.xlu0 %9680 }
0x2d78   :  { %v9667_v10 = vmul.f32 %v9661_v14, %v15297_v56  ;;  %v9687_v24 = vmul.f32 %v9681_v39, %v15297_v56 }
0x2d79   :  { %v9655_v60 = vrot.slane %v9654_v36, 2 }
0x2d7a   :  { %v9670_v52 = vsel %vm9669_vm3, %v9667_v10, 0.0  ;;  %v9690_v25 = vsel %vm9689_vm4, %v9687_v24, 0.0 }
0x2d7b   :  { %v9656_v62 = vadd.f32 %v9655_v60, %v9654_v36  ;;  %v9672_v61 = vadd.f32 %v9671_v40, %v9670_v52  ;;  %v9685_v22 = vpop.permute.xlu1 %9684 }
0x2d7c   :  { %v9688_v8 = vmul.f32 %v15295_v42, %v9685_v22  ;;  %v9573_v46 = vpop.permute.xlu0 %9572 }
0x2d7d   :  { %v9673_v47 = vrot.slane %v9672_v61, 4  ;;  %v9657_v38 = vrot.slane %v9656_v62, 1  ;;  %v9580_v37 = vmul.f32 %v9573_v46, %v15297_v56 }
0x2d7e   :  { %v9691_v23 = vsel %vm9689_vm4, %v9688_v8, 0.0 }
0x2d7f   :  { %v9674_v54 = vadd.f32 %v9673_v47, %v9672_v61  ;;  %v9692_v4 = vadd.f32 %v9691_v23, %v9690_v25  ;;  %v9658_v7 = vadd.f32 %v9657_v38, %v9656_v62  ;;  %v9583_v57 = vsel %vm9582_vm5, %v9580_v37, 0.0 }
0x2d80   :  { %v9595_v18 = vpop.permute.xlu1 %9594  ;;  %v9578_v12 = vpop.permute.xlu0 %9577 }
0x2d81   :  { %v9675_v2 = vrot.slane %v9674_v54, 2  ;;  %v9693_v19 = vrot.slane %v9692_v4, 4  ;;  %v9581_v28 = vmul.f32 %v15295_v42, %v9578_v12  ;;  %9700 = vrot.lane.b32.xlu0 %v9658_v7, %s12716_s15  ;;  %v9602_v49 = vmul.f32 %v9595_v18, %v15297_v56 }
0x2d83   :  { %v9676_v11 = vadd.f32 %v9675_v2, %v9674_v54  ;;  %v9694_v63 = vadd.f32 %v9693_v19, %v9692_v4  ;;  %v9584_v35 = vsel %vm9582_vm5, %v9581_v28, 0.0  ;;  %v9605_v20 = vsel %vm9604_vm6, %v9602_v49, 0.0 }
0x2d84   :  { %v9585_v50 = vadd.f32 %v9584_v35, %v9583_v57  ;;  %v9600_v41 = vpop.permute.xlu1 %9599  ;;  %v9617_v13 = vpop.permute.xlu0 %9616 }
0x2d85   :  { %v9695_v51 = vrot.slane %v9694_v63, 2  ;;  %v9603_v0 = vmul.f32 %v15295_v42, %v9600_v41  ;;  %v9677_v26 = vrot.slane %v9676_v11, 1  ;;  %v9624_v3 = vmul.f32 %v9617_v13, %v15297_v56 }
0x2d86   :  { %v9586_v5 = vrot.slane %v9585_v50, 4 }
0x2d87   :  { %v9696_v58 = vadd.f32 %v9695_v51, %v9694_v63  ;;  %v9606_v33 = vsel %vm9604_vm6, %v9603_v0, 0.0  ;;  %v9678_v48 = vadd.f32 %v9677_v26, %v9676_v11  ;;  %v9627_v9 = vsel %vm9626_vm7, %v9624_v3, 0.0 }
0x2d88   :  { %v9587_v32 = vadd.f32 %v9586_v5, %v9585_v50  ;;  %v9607_v17 = vadd.f32 %v9606_v33, %v9605_v20  ;;  %v9622_v55 = vpop.permute.xlu1 %9621 }
0x2d89   :  { %v9625_v30 = vmul.f32 %v15295_v42, %v9622_v55  ;;  %9704 = vrot.lane.b32.xlu1 %v9678_v48, %s12716_s15  ;;  %v9697_v34 = vrot.slane %v9696_v58, 1 }
0x2d8a   :  { %v9588_v21 = vrot.slane %v9587_v32, 2  ;;  %v9608_v6 = vrot.slane %v9607_v17, 4 }
0x2d8b   :  { %v9628_v43 = vsel %vm9626_vm7, %v9625_v30, 0.0  ;;  %v9698_v27 = vadd.f32 %v9697_v34, %v9696_v58 }
0x2d8c   :  { %v9589_v31 = vadd.f32 %v9588_v21, %v9587_v32  ;;  %v9609_v16 = vadd.f32 %v9608_v6, %v9607_v17  ;;  %v9629_v1 = vadd.f32 %v9628_v43, %v9627_v9 }
0x2d8d   :  { %9708 = vrot.lane.b32.xlu0 %v9698_v27, %s12716_s15 }
0x2d8e   :  { %v9610_v56 = vrot.slane %v9609_v16, 2  ;;  %v9630_v15 = vrot.slane %v9629_v1, 4  ;;  %v9590_v29 = vrot.slane %v9589_v31, 1 }
0x2d90   :  { %v9611_v44 = vadd.f32 %v9610_v56, %v9609_v16  ;;  %v9631_v53 = vadd.f32 %v9630_v15, %v9629_v1  ;;  %v9591_v45 = vadd.f32 %v9590_v29, %v9589_v31 }
0x2d92   :  { %v9612_v59 = vrot.slane %v9611_v44, 1  ;;  %v9632_v42 = vrot.slane %v9631_v53, 2 }
0x2d94   :  { %v9613_v36 = vadd.f32 %v9612_v59, %v9611_v44  ;;  %v9633_v14 = vadd.f32 %v9632_v42, %v9631_v53 }
0x2d96   :  { %v9634_v39 = vrot.slane %v9633_v14, 1  ;;  %v9636_v10 = vsel %vm9582_vm5, %v9591_v45, %v9613_v36 }
0x2d98   :  { %v9635_v60 = vadd.f32 %v9634_v39, %v9633_v14 }
0x2d9a   :  { %v9638_v40 = vsel %vm9637_vm8, %v9636_v10, %v9635_v60 }
0x2df3   :  { %v9701_v52 = vpop.permute.xlu0 %9700 }
0x2dfb   :  { %v9705_v24 = vpop.permute.xlu1 %9704 }
0x2dfc   :  { %v9711_v62 = vsel %vm9582_vm5, %v9701_v52, %v9705_v24 }
0x2dff   :  { %v9709_v61 = vpop.permute.xlu0 %9708 }
0x2e00   :  { %v9712_v22 = vsel %vm9637_vm8, %v9711_v62, %v9709_v61 }
0x2e01   :  { %v9714_v8 = vrot.slane %v9712_v22, 7 }
0x2e03   :  { %v9717_v46 = vsel %vm9716_vm9, %v9638_v40, %v9714_v8 }
0x2e04   :  { %9719 = vst.msk [vmem:[%s15590_s16] sm:$0x3] %vm9718_vm10, %v9717_v46 }
0x2e05   :  { %9724 = vsyncpa [#allocation3], 1 }

</bundles_post_ra>
